<compile_context>
chip_gen: v7x
topology: tpu7x:2x2x1
jax: 0.10.0
libtpu: 0.0.40
codegen_flags: <defaults>
</compile_context>

<pallas_src>
import math

import jax
import jax.numpy as jnp
from jax import lax
from jax.experimental import pallas as pl
from jax.experimental.pallas import tpu as pltpu

CONFIG = dict(n_embd=32, n_head=4, n_layer=2, vocab_size=64, n_positions=16,
              resid_pdrop=0.0, attn_pdrop=0.0)
EPS = 1e-6
GELU_C = math.sqrt(2.0 / math.pi)
NEG_INF = -1e30                 # finite masked value: no NaN on fully-masked rows
LANE = 128
VOCAB_PAD = ((CONFIG['vocab_size'] + LANE - 1) // LANE) * LANE   # lane-dense logits slab

# Matmul operand dtype.  bf16 gets native MXU rate on v5e/v6e/v7x and halves resident
# weight bytes; accumulation is f32 (preferred_element_type).  Use jnp.float32 when
# bitwise-tight parity with the f32 PyTorch reference is required.
MATMUL_DTYPE = jnp.bfloat16
APPROX_RECIP = True             # False -> exact divides for tolerance-parity checks


# ----------------------------- fused Pallas kernel ------------------------------

def _transformer_kernel(
        con_pad_ref, resp_pad_ref,                      # scalar prefetch (SMEM, int32 (B,))
        ctx_ref, resp_ref,                              # (Bb, Sc, E) / (Bb, Sr, E) f32
        e_wqkv, e_bqkv, e_wo, e_bo, e_g, e_b,           # encoder self-attn   (stacked over L)
        r_wqkv, r_bqkv, r_wo, r_bo, r_g, r_b,           # decoder resp-attn
        c_wqkv, c_bqkv, c_wo, c_bo, c_g, c_b,           # decoder cross-attn
        f_w1, f_b1, f_w2, f_b2, f_g, f_b,               # decoder feed-forward
        wpro_ref, bpro_ref,
        out_ref):
    """Whole-model forward for a block of Bb batch elements."""
    E = CONFIG['n_embd']
    H = CONFIG['n_head']
    D = E // H
    L = CONFIG['n_layer']
    scale = 1.0 / math.sqrt(D)

    Bb, Sc, _ = ctx_ref.shape
    Sr = resp_ref.shape[1]
    g0 = pl.program_id(0)

    def dot(a, b):
        return jnp.dot(a.astype(MATMUL_DTYPE), b.astype(MATMUL_DTYPE),
                       preferred_element_type=jnp.float32)

    def dot_qkT(a, b):
        # scores without an explicit k.T: contract last-dim vs last-dim on the MXU.
        return lax.dot_general(a.astype(MATMUL_DTYPE), b.astype(MATMUL_DTYPE),
                               dimension_numbers=(((1,), (1,)), ((), ())),
                               preferred_element_type=jnp.float32)

    def layer_norm(z, g, b):
        # torch reference: a_2 * (x - mean) / (x.std(unbiased) + eps) + b_2
        n = z.shape[-1]
        mean = jnp.mean(z, axis=-1, keepdims=True)
        var = jnp.sum((z - mean) ** 2, axis=-1, keepdims=True) / (n - 1)
        inv = pl.reciprocal(jnp.sqrt(var) + EPS, approx=APPROX_RECIP)   # EUP, not VALU divide
        return g * (z - mean) * inv + b

    # ---- additive masks, built in-kernel from the scalar pad counts (no mask DMAs) ----
    col_c = lax.broadcasted_iota(jnp.int32, (1, Sc), 1)
    row_r = lax.broadcasted_iota(jnp.int32, (Sr, Sr), 0)
    col_r = lax.broadcasted_iota(jnp.int32, (Sr, Sr), 1)
    enc_add, dec_add = [], []
    for j in range(Bb):
        cpad = con_pad_ref[g0 * Bb + j]
        rpad = resp_pad_ref[g0 * Bb + j]
        # (1, Sc): key-padding mask of the context (encoder self-attn + all cross-attns)
        enc_add.append(jnp.where(col_c >= Sc - cpad, NEG_INF, 0.0))
        # (Sr, Sr): causal + key-padding mask for decoder self-attn
        keep = (col_r <= row_r) & (col_r < Sr - rpad)
        dec_add.append(jnp.where(keep, 0.0, NEG_INF))

    def mha(xq, xkv, add_masks, wqkv, bqkv, wo, bo, ln_g, ln_b, self_attn, Sq, Sk):
        # Fused QKV projection on batch-stacked rows (one MXU pass; Q + KV for cross).
        if self_attn:
            qkv = dot(xq, wqkv) + bqkv                       # (Bb*Sq, 3E) f32
            q, k, v = qkv[:, :E], qkv[:, E:2 * E], qkv[:, 2 * E:]
        else:
            q = dot(xq, wqkv[:, :E]) + bqkv[:, :E]           # (Bb*Sq, E)
            kv = dot(xkv, wqkv[:, E:]) + bqkv[:, E:]         # (Bb*Sk, 2E)
            k, v = kv[:, :E], kv[:, E:]
        # Cast ONCE (not per head) for the per-head MXU ops.
        qm = q.astype(MATMUL_DTYPE)
        km = k.astype(MATMUL_DTYPE)
        vm = v.astype(MATMUL_DTYPE)
        outs = []
        for j in range(Bb):
            qj = qm[j * Sq:(j + 1) * Sq, :]
            kj = km[j * Sk:(j + 1) * Sk, :]
            vj = vm[j * Sk:(j + 1) * Sk, :]
            add = add_masks[j]                               # additive mask, hoisted
            heads = []
            for h in range(H):
                sl = slice(h * D, (h + 1) * D)
                s = dot_qkT(qj[:, sl], kj[:, sl]) * scale + add       # (Sq, Sk) f32
                p = jnp.exp(s - jnp.max(s, axis=-1, keepdims=True))
                p = p * pl.reciprocal(jnp.sum(p, axis=-1, keepdims=True),
                                      approx=APPROX_RECIP)
                heads.append(dot(p, vj[:, sl]))              # (Sq, D) f32
            outs.append(jnp.concatenate(heads, axis=-1))     # (Sq, E) lane merge, in-reg
        o_all = outs[0] if Bb == 1 else jnp.concatenate(outs, axis=0)
        # Single output projection: (Bb*Sq, E) @ (E, E) — one MXU push with K=E.
        attn = dot(o_all, wo)
        # attn_dropout / resid dropout are identity (pdrop = 0, eval semantics)
        return layer_norm(xq + attn + bo, ln_g, ln_b)

    def ffn(x, w1, b1, w2, b2, ln_g, ln_b):
        hdn = dot(x, w1) + b1
        hdn = 0.5 * hdn * (1.0 + jnp.tanh(GELU_C * (hdn + 0.044715 * hdn * hdn * hdn)))
        y = dot(hdn, w2) + b2
        return layer_norm(x + y, ln_g, ln_b)

    # Batch-stacked activations: projections/LN/FFN run on (Bb*S, E) rows.
    ctx = ctx_ref[...].reshape(Bb * Sc, E)
    resp = resp_ref[...].reshape(Bb * Sr, E)

    # TODO(synk): for larger L, replace these unrolled loops with lax.fori_loop over the
    # stacked layer dim (dynamic l indexing of the resident refs), and at real model
    # sizes stream per-layer weights (pltpu.emit_pipeline) with an explicit
    # vmem_limit_bytes instead of keeping all layers resident (v7x: 64 MiB VMEM/TC).

    # ---- encoder stack (Encoder.forward applies only context_attn) ----
    for l in range(L):
        ctx = mha(ctx, ctx, enc_add, e_wqkv[l], e_bqkv[l], e_wo[l], e_bo[l],
                  e_g[l], e_b[l], True, Sc, Sc)

    # ---- decoder stack ----
    for l in range(L):
        resp = mha(resp, resp, dec_add, r_wqkv[l], r_bqkv[l], r_wo[l], r_bo[l],
                   r_g[l], r_b[l], True, Sr, Sr)
        resp = mha(resp, ctx, enc_add, c_wqkv[l], c_bqkv[l], c_wo[l], c_bo[l],
                   c_g[l], c_b[l], False, Sr, Sc)
        resp = ffn(resp, f_w1[l], f_b1[l], f_w2[l], f_b2[l], f_g[l], f_b[l])

    # ---- vocab projection: lane-dense (Sr, 128) stores; sliced back to vocab outside ----
    logits = dot(resp, wpro_ref[...]) + bpro_ref[...]        # (Bb*Sr, VOCAB_PAD) f32
    for j in range(Bb):
        out_ref[j] = logits[j * Sr:(j + 1) * Sr, :]


# ------------------------------ JAX-side glue -------------------------------

def embedding(word_emb, ids, token_type_ids=None):
    """Embedding.forward: word emb (padding_idx=1) + sinusoidal pos + token type."""
    b, s = ids.shape
    e = CONFIG['n_embd']
    max_len = CONFIG['n_positions']
    pos = jnp.tile(jnp.arange(max_len, dtype=jnp.float32)[:, None], (1, e // 2))
    div = jnp.tile(jnp.arange(0, e, 2, dtype=jnp.float32)[None, :], (max_len, 1))
    posi = pos / (10000.0 ** (div / e))
    pos_emb = jnp.concatenate([jnp.sin(posi), jnp.cos(posi)], axis=-1)   # (max_len, E)
    pos_vec = jnp.broadcast_to(pos_emb[:s][None], (b, s, e))
    word_vec = word_emb[ids]
    tt = jnp.zeros_like(word_vec) if token_type_ids is None else word_emb[token_type_ids]
    padding_len = jnp.sum(ids == 1, axis=1).astype(jnp.int32)   # pad-token count per row
    return word_vec + pos_vec + tt, padding_len


def transformer_forward(params, context_ids, token_type_ids, response_ids,
                        batch_block=None):
    b, sc = context_ids.shape
    sr = response_ids.shape[1]
    e = CONFIG['n_embd']

    # Embedding + pad counts (plain JAX glue; masks are built inside the kernel).
    ctx_emb, con_pad = embedding(params['word_emb'], context_ids, token_type_ids)
    resp_emb, resp_pad = embedding(params['word_emb'], response_ids, None)

    if batch_block is None:
        # v7x has 2 TensorCores: keep >= 2 parallel grid steps so both stay busy.
        # v5e/v6e have 1 TC: fold the whole batch into one grid step to amortize the
        # ~0.35us fixed cost per step and double the matmul M dimension.
        kind = jax.devices()[0].device_kind.lower()
        batch_block = 1 if ('v7' in kind and b % 2 == 0) else b
    assert b % batch_block == 0
    nb = b // batch_block

    def mm(w):
        # Matmul-operand weights are cast once host-side: halves resident VMEM / DMA bytes.
        return w.astype(MATMUL_DTYPE)

    enc, dra, dca, ff = params['enc'], params['dra'], params['dca'], params['ff']
    weight_args = [
        mm(enc['wqkv']), enc['bqkv'], mm(enc['wo']), enc['bo'], enc['g'], enc['b'],
        mm(dra['wqkv']), dra['bqkv'], mm(dra['wo']), dra['bo'], dra['g'], dra['b'],
        mm(dca['wqkv']), dca['bqkv'], mm(dca['wo']), dca['bo'], dca['g'], dca['b'],
        mm(ff['w1']), ff['b1'], mm(ff['w2']), ff['b2'], ff['g'], ff['b'],
        mm(params['wpro']), params['bpro'],
    ]

    def resident(a):
        # Full-array block, same block index every grid step -> stays resident in VMEM.
        nd = a.ndim
        return pl.BlockSpec(a.shape, lambda i, cp, rp, _nd=nd: (0,) * _nd)

    in_specs = ([pl.BlockSpec((batch_block, sc, e), lambda i, cp, rp: (i, 0, 0)),
                 pl.BlockSpec((batch_block, sr, e), lambda i, cp, rp: (i, 0, 0))]
                + [resident(a) for a in weight_args])

    grid_spec = pltpu.PrefetchScalarGridSpec(
        num_scalar_prefetch=2,                 # con_pad, resp_pad -> SMEM
        grid=(nb,),
        in_specs=in_specs,
        out_specs=pl.BlockSpec((batch_block, sr, VOCAB_PAD), lambda i, cp, rp: (i, 0, 0)),
    )

    # TODO(synk): at real model sizes (E, S >> 128) fix lane-sparse activation/score
    # shapes (keep last dims multiples of 128), tile the FFN / vocab matmuls over M/K
    # with a VMEM f32 accumulator, and set vmem_limit_bytes explicitly.
    logits_p = pl.pallas_call(
        _transformer_kernel,
        out_shape=jax.ShapeDtypeStruct((b, sr, VOCAB_PAD), jnp.float32),
        grid_spec=grid_spec,
        compiler_params=pltpu.CompilerParams(
            dimension_semantics=("parallel",)),   # v7x: 2 TCs split the batch grid
    )(con_pad, resp_pad, ctx_emb, resp_emb, *weight_args)

    return logits_p[:, :, :CONFIG['vocab_size']]


# ------------------------------ Param init ---------------------------------

def init_params(key):
    e = CONFIG['n_embd']
    L = CONFIG['n_layer']
    voc = CONFIG['vocab_size']
    f = 4 * e
    keys = iter(jax.random.split(key, 256))

    def lin(fan_in, fan_out):
        w = jax.random.normal(next(keys), (fan_in, fan_out), jnp.float32) * 0.02
        b = jax.random.normal(next(keys), (fan_out,), jnp.float32) * 0.02
        return w, b

    def mha_stack():
        wqkv, bqkv, wo, bo, g, bb = [], [], [], [], [], []
        for _ in range(L):
            wq, bq = lin(e, e)
            wk, bk = lin(e, e)
            wv, bv = lin(e, e)
            w_o, b_o = lin(e, e)
            wqkv.append(jnp.concatenate([wq, wk, wv], axis=1))            # (E, 3E) fused QKV
            bqkv.append(jnp.concatenate([bq, bk, bv])[None, :])           # (1, 3E)
            wo.append(w_o)
            bo.append(b_o[None, :])
            g.append(jnp.ones((1, e), jnp.float32))
            bb.append(jnp.zeros((1, e), jnp.float32))
        return dict(wqkv=jnp.stack(wqkv), bqkv=jnp.stack(bqkv),
                    wo=jnp.stack(wo), bo=jnp.stack(bo),
                    g=jnp.stack(g), b=jnp.stack(bb))

    def ff_stack():
        w1s, b1s, w2s, b2s, gs, bs = [], [], [], [], [], []
        for _ in range(L):
            w1, b1 = lin(e, f)
            w2, b2 = lin(f, e)
            w1s.append(w1); b1s.append(b1[None, :])
            w2s.append(w2); b2s.append(b2[None, :])
            gs.append(jnp.ones((1, e), jnp.float32))
            bs.append(jnp.zeros((1, e), jnp.float32))
        return dict(w1=jnp.stack(w1s), b1=jnp.stack(b1s),
                    w2=jnp.stack(w2s), b2=jnp.stack(b2s),
                    g=jnp.stack(gs), b=jnp.stack(bs))

    word_emb = jax.random.normal(next(keys), (voc, e), jnp.float32) * 0.02
    word_emb = word_emb.at[1].set(0.0)               # padding_idx=1 row is zero
    wpro, bpro = lin(e, voc)
    # Pad the vocab projection to 128 lanes so the kernel's only HBM store is lane-dense.
    wpro_p = jnp.zeros((e, VOCAB_PAD), jnp.float32).at[:, :voc].set(wpro)
    bpro_p = jnp.zeros((1, VOCAB_PAD), jnp.float32).at[:, :voc].set(bpro)
    return dict(word_emb=word_emb, enc=mha_stack(), dra=mha_stack(), dca=mha_stack(),
                ff=ff_stack(), wpro=wpro_p, bpro=bpro_p)


# --------------------------------- Main -------------------------------------

if __name__ == "__main__":
    key = jax.random.PRNGKey(0)
    pk, dk1, dk2, dk3 = jax.random.split(key, 4)
    params = init_params(pk)

    B, Sc, Sr = 2, 8, 8
    vocab = CONFIG['vocab_size']
    context_ids = jax.random.randint(dk1, (B, Sc), 2, vocab)
    token_type_ids = jax.random.randint(dk2, (B, Sc), 2, vocab)
    response_ids = jax.random.randint(dk3, (B, Sr), 2, vocab)
    # padding token id == 1 at the tail (matches the count-based mask construction,
    # which is exactly how the PyTorch reference builds its masks)
    context_ids = context_ids.at[0, -2:].set(1)
    context_ids = context_ids.at[1, -1:].set(1)
    token_type_ids = token_type_ids.at[0, -2:].set(1)
    token_type_ids = token_type_ids.at[1, -1:].set(1)
    response_ids = response_ids.at[0, -3:].set(1)
    response_ids = response_ids.at[1, -1:].set(1)

    fwd = jax.jit(transformer_forward)
    logits = fwd(params, context_ids, token_type_ids, response_ids)
    logits = jax.block_until_ready(logits)
    assert logits.shape == (B, Sr, vocab), logits.shape
    assert bool(jnp.all(jnp.isfinite(logits)))
    print("KERNEL_OK")
</pallas_src>

<mosaic_0001>
module attributes {stable_mosaic.version = 11 : i64} {
  func.func @_transformer_kernel(%arg0: i32, %arg1: memref<2xi32, #tpu.memory_space<smem>>, %arg2: memref<2xi32, #tpu.memory_space<smem>>, %arg3: memref<2x8x32xf32, #tpu.memory_space<vmem>>, %arg4: memref<2x8x32xf32, #tpu.memory_space<vmem>>, %arg5: memref<2x32x96xbf16, #tpu.memory_space<vmem>>, %arg6: memref<2x1x96xf32, #tpu.memory_space<vmem>>, %arg7: memref<2x32x32xbf16, #tpu.memory_space<vmem>>, %arg8: memref<2x1x32xf32, #tpu.memory_space<vmem>>, %arg9: memref<2x1x32xf32, #tpu.memory_space<vmem>>, %arg10: memref<2x1x32xf32, #tpu.memory_space<vmem>>, %arg11: memref<2x32x96xbf16, #tpu.memory_space<vmem>>, %arg12: memref<2x1x96xf32, #tpu.memory_space<vmem>>, %arg13: memref<2x32x32xbf16, #tpu.memory_space<vmem>>, %arg14: memref<2x1x32xf32, #tpu.memory_space<vmem>>, %arg15: memref<2x1x32xf32, #tpu.memory_space<vmem>>, %arg16: memref<2x1x32xf32, #tpu.memory_space<vmem>>, %arg17: memref<2x32x96xbf16, #tpu.memory_space<vmem>>, %arg18: memref<2x1x96xf32, #tpu.memory_space<vmem>>, %arg19: memref<2x32x32xbf16, #tpu.memory_space<vmem>>, %arg20: memref<2x1x32xf32, #tpu.memory_space<vmem>>, %arg21: memref<2x1x32xf32, #tpu.memory_space<vmem>>, %arg22: memref<2x1x32xf32, #tpu.memory_space<vmem>>, %arg23: memref<2x32x128xbf16, #tpu.memory_space<vmem>>, %arg24: memref<2x1x128xf32, #tpu.memory_space<vmem>>, %arg25: memref<2x128x32xbf16, #tpu.memory_space<vmem>>, %arg26: memref<2x1x32xf32, #tpu.memory_space<vmem>>, %arg27: memref<2x1x32xf32, #tpu.memory_space<vmem>>, %arg28: memref<2x1x32xf32, #tpu.memory_space<vmem>>, %arg29: memref<32x128xbf16, #tpu.memory_space<vmem>>, %arg30: memref<1x128xf32, #tpu.memory_space<vmem>>, %arg31: memref<2x8x128xf32, #tpu.memory_space<vmem>>) attributes {dimension_semantics = [#tpu.dimension_semantics<parallel>], iteration_bounds = array<i64: 1>, scalar_prefetch = 2 : i64, scratch_operands = 0 : i64, tpu.core_type = #tpu.core_type<tc>, window_params = [{transform_indices = @transform_0, window_bounds = array<i64: 2, 8, 32>}, {transform_indices = @transform_1, window_bounds = array<i64: 2, 8, 32>}, {pipeline_mode = #tpu.pipeline_mode<synchronous>, transform_indices = @transform_2, window_bounds = array<i64: 2, 32, 96>}, {pipeline_mode = #tpu.pipeline_mode<synchronous>, transform_indices = @transform_3, window_bounds = array<i64: 2, 1, 96>}, {pipeline_mode = #tpu.pipeline_mode<synchronous>, transform_indices = @transform_4, window_bounds = array<i64: 2, 32, 32>}, {pipeline_mode = #tpu.pipeline_mode<synchronous>, transform_indices = @transform_5, window_bounds = array<i64: 2, 1, 32>}, {pipeline_mode = #tpu.pipeline_mode<synchronous>, transform_indices = @transform_6, window_bounds = array<i64: 2, 1, 32>}, {pipeline_mode = #tpu.pipeline_mode<synchronous>, transform_indices = @transform_7, window_bounds = array<i64: 2, 1, 32>}, {pipeline_mode = #tpu.pipeline_mode<synchronous>, transform_indices = @transform_8, window_bounds = array<i64: 2, 32, 96>}, {pipeline_mode = #tpu.pipeline_mode<synchronous>, transform_indices = @transform_9, window_bounds = array<i64: 2, 1, 96>}, {pipeline_mode = #tpu.pipeline_mode<synchronous>, transform_indices = @transform_10, window_bounds = array<i64: 2, 32, 32>}, {pipeline_mode = #tpu.pipeline_mode<synchronous>, transform_indices = @transform_11, window_bounds = array<i64: 2, 1, 32>}, {pipeline_mode = #tpu.pipeline_mode<synchronous>, transform_indices = @transform_12, window_bounds = array<i64: 2, 1, 32>}, {pipeline_mode = #tpu.pipeline_mode<synchronous>, transform_indices = @transform_13, window_bounds = array<i64: 2, 1, 32>}, {pipeline_mode = #tpu.pipeline_mode<synchronous>, transform_indices = @transform_14, window_bounds = array<i64: 2, 32, 96>}, {pipeline_mode = #tpu.pipeline_mode<synchronous>, transform_indices = @transform_15, window_bounds = array<i64: 2, 1, 96>}, {pipeline_mode = #tpu.pipeline_mode<synchronous>, transform_indices = @transform_16, window_bounds = array<i64: 2, 32, 32>}, {pipeline_mode = #tpu.pipeline_mode<synchronous>, transform_indices = @transform_17, window_bounds = array<i64: 2, 1, 32>}, {pipeline_mode = #tpu.pipeline_mode<synchronous>, transform_indices = @transform_18, window_bounds = array<i64: 2, 1, 32>}, {pipeline_mode = #tpu.pipeline_mode<synchronous>, transform_indices = @transform_19, window_bounds = array<i64: 2, 1, 32>}, {pipeline_mode = #tpu.pipeline_mode<synchronous>, transform_indices = @transform_20, window_bounds = array<i64: 2, 32, 128>}, {pipeline_mode = #tpu.pipeline_mode<synchronous>, transform_indices = @transform_21, window_bounds = array<i64: 2, 1, 128>}, {pipeline_mode = #tpu.pipeline_mode<synchronous>, transform_indices = @transform_22, window_bounds = array<i64: 2, 128, 32>}, {pipeline_mode = #tpu.pipeline_mode<synchronous>, transform_indices = @transform_23, window_bounds = array<i64: 2, 1, 32>}, {pipeline_mode = #tpu.pipeline_mode<synchronous>, transform_indices = @transform_24, window_bounds = array<i64: 2, 1, 32>}, {pipeline_mode = #tpu.pipeline_mode<synchronous>, transform_indices = @transform_25, window_bounds = array<i64: 2, 1, 32>}, {pipeline_mode = #tpu.pipeline_mode<synchronous>, transform_indices = @transform_26, window_bounds = array<i64: 32, 128>}, {pipeline_mode = #tpu.pipeline_mode<synchronous>, transform_indices = @transform_27, window_bounds = array<i64: 1, 128>}, {transform_indices = @transform_28, window_bounds = array<i64: 2, 8, 128>}]} {
    %0 = tpu.iota {dimensions = array<i32: 1>} : vector<1x8xi32>
    %1 = tpu.iota {dimensions = array<i32: 0>} : vector<8x8xi32>
    %2 = tpu.iota {dimensions = array<i32: 1>} : vector<8x8xi32>
    %c2_i32 = arith.constant 2 : i32
    %3 = arith.muli %arg0, %c2_i32 : i32
    %c0_i32 = arith.constant 0 : i32
    %4 = arith.addi %3, %c0_i32 : i32
    %5 = arith.index_cast %4 : i32 to index
    %6 = memref.load %arg1[%5] : memref<2xi32, #tpu.memory_space<smem>>
    %c2_i32_0 = arith.constant 2 : i32
    %7 = arith.muli %arg0, %c2_i32_0 : i32
    %c0_i32_1 = arith.constant 0 : i32
    %8 = arith.addi %7, %c0_i32_1 : i32
    %9 = arith.index_cast %8 : i32 to index
    %10 = memref.load %arg2[%9] : memref<2xi32, #tpu.memory_space<smem>>
    %c8_i32 = arith.constant 8 : i32
    %11 = arith.subi %c8_i32, %6 : i32
    %12 = vector.broadcast %11 : i32 to vector<1x8xi32>
    %13 = arith.cmpi sge, %0, %12 : vector<1x8xi32>
    %cst = arith.constant -1.000000e+30 : f32
    %cst_2 = arith.constant 0.000000e+00 : f32
    %14 = vector.broadcast %cst : f32 to vector<1x8xf32>
    %15 = vector.broadcast %cst_2 : f32 to vector<1x8xf32>
    %16 = arith.select %13, %14, %15 : vector<1x8xi1>, vector<1x8xf32>
    %17 = arith.cmpi sle, %2, %1 : vector<8x8xi32>
    %c8_i32_3 = arith.constant 8 : i32
    %18 = arith.subi %c8_i32_3, %10 : i32
    %19 = vector.broadcast %18 : i32 to vector<8x8xi32>
    %20 = arith.cmpi slt, %2, %19 : vector<8x8xi32>
    %21 = arith.andi %17, %20 : vector<8x8xi1>
    %cst_4 = arith.constant 0.000000e+00 : f32
    %cst_5 = arith.constant -1.000000e+30 : f32
    %22 = vector.broadcast %cst_4 : f32 to vector<8x8xf32>
    %23 = vector.broadcast %cst_5 : f32 to vector<8x8xf32>
    %24 = arith.select %21, %22, %23 : vector<8x8xi1>, vector<8x8xf32>
    %c2_i32_6 = arith.constant 2 : i32
    %25 = arith.muli %arg0, %c2_i32_6 : i32
    %c1_i32 = arith.constant 1 : i32
    %26 = arith.addi %25, %c1_i32 : i32
    %27 = arith.index_cast %26 : i32 to index
    %28 = memref.load %arg1[%27] : memref<2xi32, #tpu.memory_space<smem>>
    %c2_i32_7 = arith.constant 2 : i32
    %29 = arith.muli %arg0, %c2_i32_7 : i32
    %c1_i32_8 = arith.constant 1 : i32
    %30 = arith.addi %29, %c1_i32_8 : i32
    %31 = arith.index_cast %30 : i32 to index
    %32 = memref.load %arg2[%31] : memref<2xi32, #tpu.memory_space<smem>>
    %c8_i32_9 = arith.constant 8 : i32
    %33 = arith.subi %c8_i32_9, %28 : i32
    %34 = vector.broadcast %33 : i32 to vector<1x8xi32>
    %35 = arith.cmpi sge, %0, %34 : vector<1x8xi32>
    %cst_10 = arith.constant -1.000000e+30 : f32
    %cst_11 = arith.constant 0.000000e+00 : f32
    %36 = vector.broadcast %cst_10 : f32 to vector<1x8xf32>
    %37 = vector.broadcast %cst_11 : f32 to vector<1x8xf32>
    %38 = arith.select %35, %36, %37 : vector<1x8xi1>, vector<1x8xf32>
    %39 = arith.cmpi sle, %2, %1 : vector<8x8xi32>
    %c8_i32_12 = arith.constant 8 : i32
    %40 = arith.subi %c8_i32_12, %32 : i32
    %41 = vector.broadcast %40 : i32 to vector<8x8xi32>
    %42 = arith.cmpi slt, %2, %41 : vector<8x8xi32>
    %43 = arith.andi %39, %42 : vector<8x8xi1>
    %cst_13 = arith.constant 0.000000e+00 : f32
    %cst_14 = arith.constant -1.000000e+30 : f32
    %44 = vector.broadcast %cst_13 : f32 to vector<8x8xf32>
    %45 = vector.broadcast %cst_14 : f32 to vector<8x8xf32>
    %46 = arith.select %43, %44, %45 : vector<8x8xi1>, vector<8x8xf32>
    %c0 = arith.constant 0 : index
    %c0_15 = arith.constant 0 : index
    %c0_16 = arith.constant 0 : index
    %47 = vector.load %arg3[%c0, %c0_15, %c0_16] : memref<2x8x32xf32, #tpu.memory_space<vmem>>, vector<2x8x32xf32>
    %48 = vector.shape_cast %47 : vector<2x8x32xf32> to vector<16x32xf32>
    %c0_17 = arith.constant 0 : index
    %c0_18 = arith.constant 0 : index
    %c0_19 = arith.constant 0 : index
    %49 = vector.load %arg4[%c0_17, %c0_18, %c0_19] : memref<2x8x32xf32, #tpu.memory_space<vmem>>, vector<2x8x32xf32>
    %50 = vector.shape_cast %49 : vector<2x8x32xf32> to vector<16x32xf32>
    %c0_20 = arith.constant 0 : index
    %c0_21 = arith.constant 0 : index
    %c0_22 = arith.constant 0 : index
    %51 = vector.load %arg5[%c0_20, %c0_21, %c0_22] : memref<2x32x96xbf16, #tpu.memory_space<vmem>>, vector<1x32x96xbf16>
    %52 = vector.shape_cast %51 : vector<1x32x96xbf16> to vector<32x96xbf16>
    %c0_23 = arith.constant 0 : index
    %c0_24 = arith.constant 0 : index
    %c0_25 = arith.constant 0 : index
    %53 = vector.load %arg6[%c0_23, %c0_24, %c0_25] : memref<2x1x96xf32, #tpu.memory_space<vmem>>, vector<1x1x96xf32>
    %54 = vector.shape_cast %53 : vector<1x1x96xf32> to vector<1x96xf32>
    %c0_26 = arith.constant 0 : index
    %c0_27 = arith.constant 0 : index
    %c0_28 = arith.constant 0 : index
    %55 = vector.load %arg7[%c0_26, %c0_27, %c0_28] : memref<2x32x32xbf16, #tpu.memory_space<vmem>>, vector<1x32x32xbf16>
    %56 = vector.shape_cast %55 : vector<1x32x32xbf16> to vector<32x32xbf16>
    %c0_29 = arith.constant 0 : index
    %c0_30 = arith.constant 0 : index
    %c0_31 = arith.constant 0 : index
    %57 = vector.load %arg8[%c0_29, %c0_30, %c0_31] : memref<2x1x32xf32, #tpu.memory_space<vmem>>, vector<1x1x32xf32>
    %58 = vector.shape_cast %57 : vector<1x1x32xf32> to vector<1x32xf32>
    %c0_32 = arith.constant 0 : index
    %c0_33 = arith.constant 0 : index
    %c0_34 = arith.constant 0 : index
    %59 = vector.load %arg9[%c0_32, %c0_33, %c0_34] : memref<2x1x32xf32, #tpu.memory_space<vmem>>, vector<1x1x32xf32>
    %60 = vector.shape_cast %59 : vector<1x1x32xf32> to vector<1x32xf32>
    %c0_35 = arith.constant 0 : index
    %c0_36 = arith.constant 0 : index
    %c0_37 = arith.constant 0 : index
    %61 = vector.load %arg10[%c0_35, %c0_36, %c0_37] : memref<2x1x32xf32, #tpu.memory_space<vmem>>, vector<1x1x32xf32>
    %62 = vector.shape_cast %61 : vector<1x1x32xf32> to vector<1x32xf32>
    %63 = arith.truncf %48 : vector<16x32xf32> to vector<16x32xbf16>
    %cst_38 = arith.constant dense<0.000000e+00> : vector<16x96xf32>
    %64 = tpu.matmul %63, %52, %cst_38 {dimension_numbers = #tpu.dot_dimension_numbers<[1], [0], [0], [1], [0, 0, 1, 1], [], []>} : vector<16x32xbf16>, vector<32x96xbf16>, vector<16x96xf32> -> vector<16x96xf32>
    %65 = vector.broadcast %54 : vector<1x96xf32> to vector<16x96xf32>
    %66 = arith.addf %64, %65 : vector<16x96xf32>
    %67 = vector.extract_strided_slice %66 {offsets = [0, 0], sizes = [16, 32], strides = [1, 1]} : vector<16x96xf32> to vector<16x32xf32>
    %68 = vector.extract_strided_slice %66 {offsets = [0, 32], sizes = [16, 32], strides = [1, 1]} : vector<16x96xf32> to vector<16x32xf32>
    %69 = vector.extract_strided_slice %66 {offsets = [0, 64], sizes = [16, 32], strides = [1, 1]} : vector<16x96xf32> to vector<16x32xf32>
    %70 = arith.truncf %67 : vector<16x32xf32> to vector<16x32xbf16>
    %71 = arith.truncf %68 : vector<16x32xf32> to vector<16x32xbf16>
    %72 = arith.truncf %69 : vector<16x32xf32> to vector<16x32xbf16>
    %73 = vector.extract_strided_slice %70 {offsets = [0, 0], sizes = [8, 32], strides = [1, 1]} : vector<16x32xbf16> to vector<8x32xbf16>
    %74 = vector.extract_strided_slice %71 {offsets = [0, 0], sizes = [8, 32], strides = [1, 1]} : vector<16x32xbf16> to vector<8x32xbf16>
    %75 = vector.extract_strided_slice %72 {offsets = [0, 0], sizes = [8, 32], strides = [1, 1]} : vector<16x32xbf16> to vector<8x32xbf16>
    %76 = vector.extract_strided_slice %73 {offsets = [0, 0], sizes = [8, 8], strides = [1, 1]} : vector<8x32xbf16> to vector<8x8xbf16>
    %77 = vector.extract_strided_slice %74 {offsets = [0, 0], sizes = [8, 8], strides = [1, 1]} : vector<8x32xbf16> to vector<8x8xbf16>
    %cst_39 = arith.constant dense<0.000000e+00> : vector<8x8xf32>
    %78 = tpu.matmul %76, %77, %cst_39 {dimension_numbers = #tpu.dot_dimension_numbers<[1], [1], [0], [0], [0, 0, 1, 0], [], []>} : vector<8x8xbf16>, vector<8x8xbf16>, vector<8x8xf32> -> vector<8x8xf32>
    %cst_40 = arith.constant 0.353553385 : f32
    %79 = vector.broadcast %cst_40 : f32 to vector<8x8xf32>
    %80 = arith.mulf %78, %79 : vector<8x8xf32>
    %81 = vector.broadcast %16 : vector<1x8xf32> to vector<8x8xf32>
    %82 = arith.addf %80, %81 : vector<8x8xf32>
    %cst_41 = arith.constant dense<0xFF800000> : vector<8xf32>
    %83 = vector.multi_reduction <maximumf>, %82, %cst_41 [1] : vector<8x8xf32> to vector<8xf32>
    %84 = vector.shape_cast %83 : vector<8xf32> to vector<8x1xf32>
    %85 = vector.broadcast %84 : vector<8x1xf32> to vector<8x8xf32>
    %86 = arith.subf %82, %85 : vector<8x8xf32>
    %87 = math.exp %86 : vector<8x8xf32>
    %cst_42 = arith.constant dense<0.000000e+00> : vector<8xf32>
    %88 = vector.multi_reduction <add>, %87, %cst_42 [1] : vector<8x8xf32> to vector<8xf32>
    %89 = vector.shape_cast %88 : vector<8xf32> to vector<8x1xf32>
    %90 = tpu.reciprocal %89 {approx = true} : vector<8x1xf32> -> vector<8x1xf32>
    %91 = vector.broadcast %90 : vector<8x1xf32> to vector<8x8xf32>
    %92 = arith.mulf %87, %91 : vector<8x8xf32>
    %93 = vector.extract_strided_slice %75 {offsets = [0, 0], sizes = [8, 8], strides = [1, 1]} : vector<8x32xbf16> to vector<8x8xbf16>
    %94 = arith.truncf %92 : vector<8x8xf32> to vector<8x8xbf16>
    %cst_43 = arith.constant dense<0.000000e+00> : vector<8x8xf32>
    %95 = tpu.matmul %94, %93, %cst_43 {dimension_numbers = #tpu.dot_dimension_numbers<[1], [0], [0], [1], [0, 0, 1, 1], [], []>} : vector<8x8xbf16>, vector<8x8xbf16>, vector<8x8xf32> -> vector<8x8xf32>
    %96 = vector.extract_strided_slice %73 {offsets = [0, 8], sizes = [8, 8], strides = [1, 1]} : vector<8x32xbf16> to vector<8x8xbf16>
    %97 = vector.extract_strided_slice %74 {offsets = [0, 8], sizes = [8, 8], strides = [1, 1]} : vector<8x32xbf16> to vector<8x8xbf16>
    %cst_44 = arith.constant dense<0.000000e+00> : vector<8x8xf32>
    %98 = tpu.matmul %96, %97, %cst_44 {dimension_numbers = #tpu.dot_dimension_numbers<[1], [1], [0], [0], [0, 0, 1, 0], [], []>} : vector<8x8xbf16>, vector<8x8xbf16>, vector<8x8xf32> -> vector<8x8xf32>
    %cst_45 = arith.constant 0.353553385 : f32
    %99 = vector.broadcast %cst_45 : f32 to vector<8x8xf32>
    %100 = arith.mulf %98, %99 : vector<8x8xf32>
    %101 = vector.broadcast %16 : vector<1x8xf32> to vector<8x8xf32>
    %102 = arith.addf %100, %101 : vector<8x8xf32>
    %cst_46 = arith.constant dense<0xFF800000> : vector<8xf32>
    %103 = vector.multi_reduction <maximumf>, %102, %cst_46 [1] : vector<8x8xf32> to vector<8xf32>
    %104 = vector.shape_cast %103 : vector<8xf32> to vector<8x1xf32>
    %105 = vector.broadcast %104 : vector<8x1xf32> to vector<8x8xf32>
    %106 = arith.subf %102, %105 : vector<8x8xf32>
    %107 = math.exp %106 : vector<8x8xf32>
    %cst_47 = arith.constant dense<0.000000e+00> : vector<8xf32>
    %108 = vector.multi_reduction <add>, %107, %cst_47 [1] : vector<8x8xf32> to vector<8xf32>
    %109 = vector.shape_cast %108 : vector<8xf32> to vector<8x1xf32>
    %110 = tpu.reciprocal %109 {approx = true} : vector<8x1xf32> -> vector<8x1xf32>
    %111 = vector.broadcast %110 : vector<8x1xf32> to vector<8x8xf32>
    %112 = arith.mulf %107, %111 : vector<8x8xf32>
    %113 = vector.extract_strided_slice %75 {offsets = [0, 8], sizes = [8, 8], strides = [1, 1]} : vector<8x32xbf16> to vector<8x8xbf16>
    %114 = arith.truncf %112 : vector<8x8xf32> to vector<8x8xbf16>
    %cst_48 = arith.constant dense<0.000000e+00> : vector<8x8xf32>
    %115 = tpu.matmul %114, %113, %cst_48 {dimension_numbers = #tpu.dot_dimension_numbers<[1], [0], [0], [1], [0, 0, 1, 1], [], []>} : vector<8x8xbf16>, vector<8x8xbf16>, vector<8x8xf32> -> vector<8x8xf32>
    %116 = vector.extract_strided_slice %73 {offsets = [0, 16], sizes = [8, 8], strides = [1, 1]} : vector<8x32xbf16> to vector<8x8xbf16>
    %117 = vector.extract_strided_slice %74 {offsets = [0, 16], sizes = [8, 8], strides = [1, 1]} : vector<8x32xbf16> to vector<8x8xbf16>
    %cst_49 = arith.constant dense<0.000000e+00> : vector<8x8xf32>
    %118 = tpu.matmul %116, %117, %cst_49 {dimension_numbers = #tpu.dot_dimension_numbers<[1], [1], [0], [0], [0, 0, 1, 0], [], []>} : vector<8x8xbf16>, vector<8x8xbf16>, vector<8x8xf32> -> vector<8x8xf32>
    %cst_50 = arith.constant 0.353553385 : f32
    %119 = vector.broadcast %cst_50 : f32 to vector<8x8xf32>
    %120 = arith.mulf %118, %119 : vector<8x8xf32>
    %121 = vector.broadcast %16 : vector<1x8xf32> to vector<8x8xf32>
    %122 = arith.addf %120, %121 : vector<8x8xf32>
    %cst_51 = arith.constant dense<0xFF800000> : vector<8xf32>
    %123 = vector.multi_reduction <maximumf>, %122, %cst_51 [1] : vector<8x8xf32> to vector<8xf32>
    %124 = vector.shape_cast %123 : vector<8xf32> to vector<8x1xf32>
    %125 = vector.broadcast %124 : vector<8x1xf32> to vector<8x8xf32>
    %126 = arith.subf %122, %125 : vector<8x8xf32>
    %127 = math.exp %126 : vector<8x8xf32>
    %cst_52 = arith.constant dense<0.000000e+00> : vector<8xf32>
    %128 = vector.multi_reduction <add>, %127, %cst_52 [1] : vector<8x8xf32> to vector<8xf32>
    %129 = vector.shape_cast %128 : vector<8xf32> to vector<8x1xf32>
    %130 = tpu.reciprocal %129 {approx = true} : vector<8x1xf32> -> vector<8x1xf32>
    %131 = vector.broadcast %130 : vector<8x1xf32> to vector<8x8xf32>
    %132 = arith.mulf %127, %131 : vector<8x8xf32>
    %133 = vector.extract_strided_slice %75 {offsets = [0, 16], sizes = [8, 8], strides = [1, 1]} : vector<8x32xbf16> to vector<8x8xbf16>
    %134 = arith.truncf %132 : vector<8x8xf32> to vector<8x8xbf16>
    %cst_53 = arith.constant dense<0.000000e+00> : vector<8x8xf32>
    %135 = tpu.matmul %134, %133, %cst_53 {dimension_numbers = #tpu.dot_dimension_numbers<[1], [0], [0], [1], [0, 0, 1, 1], [], []>} : vector<8x8xbf16>, vector<8x8xbf16>, vector<8x8xf32> -> vector<8x8xf32>
    %136 = vector.extract_strided_slice %73 {offsets = [0, 24], sizes = [8, 8], strides = [1, 1]} : vector<8x32xbf16> to vector<8x8xbf16>
    %137 = vector.extract_strided_slice %74 {offsets = [0, 24], sizes = [8, 8], strides = [1, 1]} : vector<8x32xbf16> to vector<8x8xbf16>
    %cst_54 = arith.constant dense<0.000000e+00> : vector<8x8xf32>
    %138 = tpu.matmul %136, %137, %cst_54 {dimension_numbers = #tpu.dot_dimension_numbers<[1], [1], [0], [0], [0, 0, 1, 0], [], []>} : vector<8x8xbf16>, vector<8x8xbf16>, vector<8x8xf32> -> vector<8x8xf32>
    %cst_55 = arith.constant 0.353553385 : f32
    %139 = vector.broadcast %cst_55 : f32 to vector<8x8xf32>
    %140 = arith.mulf %138, %139 : vector<8x8xf32>
    %141 = vector.broadcast %16 : vector<1x8xf32> to vector<8x8xf32>
    %142 = arith.addf %140, %141 : vector<8x8xf32>
    %cst_56 = arith.constant dense<0xFF800000> : vector<8xf32>
    %143 = vector.multi_reduction <maximumf>, %142, %cst_56 [1] : vector<8x8xf32> to vector<8xf32>
    %144 = vector.shape_cast %143 : vector<8xf32> to vector<8x1xf32>
    %145 = vector.broadcast %144 : vector<8x1xf32> to vector<8x8xf32>
    %146 = arith.subf %142, %145 : vector<8x8xf32>
    %147 = math.exp %146 : vector<8x8xf32>
    %cst_57 = arith.constant dense<0.000000e+00> : vector<8xf32>
    %148 = vector.multi_reduction <add>, %147, %cst_57 [1] : vector<8x8xf32> to vector<8xf32>
    %149 = vector.shape_cast %148 : vector<8xf32> to vector<8x1xf32>
    %150 = tpu.reciprocal %149 {approx = true} : vector<8x1xf32> -> vector<8x1xf32>
    %151 = vector.broadcast %150 : vector<8x1xf32> to vector<8x8xf32>
    %152 = arith.mulf %147, %151 : vector<8x8xf32>
    %153 = vector.extract_strided_slice %75 {offsets = [0, 24], sizes = [8, 8], strides = [1, 1]} : vector<8x32xbf16> to vector<8x8xbf16>
    %154 = arith.truncf %152 : vector<8x8xf32> to vector<8x8xbf16>
    %cst_58 = arith.constant dense<0.000000e+00> : vector<8x8xf32>
    %155 = tpu.matmul %154, %153, %cst_58 {dimension_numbers = #tpu.dot_dimension_numbers<[1], [0], [0], [1], [0, 0, 1, 1], [], []>} : vector<8x8xbf16>, vector<8x8xbf16>, vector<8x8xf32> -> vector<8x8xf32>
    %156 = tpu.concatenate %95, %115, %135, %155 in 1 : vector<8x8xf32>, vector<8x8xf32>, vector<8x8xf32>, vector<8x8xf32> -> vector<8x32xf32>
    %157 = vector.extract_strided_slice %70 {offsets = [8, 0], sizes = [8, 32], strides = [1, 1]} : vector<16x32xbf16> to vector<8x32xbf16>
    %158 = vector.extract_strided_slice %71 {offsets = [8, 0], sizes = [8, 32], strides = [1, 1]} : vector<16x32xbf16> to vector<8x32xbf16>
    %159 = vector.extract_strided_slice %72 {offsets = [8, 0], sizes = [8, 32], strides = [1, 1]} : vector<16x32xbf16> to vector<8x32xbf16>
    %160 = vector.extract_strided_slice %157 {offsets = [0, 0], sizes = [8, 8], strides = [1, 1]} : vector<8x32xbf16> to vector<8x8xbf16>
    %161 = vector.extract_strided_slice %158 {offsets = [0, 0], sizes = [8, 8], strides = [1, 1]} : vector<8x32xbf16> to vector<8x8xbf16>
    %cst_59 = arith.constant dense<0.000000e+00> : vector<8x8xf32>
    %162 = tpu.matmul %160, %161, %cst_59 {dimension_numbers = #tpu.dot_dimension_numbers<[1], [1], [0], [0], [0, 0, 1, 0], [], []>} : vector<8x8xbf16>, vector<8x8xbf16>, vector<8x8xf32> -> vector<8x8xf32>
    %cst_60 = arith.constant 0.353553385 : f32
    %163 = vector.broadcast %cst_60 : f32 to vector<8x8xf32>
    %164 = arith.mulf %162, %163 : vector<8x8xf32>
    %165 = vector.broadcast %38 : vector<1x8xf32> to vector<8x8xf32>
    %166 = arith.addf %164, %165 : vector<8x8xf32>
    %cst_61 = arith.constant dense<0xFF800000> : vector<8xf32>
    %167 = vector.multi_reduction <maximumf>, %166, %cst_61 [1] : vector<8x8xf32> to vector<8xf32>
    %168 = vector.shape_cast %167 : vector<8xf32> to vector<8x1xf32>
    %169 = vector.broadcast %168 : vector<8x1xf32> to vector<8x8xf32>
    %170 = arith.subf %166, %169 : vector<8x8xf32>
    %171 = math.exp %170 : vector<8x8xf32>
    %cst_62 = arith.constant dense<0.000000e+00> : vector<8xf32>
    %172 = vector.multi_reduction <add>, %171, %cst_62 [1] : vector<8x8xf32> to vector<8xf32>
    %173 = vector.shape_cast %172 : vector<8xf32> to vector<8x1xf32>
    %174 = tpu.reciprocal %173 {approx = true} : vector<8x1xf32> -> vector<8x1xf32>
    %175 = vector.broadcast %174 : vector<8x1xf32> to vector<8x8xf32>
    %176 = arith.mulf %171, %175 : vector<8x8xf32>
    %177 = vector.extract_strided_slice %159 {offsets = [0, 0], sizes = [8, 8], strides = [1, 1]} : vector<8x32xbf16> to vector<8x8xbf16>
    %178 = arith.truncf %176 : vector<8x8xf32> to vector<8x8xbf16>
    %cst_63 = arith.constant dense<0.000000e+00> : vector<8x8xf32>
    %179 = tpu.matmul %178, %177, %cst_63 {dimension_numbers = #tpu.dot_dimension_numbers<[1], [0], [0], [1], [0, 0, 1, 1], [], []>} : vector<8x8xbf16>, vector<8x8xbf16>, vector<8x8xf32> -> vector<8x8xf32>
    %180 = vector.extract_strided_slice %157 {offsets = [0, 8], sizes = [8, 8], strides = [1, 1]} : vector<8x32xbf16> to vector<8x8xbf16>
    %181 = vector.extract_strided_slice %158 {offsets = [0, 8], sizes = [8, 8], strides = [1, 1]} : vector<8x32xbf16> to vector<8x8xbf16>
    %cst_64 = arith.constant dense<0.000000e+00> : vector<8x8xf32>
    %182 = tpu.matmul %180, %181, %cst_64 {dimension_numbers = #tpu.dot_dimension_numbers<[1], [1], [0], [0], [0, 0, 1, 0], [], []>} : vector<8x8xbf16>, vector<8x8xbf16>, vector<8x8xf32> -> vector<8x8xf32>
    %cst_65 = arith.constant 0.353553385 : f32
    %183 = vector.broadcast %cst_65 : f32 to vector<8x8xf32>
    %184 = arith.mulf %182, %183 : vector<8x8xf32>
    %185 = vector.broadcast %38 : vector<1x8xf32> to vector<8x8xf32>
    %186 = arith.addf %184, %185 : vector<8x8xf32>
    %cst_66 = arith.constant dense<0xFF800000> : vector<8xf32>
    %187 = vector.multi_reduction <maximumf>, %186, %cst_66 [1] : vector<8x8xf32> to vector<8xf32>
    %188 = vector.shape_cast %187 : vector<8xf32> to vector<8x1xf32>
    %189 = vector.broadcast %188 : vector<8x1xf32> to vector<8x8xf32>
    %190 = arith.subf %186, %189 : vector<8x8xf32>
    %191 = math.exp %190 : vector<8x8xf32>
    %cst_67 = arith.constant dense<0.000000e+00> : vector<8xf32>
    %192 = vector.multi_reduction <add>, %191, %cst_67 [1] : vector<8x8xf32> to vector<8xf32>
    %193 = vector.shape_cast %192 : vector<8xf32> to vector<8x1xf32>
    %194 = tpu.reciprocal %193 {approx = true} : vector<8x1xf32> -> vector<8x1xf32>
    %195 = vector.broadcast %194 : vector<8x1xf32> to vector<8x8xf32>
    %196 = arith.mulf %191, %195 : vector<8x8xf32>
    %197 = vector.extract_strided_slice %159 {offsets = [0, 8], sizes = [8, 8], strides = [1, 1]} : vector<8x32xbf16> to vector<8x8xbf16>
    %198 = arith.truncf %196 : vector<8x8xf32> to vector<8x8xbf16>
    %cst_68 = arith.constant dense<0.000000e+00> : vector<8x8xf32>
    %199 = tpu.matmul %198, %197, %cst_68 {dimension_numbers = #tpu.dot_dimension_numbers<[1], [0], [0], [1], [0, 0, 1, 1], [], []>} : vector<8x8xbf16>, vector<8x8xbf16>, vector<8x8xf32> -> vector<8x8xf32>
    %200 = vector.extract_strided_slice %157 {offsets = [0, 16], sizes = [8, 8], strides = [1, 1]} : vector<8x32xbf16> to vector<8x8xbf16>
    %201 = vector.extract_strided_slice %158 {offsets = [0, 16], sizes = [8, 8], strides = [1, 1]} : vector<8x32xbf16> to vector<8x8xbf16>
    %cst_69 = arith.constant dense<0.000000e+00> : vector<8x8xf32>
    %202 = tpu.matmul %200, %201, %cst_69 {dimension_numbers = #tpu.dot_dimension_numbers<[1], [1], [0], [0], [0, 0, 1, 0], [], []>} : vector<8x8xbf16>, vector<8x8xbf16>, vector<8x8xf32> -> vector<8x8xf32>
    %cst_70 = arith.constant 0.353553385 : f32
    %203 = vector.broadcast %cst_70 : f32 to vector<8x8xf32>
    %204 = arith.mulf %202, %203 : vector<8x8xf32>
    %205 = vector.broadcast %38 : vector<1x8xf32> to vector<8x8xf32>
    %206 = arith.addf %204, %205 : vector<8x8xf32>
    %cst_71 = arith.constant dense<0xFF800000> : vector<8xf32>
    %207 = vector.multi_reduction <maximumf>, %206, %cst_71 [1] : vector<8x8xf32> to vector<8xf32>
    %208 = vector.shape_cast %207 : vector<8xf32> to vector<8x1xf32>
    %209 = vector.broadcast %208 : vector<8x1xf32> to vector<8x8xf32>
    %210 = arith.subf %206, %209 : vector<8x8xf32>
    %211 = math.exp %210 : vector<8x8xf32>
    %cst_72 = arith.constant dense<0.000000e+00> : vector<8xf32>
    %212 = vector.multi_reduction <add>, %211, %cst_72 [1] : vector<8x8xf32> to vector<8xf32>
    %213 = vector.shape_cast %212 : vector<8xf32> to vector<8x1xf32>
    %214 = tpu.reciprocal %213 {approx = true} : vector<8x1xf32> -> vector<8x1xf32>
    %215 = vector.broadcast %214 : vector<8x1xf32> to vector<8x8xf32>
    %216 = arith.mulf %211, %215 : vector<8x8xf32>
    %217 = vector.extract_strided_slice %159 {offsets = [0, 16], sizes = [8, 8], strides = [1, 1]} : vector<8x32xbf16> to vector<8x8xbf16>
    %218 = arith.truncf %216 : vector<8x8xf32> to vector<8x8xbf16>
    %cst_73 = arith.constant dense<0.000000e+00> : vector<8x8xf32>
    %219 = tpu.matmul %218, %217, %cst_73 {dimension_numbers = #tpu.dot_dimension_numbers<[1], [0], [0], [1], [0, 0, 1, 1], [], []>} : vector<8x8xbf16>, vector<8x8xbf16>, vector<8x8xf32> -> vector<8x8xf32>
    %220 = vector.extract_strided_slice %157 {offsets = [0, 24], sizes = [8, 8], strides = [1, 1]} : vector<8x32xbf16> to vector<8x8xbf16>
    %221 = vector.extract_strided_slice %158 {offsets = [0, 24], sizes = [8, 8], strides = [1, 1]} : vector<8x32xbf16> to vector<8x8xbf16>
    %cst_74 = arith.constant dense<0.000000e+00> : vector<8x8xf32>
    %222 = tpu.matmul %220, %221, %cst_74 {dimension_numbers = #tpu.dot_dimension_numbers<[1], [1], [0], [0], [0, 0, 1, 0], [], []>} : vector<8x8xbf16>, vector<8x8xbf16>, vector<8x8xf32> -> vector<8x8xf32>
    %cst_75 = arith.constant 0.353553385 : f32
    %223 = vector.broadcast %cst_75 : f32 to vector<8x8xf32>
    %224 = arith.mulf %222, %223 : vector<8x8xf32>
    %225 = vector.broadcast %38 : vector<1x8xf32> to vector<8x8xf32>
    %226 = arith.addf %224, %225 : vector<8x8xf32>
    %cst_76 = arith.constant dense<0xFF800000> : vector<8xf32>
    %227 = vector.multi_reduction <maximumf>, %226, %cst_76 [1] : vector<8x8xf32> to vector<8xf32>
    %228 = vector.shape_cast %227 : vector<8xf32> to vector<8x1xf32>
    %229 = vector.broadcast %228 : vector<8x1xf32> to vector<8x8xf32>
    %230 = arith.subf %226, %229 : vector<8x8xf32>
    %231 = math.exp %230 : vector<8x8xf32>
    %cst_77 = arith.constant dense<0.000000e+00> : vector<8xf32>
    %232 = vector.multi_reduction <add>, %231, %cst_77 [1] : vector<8x8xf32> to vector<8xf32>
    %233 = vector.shape_cast %232 : vector<8xf32> to vector<8x1xf32>
    %234 = tpu.reciprocal %233 {approx = true} : vector<8x1xf32> -> vector<8x1xf32>
    %235 = vector.broadcast %234 : vector<8x1xf32> to vector<8x8xf32>
    %236 = arith.mulf %231, %235 : vector<8x8xf32>
    %237 = vector.extract_strided_slice %159 {offsets = [0, 24], sizes = [8, 8], strides = [1, 1]} : vector<8x32xbf16> to vector<8x8xbf16>
    %238 = arith.truncf %236 : vector<8x8xf32> to vector<8x8xbf16>
    %cst_78 = arith.constant dense<0.000000e+00> : vector<8x8xf32>
    %239 = tpu.matmul %238, %237, %cst_78 {dimension_numbers = #tpu.dot_dimension_numbers<[1], [0], [0], [1], [0, 0, 1, 1], [], []>} : vector<8x8xbf16>, vector<8x8xbf16>, vector<8x8xf32> -> vector<8x8xf32>
    %240 = tpu.concatenate %179, %199, %219, %239 in 1 : vector<8x8xf32>, vector<8x8xf32>, vector<8x8xf32>, vector<8x8xf32> -> vector<8x32xf32>
    %241 = tpu.concatenate %156, %240 in 0 : vector<8x32xf32>, vector<8x32xf32> -> vector<16x32xf32>
    %242 = arith.truncf %241 : vector<16x32xf32> to vector<16x32xbf16>
    %cst_79 = arith.constant dense<0.000000e+00> : vector<16x32xf32>
    %243 = tpu.matmul %242, %56, %cst_79 {dimension_numbers = #tpu.dot_dimension_numbers<[1], [0], [0], [1], [0, 0, 1, 1], [], []>} : vector<16x32xbf16>, vector<32x32xbf16>, vector<16x32xf32> -> vector<16x32xf32>
    %244 = arith.addf %48, %243 : vector<16x32xf32>
    %245 = vector.broadcast %58 : vector<1x32xf32> to vector<16x32xf32>
    %246 = arith.addf %244, %245 : vector<16x32xf32>
    %cst_80 = arith.constant dense<0.000000e+00> : vector<16xf32>
    %247 = vector.multi_reduction <add>, %246, %cst_80 [1] : vector<16x32xf32> to vector<16xf32>
    %248 = vector.shape_cast %247 : vector<16xf32> to vector<16x1xf32>
    %cst_81 = arith.constant 3.200000e+01 : f32
    %249 = vector.broadcast %cst_81 : f32 to vector<16x1xf32>
    %250 = arith.divf %248, %249 : vector<16x1xf32>
    %251 = vector.broadcast %250 : vector<16x1xf32> to vector<16x32xf32>
    %252 = arith.subf %246, %251 : vector<16x32xf32>
    %253 = arith.mulf %252, %252 : vector<16x32xf32>
    %cst_82 = arith.constant dense<0.000000e+00> : vector<16xf32>
    %254 = vector.multi_reduction <add>, %253, %cst_82 [1] : vector<16x32xf32> to vector<16xf32>
    %255 = vector.shape_cast %254 : vector<16xf32> to vector<16x1xf32>
    %cst_83 = arith.constant 3.100000e+01 : f32
    %256 = vector.broadcast %cst_83 : f32 to vector<16x1xf32>
    %257 = arith.divf %255, %256 : vector<16x1xf32>
    %258 = math.sqrt %257 : vector<16x1xf32>
    %cst_84 = arith.constant 9.99999997E-7 : f32
    %259 = vector.broadcast %cst_84 : f32 to vector<16x1xf32>
    %260 = arith.addf %258, %259 : vector<16x1xf32>
    %261 = tpu.reciprocal %260 {approx = true} : vector<16x1xf32> -> vector<16x1xf32>
    %262 = vector.broadcast %250 : vector<16x1xf32> to vector<16x32xf32>
    %263 = arith.subf %246, %262 : vector<16x32xf32>
    %264 = vector.broadcast %60 : vector<1x32xf32> to vector<16x32xf32>
    %265 = arith.mulf %264, %263 : vector<16x32xf32>
    %266 = vector.broadcast %261 : vector<16x1xf32> to vector<16x32xf32>
    %267 = arith.mulf %265, %266 : vector<16x32xf32>
    %268 = vector.broadcast %62 : vector<1x32xf32> to vector<16x32xf32>
    %269 = arith.addf %267, %268 : vector<16x32xf32>
    %c1 = arith.constant 1 : index
    %c0_85 = arith.constant 0 : index
    %c0_86 = arith.constant 0 : index
    %270 = vector.load %arg5[%c1, %c0_85, %c0_86] : memref<2x32x96xbf16, #tpu.memory_space<vmem>>, vector<1x32x96xbf16>
    %271 = vector.shape_cast %270 : vector<1x32x96xbf16> to vector<32x96xbf16>
    %c1_87 = arith.constant 1 : index
    %c0_88 = arith.constant 0 : index
    %c0_89 = arith.constant 0 : index
    %272 = vector.load %arg6[%c1_87, %c0_88, %c0_89] : memref<2x1x96xf32, #tpu.memory_space<vmem>>, vector<1x1x96xf32>
    %273 = vector.shape_cast %272 : vector<1x1x96xf32> to vector<1x96xf32>
    %c1_90 = arith.constant 1 : index
    %c0_91 = arith.constant 0 : index
    %c0_92 = arith.constant 0 : index
    %274 = vector.load %arg7[%c1_90, %c0_91, %c0_92] : memref<2x32x32xbf16, #tpu.memory_space<vmem>>, vector<1x32x32xbf16>
    %275 = vector.shape_cast %274 : vector<1x32x32xbf16> to vector<32x32xbf16>
    %c1_93 = arith.constant 1 : index
    %c0_94 = arith.constant 0 : index
    %c0_95 = arith.constant 0 : index
    %276 = vector.load %arg8[%c1_93, %c0_94, %c0_95] : memref<2x1x32xf32, #tpu.memory_space<vmem>>, vector<1x1x32xf32>
    %277 = vector.shape_cast %276 : vector<1x1x32xf32> to vector<1x32xf32>
    %c1_96 = arith.constant 1 : index
    %c0_97 = arith.constant 0 : index
    %c0_98 = arith.constant 0 : index
    %278 = vector.load %arg9[%c1_96, %c0_97, %c0_98] : memref<2x1x32xf32, #tpu.memory_space<vmem>>, vector<1x1x32xf32>
    %279 = vector.shape_cast %278 : vector<1x1x32xf32> to vector<1x32xf32>
    %c1_99 = arith.constant 1 : index
    %c0_100 = arith.constant 0 : index
    %c0_101 = arith.constant 0 : index
    %280 = vector.load %arg10[%c1_99, %c0_100, %c0_101] : memref<2x1x32xf32, #tpu.memory_space<vmem>>, vector<1x1x32xf32>
    %281 = vector.shape_cast %280 : vector<1x1x32xf32> to vector<1x32xf32>
    %282 = arith.truncf %269 : vector<16x32xf32> to vector<16x32xbf16>
    %cst_102 = arith.constant dense<0.000000e+00> : vector<16x96xf32>
    %283 = tpu.matmul %282, %271, %cst_102 {dimension_numbers = #tpu.dot_dimension_numbers<[1], [0], [0], [1], [0, 0, 1, 1], [], []>} : vector<16x32xbf16>, vector<32x96xbf16>, vector<16x96xf32> -> vector<16x96xf32>
    %284 = vector.broadcast %273 : vector<1x96xf32> to vector<16x96xf32>
    %285 = arith.addf %283, %284 : vector<16x96xf32>
    %286 = vector.extract_strided_slice %285 {offsets = [0, 0], sizes = [16, 32], strides = [1, 1]} : vector<16x96xf32> to vector<16x32xf32>
    %287 = vector.extract_strided_slice %285 {offsets = [0, 32], sizes = [16, 32], strides = [1, 1]} : vector<16x96xf32> to vector<16x32xf32>
    %288 = vector.extract_strided_slice %285 {offsets = [0, 64], sizes = [16, 32], strides = [1, 1]} : vector<16x96xf32> to vector<16x32xf32>
    %289 = arith.truncf %286 : vector<16x32xf32> to vector<16x32xbf16>
    %290 = arith.truncf %287 : vector<16x32xf32> to vector<16x32xbf16>
    %291 = arith.truncf %288 : vector<16x32xf32> to vector<16x32xbf16>
    %292 = vector.extract_strided_slice %289 {offsets = [0, 0], sizes = [8, 32], strides = [1, 1]} : vector<16x32xbf16> to vector<8x32xbf16>
    %293 = vector.extract_strided_slice %290 {offsets = [0, 0], sizes = [8, 32], strides = [1, 1]} : vector<16x32xbf16> to vector<8x32xbf16>
    %294 = vector.extract_strided_slice %291 {offsets = [0, 0], sizes = [8, 32], strides = [1, 1]} : vector<16x32xbf16> to vector<8x32xbf16>
    %295 = vector.extract_strided_slice %292 {offsets = [0, 0], sizes = [8, 8], strides = [1, 1]} : vector<8x32xbf16> to vector<8x8xbf16>
    %296 = vector.extract_strided_slice %293 {offsets = [0, 0], sizes = [8, 8], strides = [1, 1]} : vector<8x32xbf16> to vector<8x8xbf16>
    %cst_103 = arith.constant dense<0.000000e+00> : vector<8x8xf32>
    %297 = tpu.matmul %295, %296, %cst_103 {dimension_numbers = #tpu.dot_dimension_numbers<[1], [1], [0], [0], [0, 0, 1, 0], [], []>} : vector<8x8xbf16>, vector<8x8xbf16>, vector<8x8xf32> -> vector<8x8xf32>
    %cst_104 = arith.constant 0.353553385 : f32
    %298 = vector.broadcast %cst_104 : f32 to vector<8x8xf32>
    %299 = arith.mulf %297, %298 : vector<8x8xf32>
    %300 = vector.broadcast %16 : vector<1x8xf32> to vector<8x8xf32>
    %301 = arith.addf %299, %300 : vector<8x8xf32>
    %cst_105 = arith.constant dense<0xFF800000> : vector<8xf32>
    %302 = vector.multi_reduction <maximumf>, %301, %cst_105 [1] : vector<8x8xf32> to vector<8xf32>
    %303 = vector.shape_cast %302 : vector<8xf32> to vector<8x1xf32>
    %304 = vector.broadcast %303 : vector<8x1xf32> to vector<8x8xf32>
    %305 = arith.subf %301, %304 : vector<8x8xf32>
    %306 = math.exp %305 : vector<8x8xf32>
    %cst_106 = arith.constant dense<0.000000e+00> : vector<8xf32>
    %307 = vector.multi_reduction <add>, %306, %cst_106 [1] : vector<8x8xf32> to vector<8xf32>
    %308 = vector.shape_cast %307 : vector<8xf32> to vector<8x1xf32>
    %309 = tpu.reciprocal %308 {approx = true} : vector<8x1xf32> -> vector<8x1xf32>
    %310 = vector.broadcast %309 : vector<8x1xf32> to vector<8x8xf32>
    %311 = arith.mulf %306, %310 : vector<8x8xf32>
    %312 = vector.extract_strided_slice %294 {offsets = [0, 0], sizes = [8, 8], strides = [1, 1]} : vector<8x32xbf16> to vector<8x8xbf16>
    %313 = arith.truncf %311 : vector<8x8xf32> to vector<8x8xbf16>
    %cst_107 = arith.constant dense<0.000000e+00> : vector<8x8xf32>
    %314 = tpu.matmul %313, %312, %cst_107 {dimension_numbers = #tpu.dot_dimension_numbers<[1], [0], [0], [1], [0, 0, 1, 1], [], []>} : vector<8x8xbf16>, vector<8x8xbf16>, vector<8x8xf32> -> vector<8x8xf32>
    %315 = vector.extract_strided_slice %292 {offsets = [0, 8], sizes = [8, 8], strides = [1, 1]} : vector<8x32xbf16> to vector<8x8xbf16>
    %316 = vector.extract_strided_slice %293 {offsets = [0, 8], sizes = [8, 8], strides = [1, 1]} : vector<8x32xbf16> to vector<8x8xbf16>
    %cst_108 = arith.constant dense<0.000000e+00> : vector<8x8xf32>
    %317 = tpu.matmul %315, %316, %cst_108 {dimension_numbers = #tpu.dot_dimension_numbers<[1], [1], [0], [0], [0, 0, 1, 0], [], []>} : vector<8x8xbf16>, vector<8x8xbf16>, vector<8x8xf32> -> vector<8x8xf32>
    %cst_109 = arith.constant 0.353553385 : f32
    %318 = vector.broadcast %cst_109 : f32 to vector<8x8xf32>
    %319 = arith.mulf %317, %318 : vector<8x8xf32>
    %320 = vector.broadcast %16 : vector<1x8xf32> to vector<8x8xf32>
    %321 = arith.addf %319, %320 : vector<8x8xf32>
    %cst_110 = arith.constant dense<0xFF800000> : vector<8xf32>
    %322 = vector.multi_reduction <maximumf>, %321, %cst_110 [1] : vector<8x8xf32> to vector<8xf32>
    %323 = vector.shape_cast %322 : vector<8xf32> to vector<8x1xf32>
    %324 = vector.broadcast %323 : vector<8x1xf32> to vector<8x8xf32>
    %325 = arith.subf %321, %324 : vector<8x8xf32>
    %326 = math.exp %325 : vector<8x8xf32>
    %cst_111 = arith.constant dense<0.000000e+00> : vector<8xf32>
    %327 = vector.multi_reduction <add>, %326, %cst_111 [1] : vector<8x8xf32> to vector<8xf32>
    %328 = vector.shape_cast %327 : vector<8xf32> to vector<8x1xf32>
    %329 = tpu.reciprocal %328 {approx = true} : vector<8x1xf32> -> vector<8x1xf32>
    %330 = vector.broadcast %329 : vector<8x1xf32> to vector<8x8xf32>
    %331 = arith.mulf %326, %330 : vector<8x8xf32>
    %332 = vector.extract_strided_slice %294 {offsets = [0, 8], sizes = [8, 8], strides = [1, 1]} : vector<8x32xbf16> to vector<8x8xbf16>
    %333 = arith.truncf %331 : vector<8x8xf32> to vector<8x8xbf16>
    %cst_112 = arith.constant dense<0.000000e+00> : vector<8x8xf32>
    %334 = tpu.matmul %333, %332, %cst_112 {dimension_numbers = #tpu.dot_dimension_numbers<[1], [0], [0], [1], [0, 0, 1, 1], [], []>} : vector<8x8xbf16>, vector<8x8xbf16>, vector<8x8xf32> -> vector<8x8xf32>
    %335 = vector.extract_strided_slice %292 {offsets = [0, 16], sizes = [8, 8], strides = [1, 1]} : vector<8x32xbf16> to vector<8x8xbf16>
    %336 = vector.extract_strided_slice %293 {offsets = [0, 16], sizes = [8, 8], strides = [1, 1]} : vector<8x32xbf16> to vector<8x8xbf16>
    %cst_113 = arith.constant dense<0.000000e+00> : vector<8x8xf32>
    %337 = tpu.matmul %335, %336, %cst_113 {dimension_numbers = #tpu.dot_dimension_numbers<[1], [1], [0], [0], [0, 0, 1, 0], [], []>} : vector<8x8xbf16>, vector<8x8xbf16>, vector<8x8xf32> -> vector<8x8xf32>
    %cst_114 = arith.constant 0.353553385 : f32
    %338 = vector.broadcast %cst_114 : f32 to vector<8x8xf32>
    %339 = arith.mulf %337, %338 : vector<8x8xf32>
    %340 = vector.broadcast %16 : vector<1x8xf32> to vector<8x8xf32>
    %341 = arith.addf %339, %340 : vector<8x8xf32>
    %cst_115 = arith.constant dense<0xFF800000> : vector<8xf32>
    %342 = vector.multi_reduction <maximumf>, %341, %cst_115 [1] : vector<8x8xf32> to vector<8xf32>
    %343 = vector.shape_cast %342 : vector<8xf32> to vector<8x1xf32>
    %344 = vector.broadcast %343 : vector<8x1xf32> to vector<8x8xf32>
    %345 = arith.subf %341, %344 : vector<8x8xf32>
    %346 = math.exp %345 : vector<8x8xf32>
    %cst_116 = arith.constant dense<0.000000e+00> : vector<8xf32>
    %347 = vector.multi_reduction <add>, %346, %cst_116 [1] : vector<8x8xf32> to vector<8xf32>
    %348 = vector.shape_cast %347 : vector<8xf32> to vector<8x1xf32>
    %349 = tpu.reciprocal %348 {approx = true} : vector<8x1xf32> -> vector<8x1xf32>
    %350 = vector.broadcast %349 : vector<8x1xf32> to vector<8x8xf32>
    %351 = arith.mulf %346, %350 : vector<8x8xf32>
    %352 = vector.extract_strided_slice %294 {offsets = [0, 16], sizes = [8, 8], strides = [1, 1]} : vector<8x32xbf16> to vector<8x8xbf16>
    %353 = arith.truncf %351 : vector<8x8xf32> to vector<8x8xbf16>
    %cst_117 = arith.constant dense<0.000000e+00> : vector<8x8xf32>
    %354 = tpu.matmul %353, %352, %cst_117 {dimension_numbers = #tpu.dot_dimension_numbers<[1], [0], [0], [1], [0, 0, 1, 1], [], []>} : vector<8x8xbf16>, vector<8x8xbf16>, vector<8x8xf32> -> vector<8x8xf32>
    %355 = vector.extract_strided_slice %292 {offsets = [0, 24], sizes = [8, 8], strides = [1, 1]} : vector<8x32xbf16> to vector<8x8xbf16>
    %356 = vector.extract_strided_slice %293 {offsets = [0, 24], sizes = [8, 8], strides = [1, 1]} : vector<8x32xbf16> to vector<8x8xbf16>
    %cst_118 = arith.constant dense<0.000000e+00> : vector<8x8xf32>
    %357 = tpu.matmul %355, %356, %cst_118 {dimension_numbers = #tpu.dot_dimension_numbers<[1], [1], [0], [0], [0, 0, 1, 0], [], []>} : vector<8x8xbf16>, vector<8x8xbf16>, vector<8x8xf32> -> vector<8x8xf32>
    %cst_119 = arith.constant 0.353553385 : f32
    %358 = vector.broadcast %cst_119 : f32 to vector<8x8xf32>
    %359 = arith.mulf %357, %358 : vector<8x8xf32>
    %360 = vector.broadcast %16 : vector<1x8xf32> to vector<8x8xf32>
    %361 = arith.addf %359, %360 : vector<8x8xf32>
    %cst_120 = arith.constant dense<0xFF800000> : vector<8xf32>
    %362 = vector.multi_reduction <maximumf>, %361, %cst_120 [1] : vector<8x8xf32> to vector<8xf32>
    %363 = vector.shape_cast %362 : vector<8xf32> to vector<8x1xf32>
    %364 = vector.broadcast %363 : vector<8x1xf32> to vector<8x8xf32>
    %365 = arith.subf %361, %364 : vector<8x8xf32>
    %366 = math.exp %365 : vector<8x8xf32>
    %cst_121 = arith.constant dense<0.000000e+00> : vector<8xf32>
    %367 = vector.multi_reduction <add>, %366, %cst_121 [1] : vector<8x8xf32> to vector<8xf32>
    %368 = vector.shape_cast %367 : vector<8xf32> to vector<8x1xf32>
    %369 = tpu.reciprocal %368 {approx = true} : vector<8x1xf32> -> vector<8x1xf32>
    %370 = vector.broadcast %369 : vector<8x1xf32> to vector<8x8xf32>
    %371 = arith.mulf %366, %370 : vector<8x8xf32>
    %372 = vector.extract_strided_slice %294 {offsets = [0, 24], sizes = [8, 8], strides = [1, 1]} : vector<8x32xbf16> to vector<8x8xbf16>
    %373 = arith.truncf %371 : vector<8x8xf32> to vector<8x8xbf16>
    %cst_122 = arith.constant dense<0.000000e+00> : vector<8x8xf32>
    %374 = tpu.matmul %373, %372, %cst_122 {dimension_numbers = #tpu.dot_dimension_numbers<[1], [0], [0], [1], [0, 0, 1, 1], [], []>} : vector<8x8xbf16>, vector<8x8xbf16>, vector<8x8xf32> -> vector<8x8xf32>
    %375 = tpu.concatenate %314, %334, %354, %374 in 1 : vector<8x8xf32>, vector<8x8xf32>, vector<8x8xf32>, vector<8x8xf32> -> vector<8x32xf32>
    %376 = vector.extract_strided_slice %289 {offsets = [8, 0], sizes = [8, 32], strides = [1, 1]} : vector<16x32xbf16> to vector<8x32xbf16>
    %377 = vector.extract_strided_slice %290 {offsets = [8, 0], sizes = [8, 32], strides = [1, 1]} : vector<16x32xbf16> to vector<8x32xbf16>
    %378 = vector.extract_strided_slice %291 {offsets = [8, 0], sizes = [8, 32], strides = [1, 1]} : vector<16x32xbf16> to vector<8x32xbf16>
    %379 = vector.extract_strided_slice %376 {offsets = [0, 0], sizes = [8, 8], strides = [1, 1]} : vector<8x32xbf16> to vector<8x8xbf16>
    %380 = vector.extract_strided_slice %377 {offsets = [0, 0], sizes = [8, 8], strides = [1, 1]} : vector<8x32xbf16> to vector<8x8xbf16>
    %cst_123 = arith.constant dense<0.000000e+00> : vector<8x8xf32>
    %381 = tpu.matmul %379, %380, %cst_123 {dimension_numbers = #tpu.dot_dimension_numbers<[1], [1], [0], [0], [0, 0, 1, 0], [], []>} : vector<8x8xbf16>, vector<8x8xbf16>, vector<8x8xf32> -> vector<8x8xf32>
    %cst_124 = arith.constant 0.353553385 : f32
    %382 = vector.broadcast %cst_124 : f32 to vector<8x8xf32>
    %383 = arith.mulf %381, %382 : vector<8x8xf32>
    %384 = vector.broadcast %38 : vector<1x8xf32> to vector<8x8xf32>
    %385 = arith.addf %383, %384 : vector<8x8xf32>
    %cst_125 = arith.constant dense<0xFF800000> : vector<8xf32>
    %386 = vector.multi_reduction <maximumf>, %385, %cst_125 [1] : vector<8x8xf32> to vector<8xf32>
    %387 = vector.shape_cast %386 : vector<8xf32> to vector<8x1xf32>
    %388 = vector.broadcast %387 : vector<8x1xf32> to vector<8x8xf32>
    %389 = arith.subf %385, %388 : vector<8x8xf32>
    %390 = math.exp %389 : vector<8x8xf32>
    %cst_126 = arith.constant dense<0.000000e+00> : vector<8xf32>
    %391 = vector.multi_reduction <add>, %390, %cst_126 [1] : vector<8x8xf32> to vector<8xf32>
    %392 = vector.shape_cast %391 : vector<8xf32> to vector<8x1xf32>
    %393 = tpu.reciprocal %392 {approx = true} : vector<8x1xf32> -> vector<8x1xf32>
    %394 = vector.broadcast %393 : vector<8x1xf32> to vector<8x8xf32>
    %395 = arith.mulf %390, %394 : vector<8x8xf32>
    %396 = vector.extract_strided_slice %378 {offsets = [0, 0], sizes = [8, 8], strides = [1, 1]} : vector<8x32xbf16> to vector<8x8xbf16>
    %397 = arith.truncf %395 : vector<8x8xf32> to vector<8x8xbf16>
    %cst_127 = arith.constant dense<0.000000e+00> : vector<8x8xf32>
    %398 = tpu.matmul %397, %396, %cst_127 {dimension_numbers = #tpu.dot_dimension_numbers<[1], [0], [0], [1], [0, 0, 1, 1], [], []>} : vector<8x8xbf16>, vector<8x8xbf16>, vector<8x8xf32> -> vector<8x8xf32>
    %399 = vector.extract_strided_slice %376 {offsets = [0, 8], sizes = [8, 8], strides = [1, 1]} : vector<8x32xbf16> to vector<8x8xbf16>
    %400 = vector.extract_strided_slice %377 {offsets = [0, 8], sizes = [8, 8], strides = [1, 1]} : vector<8x32xbf16> to vector<8x8xbf16>
    %cst_128 = arith.constant dense<0.000000e+00> : vector<8x8xf32>
    %401 = tpu.matmul %399, %400, %cst_128 {dimension_numbers = #tpu.dot_dimension_numbers<[1], [1], [0], [0], [0, 0, 1, 0], [], []>} : vector<8x8xbf16>, vector<8x8xbf16>, vector<8x8xf32> -> vector<8x8xf32>
    %cst_129 = arith.constant 0.353553385 : f32
    %402 = vector.broadcast %cst_129 : f32 to vector<8x8xf32>
    %403 = arith.mulf %401, %402 : vector<8x8xf32>
    %404 = vector.broadcast %38 : vector<1x8xf32> to vector<8x8xf32>
    %405 = arith.addf %403, %404 : vector<8x8xf32>
    %cst_130 = arith.constant dense<0xFF800000> : vector<8xf32>
    %406 = vector.multi_reduction <maximumf>, %405, %cst_130 [1] : vector<8x8xf32> to vector<8xf32>
    %407 = vector.shape_cast %406 : vector<8xf32> to vector<8x1xf32>
    %408 = vector.broadcast %407 : vector<8x1xf32> to vector<8x8xf32>
    %409 = arith.subf %405, %408 : vector<8x8xf32>
    %410 = math.exp %409 : vector<8x8xf32>
    %cst_131 = arith.constant dense<0.000000e+00> : vector<8xf32>
    %411 = vector.multi_reduction <add>, %410, %cst_131 [1] : vector<8x8xf32> to vector<8xf32>
    %412 = vector.shape_cast %411 : vector<8xf32> to vector<8x1xf32>
    %413 = tpu.reciprocal %412 {approx = true} : vector<8x1xf32> -> vector<8x1xf32>
    %414 = vector.broadcast %413 : vector<8x1xf32> to vector<8x8xf32>
    %415 = arith.mulf %410, %414 : vector<8x8xf32>
    %416 = vector.extract_strided_slice %378 {offsets = [0, 8], sizes = [8, 8], strides = [1, 1]} : vector<8x32xbf16> to vector<8x8xbf16>
    %417 = arith.truncf %415 : vector<8x8xf32> to vector<8x8xbf16>
    %cst_132 = arith.constant dense<0.000000e+00> : vector<8x8xf32>
    %418 = tpu.matmul %417, %416, %cst_132 {dimension_numbers = #tpu.dot_dimension_numbers<[1], [0], [0], [1], [0, 0, 1, 1], [], []>} : vector<8x8xbf16>, vector<8x8xbf16>, vector<8x8xf32> -> vector<8x8xf32>
    %419 = vector.extract_strided_slice %376 {offsets = [0, 16], sizes = [8, 8], strides = [1, 1]} : vector<8x32xbf16> to vector<8x8xbf16>
    %420 = vector.extract_strided_slice %377 {offsets = [0, 16], sizes = [8, 8], strides = [1, 1]} : vector<8x32xbf16> to vector<8x8xbf16>
    %cst_133 = arith.constant dense<0.000000e+00> : vector<8x8xf32>
    %421 = tpu.matmul %419, %420, %cst_133 {dimension_numbers = #tpu.dot_dimension_numbers<[1], [1], [0], [0], [0, 0, 1, 0], [], []>} : vector<8x8xbf16>, vector<8x8xbf16>, vector<8x8xf32> -> vector<8x8xf32>
    %cst_134 = arith.constant 0.353553385 : f32
    %422 = vector.broadcast %cst_134 : f32 to vector<8x8xf32>
    %423 = arith.mulf %421, %422 : vector<8x8xf32>
    %424 = vector.broadcast %38 : vector<1x8xf32> to vector<8x8xf32>
    %425 = arith.addf %423, %424 : vector<8x8xf32>
    %cst_135 = arith.constant dense<0xFF800000> : vector<8xf32>
    %426 = vector.multi_reduction <maximumf>, %425, %cst_135 [1] : vector<8x8xf32> to vector<8xf32>
    %427 = vector.shape_cast %426 : vector<8xf32> to vector<8x1xf32>
    %428 = vector.broadcast %427 : vector<8x1xf32> to vector<8x8xf32>
    %429 = arith.subf %425, %428 : vector<8x8xf32>
    %430 = math.exp %429 : vector<8x8xf32>
    %cst_136 = arith.constant dense<0.000000e+00> : vector<8xf32>
    %431 = vector.multi_reduction <add>, %430, %cst_136 [1] : vector<8x8xf32> to vector<8xf32>
    %432 = vector.shape_cast %431 : vector<8xf32> to vector<8x1xf32>
    %433 = tpu.reciprocal %432 {approx = true} : vector<8x1xf32> -> vector<8x1xf32>
    %434 = vector.broadcast %433 : vector<8x1xf32> to vector<8x8xf32>
    %435 = arith.mulf %430, %434 : vector<8x8xf32>
    %436 = vector.extract_strided_slice %378 {offsets = [0, 16], sizes = [8, 8], strides = [1, 1]} : vector<8x32xbf16> to vector<8x8xbf16>
    %437 = arith.truncf %435 : vector<8x8xf32> to vector<8x8xbf16>
    %cst_137 = arith.constant dense<0.000000e+00> : vector<8x8xf32>
    %438 = tpu.matmul %437, %436, %cst_137 {dimension_numbers = #tpu.dot_dimension_numbers<[1], [0], [0], [1], [0, 0, 1, 1], [], []>} : vector<8x8xbf16>, vector<8x8xbf16>, vector<8x8xf32> -> vector<8x8xf32>
    %439 = vector.extract_strided_slice %376 {offsets = [0, 24], sizes = [8, 8], strides = [1, 1]} : vector<8x32xbf16> to vector<8x8xbf16>
    %440 = vector.extract_strided_slice %377 {offsets = [0, 24], sizes = [8, 8], strides = [1, 1]} : vector<8x32xbf16> to vector<8x8xbf16>
    %cst_138 = arith.constant dense<0.000000e+00> : vector<8x8xf32>
    %441 = tpu.matmul %439, %440, %cst_138 {dimension_numbers = #tpu.dot_dimension_numbers<[1], [1], [0], [0], [0, 0, 1, 0], [], []>} : vector<8x8xbf16>, vector<8x8xbf16>, vector<8x8xf32> -> vector<8x8xf32>
    %cst_139 = arith.constant 0.353553385 : f32
    %442 = vector.broadcast %cst_139 : f32 to vector<8x8xf32>
    %443 = arith.mulf %441, %442 : vector<8x8xf32>
    %444 = vector.broadcast %38 : vector<1x8xf32> to vector<8x8xf32>
    %445 = arith.addf %443, %444 : vector<8x8xf32>
    %cst_140 = arith.constant dense<0xFF800000> : vector<8xf32>
    %446 = vector.multi_reduction <maximumf>, %445, %cst_140 [1] : vector<8x8xf32> to vector<8xf32>
    %447 = vector.shape_cast %446 : vector<8xf32> to vector<8x1xf32>
    %448 = vector.broadcast %447 : vector<8x1xf32> to vector<8x8xf32>
    %449 = arith.subf %445, %448 : vector<8x8xf32>
    %450 = math.exp %449 : vector<8x8xf32>
    %cst_141 = arith.constant dense<0.000000e+00> : vector<8xf32>
    %451 = vector.multi_reduction <add>, %450, %cst_141 [1] : vector<8x8xf32> to vector<8xf32>
    %452 = vector.shape_cast %451 : vector<8xf32> to vector<8x1xf32>
    %453 = tpu.reciprocal %452 {approx = true} : vector<8x1xf32> -> vector<8x1xf32>
    %454 = vector.broadcast %453 : vector<8x1xf32> to vector<8x8xf32>
    %455 = arith.mulf %450, %454 : vector<8x8xf32>
    %456 = vector.extract_strided_slice %378 {offsets = [0, 24], sizes = [8, 8], strides = [1, 1]} : vector<8x32xbf16> to vector<8x8xbf16>
    %457 = arith.truncf %455 : vector<8x8xf32> to vector<8x8xbf16>
    %cst_142 = arith.constant dense<0.000000e+00> : vector<8x8xf32>
    %458 = tpu.matmul %457, %456, %cst_142 {dimension_numbers = #tpu.dot_dimension_numbers<[1], [0], [0], [1], [0, 0, 1, 1], [], []>} : vector<8x8xbf16>, vector<8x8xbf16>, vector<8x8xf32> -> vector<8x8xf32>
    %459 = tpu.concatenate %398, %418, %438, %458 in 1 : vector<8x8xf32>, vector<8x8xf32>, vector<8x8xf32>, vector<8x8xf32> -> vector<8x32xf32>
    %460 = tpu.concatenate %375, %459 in 0 : vector<8x32xf32>, vector<8x32xf32> -> vector<16x32xf32>
    %461 = arith.truncf %460 : vector<16x32xf32> to vector<16x32xbf16>
    %cst_143 = arith.constant dense<0.000000e+00> : vector<16x32xf32>
    %462 = tpu.matmul %461, %275, %cst_143 {dimension_numbers = #tpu.dot_dimension_numbers<[1], [0], [0], [1], [0, 0, 1, 1], [], []>} : vector<16x32xbf16>, vector<32x32xbf16>, vector<16x32xf32> -> vector<16x32xf32>
    %463 = arith.addf %269, %462 : vector<16x32xf32>
    %464 = vector.broadcast %277 : vector<1x32xf32> to vector<16x32xf32>
    %465 = arith.addf %463, %464 : vector<16x32xf32>
    %cst_144 = arith.constant dense<0.000000e+00> : vector<16xf32>
    %466 = vector.multi_reduction <add>, %465, %cst_144 [1] : vector<16x32xf32> to vector<16xf32>
    %467 = vector.shape_cast %466 : vector<16xf32> to vector<16x1xf32>
    %cst_145 = arith.constant 3.200000e+01 : f32
    %468 = vector.broadcast %cst_145 : f32 to vector<16x1xf32>
    %469 = arith.divf %467, %468 : vector<16x1xf32>
    %470 = vector.broadcast %469 : vector<16x1xf32> to vector<16x32xf32>
    %471 = arith.subf %465, %470 : vector<16x32xf32>
    %472 = arith.mulf %471, %471 : vector<16x32xf32>
    %cst_146 = arith.constant dense<0.000000e+00> : vector<16xf32>
    %473 = vector.multi_reduction <add>, %472, %cst_146 [1] : vector<16x32xf32> to vector<16xf32>
    %474 = vector.shape_cast %473 : vector<16xf32> to vector<16x1xf32>
    %cst_147 = arith.constant 3.100000e+01 : f32
    %475 = vector.broadcast %cst_147 : f32 to vector<16x1xf32>
    %476 = arith.divf %474, %475 : vector<16x1xf32>
    %477 = math.sqrt %476 : vector<16x1xf32>
    %cst_148 = arith.constant 9.99999997E-7 : f32
    %478 = vector.broadcast %cst_148 : f32 to vector<16x1xf32>
    %479 = arith.addf %477, %478 : vector<16x1xf32>
    %480 = tpu.reciprocal %479 {approx = true} : vector<16x1xf32> -> vector<16x1xf32>
    %481 = vector.broadcast %469 : vector<16x1xf32> to vector<16x32xf32>
    %482 = arith.subf %465, %481 : vector<16x32xf32>
    %483 = vector.broadcast %279 : vector<1x32xf32> to vector<16x32xf32>
    %484 = arith.mulf %483, %482 : vector<16x32xf32>
    %485 = vector.broadcast %480 : vector<16x1xf32> to vector<16x32xf32>
    %486 = arith.mulf %484, %485 : vector<16x32xf32>
    %487 = vector.broadcast %281 : vector<1x32xf32> to vector<16x32xf32>
    %488 = arith.addf %486, %487 : vector<16x32xf32>
    %c0_149 = arith.constant 0 : index
    %c0_150 = arith.constant 0 : index
    %c0_151 = arith.constant 0 : index
    %489 = vector.load %arg11[%c0_149, %c0_150, %c0_151] : memref<2x32x96xbf16, #tpu.memory_space<vmem>>, vector<1x32x96xbf16>
    %490 = vector.shape_cast %489 : vector<1x32x96xbf16> to vector<32x96xbf16>
    %c0_152 = arith.constant 0 : index
    %c0_153 = arith.constant 0 : index
    %c0_154 = arith.constant 0 : index
    %491 = vector.load %arg12[%c0_152, %c0_153, %c0_154] : memref<2x1x96xf32, #tpu.memory_space<vmem>>, vector<1x1x96xf32>
    %492 = vector.shape_cast %491 : vector<1x1x96xf32> to vector<1x96xf32>
    %c0_155 = arith.constant 0 : index
    %c0_156 = arith.constant 0 : index
    %c0_157 = arith.constant 0 : index
    %493 = vector.load %arg13[%c0_155, %c0_156, %c0_157] : memref<2x32x32xbf16, #tpu.memory_space<vmem>>, vector<1x32x32xbf16>
    %494 = vector.shape_cast %493 : vector<1x32x32xbf16> to vector<32x32xbf16>
    %c0_158 = arith.constant 0 : index
    %c0_159 = arith.constant 0 : index
    %c0_160 = arith.constant 0 : index
    %495 = vector.load %arg14[%c0_158, %c0_159, %c0_160] : memref<2x1x32xf32, #tpu.memory_space<vmem>>, vector<1x1x32xf32>
    %496 = vector.shape_cast %495 : vector<1x1x32xf32> to vector<1x32xf32>
    %c0_161 = arith.constant 0 : index
    %c0_162 = arith.constant 0 : index
    %c0_163 = arith.constant 0 : index
    %497 = vector.load %arg15[%c0_161, %c0_162, %c0_163] : memref<2x1x32xf32, #tpu.memory_space<vmem>>, vector<1x1x32xf32>
    %498 = vector.shape_cast %497 : vector<1x1x32xf32> to vector<1x32xf32>
    %c0_164 = arith.constant 0 : index
    %c0_165 = arith.constant 0 : index
    %c0_166 = arith.constant 0 : index
    %499 = vector.load %arg16[%c0_164, %c0_165, %c0_166] : memref<2x1x32xf32, #tpu.memory_space<vmem>>, vector<1x1x32xf32>
    %500 = vector.shape_cast %499 : vector<1x1x32xf32> to vector<1x32xf32>
    %501 = arith.truncf %50 : vector<16x32xf32> to vector<16x32xbf16>
    %cst_167 = arith.constant dense<0.000000e+00> : vector<16x96xf32>
    %502 = tpu.matmul %501, %490, %cst_167 {dimension_numbers = #tpu.dot_dimension_numbers<[1], [0], [0], [1], [0, 0, 1, 1], [], []>} : vector<16x32xbf16>, vector<32x96xbf16>, vector<16x96xf32> -> vector<16x96xf32>
    %503 = vector.broadcast %492 : vector<1x96xf32> to vector<16x96xf32>
    %504 = arith.addf %502, %503 : vector<16x96xf32>
    %505 = vector.extract_strided_slice %504 {offsets = [0, 0], sizes = [16, 32], strides = [1, 1]} : vector<16x96xf32> to vector<16x32xf32>
    %506 = vector.extract_strided_slice %504 {offsets = [0, 32], sizes = [16, 32], strides = [1, 1]} : vector<16x96xf32> to vector<16x32xf32>
    %507 = vector.extract_strided_slice %504 {offsets = [0, 64], sizes = [16, 32], strides = [1, 1]} : vector<16x96xf32> to vector<16x32xf32>
    %508 = arith.truncf %505 : vector<16x32xf32> to vector<16x32xbf16>
    %509 = arith.truncf %506 : vector<16x32xf32> to vector<16x32xbf16>
    %510 = arith.truncf %507 : vector<16x32xf32> to vector<16x32xbf16>
    %511 = vector.extract_strided_slice %508 {offsets = [0, 0], sizes = [8, 32], strides = [1, 1]} : vector<16x32xbf16> to vector<8x32xbf16>
    %512 = vector.extract_strided_slice %509 {offsets = [0, 0], sizes = [8, 32], strides = [1, 1]} : vector<16x32xbf16> to vector<8x32xbf16>
    %513 = vector.extract_strided_slice %510 {offsets = [0, 0], sizes = [8, 32], strides = [1, 1]} : vector<16x32xbf16> to vector<8x32xbf16>
    %514 = vector.extract_strided_slice %511 {offsets = [0, 0], sizes = [8, 8], strides = [1, 1]} : vector<8x32xbf16> to vector<8x8xbf16>
    %515 = vector.extract_strided_slice %512 {offsets = [0, 0], sizes = [8, 8], strides = [1, 1]} : vector<8x32xbf16> to vector<8x8xbf16>
    %cst_168 = arith.constant dense<0.000000e+00> : vector<8x8xf32>
    %516 = tpu.matmul %514, %515, %cst_168 {dimension_numbers = #tpu.dot_dimension_numbers<[1], [1], [0], [0], [0, 0, 1, 0], [], []>} : vector<8x8xbf16>, vector<8x8xbf16>, vector<8x8xf32> -> vector<8x8xf32>
    %cst_169 = arith.constant 0.353553385 : f32
    %517 = vector.broadcast %cst_169 : f32 to vector<8x8xf32>
    %518 = arith.mulf %516, %517 : vector<8x8xf32>
    %519 = arith.addf %518, %24 : vector<8x8xf32>
    %cst_170 = arith.constant dense<0xFF800000> : vector<8xf32>
    %520 = vector.multi_reduction <maximumf>, %519, %cst_170 [1] : vector<8x8xf32> to vector<8xf32>
    %521 = vector.shape_cast %520 : vector<8xf32> to vector<8x1xf32>
    %522 = vector.broadcast %521 : vector<8x1xf32> to vector<8x8xf32>
    %523 = arith.subf %519, %522 : vector<8x8xf32>
    %524 = math.exp %523 : vector<8x8xf32>
    %cst_171 = arith.constant dense<0.000000e+00> : vector<8xf32>
    %525 = vector.multi_reduction <add>, %524, %cst_171 [1] : vector<8x8xf32> to vector<8xf32>
    %526 = vector.shape_cast %525 : vector<8xf32> to vector<8x1xf32>
    %527 = tpu.reciprocal %526 {approx = true} : vector<8x1xf32> -> vector<8x1xf32>
    %528 = vector.broadcast %527 : vector<8x1xf32> to vector<8x8xf32>
    %529 = arith.mulf %524, %528 : vector<8x8xf32>
    %530 = vector.extract_strided_slice %513 {offsets = [0, 0], sizes = [8, 8], strides = [1, 1]} : vector<8x32xbf16> to vector<8x8xbf16>
    %531 = arith.truncf %529 : vector<8x8xf32> to vector<8x8xbf16>
    %cst_172 = arith.constant dense<0.000000e+00> : vector<8x8xf32>
    %532 = tpu.matmul %531, %530, %cst_172 {dimension_numbers = #tpu.dot_dimension_numbers<[1], [0], [0], [1], [0, 0, 1, 1], [], []>} : vector<8x8xbf16>, vector<8x8xbf16>, vector<8x8xf32> -> vector<8x8xf32>
    %533 = vector.extract_strided_slice %511 {offsets = [0, 8], sizes = [8, 8], strides = [1, 1]} : vector<8x32xbf16> to vector<8x8xbf16>
    %534 = vector.extract_strided_slice %512 {offsets = [0, 8], sizes = [8, 8], strides = [1, 1]} : vector<8x32xbf16> to vector<8x8xbf16>
    %cst_173 = arith.constant dense<0.000000e+00> : vector<8x8xf32>
    %535 = tpu.matmul %533, %534, %cst_173 {dimension_numbers = #tpu.dot_dimension_numbers<[1], [1], [0], [0], [0, 0, 1, 0], [], []>} : vector<8x8xbf16>, vector<8x8xbf16>, vector<8x8xf32> -> vector<8x8xf32>
    %cst_174 = arith.constant 0.353553385 : f32
    %536 = vector.broadcast %cst_174 : f32 to vector<8x8xf32>
    %537 = arith.mulf %535, %536 : vector<8x8xf32>
    %538 = arith.addf %537, %24 : vector<8x8xf32>
    %cst_175 = arith.constant dense<0xFF800000> : vector<8xf32>
    %539 = vector.multi_reduction <maximumf>, %538, %cst_175 [1] : vector<8x8xf32> to vector<8xf32>
    %540 = vector.shape_cast %539 : vector<8xf32> to vector<8x1xf32>
    %541 = vector.broadcast %540 : vector<8x1xf32> to vector<8x8xf32>
    %542 = arith.subf %538, %541 : vector<8x8xf32>
    %543 = math.exp %542 : vector<8x8xf32>
    %cst_176 = arith.constant dense<0.000000e+00> : vector<8xf32>
    %544 = vector.multi_reduction <add>, %543, %cst_176 [1] : vector<8x8xf32> to vector<8xf32>
    %545 = vector.shape_cast %544 : vector<8xf32> to vector<8x1xf32>
    %546 = tpu.reciprocal %545 {approx = true} : vector<8x1xf32> -> vector<8x1xf32>
    %547 = vector.broadcast %546 : vector<8x1xf32> to vector<8x8xf32>
    %548 = arith.mulf %543, %547 : vector<8x8xf32>
    %549 = vector.extract_strided_slice %513 {offsets = [0, 8], sizes = [8, 8], strides = [1, 1]} : vector<8x32xbf16> to vector<8x8xbf16>
    %550 = arith.truncf %548 : vector<8x8xf32> to vector<8x8xbf16>
    %cst_177 = arith.constant dense<0.000000e+00> : vector<8x8xf32>
    %551 = tpu.matmul %550, %549, %cst_177 {dimension_numbers = #tpu.dot_dimension_numbers<[1], [0], [0], [1], [0, 0, 1, 1], [], []>} : vector<8x8xbf16>, vector<8x8xbf16>, vector<8x8xf32> -> vector<8x8xf32>
    %552 = vector.extract_strided_slice %511 {offsets = [0, 16], sizes = [8, 8], strides = [1, 1]} : vector<8x32xbf16> to vector<8x8xbf16>
    %553 = vector.extract_strided_slice %512 {offsets = [0, 16], sizes = [8, 8], strides = [1, 1]} : vector<8x32xbf16> to vector<8x8xbf16>
    %cst_178 = arith.constant dense<0.000000e+00> : vector<8x8xf32>
    %554 = tpu.matmul %552, %553, %cst_178 {dimension_numbers = #tpu.dot_dimension_numbers<[1], [1], [0], [0], [0, 0, 1, 0], [], []>} : vector<8x8xbf16>, vector<8x8xbf16>, vector<8x8xf32> -> vector<8x8xf32>
    %cst_179 = arith.constant 0.353553385 : f32
    %555 = vector.broadcast %cst_179 : f32 to vector<8x8xf32>
    %556 = arith.mulf %554, %555 : vector<8x8xf32>
    %557 = arith.addf %556, %24 : vector<8x8xf32>
    %cst_180 = arith.constant dense<0xFF800000> : vector<8xf32>
    %558 = vector.multi_reduction <maximumf>, %557, %cst_180 [1] : vector<8x8xf32> to vector<8xf32>
    %559 = vector.shape_cast %558 : vector<8xf32> to vector<8x1xf32>
    %560 = vector.broadcast %559 : vector<8x1xf32> to vector<8x8xf32>
    %561 = arith.subf %557, %560 : vector<8x8xf32>
    %562 = math.exp %561 : vector<8x8xf32>
    %cst_181 = arith.constant dense<0.000000e+00> : vector<8xf32>
    %563 = vector.multi_reduction <add>, %562, %cst_181 [1] : vector<8x8xf32> to vector<8xf32>
    %564 = vector.shape_cast %563 : vector<8xf32> to vector<8x1xf32>
    %565 = tpu.reciprocal %564 {approx = true} : vector<8x1xf32> -> vector<8x1xf32>
    %566 = vector.broadcast %565 : vector<8x1xf32> to vector<8x8xf32>
    %567 = arith.mulf %562, %566 : vector<8x8xf32>
    %568 = vector.extract_strided_slice %513 {offsets = [0, 16], sizes = [8, 8], strides = [1, 1]} : vector<8x32xbf16> to vector<8x8xbf16>
    %569 = arith.truncf %567 : vector<8x8xf32> to vector<8x8xbf16>
    %cst_182 = arith.constant dense<0.000000e+00> : vector<8x8xf32>
    %570 = tpu.matmul %569, %568, %cst_182 {dimension_numbers = #tpu.dot_dimension_numbers<[1], [0], [0], [1], [0, 0, 1, 1], [], []>} : vector<8x8xbf16>, vector<8x8xbf16>, vector<8x8xf32> -> vector<8x8xf32>
    %571 = vector.extract_strided_slice %511 {offsets = [0, 24], sizes = [8, 8], strides = [1, 1]} : vector<8x32xbf16> to vector<8x8xbf16>
    %572 = vector.extract_strided_slice %512 {offsets = [0, 24], sizes = [8, 8], strides = [1, 1]} : vector<8x32xbf16> to vector<8x8xbf16>
    %cst_183 = arith.constant dense<0.000000e+00> : vector<8x8xf32>
    %573 = tpu.matmul %571, %572, %cst_183 {dimension_numbers = #tpu.dot_dimension_numbers<[1], [1], [0], [0], [0, 0, 1, 0], [], []>} : vector<8x8xbf16>, vector<8x8xbf16>, vector<8x8xf32> -> vector<8x8xf32>
    %cst_184 = arith.constant 0.353553385 : f32
    %574 = vector.broadcast %cst_184 : f32 to vector<8x8xf32>
    %575 = arith.mulf %573, %574 : vector<8x8xf32>
    %576 = arith.addf %575, %24 : vector<8x8xf32>
    %cst_185 = arith.constant dense<0xFF800000> : vector<8xf32>
    %577 = vector.multi_reduction <maximumf>, %576, %cst_185 [1] : vector<8x8xf32> to vector<8xf32>
    %578 = vector.shape_cast %577 : vector<8xf32> to vector<8x1xf32>
    %579 = vector.broadcast %578 : vector<8x1xf32> to vector<8x8xf32>
    %580 = arith.subf %576, %579 : vector<8x8xf32>
    %581 = math.exp %580 : vector<8x8xf32>
    %cst_186 = arith.constant dense<0.000000e+00> : vector<8xf32>
    %582 = vector.multi_reduction <add>, %581, %cst_186 [1] : vector<8x8xf32> to vector<8xf32>
    %583 = vector.shape_cast %582 : vector<8xf32> to vector<8x1xf32>
    %584 = tpu.reciprocal %583 {approx = true} : vector<8x1xf32> -> vector<8x1xf32>
    %585 = vector.broadcast %584 : vector<8x1xf32> to vector<8x8xf32>
    %586 = arith.mulf %581, %585 : vector<8x8xf32>
    %587 = vector.extract_strided_slice %513 {offsets = [0, 24], sizes = [8, 8], strides = [1, 1]} : vector<8x32xbf16> to vector<8x8xbf16>
    %588 = arith.truncf %586 : vector<8x8xf32> to vector<8x8xbf16>
    %cst_187 = arith.constant dense<0.000000e+00> : vector<8x8xf32>
    %589 = tpu.matmul %588, %587, %cst_187 {dimension_numbers = #tpu.dot_dimension_numbers<[1], [0], [0], [1], [0, 0, 1, 1], [], []>} : vector<8x8xbf16>, vector<8x8xbf16>, vector<8x8xf32> -> vector<8x8xf32>
    %590 = tpu.concatenate %532, %551, %570, %589 in 1 : vector<8x8xf32>, vector<8x8xf32>, vector<8x8xf32>, vector<8x8xf32> -> vector<8x32xf32>
    %591 = vector.extract_strided_slice %508 {offsets = [8, 0], sizes = [8, 32], strides = [1, 1]} : vector<16x32xbf16> to vector<8x32xbf16>
    %592 = vector.extract_strided_slice %509 {offsets = [8, 0], sizes = [8, 32], strides = [1, 1]} : vector<16x32xbf16> to vector<8x32xbf16>
    %593 = vector.extract_strided_slice %510 {offsets = [8, 0], sizes = [8, 32], strides = [1, 1]} : vector<16x32xbf16> to vector<8x32xbf16>
    %594 = vector.extract_strided_slice %591 {offsets = [0, 0], sizes = [8, 8], strides = [1, 1]} : vector<8x32xbf16> to vector<8x8xbf16>
    %595 = vector.extract_strided_slice %592 {offsets = [0, 0], sizes = [8, 8], strides = [1, 1]} : vector<8x32xbf16> to vector<8x8xbf16>
    %cst_188 = arith.constant dense<0.000000e+00> : vector<8x8xf32>
    %596 = tpu.matmul %594, %595, %cst_188 {dimension_numbers = #tpu.dot_dimension_numbers<[1], [1], [0], [0], [0, 0, 1, 0], [], []>} : vector<8x8xbf16>, vector<8x8xbf16>, vector<8x8xf32> -> vector<8x8xf32>
    %cst_189 = arith.constant 0.353553385 : f32
    %597 = vector.broadcast %cst_189 : f32 to vector<8x8xf32>
    %598 = arith.mulf %596, %597 : vector<8x8xf32>
    %599 = arith.addf %598, %46 : vector<8x8xf32>
    %cst_190 = arith.constant dense<0xFF800000> : vector<8xf32>
    %600 = vector.multi_reduction <maximumf>, %599, %cst_190 [1] : vector<8x8xf32> to vector<8xf32>
    %601 = vector.shape_cast %600 : vector<8xf32> to vector<8x1xf32>
    %602 = vector.broadcast %601 : vector<8x1xf32> to vector<8x8xf32>
    %603 = arith.subf %599, %602 : vector<8x8xf32>
    %604 = math.exp %603 : vector<8x8xf32>
    %cst_191 = arith.constant dense<0.000000e+00> : vector<8xf32>
    %605 = vector.multi_reduction <add>, %604, %cst_191 [1] : vector<8x8xf32> to vector<8xf32>
    %606 = vector.shape_cast %605 : vector<8xf32> to vector<8x1xf32>
    %607 = tpu.reciprocal %606 {approx = true} : vector<8x1xf32> -> vector<8x1xf32>
    %608 = vector.broadcast %607 : vector<8x1xf32> to vector<8x8xf32>
    %609 = arith.mulf %604, %608 : vector<8x8xf32>
    %610 = vector.extract_strided_slice %593 {offsets = [0, 0], sizes = [8, 8], strides = [1, 1]} : vector<8x32xbf16> to vector<8x8xbf16>
    %611 = arith.truncf %609 : vector<8x8xf32> to vector<8x8xbf16>
    %cst_192 = arith.constant dense<0.000000e+00> : vector<8x8xf32>
    %612 = tpu.matmul %611, %610, %cst_192 {dimension_numbers = #tpu.dot_dimension_numbers<[1], [0], [0], [1], [0, 0, 1, 1], [], []>} : vector<8x8xbf16>, vector<8x8xbf16>, vector<8x8xf32> -> vector<8x8xf32>
    %613 = vector.extract_strided_slice %591 {offsets = [0, 8], sizes = [8, 8], strides = [1, 1]} : vector<8x32xbf16> to vector<8x8xbf16>
    %614 = vector.extract_strided_slice %592 {offsets = [0, 8], sizes = [8, 8], strides = [1, 1]} : vector<8x32xbf16> to vector<8x8xbf16>
    %cst_193 = arith.constant dense<0.000000e+00> : vector<8x8xf32>
    %615 = tpu.matmul %613, %614, %cst_193 {dimension_numbers = #tpu.dot_dimension_numbers<[1], [1], [0], [0], [0, 0, 1, 0], [], []>} : vector<8x8xbf16>, vector<8x8xbf16>, vector<8x8xf32> -> vector<8x8xf32>
    %cst_194 = arith.constant 0.353553385 : f32
    %616 = vector.broadcast %cst_194 : f32 to vector<8x8xf32>
    %617 = arith.mulf %615, %616 : vector<8x8xf32>
    %618 = arith.addf %617, %46 : vector<8x8xf32>
    %cst_195 = arith.constant dense<0xFF800000> : vector<8xf32>
    %619 = vector.multi_reduction <maximumf>, %618, %cst_195 [1] : vector<8x8xf32> to vector<8xf32>
    %620 = vector.shape_cast %619 : vector<8xf32> to vector<8x1xf32>
    %621 = vector.broadcast %620 : vector<8x1xf32> to vector<8x8xf32>
    %622 = arith.subf %618, %621 : vector<8x8xf32>
    %623 = math.exp %622 : vector<8x8xf32>
    %cst_196 = arith.constant dense<0.000000e+00> : vector<8xf32>
    %624 = vector.multi_reduction <add>, %623, %cst_196 [1] : vector<8x8xf32> to vector<8xf32>
    %625 = vector.shape_cast %624 : vector<8xf32> to vector<8x1xf32>
    %626 = tpu.reciprocal %625 {approx = true} : vector<8x1xf32> -> vector<8x1xf32>
    %627 = vector.broadcast %626 : vector<8x1xf32> to vector<8x8xf32>
    %628 = arith.mulf %623, %627 : vector<8x8xf32>
    %629 = vector.extract_strided_slice %593 {offsets = [0, 8], sizes = [8, 8], strides = [1, 1]} : vector<8x32xbf16> to vector<8x8xbf16>
    %630 = arith.truncf %628 : vector<8x8xf32> to vector<8x8xbf16>
    %cst_197 = arith.constant dense<0.000000e+00> : vector<8x8xf32>
    %631 = tpu.matmul %630, %629, %cst_197 {dimension_numbers = #tpu.dot_dimension_numbers<[1], [0], [0], [1], [0, 0, 1, 1], [], []>} : vector<8x8xbf16>, vector<8x8xbf16>, vector<8x8xf32> -> vector<8x8xf32>
    %632 = vector.extract_strided_slice %591 {offsets = [0, 16], sizes = [8, 8], strides = [1, 1]} : vector<8x32xbf16> to vector<8x8xbf16>
    %633 = vector.extract_strided_slice %592 {offsets = [0, 16], sizes = [8, 8], strides = [1, 1]} : vector<8x32xbf16> to vector<8x8xbf16>
    %cst_198 = arith.constant dense<0.000000e+00> : vector<8x8xf32>
    %634 = tpu.matmul %632, %633, %cst_198 {dimension_numbers = #tpu.dot_dimension_numbers<[1], [1], [0], [0], [0, 0, 1, 0], [], []>} : vector<8x8xbf16>, vector<8x8xbf16>, vector<8x8xf32> -> vector<8x8xf32>
    %cst_199 = arith.constant 0.353553385 : f32
    %635 = vector.broadcast %cst_199 : f32 to vector<8x8xf32>
    %636 = arith.mulf %634, %635 : vector<8x8xf32>
    %637 = arith.addf %636, %46 : vector<8x8xf32>
    %cst_200 = arith.constant dense<0xFF800000> : vector<8xf32>
    %638 = vector.multi_reduction <maximumf>, %637, %cst_200 [1] : vector<8x8xf32> to vector<8xf32>
    %639 = vector.shape_cast %638 : vector<8xf32> to vector<8x1xf32>
    %640 = vector.broadcast %639 : vector<8x1xf32> to vector<8x8xf32>
    %641 = arith.subf %637, %640 : vector<8x8xf32>
    %642 = math.exp %641 : vector<8x8xf32>
    %cst_201 = arith.constant dense<0.000000e+00> : vector<8xf32>
    %643 = vector.multi_reduction <add>, %642, %cst_201 [1] : vector<8x8xf32> to vector<8xf32>
    %644 = vector.shape_cast %643 : vector<8xf32> to vector<8x1xf32>
    %645 = tpu.reciprocal %644 {approx = true} : vector<8x1xf32> -> vector<8x1xf32>
    %646 = vector.broadcast %645 : vector<8x1xf32> to vector<8x8xf32>
    %647 = arith.mulf %642, %646 : vector<8x8xf32>
    %648 = vector.extract_strided_slice %593 {offsets = [0, 16], sizes = [8, 8], strides = [1, 1]} : vector<8x32xbf16> to vector<8x8xbf16>
    %649 = arith.truncf %647 : vector<8x8xf32> to vector<8x8xbf16>
    %cst_202 = arith.constant dense<0.000000e+00> : vector<8x8xf32>
    %650 = tpu.matmul %649, %648, %cst_202 {dimension_numbers = #tpu.dot_dimension_numbers<[1], [0], [0], [1], [0, 0, 1, 1], [], []>} : vector<8x8xbf16>, vector<8x8xbf16>, vector<8x8xf32> -> vector<8x8xf32>
    %651 = vector.extract_strided_slice %591 {offsets = [0, 24], sizes = [8, 8], strides = [1, 1]} : vector<8x32xbf16> to vector<8x8xbf16>
    %652 = vector.extract_strided_slice %592 {offsets = [0, 24], sizes = [8, 8], strides = [1, 1]} : vector<8x32xbf16> to vector<8x8xbf16>
    %cst_203 = arith.constant dense<0.000000e+00> : vector<8x8xf32>
    %653 = tpu.matmul %651, %652, %cst_203 {dimension_numbers = #tpu.dot_dimension_numbers<[1], [1], [0], [0], [0, 0, 1, 0], [], []>} : vector<8x8xbf16>, vector<8x8xbf16>, vector<8x8xf32> -> vector<8x8xf32>
    %cst_204 = arith.constant 0.353553385 : f32
    %654 = vector.broadcast %cst_204 : f32 to vector<8x8xf32>
    %655 = arith.mulf %653, %654 : vector<8x8xf32>
    %656 = arith.addf %655, %46 : vector<8x8xf32>
    %cst_205 = arith.constant dense<0xFF800000> : vector<8xf32>
    %657 = vector.multi_reduction <maximumf>, %656, %cst_205 [1] : vector<8x8xf32> to vector<8xf32>
    %658 = vector.shape_cast %657 : vector<8xf32> to vector<8x1xf32>
    %659 = vector.broadcast %658 : vector<8x1xf32> to vector<8x8xf32>
    %660 = arith.subf %656, %659 : vector<8x8xf32>
    %661 = math.exp %660 : vector<8x8xf32>
    %cst_206 = arith.constant dense<0.000000e+00> : vector<8xf32>
    %662 = vector.multi_reduction <add>, %661, %cst_206 [1] : vector<8x8xf32> to vector<8xf32>
    %663 = vector.shape_cast %662 : vector<8xf32> to vector<8x1xf32>
    %664 = tpu.reciprocal %663 {approx = true} : vector<8x1xf32> -> vector<8x1xf32>
    %665 = vector.broadcast %664 : vector<8x1xf32> to vector<8x8xf32>
    %666 = arith.mulf %661, %665 : vector<8x8xf32>
    %667 = vector.extract_strided_slice %593 {offsets = [0, 24], sizes = [8, 8], strides = [1, 1]} : vector<8x32xbf16> to vector<8x8xbf16>
    %668 = arith.truncf %666 : vector<8x8xf32> to vector<8x8xbf16>
    %cst_207 = arith.constant dense<0.000000e+00> : vector<8x8xf32>
    %669 = tpu.matmul %668, %667, %cst_207 {dimension_numbers = #tpu.dot_dimension_numbers<[1], [0], [0], [1], [0, 0, 1, 1], [], []>} : vector<8x8xbf16>, vector<8x8xbf16>, vector<8x8xf32> -> vector<8x8xf32>
    %670 = tpu.concatenate %612, %631, %650, %669 in 1 : vector<8x8xf32>, vector<8x8xf32>, vector<8x8xf32>, vector<8x8xf32> -> vector<8x32xf32>
    %671 = tpu.concatenate %590, %670 in 0 : vector<8x32xf32>, vector<8x32xf32> -> vector<16x32xf32>
    %672 = arith.truncf %671 : vector<16x32xf32> to vector<16x32xbf16>
    %cst_208 = arith.constant dense<0.000000e+00> : vector<16x32xf32>
    %673 = tpu.matmul %672, %494, %cst_208 {dimension_numbers = #tpu.dot_dimension_numbers<[1], [0], [0], [1], [0, 0, 1, 1], [], []>} : vector<16x32xbf16>, vector<32x32xbf16>, vector<16x32xf32> -> vector<16x32xf32>
    %674 = arith.addf %50, %673 : vector<16x32xf32>
    %675 = vector.broadcast %496 : vector<1x32xf32> to vector<16x32xf32>
    %676 = arith.addf %674, %675 : vector<16x32xf32>
    %cst_209 = arith.constant dense<0.000000e+00> : vector<16xf32>
    %677 = vector.multi_reduction <add>, %676, %cst_209 [1] : vector<16x32xf32> to vector<16xf32>
    %678 = vector.shape_cast %677 : vector<16xf32> to vector<16x1xf32>
    %cst_210 = arith.constant 3.200000e+01 : f32
    %679 = vector.broadcast %cst_210 : f32 to vector<16x1xf32>
    %680 = arith.divf %678, %679 : vector<16x1xf32>
    %681 = vector.broadcast %680 : vector<16x1xf32> to vector<16x32xf32>
    %682 = arith.subf %676, %681 : vector<16x32xf32>
    %683 = arith.mulf %682, %682 : vector<16x32xf32>
    %cst_211 = arith.constant dense<0.000000e+00> : vector<16xf32>
    %684 = vector.multi_reduction <add>, %683, %cst_211 [1] : vector<16x32xf32> to vector<16xf32>
    %685 = vector.shape_cast %684 : vector<16xf32> to vector<16x1xf32>
    %cst_212 = arith.constant 3.100000e+01 : f32
    %686 = vector.broadcast %cst_212 : f32 to vector<16x1xf32>
    %687 = arith.divf %685, %686 : vector<16x1xf32>
    %688 = math.sqrt %687 : vector<16x1xf32>
    %cst_213 = arith.constant 9.99999997E-7 : f32
    %689 = vector.broadcast %cst_213 : f32 to vector<16x1xf32>
    %690 = arith.addf %688, %689 : vector<16x1xf32>
    %691 = tpu.reciprocal %690 {approx = true} : vector<16x1xf32> -> vector<16x1xf32>
    %692 = vector.broadcast %680 : vector<16x1xf32> to vector<16x32xf32>
    %693 = arith.subf %676, %692 : vector<16x32xf32>
    %694 = vector.broadcast %498 : vector<1x32xf32> to vector<16x32xf32>
    %695 = arith.mulf %694, %693 : vector<16x32xf32>
    %696 = vector.broadcast %691 : vector<16x1xf32> to vector<16x32xf32>
    %697 = arith.mulf %695, %696 : vector<16x32xf32>
    %698 = vector.broadcast %500 : vector<1x32xf32> to vector<16x32xf32>
    %699 = arith.addf %697, %698 : vector<16x32xf32>
    %c0_214 = arith.constant 0 : index
    %c0_215 = arith.constant 0 : index
    %c0_216 = arith.constant 0 : index
    %700 = vector.load %arg17[%c0_214, %c0_215, %c0_216] : memref<2x32x96xbf16, #tpu.memory_space<vmem>>, vector<1x32x96xbf16>
    %701 = vector.shape_cast %700 : vector<1x32x96xbf16> to vector<32x96xbf16>
    %c0_217 = arith.constant 0 : index
    %c0_218 = arith.constant 0 : index
    %c0_219 = arith.constant 0 : index
    %702 = vector.load %arg18[%c0_217, %c0_218, %c0_219] : memref<2x1x96xf32, #tpu.memory_space<vmem>>, vector<1x1x96xf32>
    %703 = vector.shape_cast %702 : vector<1x1x96xf32> to vector<1x96xf32>
    %c0_220 = arith.constant 0 : index
    %c0_221 = arith.constant 0 : index
    %c0_222 = arith.constant 0 : index
    %704 = vector.load %arg19[%c0_220, %c0_221, %c0_222] : memref<2x32x32xbf16, #tpu.memory_space<vmem>>, vector<1x32x32xbf16>
    %705 = vector.shape_cast %704 : vector<1x32x32xbf16> to vector<32x32xbf16>
    %c0_223 = arith.constant 0 : index
    %c0_224 = arith.constant 0 : index
    %c0_225 = arith.constant 0 : index
    %706 = vector.load %arg20[%c0_223, %c0_224, %c0_225] : memref<2x1x32xf32, #tpu.memory_space<vmem>>, vector<1x1x32xf32>
    %707 = vector.shape_cast %706 : vector<1x1x32xf32> to vector<1x32xf32>
    %c0_226 = arith.constant 0 : index
    %c0_227 = arith.constant 0 : index
    %c0_228 = arith.constant 0 : index
    %708 = vector.load %arg21[%c0_226, %c0_227, %c0_228] : memref<2x1x32xf32, #tpu.memory_space<vmem>>, vector<1x1x32xf32>
    %709 = vector.shape_cast %708 : vector<1x1x32xf32> to vector<1x32xf32>
    %c0_229 = arith.constant 0 : index
    %c0_230 = arith.constant 0 : index
    %c0_231 = arith.constant 0 : index
    %710 = vector.load %arg22[%c0_229, %c0_230, %c0_231] : memref<2x1x32xf32, #tpu.memory_space<vmem>>, vector<1x1x32xf32>
    %711 = vector.shape_cast %710 : vector<1x1x32xf32> to vector<1x32xf32>
    %712 = vector.extract_strided_slice %701 {offsets = [0, 0], sizes = [32, 32], strides = [1, 1]} : vector<32x96xbf16> to vector<32x32xbf16>
    %713 = arith.truncf %699 : vector<16x32xf32> to vector<16x32xbf16>
    %cst_232 = arith.constant dense<0.000000e+00> : vector<16x32xf32>
    %714 = tpu.matmul %713, %712, %cst_232 {dimension_numbers = #tpu.dot_dimension_numbers<[1], [0], [0], [1], [0, 0, 1, 1], [], []>} : vector<16x32xbf16>, vector<32x32xbf16>, vector<16x32xf32> -> vector<16x32xf32>
    %715 = vector.extract_strided_slice %703 {offsets = [0, 0], sizes = [1, 32], strides = [1, 1]} : vector<1x96xf32> to vector<1x32xf32>
    %716 = vector.broadcast %715 : vector<1x32xf32> to vector<16x32xf32>
    %717 = arith.addf %714, %716 : vector<16x32xf32>
    %718 = vector.extract_strided_slice %701 {offsets = [0, 32], sizes = [32, 64], strides = [1, 1]} : vector<32x96xbf16> to vector<32x64xbf16>
    %719 = arith.truncf %488 : vector<16x32xf32> to vector<16x32xbf16>
    %cst_233 = arith.constant dense<0.000000e+00> : vector<16x64xf32>
    %720 = tpu.matmul %719, %718, %cst_233 {dimension_numbers = #tpu.dot_dimension_numbers<[1], [0], [0], [1], [0, 0, 1, 1], [], []>} : vector<16x32xbf16>, vector<32x64xbf16>, vector<16x64xf32> -> vector<16x64xf32>
    %721 = vector.extract_strided_slice %703 {offsets = [0, 32], sizes = [1, 64], strides = [1, 1]} : vector<1x96xf32> to vector<1x64xf32>
    %722 = vector.broadcast %721 : vector<1x64xf32> to vector<16x64xf32>
    %723 = arith.addf %720, %722 : vector<16x64xf32>
    %724 = vector.extract_strided_slice %723 {offsets = [0, 0], sizes = [16, 32], strides = [1, 1]} : vector<16x64xf32> to vector<16x32xf32>
    %725 = vector.extract_strided_slice %723 {offsets = [0, 32], sizes = [16, 32], strides = [1, 1]} : vector<16x64xf32> to vector<16x32xf32>
    %726 = arith.truncf %717 : vector<16x32xf32> to vector<16x32xbf16>
    %727 = arith.truncf %724 : vector<16x32xf32> to vector<16x32xbf16>
    %728 = arith.truncf %725 : vector<16x32xf32> to vector<16x32xbf16>
    %729 = vector.extract_strided_slice %726 {offsets = [0, 0], sizes = [8, 32], strides = [1, 1]} : vector<16x32xbf16> to vector<8x32xbf16>
    %730 = vector.extract_strided_slice %727 {offsets = [0, 0], sizes = [8, 32], strides = [1, 1]} : vector<16x32xbf16> to vector<8x32xbf16>
    %731 = vector.extract_strided_slice %728 {offsets = [0, 0], sizes = [8, 32], strides = [1, 1]} : vector<16x32xbf16> to vector<8x32xbf16>
    %732 = vector.extract_strided_slice %729 {offsets = [0, 0], sizes = [8, 8], strides = [1, 1]} : vector<8x32xbf16> to vector<8x8xbf16>
    %733 = vector.extract_strided_slice %730 {offsets = [0, 0], sizes = [8, 8], strides = [1, 1]} : vector<8x32xbf16> to vector<8x8xbf16>
    %cst_234 = arith.constant dense<0.000000e+00> : vector<8x8xf32>
    %734 = tpu.matmul %732, %733, %cst_234 {dimension_numbers = #tpu.dot_dimension_numbers<[1], [1], [0], [0], [0, 0, 1, 0], [], []>} : vector<8x8xbf16>, vector<8x8xbf16>, vector<8x8xf32> -> vector<8x8xf32>
    %cst_235 = arith.constant 0.353553385 : f32
    %735 = vector.broadcast %cst_235 : f32 to vector<8x8xf32>
    %736 = arith.mulf %734, %735 : vector<8x8xf32>
    %737 = vector.broadcast %16 : vector<1x8xf32> to vector<8x8xf32>
    %738 = arith.addf %736, %737 : vector<8x8xf32>
    %cst_236 = arith.constant dense<0xFF800000> : vector<8xf32>
    %739 = vector.multi_reduction <maximumf>, %738, %cst_236 [1] : vector<8x8xf32> to vector<8xf32>
    %740 = vector.shape_cast %739 : vector<8xf32> to vector<8x1xf32>
    %741 = vector.broadcast %740 : vector<8x1xf32> to vector<8x8xf32>
    %742 = arith.subf %738, %741 : vector<8x8xf32>
    %743 = math.exp %742 : vector<8x8xf32>
    %cst_237 = arith.constant dense<0.000000e+00> : vector<8xf32>
    %744 = vector.multi_reduction <add>, %743, %cst_237 [1] : vector<8x8xf32> to vector<8xf32>
    %745 = vector.shape_cast %744 : vector<8xf32> to vector<8x1xf32>
    %746 = tpu.reciprocal %745 {approx = true} : vector<8x1xf32> -> vector<8x1xf32>
    %747 = vector.broadcast %746 : vector<8x1xf32> to vector<8x8xf32>
    %748 = arith.mulf %743, %747 : vector<8x8xf32>
    %749 = vector.extract_strided_slice %731 {offsets = [0, 0], sizes = [8, 8], strides = [1, 1]} : vector<8x32xbf16> to vector<8x8xbf16>
    %750 = arith.truncf %748 : vector<8x8xf32> to vector<8x8xbf16>
    %cst_238 = arith.constant dense<0.000000e+00> : vector<8x8xf32>
    %751 = tpu.matmul %750, %749, %cst_238 {dimension_numbers = #tpu.dot_dimension_numbers<[1], [0], [0], [1], [0, 0, 1, 1], [], []>} : vector<8x8xbf16>, vector<8x8xbf16>, vector<8x8xf32> -> vector<8x8xf32>
    %752 = vector.extract_strided_slice %729 {offsets = [0, 8], sizes = [8, 8], strides = [1, 1]} : vector<8x32xbf16> to vector<8x8xbf16>
    %753 = vector.extract_strided_slice %730 {offsets = [0, 8], sizes = [8, 8], strides = [1, 1]} : vector<8x32xbf16> to vector<8x8xbf16>
    %cst_239 = arith.constant dense<0.000000e+00> : vector<8x8xf32>
    %754 = tpu.matmul %752, %753, %cst_239 {dimension_numbers = #tpu.dot_dimension_numbers<[1], [1], [0], [0], [0, 0, 1, 0], [], []>} : vector<8x8xbf16>, vector<8x8xbf16>, vector<8x8xf32> -> vector<8x8xf32>
    %cst_240 = arith.constant 0.353553385 : f32
    %755 = vector.broadcast %cst_240 : f32 to vector<8x8xf32>
    %756 = arith.mulf %754, %755 : vector<8x8xf32>
    %757 = vector.broadcast %16 : vector<1x8xf32> to vector<8x8xf32>
    %758 = arith.addf %756, %757 : vector<8x8xf32>
    %cst_241 = arith.constant dense<0xFF800000> : vector<8xf32>
    %759 = vector.multi_reduction <maximumf>, %758, %cst_241 [1] : vector<8x8xf32> to vector<8xf32>
    %760 = vector.shape_cast %759 : vector<8xf32> to vector<8x1xf32>
    %761 = vector.broadcast %760 : vector<8x1xf32> to vector<8x8xf32>
    %762 = arith.subf %758, %761 : vector<8x8xf32>
    %763 = math.exp %762 : vector<8x8xf32>
    %cst_242 = arith.constant dense<0.000000e+00> : vector<8xf32>
    %764 = vector.multi_reduction <add>, %763, %cst_242 [1] : vector<8x8xf32> to vector<8xf32>
    %765 = vector.shape_cast %764 : vector<8xf32> to vector<8x1xf32>
    %766 = tpu.reciprocal %765 {approx = true} : vector<8x1xf32> -> vector<8x1xf32>
    %767 = vector.broadcast %766 : vector<8x1xf32> to vector<8x8xf32>
    %768 = arith.mulf %763, %767 : vector<8x8xf32>
    %769 = vector.extract_strided_slice %731 {offsets = [0, 8], sizes = [8, 8], strides = [1, 1]} : vector<8x32xbf16> to vector<8x8xbf16>
    %770 = arith.truncf %768 : vector<8x8xf32> to vector<8x8xbf16>
    %cst_243 = arith.constant dense<0.000000e+00> : vector<8x8xf32>
    %771 = tpu.matmul %770, %769, %cst_243 {dimension_numbers = #tpu.dot_dimension_numbers<[1], [0], [0], [1], [0, 0, 1, 1], [], []>} : vector<8x8xbf16>, vector<8x8xbf16>, vector<8x8xf32> -> vector<8x8xf32>
    %772 = vector.extract_strided_slice %729 {offsets = [0, 16], sizes = [8, 8], strides = [1, 1]} : vector<8x32xbf16> to vector<8x8xbf16>
    %773 = vector.extract_strided_slice %730 {offsets = [0, 16], sizes = [8, 8], strides = [1, 1]} : vector<8x32xbf16> to vector<8x8xbf16>
    %cst_244 = arith.constant dense<0.000000e+00> : vector<8x8xf32>
    %774 = tpu.matmul %772, %773, %cst_244 {dimension_numbers = #tpu.dot_dimension_numbers<[1], [1], [0], [0], [0, 0, 1, 0], [], []>} : vector<8x8xbf16>, vector<8x8xbf16>, vector<8x8xf32> -> vector<8x8xf32>
    %cst_245 = arith.constant 0.353553385 : f32
    %775 = vector.broadcast %cst_245 : f32 to vector<8x8xf32>
    %776 = arith.mulf %774, %775 : vector<8x8xf32>
    %777 = vector.broadcast %16 : vector<1x8xf32> to vector<8x8xf32>
    %778 = arith.addf %776, %777 : vector<8x8xf32>
    %cst_246 = arith.constant dense<0xFF800000> : vector<8xf32>
    %779 = vector.multi_reduction <maximumf>, %778, %cst_246 [1] : vector<8x8xf32> to vector<8xf32>
    %780 = vector.shape_cast %779 : vector<8xf32> to vector<8x1xf32>
    %781 = vector.broadcast %780 : vector<8x1xf32> to vector<8x8xf32>
    %782 = arith.subf %778, %781 : vector<8x8xf32>
    %783 = math.exp %782 : vector<8x8xf32>
    %cst_247 = arith.constant dense<0.000000e+00> : vector<8xf32>
    %784 = vector.multi_reduction <add>, %783, %cst_247 [1] : vector<8x8xf32> to vector<8xf32>
    %785 = vector.shape_cast %784 : vector<8xf32> to vector<8x1xf32>
    %786 = tpu.reciprocal %785 {approx = true} : vector<8x1xf32> -> vector<8x1xf32>
    %787 = vector.broadcast %786 : vector<8x1xf32> to vector<8x8xf32>
    %788 = arith.mulf %783, %787 : vector<8x8xf32>
    %789 = vector.extract_strided_slice %731 {offsets = [0, 16], sizes = [8, 8], strides = [1, 1]} : vector<8x32xbf16> to vector<8x8xbf16>
    %790 = arith.truncf %788 : vector<8x8xf32> to vector<8x8xbf16>
    %cst_248 = arith.constant dense<0.000000e+00> : vector<8x8xf32>
    %791 = tpu.matmul %790, %789, %cst_248 {dimension_numbers = #tpu.dot_dimension_numbers<[1], [0], [0], [1], [0, 0, 1, 1], [], []>} : vector<8x8xbf16>, vector<8x8xbf16>, vector<8x8xf32> -> vector<8x8xf32>
    %792 = vector.extract_strided_slice %729 {offsets = [0, 24], sizes = [8, 8], strides = [1, 1]} : vector<8x32xbf16> to vector<8x8xbf16>
    %793 = vector.extract_strided_slice %730 {offsets = [0, 24], sizes = [8, 8], strides = [1, 1]} : vector<8x32xbf16> to vector<8x8xbf16>
    %cst_249 = arith.constant dense<0.000000e+00> : vector<8x8xf32>
    %794 = tpu.matmul %792, %793, %cst_249 {dimension_numbers = #tpu.dot_dimension_numbers<[1], [1], [0], [0], [0, 0, 1, 0], [], []>} : vector<8x8xbf16>, vector<8x8xbf16>, vector<8x8xf32> -> vector<8x8xf32>
    %cst_250 = arith.constant 0.353553385 : f32
    %795 = vector.broadcast %cst_250 : f32 to vector<8x8xf32>
    %796 = arith.mulf %794, %795 : vector<8x8xf32>
    %797 = vector.broadcast %16 : vector<1x8xf32> to vector<8x8xf32>
    %798 = arith.addf %796, %797 : vector<8x8xf32>
    %cst_251 = arith.constant dense<0xFF800000> : vector<8xf32>
    %799 = vector.multi_reduction <maximumf>, %798, %cst_251 [1] : vector<8x8xf32> to vector<8xf32>
    %800 = vector.shape_cast %799 : vector<8xf32> to vector<8x1xf32>
    %801 = vector.broadcast %800 : vector<8x1xf32> to vector<8x8xf32>
    %802 = arith.subf %798, %801 : vector<8x8xf32>
    %803 = math.exp %802 : vector<8x8xf32>
    %cst_252 = arith.constant dense<0.000000e+00> : vector<8xf32>
    %804 = vector.multi_reduction <add>, %803, %cst_252 [1] : vector<8x8xf32> to vector<8xf32>
    %805 = vector.shape_cast %804 : vector<8xf32> to vector<8x1xf32>
    %806 = tpu.reciprocal %805 {approx = true} : vector<8x1xf32> -> vector<8x1xf32>
    %807 = vector.broadcast %806 : vector<8x1xf32> to vector<8x8xf32>
    %808 = arith.mulf %803, %807 : vector<8x8xf32>
    %809 = vector.extract_strided_slice %731 {offsets = [0, 24], sizes = [8, 8], strides = [1, 1]} : vector<8x32xbf16> to vector<8x8xbf16>
    %810 = arith.truncf %808 : vector<8x8xf32> to vector<8x8xbf16>
    %cst_253 = arith.constant dense<0.000000e+00> : vector<8x8xf32>
    %811 = tpu.matmul %810, %809, %cst_253 {dimension_numbers = #tpu.dot_dimension_numbers<[1], [0], [0], [1], [0, 0, 1, 1], [], []>} : vector<8x8xbf16>, vector<8x8xbf16>, vector<8x8xf32> -> vector<8x8xf32>
    %812 = tpu.concatenate %751, %771, %791, %811 in 1 : vector<8x8xf32>, vector<8x8xf32>, vector<8x8xf32>, vector<8x8xf32> -> vector<8x32xf32>
    %813 = vector.extract_strided_slice %726 {offsets = [8, 0], sizes = [8, 32], strides = [1, 1]} : vector<16x32xbf16> to vector<8x32xbf16>
    %814 = vector.extract_strided_slice %727 {offsets = [8, 0], sizes = [8, 32], strides = [1, 1]} : vector<16x32xbf16> to vector<8x32xbf16>
    %815 = vector.extract_strided_slice %728 {offsets = [8, 0], sizes = [8, 32], strides = [1, 1]} : vector<16x32xbf16> to vector<8x32xbf16>
    %816 = vector.extract_strided_slice %813 {offsets = [0, 0], sizes = [8, 8], strides = [1, 1]} : vector<8x32xbf16> to vector<8x8xbf16>
    %817 = vector.extract_strided_slice %814 {offsets = [0, 0], sizes = [8, 8], strides = [1, 1]} : vector<8x32xbf16> to vector<8x8xbf16>
    %cst_254 = arith.constant dense<0.000000e+00> : vector<8x8xf32>
    %818 = tpu.matmul %816, %817, %cst_254 {dimension_numbers = #tpu.dot_dimension_numbers<[1], [1], [0], [0], [0, 0, 1, 0], [], []>} : vector<8x8xbf16>, vector<8x8xbf16>, vector<8x8xf32> -> vector<8x8xf32>
    %cst_255 = arith.constant 0.353553385 : f32
    %819 = vector.broadcast %cst_255 : f32 to vector<8x8xf32>
    %820 = arith.mulf %818, %819 : vector<8x8xf32>
    %821 = vector.broadcast %38 : vector<1x8xf32> to vector<8x8xf32>
    %822 = arith.addf %820, %821 : vector<8x8xf32>
    %cst_256 = arith.constant dense<0xFF800000> : vector<8xf32>
    %823 = vector.multi_reduction <maximumf>, %822, %cst_256 [1] : vector<8x8xf32> to vector<8xf32>
    %824 = vector.shape_cast %823 : vector<8xf32> to vector<8x1xf32>
    %825 = vector.broadcast %824 : vector<8x1xf32> to vector<8x8xf32>
    %826 = arith.subf %822, %825 : vector<8x8xf32>
    %827 = math.exp %826 : vector<8x8xf32>
    %cst_257 = arith.constant dense<0.000000e+00> : vector<8xf32>
    %828 = vector.multi_reduction <add>, %827, %cst_257 [1] : vector<8x8xf32> to vector<8xf32>
    %829 = vector.shape_cast %828 : vector<8xf32> to vector<8x1xf32>
    %830 = tpu.reciprocal %829 {approx = true} : vector<8x1xf32> -> vector<8x1xf32>
    %831 = vector.broadcast %830 : vector<8x1xf32> to vector<8x8xf32>
    %832 = arith.mulf %827, %831 : vector<8x8xf32>
    %833 = vector.extract_strided_slice %815 {offsets = [0, 0], sizes = [8, 8], strides = [1, 1]} : vector<8x32xbf16> to vector<8x8xbf16>
    %834 = arith.truncf %832 : vector<8x8xf32> to vector<8x8xbf16>
    %cst_258 = arith.constant dense<0.000000e+00> : vector<8x8xf32>
    %835 = tpu.matmul %834, %833, %cst_258 {dimension_numbers = #tpu.dot_dimension_numbers<[1], [0], [0], [1], [0, 0, 1, 1], [], []>} : vector<8x8xbf16>, vector<8x8xbf16>, vector<8x8xf32> -> vector<8x8xf32>
    %836 = vector.extract_strided_slice %813 {offsets = [0, 8], sizes = [8, 8], strides = [1, 1]} : vector<8x32xbf16> to vector<8x8xbf16>
    %837 = vector.extract_strided_slice %814 {offsets = [0, 8], sizes = [8, 8], strides = [1, 1]} : vector<8x32xbf16> to vector<8x8xbf16>
    %cst_259 = arith.constant dense<0.000000e+00> : vector<8x8xf32>
    %838 = tpu.matmul %836, %837, %cst_259 {dimension_numbers = #tpu.dot_dimension_numbers<[1], [1], [0], [0], [0, 0, 1, 0], [], []>} : vector<8x8xbf16>, vector<8x8xbf16>, vector<8x8xf32> -> vector<8x8xf32>
    %cst_260 = arith.constant 0.353553385 : f32
    %839 = vector.broadcast %cst_260 : f32 to vector<8x8xf32>
    %840 = arith.mulf %838, %839 : vector<8x8xf32>
    %841 = vector.broadcast %38 : vector<1x8xf32> to vector<8x8xf32>
    %842 = arith.addf %840, %841 : vector<8x8xf32>
    %cst_261 = arith.constant dense<0xFF800000> : vector<8xf32>
    %843 = vector.multi_reduction <maximumf>, %842, %cst_261 [1] : vector<8x8xf32> to vector<8xf32>
    %844 = vector.shape_cast %843 : vector<8xf32> to vector<8x1xf32>
    %845 = vector.broadcast %844 : vector<8x1xf32> to vector<8x8xf32>
    %846 = arith.subf %842, %845 : vector<8x8xf32>
    %847 = math.exp %846 : vector<8x8xf32>
    %cst_262 = arith.constant dense<0.000000e+00> : vector<8xf32>
    %848 = vector.multi_reduction <add>, %847, %cst_262 [1] : vector<8x8xf32> to vector<8xf32>
    %849 = vector.shape_cast %848 : vector<8xf32> to vector<8x1xf32>
    %850 = tpu.reciprocal %849 {approx = true} : vector<8x1xf32> -> vector<8x1xf32>
    %851 = vector.broadcast %850 : vector<8x1xf32> to vector<8x8xf32>
    %852 = arith.mulf %847, %851 : vector<8x8xf32>
    %853 = vector.extract_strided_slice %815 {offsets = [0, 8], sizes = [8, 8], strides = [1, 1]} : vector<8x32xbf16> to vector<8x8xbf16>
    %854 = arith.truncf %852 : vector<8x8xf32> to vector<8x8xbf16>
    %cst_263 = arith.constant dense<0.000000e+00> : vector<8x8xf32>
    %855 = tpu.matmul %854, %853, %cst_263 {dimension_numbers = #tpu.dot_dimension_numbers<[1], [0], [0], [1], [0, 0, 1, 1], [], []>} : vector<8x8xbf16>, vector<8x8xbf16>, vector<8x8xf32> -> vector<8x8xf32>
    %856 = vector.extract_strided_slice %813 {offsets = [0, 16], sizes = [8, 8], strides = [1, 1]} : vector<8x32xbf16> to vector<8x8xbf16>
    %857 = vector.extract_strided_slice %814 {offsets = [0, 16], sizes = [8, 8], strides = [1, 1]} : vector<8x32xbf16> to vector<8x8xbf16>
    %cst_264 = arith.constant dense<0.000000e+00> : vector<8x8xf32>
    %858 = tpu.matmul %856, %857, %cst_264 {dimension_numbers = #tpu.dot_dimension_numbers<[1], [1], [0], [0], [0, 0, 1, 0], [], []>} : vector<8x8xbf16>, vector<8x8xbf16>, vector<8x8xf32> -> vector<8x8xf32>
    %cst_265 = arith.constant 0.353553385 : f32
    %859 = vector.broadcast %cst_265 : f32 to vector<8x8xf32>
    %860 = arith.mulf %858, %859 : vector<8x8xf32>
    %861 = vector.broadcast %38 : vector<1x8xf32> to vector<8x8xf32>
    %862 = arith.addf %860, %861 : vector<8x8xf32>
    %cst_266 = arith.constant dense<0xFF800000> : vector<8xf32>
    %863 = vector.multi_reduction <maximumf>, %862, %cst_266 [1] : vector<8x8xf32> to vector<8xf32>
    %864 = vector.shape_cast %863 : vector<8xf32> to vector<8x1xf32>
    %865 = vector.broadcast %864 : vector<8x1xf32> to vector<8x8xf32>
    %866 = arith.subf %862, %865 : vector<8x8xf32>
    %867 = math.exp %866 : vector<8x8xf32>
    %cst_267 = arith.constant dense<0.000000e+00> : vector<8xf32>
    %868 = vector.multi_reduction <add>, %867, %cst_267 [1] : vector<8x8xf32> to vector<8xf32>
    %869 = vector.shape_cast %868 : vector<8xf32> to vector<8x1xf32>
    %870 = tpu.reciprocal %869 {approx = true} : vector<8x1xf32> -> vector<8x1xf32>
    %871 = vector.broadcast %870 : vector<8x1xf32> to vector<8x8xf32>
    %872 = arith.mulf %867, %871 : vector<8x8xf32>
    %873 = vector.extract_strided_slice %815 {offsets = [0, 16], sizes = [8, 8], strides = [1, 1]} : vector<8x32xbf16> to vector<8x8xbf16>
    %874 = arith.truncf %872 : vector<8x8xf32> to vector<8x8xbf16>
    %cst_268 = arith.constant dense<0.000000e+00> : vector<8x8xf32>
    %875 = tpu.matmul %874, %873, %cst_268 {dimension_numbers = #tpu.dot_dimension_numbers<[1], [0], [0], [1], [0, 0, 1, 1], [], []>} : vector<8x8xbf16>, vector<8x8xbf16>, vector<8x8xf32> -> vector<8x8xf32>
    %876 = vector.extract_strided_slice %813 {offsets = [0, 24], sizes = [8, 8], strides = [1, 1]} : vector<8x32xbf16> to vector<8x8xbf16>
    %877 = vector.extract_strided_slice %814 {offsets = [0, 24], sizes = [8, 8], strides = [1, 1]} : vector<8x32xbf16> to vector<8x8xbf16>
    %cst_269 = arith.constant dense<0.000000e+00> : vector<8x8xf32>
    %878 = tpu.matmul %876, %877, %cst_269 {dimension_numbers = #tpu.dot_dimension_numbers<[1], [1], [0], [0], [0, 0, 1, 0], [], []>} : vector<8x8xbf16>, vector<8x8xbf16>, vector<8x8xf32> -> vector<8x8xf32>
    %cst_270 = arith.constant 0.353553385 : f32
    %879 = vector.broadcast %cst_270 : f32 to vector<8x8xf32>
    %880 = arith.mulf %878, %879 : vector<8x8xf32>
    %881 = vector.broadcast %38 : vector<1x8xf32> to vector<8x8xf32>
    %882 = arith.addf %880, %881 : vector<8x8xf32>
    %cst_271 = arith.constant dense<0xFF800000> : vector<8xf32>
    %883 = vector.multi_reduction <maximumf>, %882, %cst_271 [1] : vector<8x8xf32> to vector<8xf32>
    %884 = vector.shape_cast %883 : vector<8xf32> to vector<8x1xf32>
    %885 = vector.broadcast %884 : vector<8x1xf32> to vector<8x8xf32>
    %886 = arith.subf %882, %885 : vector<8x8xf32>
    %887 = math.exp %886 : vector<8x8xf32>
    %cst_272 = arith.constant dense<0.000000e+00> : vector<8xf32>
    %888 = vector.multi_reduction <add>, %887, %cst_272 [1] : vector<8x8xf32> to vector<8xf32>
    %889 = vector.shape_cast %888 : vector<8xf32> to vector<8x1xf32>
    %890 = tpu.reciprocal %889 {approx = true} : vector<8x1xf32> -> vector<8x1xf32>
    %891 = vector.broadcast %890 : vector<8x1xf32> to vector<8x8xf32>
    %892 = arith.mulf %887, %891 : vector<8x8xf32>
    %893 = vector.extract_strided_slice %815 {offsets = [0, 24], sizes = [8, 8], strides = [1, 1]} : vector<8x32xbf16> to vector<8x8xbf16>
    %894 = arith.truncf %892 : vector<8x8xf32> to vector<8x8xbf16>
    %cst_273 = arith.constant dense<0.000000e+00> : vector<8x8xf32>
    %895 = tpu.matmul %894, %893, %cst_273 {dimension_numbers = #tpu.dot_dimension_numbers<[1], [0], [0], [1], [0, 0, 1, 1], [], []>} : vector<8x8xbf16>, vector<8x8xbf16>, vector<8x8xf32> -> vector<8x8xf32>
    %896 = tpu.concatenate %835, %855, %875, %895 in 1 : vector<8x8xf32>, vector<8x8xf32>, vector<8x8xf32>, vector<8x8xf32> -> vector<8x32xf32>
    %897 = tpu.concatenate %812, %896 in 0 : vector<8x32xf32>, vector<8x32xf32> -> vector<16x32xf32>
    %898 = arith.truncf %897 : vector<16x32xf32> to vector<16x32xbf16>
    %cst_274 = arith.constant dense<0.000000e+00> : vector<16x32xf32>
    %899 = tpu.matmul %898, %705, %cst_274 {dimension_numbers = #tpu.dot_dimension_numbers<[1], [0], [0], [1], [0, 0, 1, 1], [], []>} : vector<16x32xbf16>, vector<32x32xbf16>, vector<16x32xf32> -> vector<16x32xf32>
    %900 = arith.addf %699, %899 : vector<16x32xf32>
    %901 = vector.broadcast %707 : vector<1x32xf32> to vector<16x32xf32>
    %902 = arith.addf %900, %901 : vector<16x32xf32>
    %cst_275 = arith.constant dense<0.000000e+00> : vector<16xf32>
    %903 = vector.multi_reduction <add>, %902, %cst_275 [1] : vector<16x32xf32> to vector<16xf32>
    %904 = vector.shape_cast %903 : vector<16xf32> to vector<16x1xf32>
    %cst_276 = arith.constant 3.200000e+01 : f32
    %905 = vector.broadcast %cst_276 : f32 to vector<16x1xf32>
    %906 = arith.divf %904, %905 : vector<16x1xf32>
    %907 = vector.broadcast %906 : vector<16x1xf32> to vector<16x32xf32>
    %908 = arith.subf %902, %907 : vector<16x32xf32>
    %909 = arith.mulf %908, %908 : vector<16x32xf32>
    %cst_277 = arith.constant dense<0.000000e+00> : vector<16xf32>
    %910 = vector.multi_reduction <add>, %909, %cst_277 [1] : vector<16x32xf32> to vector<16xf32>
    %911 = vector.shape_cast %910 : vector<16xf32> to vector<16x1xf32>
    %cst_278 = arith.constant 3.100000e+01 : f32
    %912 = vector.broadcast %cst_278 : f32 to vector<16x1xf32>
    %913 = arith.divf %911, %912 : vector<16x1xf32>
    %914 = math.sqrt %913 : vector<16x1xf32>
    %cst_279 = arith.constant 9.99999997E-7 : f32
    %915 = vector.broadcast %cst_279 : f32 to vector<16x1xf32>
    %916 = arith.addf %914, %915 : vector<16x1xf32>
    %917 = tpu.reciprocal %916 {approx = true} : vector<16x1xf32> -> vector<16x1xf32>
    %918 = vector.broadcast %906 : vector<16x1xf32> to vector<16x32xf32>
    %919 = arith.subf %902, %918 : vector<16x32xf32>
    %920 = vector.broadcast %709 : vector<1x32xf32> to vector<16x32xf32>
    %921 = arith.mulf %920, %919 : vector<16x32xf32>
    %922 = vector.broadcast %917 : vector<16x1xf32> to vector<16x32xf32>
    %923 = arith.mulf %921, %922 : vector<16x32xf32>
    %924 = vector.broadcast %711 : vector<1x32xf32> to vector<16x32xf32>
    %925 = arith.addf %923, %924 : vector<16x32xf32>
    %c0_280 = arith.constant 0 : index
    %c0_281 = arith.constant 0 : index
    %c0_282 = arith.constant 0 : index
    %926 = vector.load %arg23[%c0_280, %c0_281, %c0_282] : memref<2x32x128xbf16, #tpu.memory_space<vmem>>, vector<1x32x128xbf16>
    %927 = vector.shape_cast %926 : vector<1x32x128xbf16> to vector<32x128xbf16>
    %c0_283 = arith.constant 0 : index
    %c0_284 = arith.constant 0 : index
    %c0_285 = arith.constant 0 : index
    %928 = vector.load %arg24[%c0_283, %c0_284, %c0_285] : memref<2x1x128xf32, #tpu.memory_space<vmem>>, vector<1x1x128xf32>
    %929 = vector.shape_cast %928 : vector<1x1x128xf32> to vector<1x128xf32>
    %c0_286 = arith.constant 0 : index
    %c0_287 = arith.constant 0 : index
    %c0_288 = arith.constant 0 : index
    %930 = vector.load %arg25[%c0_286, %c0_287, %c0_288] : memref<2x128x32xbf16, #tpu.memory_space<vmem>>, vector<1x128x32xbf16>
    %931 = vector.shape_cast %930 : vector<1x128x32xbf16> to vector<128x32xbf16>
    %c0_289 = arith.constant 0 : index
    %c0_290 = arith.constant 0 : index
    %c0_291 = arith.constant 0 : index
    %932 = vector.load %arg26[%c0_289, %c0_290, %c0_291] : memref<2x1x32xf32, #tpu.memory_space<vmem>>, vector<1x1x32xf32>
    %933 = vector.shape_cast %932 : vector<1x1x32xf32> to vector<1x32xf32>
    %c0_292 = arith.constant 0 : index
    %c0_293 = arith.constant 0 : index
    %c0_294 = arith.constant 0 : index
    %934 = vector.load %arg27[%c0_292, %c0_293, %c0_294] : memref<2x1x32xf32, #tpu.memory_space<vmem>>, vector<1x1x32xf32>
    %935 = vector.shape_cast %934 : vector<1x1x32xf32> to vector<1x32xf32>
    %c0_295 = arith.constant 0 : index
    %c0_296 = arith.constant 0 : index
    %c0_297 = arith.constant 0 : index
    %936 = vector.load %arg28[%c0_295, %c0_296, %c0_297] : memref<2x1x32xf32, #tpu.memory_space<vmem>>, vector<1x1x32xf32>
    %937 = vector.shape_cast %936 : vector<1x1x32xf32> to vector<1x32xf32>
    %938 = arith.truncf %925 : vector<16x32xf32> to vector<16x32xbf16>
    %cst_298 = arith.constant dense<0.000000e+00> : vector<16x128xf32>
    %939 = tpu.matmul %938, %927, %cst_298 {dimension_numbers = #tpu.dot_dimension_numbers<[1], [0], [0], [1], [0, 0, 1, 1], [], []>} : vector<16x32xbf16>, vector<32x128xbf16>, vector<16x128xf32> -> vector<16x128xf32>
    %940 = vector.broadcast %929 : vector<1x128xf32> to vector<16x128xf32>
    %941 = arith.addf %939, %940 : vector<16x128xf32>
    %cst_299 = arith.constant 5.000000e-01 : f32
    %942 = vector.broadcast %cst_299 : f32 to vector<16x128xf32>
    %943 = arith.mulf %942, %941 : vector<16x128xf32>
    %cst_300 = arith.constant 4.471500e-02 : f32
    %944 = vector.broadcast %cst_300 : f32 to vector<16x128xf32>
    %945 = arith.mulf %944, %941 : vector<16x128xf32>
    %946 = arith.mulf %945, %941 : vector<16x128xf32>
    %947 = arith.mulf %946, %941 : vector<16x128xf32>
    %948 = arith.addf %941, %947 : vector<16x128xf32>
    %cst_301 = arith.constant 0.797884583 : f32
    %949 = vector.broadcast %cst_301 : f32 to vector<16x128xf32>
    %950 = arith.mulf %949, %948 : vector<16x128xf32>
    %951 = math.tanh %950 : vector<16x128xf32>
    %cst_302 = arith.constant 1.000000e+00 : f32
    %952 = vector.broadcast %cst_302 : f32 to vector<16x128xf32>
    %953 = arith.addf %952, %951 : vector<16x128xf32>
    %954 = arith.mulf %943, %953 : vector<16x128xf32>
    %955 = arith.truncf %954 : vector<16x128xf32> to vector<16x128xbf16>
    %cst_303 = arith.constant dense<0.000000e+00> : vector<16x32xf32>
    %956 = tpu.matmul %955, %931, %cst_303 {dimension_numbers = #tpu.dot_dimension_numbers<[1], [0], [0], [1], [0, 0, 1, 1], [], []>} : vector<16x128xbf16>, vector<128x32xbf16>, vector<16x32xf32> -> vector<16x32xf32>
    %957 = vector.broadcast %933 : vector<1x32xf32> to vector<16x32xf32>
    %958 = arith.addf %956, %957 : vector<16x32xf32>
    %959 = arith.addf %925, %958 : vector<16x32xf32>
    %cst_304 = arith.constant dense<0.000000e+00> : vector<16xf32>
    %960 = vector.multi_reduction <add>, %959, %cst_304 [1] : vector<16x32xf32> to vector<16xf32>
    %961 = vector.shape_cast %960 : vector<16xf32> to vector<16x1xf32>
    %cst_305 = arith.constant 3.200000e+01 : f32
    %962 = vector.broadcast %cst_305 : f32 to vector<16x1xf32>
    %963 = arith.divf %961, %962 : vector<16x1xf32>
    %964 = vector.broadcast %963 : vector<16x1xf32> to vector<16x32xf32>
    %965 = arith.subf %959, %964 : vector<16x32xf32>
    %966 = arith.mulf %965, %965 : vector<16x32xf32>
    %cst_306 = arith.constant dense<0.000000e+00> : vector<16xf32>
    %967 = vector.multi_reduction <add>, %966, %cst_306 [1] : vector<16x32xf32> to vector<16xf32>
    %968 = vector.shape_cast %967 : vector<16xf32> to vector<16x1xf32>
    %cst_307 = arith.constant 3.100000e+01 : f32
    %969 = vector.broadcast %cst_307 : f32 to vector<16x1xf32>
    %970 = arith.divf %968, %969 : vector<16x1xf32>
    %971 = math.sqrt %970 : vector<16x1xf32>
    %cst_308 = arith.constant 9.99999997E-7 : f32
    %972 = vector.broadcast %cst_308 : f32 to vector<16x1xf32>
    %973 = arith.addf %971, %972 : vector<16x1xf32>
    %974 = tpu.reciprocal %973 {approx = true} : vector<16x1xf32> -> vector<16x1xf32>
    %975 = vector.broadcast %963 : vector<16x1xf32> to vector<16x32xf32>
    %976 = arith.subf %959, %975 : vector<16x32xf32>
    %977 = vector.broadcast %935 : vector<1x32xf32> to vector<16x32xf32>
    %978 = arith.mulf %977, %976 : vector<16x32xf32>
    %979 = vector.broadcast %974 : vector<16x1xf32> to vector<16x32xf32>
    %980 = arith.mulf %978, %979 : vector<16x32xf32>
    %981 = vector.broadcast %937 : vector<1x32xf32> to vector<16x32xf32>
    %982 = arith.addf %980, %981 : vector<16x32xf32>
    %c1_309 = arith.constant 1 : index
    %c0_310 = arith.constant 0 : index
    %c0_311 = arith.constant 0 : index
    %983 = vector.load %arg11[%c1_309, %c0_310, %c0_311] : memref<2x32x96xbf16, #tpu.memory_space<vmem>>, vector<1x32x96xbf16>
    %984 = vector.shape_cast %983 : vector<1x32x96xbf16> to vector<32x96xbf16>
    %c1_312 = arith.constant 1 : index
    %c0_313 = arith.constant 0 : index
    %c0_314 = arith.constant 0 : index
    %985 = vector.load %arg12[%c1_312, %c0_313, %c0_314] : memref<2x1x96xf32, #tpu.memory_space<vmem>>, vector<1x1x96xf32>
    %986 = vector.shape_cast %985 : vector<1x1x96xf32> to vector<1x96xf32>
    %c1_315 = arith.constant 1 : index
    %c0_316 = arith.constant 0 : index
    %c0_317 = arith.constant 0 : index
    %987 = vector.load %arg13[%c1_315, %c0_316, %c0_317] : memref<2x32x32xbf16, #tpu.memory_space<vmem>>, vector<1x32x32xbf16>
    %988 = vector.shape_cast %987 : vector<1x32x32xbf16> to vector<32x32xbf16>
    %c1_318 = arith.constant 1 : index
    %c0_319 = arith.constant 0 : index
    %c0_320 = arith.constant 0 : index
    %989 = vector.load %arg14[%c1_318, %c0_319, %c0_320] : memref<2x1x32xf32, #tpu.memory_space<vmem>>, vector<1x1x32xf32>
    %990 = vector.shape_cast %989 : vector<1x1x32xf32> to vector<1x32xf32>
    %c1_321 = arith.constant 1 : index
    %c0_322 = arith.constant 0 : index
    %c0_323 = arith.constant 0 : index
    %991 = vector.load %arg15[%c1_321, %c0_322, %c0_323] : memref<2x1x32xf32, #tpu.memory_space<vmem>>, vector<1x1x32xf32>
    %992 = vector.shape_cast %991 : vector<1x1x32xf32> to vector<1x32xf32>
    %c1_324 = arith.constant 1 : index
    %c0_325 = arith.constant 0 : index
    %c0_326 = arith.constant 0 : index
    %993 = vector.load %arg16[%c1_324, %c0_325, %c0_326] : memref<2x1x32xf32, #tpu.memory_space<vmem>>, vector<1x1x32xf32>
    %994 = vector.shape_cast %993 : vector<1x1x32xf32> to vector<1x32xf32>
    %995 = arith.truncf %982 : vector<16x32xf32> to vector<16x32xbf16>
    %cst_327 = arith.constant dense<0.000000e+00> : vector<16x96xf32>
    %996 = tpu.matmul %995, %984, %cst_327 {dimension_numbers = #tpu.dot_dimension_numbers<[1], [0], [0], [1], [0, 0, 1, 1], [], []>} : vector<16x32xbf16>, vector<32x96xbf16>, vector<16x96xf32> -> vector<16x96xf32>
    %997 = vector.broadcast %986 : vector<1x96xf32> to vector<16x96xf32>
    %998 = arith.addf %996, %997 : vector<16x96xf32>
    %999 = vector.extract_strided_slice %998 {offsets = [0, 0], sizes = [16, 32], strides = [1, 1]} : vector<16x96xf32> to vector<16x32xf32>
    %1000 = vector.extract_strided_slice %998 {offsets = [0, 32], sizes = [16, 32], strides = [1, 1]} : vector<16x96xf32> to vector<16x32xf32>
    %1001 = vector.extract_strided_slice %998 {offsets = [0, 64], sizes = [16, 32], strides = [1, 1]} : vector<16x96xf32> to vector<16x32xf32>
    %1002 = arith.truncf %999 : vector<16x32xf32> to vector<16x32xbf16>
    %1003 = arith.truncf %1000 : vector<16x32xf32> to vector<16x32xbf16>
    %1004 = arith.truncf %1001 : vector<16x32xf32> to vector<16x32xbf16>
    %1005 = vector.extract_strided_slice %1002 {offsets = [0, 0], sizes = [8, 32], strides = [1, 1]} : vector<16x32xbf16> to vector<8x32xbf16>
    %1006 = vector.extract_strided_slice %1003 {offsets = [0, 0], sizes = [8, 32], strides = [1, 1]} : vector<16x32xbf16> to vector<8x32xbf16>
    %1007 = vector.extract_strided_slice %1004 {offsets = [0, 0], sizes = [8, 32], strides = [1, 1]} : vector<16x32xbf16> to vector<8x32xbf16>
    %1008 = vector.extract_strided_slice %1005 {offsets = [0, 0], sizes = [8, 8], strides = [1, 1]} : vector<8x32xbf16> to vector<8x8xbf16>
    %1009 = vector.extract_strided_slice %1006 {offsets = [0, 0], sizes = [8, 8], strides = [1, 1]} : vector<8x32xbf16> to vector<8x8xbf16>
    %cst_328 = arith.constant dense<0.000000e+00> : vector<8x8xf32>
    %1010 = tpu.matmul %1008, %1009, %cst_328 {dimension_numbers = #tpu.dot_dimension_numbers<[1], [1], [0], [0], [0, 0, 1, 0], [], []>} : vector<8x8xbf16>, vector<8x8xbf16>, vector<8x8xf32> -> vector<8x8xf32>
    %cst_329 = arith.constant 0.353553385 : f32
    %1011 = vector.broadcast %cst_329 : f32 to vector<8x8xf32>
    %1012 = arith.mulf %1010, %1011 : vector<8x8xf32>
    %1013 = arith.addf %1012, %24 : vector<8x8xf32>
    %cst_330 = arith.constant dense<0xFF800000> : vector<8xf32>
    %1014 = vector.multi_reduction <maximumf>, %1013, %cst_330 [1] : vector<8x8xf32> to vector<8xf32>
    %1015 = vector.shape_cast %1014 : vector<8xf32> to vector<8x1xf32>
    %1016 = vector.broadcast %1015 : vector<8x1xf32> to vector<8x8xf32>
    %1017 = arith.subf %1013, %1016 : vector<8x8xf32>
    %1018 = math.exp %1017 : vector<8x8xf32>
    %cst_331 = arith.constant dense<0.000000e+00> : vector<8xf32>
    %1019 = vector.multi_reduction <add>, %1018, %cst_331 [1] : vector<8x8xf32> to vector<8xf32>
    %1020 = vector.shape_cast %1019 : vector<8xf32> to vector<8x1xf32>
    %1021 = tpu.reciprocal %1020 {approx = true} : vector<8x1xf32> -> vector<8x1xf32>
    %1022 = vector.broadcast %1021 : vector<8x1xf32> to vector<8x8xf32>
    %1023 = arith.mulf %1018, %1022 : vector<8x8xf32>
    %1024 = vector.extract_strided_slice %1007 {offsets = [0, 0], sizes = [8, 8], strides = [1, 1]} : vector<8x32xbf16> to vector<8x8xbf16>
    %1025 = arith.truncf %1023 : vector<8x8xf32> to vector<8x8xbf16>
    %cst_332 = arith.constant dense<0.000000e+00> : vector<8x8xf32>
    %1026 = tpu.matmul %1025, %1024, %cst_332 {dimension_numbers = #tpu.dot_dimension_numbers<[1], [0], [0], [1], [0, 0, 1, 1], [], []>} : vector<8x8xbf16>, vector<8x8xbf16>, vector<8x8xf32> -> vector<8x8xf32>
    %1027 = vector.extract_strided_slice %1005 {offsets = [0, 8], sizes = [8, 8], strides = [1, 1]} : vector<8x32xbf16> to vector<8x8xbf16>
    %1028 = vector.extract_strided_slice %1006 {offsets = [0, 8], sizes = [8, 8], strides = [1, 1]} : vector<8x32xbf16> to vector<8x8xbf16>
    %cst_333 = arith.constant dense<0.000000e+00> : vector<8x8xf32>
    %1029 = tpu.matmul %1027, %1028, %cst_333 {dimension_numbers = #tpu.dot_dimension_numbers<[1], [1], [0], [0], [0, 0, 1, 0], [], []>} : vector<8x8xbf16>, vector<8x8xbf16>, vector<8x8xf32> -> vector<8x8xf32>
    %cst_334 = arith.constant 0.353553385 : f32
    %1030 = vector.broadcast %cst_334 : f32 to vector<8x8xf32>
    %1031 = arith.mulf %1029, %1030 : vector<8x8xf32>
    %1032 = arith.addf %1031, %24 : vector<8x8xf32>
    %cst_335 = arith.constant dense<0xFF800000> : vector<8xf32>
    %1033 = vector.multi_reduction <maximumf>, %1032, %cst_335 [1] : vector<8x8xf32> to vector<8xf32>
    %1034 = vector.shape_cast %1033 : vector<8xf32> to vector<8x1xf32>
    %1035 = vector.broadcast %1034 : vector<8x1xf32> to vector<8x8xf32>
    %1036 = arith.subf %1032, %1035 : vector<8x8xf32>
    %1037 = math.exp %1036 : vector<8x8xf32>
    %cst_336 = arith.constant dense<0.000000e+00> : vector<8xf32>
    %1038 = vector.multi_reduction <add>, %1037, %cst_336 [1] : vector<8x8xf32> to vector<8xf32>
    %1039 = vector.shape_cast %1038 : vector<8xf32> to vector<8x1xf32>
    %1040 = tpu.reciprocal %1039 {approx = true} : vector<8x1xf32> -> vector<8x1xf32>
    %1041 = vector.broadcast %1040 : vector<8x1xf32> to vector<8x8xf32>
    %1042 = arith.mulf %1037, %1041 : vector<8x8xf32>
    %1043 = vector.extract_strided_slice %1007 {offsets = [0, 8], sizes = [8, 8], strides = [1, 1]} : vector<8x32xbf16> to vector<8x8xbf16>
    %1044 = arith.truncf %1042 : vector<8x8xf32> to vector<8x8xbf16>
    %cst_337 = arith.constant dense<0.000000e+00> : vector<8x8xf32>
    %1045 = tpu.matmul %1044, %1043, %cst_337 {dimension_numbers = #tpu.dot_dimension_numbers<[1], [0], [0], [1], [0, 0, 1, 1], [], []>} : vector<8x8xbf16>, vector<8x8xbf16>, vector<8x8xf32> -> vector<8x8xf32>
    %1046 = vector.extract_strided_slice %1005 {offsets = [0, 16], sizes = [8, 8], strides = [1, 1]} : vector<8x32xbf16> to vector<8x8xbf16>
    %1047 = vector.extract_strided_slice %1006 {offsets = [0, 16], sizes = [8, 8], strides = [1, 1]} : vector<8x32xbf16> to vector<8x8xbf16>
    %cst_338 = arith.constant dense<0.000000e+00> : vector<8x8xf32>
    %1048 = tpu.matmul %1046, %1047, %cst_338 {dimension_numbers = #tpu.dot_dimension_numbers<[1], [1], [0], [0], [0, 0, 1, 0], [], []>} : vector<8x8xbf16>, vector<8x8xbf16>, vector<8x8xf32> -> vector<8x8xf32>
    %cst_339 = arith.constant 0.353553385 : f32
    %1049 = vector.broadcast %cst_339 : f32 to vector<8x8xf32>
    %1050 = arith.mulf %1048, %1049 : vector<8x8xf32>
    %1051 = arith.addf %1050, %24 : vector<8x8xf32>
    %cst_340 = arith.constant dense<0xFF800000> : vector<8xf32>
    %1052 = vector.multi_reduction <maximumf>, %1051, %cst_340 [1] : vector<8x8xf32> to vector<8xf32>
    %1053 = vector.shape_cast %1052 : vector<8xf32> to vector<8x1xf32>
    %1054 = vector.broadcast %1053 : vector<8x1xf32> to vector<8x8xf32>
    %1055 = arith.subf %1051, %1054 : vector<8x8xf32>
    %1056 = math.exp %1055 : vector<8x8xf32>
    %cst_341 = arith.constant dense<0.000000e+00> : vector<8xf32>
    %1057 = vector.multi_reduction <add>, %1056, %cst_341 [1] : vector<8x8xf32> to vector<8xf32>
    %1058 = vector.shape_cast %1057 : vector<8xf32> to vector<8x1xf32>
    %1059 = tpu.reciprocal %1058 {approx = true} : vector<8x1xf32> -> vector<8x1xf32>
    %1060 = vector.broadcast %1059 : vector<8x1xf32> to vector<8x8xf32>
    %1061 = arith.mulf %1056, %1060 : vector<8x8xf32>
    %1062 = vector.extract_strided_slice %1007 {offsets = [0, 16], sizes = [8, 8], strides = [1, 1]} : vector<8x32xbf16> to vector<8x8xbf16>
    %1063 = arith.truncf %1061 : vector<8x8xf32> to vector<8x8xbf16>
    %cst_342 = arith.constant dense<0.000000e+00> : vector<8x8xf32>
    %1064 = tpu.matmul %1063, %1062, %cst_342 {dimension_numbers = #tpu.dot_dimension_numbers<[1], [0], [0], [1], [0, 0, 1, 1], [], []>} : vector<8x8xbf16>, vector<8x8xbf16>, vector<8x8xf32> -> vector<8x8xf32>
    %1065 = vector.extract_strided_slice %1005 {offsets = [0, 24], sizes = [8, 8], strides = [1, 1]} : vector<8x32xbf16> to vector<8x8xbf16>
    %1066 = vector.extract_strided_slice %1006 {offsets = [0, 24], sizes = [8, 8], strides = [1, 1]} : vector<8x32xbf16> to vector<8x8xbf16>
    %cst_343 = arith.constant dense<0.000000e+00> : vector<8x8xf32>
    %1067 = tpu.matmul %1065, %1066, %cst_343 {dimension_numbers = #tpu.dot_dimension_numbers<[1], [1], [0], [0], [0, 0, 1, 0], [], []>} : vector<8x8xbf16>, vector<8x8xbf16>, vector<8x8xf32> -> vector<8x8xf32>
    %cst_344 = arith.constant 0.353553385 : f32
    %1068 = vector.broadcast %cst_344 : f32 to vector<8x8xf32>
    %1069 = arith.mulf %1067, %1068 : vector<8x8xf32>
    %1070 = arith.addf %1069, %24 : vector<8x8xf32>
    %cst_345 = arith.constant dense<0xFF800000> : vector<8xf32>
    %1071 = vector.multi_reduction <maximumf>, %1070, %cst_345 [1] : vector<8x8xf32> to vector<8xf32>
    %1072 = vector.shape_cast %1071 : vector<8xf32> to vector<8x1xf32>
    %1073 = vector.broadcast %1072 : vector<8x1xf32> to vector<8x8xf32>
    %1074 = arith.subf %1070, %1073 : vector<8x8xf32>
    %1075 = math.exp %1074 : vector<8x8xf32>
    %cst_346 = arith.constant dense<0.000000e+00> : vector<8xf32>
    %1076 = vector.multi_reduction <add>, %1075, %cst_346 [1] : vector<8x8xf32> to vector<8xf32>
    %1077 = vector.shape_cast %1076 : vector<8xf32> to vector<8x1xf32>
    %1078 = tpu.reciprocal %1077 {approx = true} : vector<8x1xf32> -> vector<8x1xf32>
    %1079 = vector.broadcast %1078 : vector<8x1xf32> to vector<8x8xf32>
    %1080 = arith.mulf %1075, %1079 : vector<8x8xf32>
    %1081 = vector.extract_strided_slice %1007 {offsets = [0, 24], sizes = [8, 8], strides = [1, 1]} : vector<8x32xbf16> to vector<8x8xbf16>
    %1082 = arith.truncf %1080 : vector<8x8xf32> to vector<8x8xbf16>
    %cst_347 = arith.constant dense<0.000000e+00> : vector<8x8xf32>
    %1083 = tpu.matmul %1082, %1081, %cst_347 {dimension_numbers = #tpu.dot_dimension_numbers<[1], [0], [0], [1], [0, 0, 1, 1], [], []>} : vector<8x8xbf16>, vector<8x8xbf16>, vector<8x8xf32> -> vector<8x8xf32>
    %1084 = tpu.concatenate %1026, %1045, %1064, %1083 in 1 : vector<8x8xf32>, vector<8x8xf32>, vector<8x8xf32>, vector<8x8xf32> -> vector<8x32xf32>
    %1085 = vector.extract_strided_slice %1002 {offsets = [8, 0], sizes = [8, 32], strides = [1, 1]} : vector<16x32xbf16> to vector<8x32xbf16>
    %1086 = vector.extract_strided_slice %1003 {offsets = [8, 0], sizes = [8, 32], strides = [1, 1]} : vector<16x32xbf16> to vector<8x32xbf16>
    %1087 = vector.extract_strided_slice %1004 {offsets = [8, 0], sizes = [8, 32], strides = [1, 1]} : vector<16x32xbf16> to vector<8x32xbf16>
    %1088 = vector.extract_strided_slice %1085 {offsets = [0, 0], sizes = [8, 8], strides = [1, 1]} : vector<8x32xbf16> to vector<8x8xbf16>
    %1089 = vector.extract_strided_slice %1086 {offsets = [0, 0], sizes = [8, 8], strides = [1, 1]} : vector<8x32xbf16> to vector<8x8xbf16>
    %cst_348 = arith.constant dense<0.000000e+00> : vector<8x8xf32>
    %1090 = tpu.matmul %1088, %1089, %cst_348 {dimension_numbers = #tpu.dot_dimension_numbers<[1], [1], [0], [0], [0, 0, 1, 0], [], []>} : vector<8x8xbf16>, vector<8x8xbf16>, vector<8x8xf32> -> vector<8x8xf32>
    %cst_349 = arith.constant 0.353553385 : f32
    %1091 = vector.broadcast %cst_349 : f32 to vector<8x8xf32>
    %1092 = arith.mulf %1090, %1091 : vector<8x8xf32>
    %1093 = arith.addf %1092, %46 : vector<8x8xf32>
    %cst_350 = arith.constant dense<0xFF800000> : vector<8xf32>
    %1094 = vector.multi_reduction <maximumf>, %1093, %cst_350 [1] : vector<8x8xf32> to vector<8xf32>
    %1095 = vector.shape_cast %1094 : vector<8xf32> to vector<8x1xf32>
    %1096 = vector.broadcast %1095 : vector<8x1xf32> to vector<8x8xf32>
    %1097 = arith.subf %1093, %1096 : vector<8x8xf32>
    %1098 = math.exp %1097 : vector<8x8xf32>
    %cst_351 = arith.constant dense<0.000000e+00> : vector<8xf32>
    %1099 = vector.multi_reduction <add>, %1098, %cst_351 [1] : vector<8x8xf32> to vector<8xf32>
    %1100 = vector.shape_cast %1099 : vector<8xf32> to vector<8x1xf32>
    %1101 = tpu.reciprocal %1100 {approx = true} : vector<8x1xf32> -> vector<8x1xf32>
    %1102 = vector.broadcast %1101 : vector<8x1xf32> to vector<8x8xf32>
    %1103 = arith.mulf %1098, %1102 : vector<8x8xf32>
    %1104 = vector.extract_strided_slice %1087 {offsets = [0, 0], sizes = [8, 8], strides = [1, 1]} : vector<8x32xbf16> to vector<8x8xbf16>
    %1105 = arith.truncf %1103 : vector<8x8xf32> to vector<8x8xbf16>
    %cst_352 = arith.constant dense<0.000000e+00> : vector<8x8xf32>
    %1106 = tpu.matmul %1105, %1104, %cst_352 {dimension_numbers = #tpu.dot_dimension_numbers<[1], [0], [0], [1], [0, 0, 1, 1], [], []>} : vector<8x8xbf16>, vector<8x8xbf16>, vector<8x8xf32> -> vector<8x8xf32>
    %1107 = vector.extract_strided_slice %1085 {offsets = [0, 8], sizes = [8, 8], strides = [1, 1]} : vector<8x32xbf16> to vector<8x8xbf16>
    %1108 = vector.extract_strided_slice %1086 {offsets = [0, 8], sizes = [8, 8], strides = [1, 1]} : vector<8x32xbf16> to vector<8x8xbf16>
    %cst_353 = arith.constant dense<0.000000e+00> : vector<8x8xf32>
    %1109 = tpu.matmul %1107, %1108, %cst_353 {dimension_numbers = #tpu.dot_dimension_numbers<[1], [1], [0], [0], [0, 0, 1, 0], [], []>} : vector<8x8xbf16>, vector<8x8xbf16>, vector<8x8xf32> -> vector<8x8xf32>
    %cst_354 = arith.constant 0.353553385 : f32
    %1110 = vector.broadcast %cst_354 : f32 to vector<8x8xf32>
    %1111 = arith.mulf %1109, %1110 : vector<8x8xf32>
    %1112 = arith.addf %1111, %46 : vector<8x8xf32>
    %cst_355 = arith.constant dense<0xFF800000> : vector<8xf32>
    %1113 = vector.multi_reduction <maximumf>, %1112, %cst_355 [1] : vector<8x8xf32> to vector<8xf32>
    %1114 = vector.shape_cast %1113 : vector<8xf32> to vector<8x1xf32>
    %1115 = vector.broadcast %1114 : vector<8x1xf32> to vector<8x8xf32>
    %1116 = arith.subf %1112, %1115 : vector<8x8xf32>
    %1117 = math.exp %1116 : vector<8x8xf32>
    %cst_356 = arith.constant dense<0.000000e+00> : vector<8xf32>
    %1118 = vector.multi_reduction <add>, %1117, %cst_356 [1] : vector<8x8xf32> to vector<8xf32>
    %1119 = vector.shape_cast %1118 : vector<8xf32> to vector<8x1xf32>
    %1120 = tpu.reciprocal %1119 {approx = true} : vector<8x1xf32> -> vector<8x1xf32>
    %1121 = vector.broadcast %1120 : vector<8x1xf32> to vector<8x8xf32>
    %1122 = arith.mulf %1117, %1121 : vector<8x8xf32>
    %1123 = vector.extract_strided_slice %1087 {offsets = [0, 8], sizes = [8, 8], strides = [1, 1]} : vector<8x32xbf16> to vector<8x8xbf16>
    %1124 = arith.truncf %1122 : vector<8x8xf32> to vector<8x8xbf16>
    %cst_357 = arith.constant dense<0.000000e+00> : vector<8x8xf32>
    %1125 = tpu.matmul %1124, %1123, %cst_357 {dimension_numbers = #tpu.dot_dimension_numbers<[1], [0], [0], [1], [0, 0, 1, 1], [], []>} : vector<8x8xbf16>, vector<8x8xbf16>, vector<8x8xf32> -> vector<8x8xf32>
    %1126 = vector.extract_strided_slice %1085 {offsets = [0, 16], sizes = [8, 8], strides = [1, 1]} : vector<8x32xbf16> to vector<8x8xbf16>
    %1127 = vector.extract_strided_slice %1086 {offsets = [0, 16], sizes = [8, 8], strides = [1, 1]} : vector<8x32xbf16> to vector<8x8xbf16>
    %cst_358 = arith.constant dense<0.000000e+00> : vector<8x8xf32>
    %1128 = tpu.matmul %1126, %1127, %cst_358 {dimension_numbers = #tpu.dot_dimension_numbers<[1], [1], [0], [0], [0, 0, 1, 0], [], []>} : vector<8x8xbf16>, vector<8x8xbf16>, vector<8x8xf32> -> vector<8x8xf32>
    %cst_359 = arith.constant 0.353553385 : f32
    %1129 = vector.broadcast %cst_359 : f32 to vector<8x8xf32>
    %1130 = arith.mulf %1128, %1129 : vector<8x8xf32>
    %1131 = arith.addf %1130, %46 : vector<8x8xf32>
    %cst_360 = arith.constant dense<0xFF800000> : vector<8xf32>
    %1132 = vector.multi_reduction <maximumf>, %1131, %cst_360 [1] : vector<8x8xf32> to vector<8xf32>
    %1133 = vector.shape_cast %1132 : vector<8xf32> to vector<8x1xf32>
    %1134 = vector.broadcast %1133 : vector<8x1xf32> to vector<8x8xf32>
    %1135 = arith.subf %1131, %1134 : vector<8x8xf32>
    %1136 = math.exp %1135 : vector<8x8xf32>
    %cst_361 = arith.constant dense<0.000000e+00> : vector<8xf32>
    %1137 = vector.multi_reduction <add>, %1136, %cst_361 [1] : vector<8x8xf32> to vector<8xf32>
    %1138 = vector.shape_cast %1137 : vector<8xf32> to vector<8x1xf32>
    %1139 = tpu.reciprocal %1138 {approx = true} : vector<8x1xf32> -> vector<8x1xf32>
    %1140 = vector.broadcast %1139 : vector<8x1xf32> to vector<8x8xf32>
    %1141 = arith.mulf %1136, %1140 : vector<8x8xf32>
    %1142 = vector.extract_strided_slice %1087 {offsets = [0, 16], sizes = [8, 8], strides = [1, 1]} : vector<8x32xbf16> to vector<8x8xbf16>
    %1143 = arith.truncf %1141 : vector<8x8xf32> to vector<8x8xbf16>
    %cst_362 = arith.constant dense<0.000000e+00> : vector<8x8xf32>
    %1144 = tpu.matmul %1143, %1142, %cst_362 {dimension_numbers = #tpu.dot_dimension_numbers<[1], [0], [0], [1], [0, 0, 1, 1], [], []>} : vector<8x8xbf16>, vector<8x8xbf16>, vector<8x8xf32> -> vector<8x8xf32>
    %1145 = vector.extract_strided_slice %1085 {offsets = [0, 24], sizes = [8, 8], strides = [1, 1]} : vector<8x32xbf16> to vector<8x8xbf16>
    %1146 = vector.extract_strided_slice %1086 {offsets = [0, 24], sizes = [8, 8], strides = [1, 1]} : vector<8x32xbf16> to vector<8x8xbf16>
    %cst_363 = arith.constant dense<0.000000e+00> : vector<8x8xf32>
    %1147 = tpu.matmul %1145, %1146, %cst_363 {dimension_numbers = #tpu.dot_dimension_numbers<[1], [1], [0], [0], [0, 0, 1, 0], [], []>} : vector<8x8xbf16>, vector<8x8xbf16>, vector<8x8xf32> -> vector<8x8xf32>
    %cst_364 = arith.constant 0.353553385 : f32
    %1148 = vector.broadcast %cst_364 : f32 to vector<8x8xf32>
    %1149 = arith.mulf %1147, %1148 : vector<8x8xf32>
    %1150 = arith.addf %1149, %46 : vector<8x8xf32>
    %cst_365 = arith.constant dense<0xFF800000> : vector<8xf32>
    %1151 = vector.multi_reduction <maximumf>, %1150, %cst_365 [1] : vector<8x8xf32> to vector<8xf32>
    %1152 = vector.shape_cast %1151 : vector<8xf32> to vector<8x1xf32>
    %1153 = vector.broadcast %1152 : vector<8x1xf32> to vector<8x8xf32>
    %1154 = arith.subf %1150, %1153 : vector<8x8xf32>
    %1155 = math.exp %1154 : vector<8x8xf32>
    %cst_366 = arith.constant dense<0.000000e+00> : vector<8xf32>
    %1156 = vector.multi_reduction <add>, %1155, %cst_366 [1] : vector<8x8xf32> to vector<8xf32>
    %1157 = vector.shape_cast %1156 : vector<8xf32> to vector<8x1xf32>
    %1158 = tpu.reciprocal %1157 {approx = true} : vector<8x1xf32> -> vector<8x1xf32>
    %1159 = vector.broadcast %1158 : vector<8x1xf32> to vector<8x8xf32>
    %1160 = arith.mulf %1155, %1159 : vector<8x8xf32>
    %1161 = vector.extract_strided_slice %1087 {offsets = [0, 24], sizes = [8, 8], strides = [1, 1]} : vector<8x32xbf16> to vector<8x8xbf16>
    %1162 = arith.truncf %1160 : vector<8x8xf32> to vector<8x8xbf16>
    %cst_367 = arith.constant dense<0.000000e+00> : vector<8x8xf32>
    %1163 = tpu.matmul %1162, %1161, %cst_367 {dimension_numbers = #tpu.dot_dimension_numbers<[1], [0], [0], [1], [0, 0, 1, 1], [], []>} : vector<8x8xbf16>, vector<8x8xbf16>, vector<8x8xf32> -> vector<8x8xf32>
    %1164 = tpu.concatenate %1106, %1125, %1144, %1163 in 1 : vector<8x8xf32>, vector<8x8xf32>, vector<8x8xf32>, vector<8x8xf32> -> vector<8x32xf32>
    %1165 = tpu.concatenate %1084, %1164 in 0 : vector<8x32xf32>, vector<8x32xf32> -> vector<16x32xf32>
    %1166 = arith.truncf %1165 : vector<16x32xf32> to vector<16x32xbf16>
    %cst_368 = arith.constant dense<0.000000e+00> : vector<16x32xf32>
    %1167 = tpu.matmul %1166, %988, %cst_368 {dimension_numbers = #tpu.dot_dimension_numbers<[1], [0], [0], [1], [0, 0, 1, 1], [], []>} : vector<16x32xbf16>, vector<32x32xbf16>, vector<16x32xf32> -> vector<16x32xf32>
    %1168 = arith.addf %982, %1167 : vector<16x32xf32>
    %1169 = vector.broadcast %990 : vector<1x32xf32> to vector<16x32xf32>
    %1170 = arith.addf %1168, %1169 : vector<16x32xf32>
    %cst_369 = arith.constant dense<0.000000e+00> : vector<16xf32>
    %1171 = vector.multi_reduction <add>, %1170, %cst_369 [1] : vector<16x32xf32> to vector<16xf32>
    %1172 = vector.shape_cast %1171 : vector<16xf32> to vector<16x1xf32>
    %cst_370 = arith.constant 3.200000e+01 : f32
    %1173 = vector.broadcast %cst_370 : f32 to vector<16x1xf32>
    %1174 = arith.divf %1172, %1173 : vector<16x1xf32>
    %1175 = vector.broadcast %1174 : vector<16x1xf32> to vector<16x32xf32>
    %1176 = arith.subf %1170, %1175 : vector<16x32xf32>
    %1177 = arith.mulf %1176, %1176 : vector<16x32xf32>
    %cst_371 = arith.constant dense<0.000000e+00> : vector<16xf32>
    %1178 = vector.multi_reduction <add>, %1177, %cst_371 [1] : vector<16x32xf32> to vector<16xf32>
    %1179 = vector.shape_cast %1178 : vector<16xf32> to vector<16x1xf32>
    %cst_372 = arith.constant 3.100000e+01 : f32
    %1180 = vector.broadcast %cst_372 : f32 to vector<16x1xf32>
    %1181 = arith.divf %1179, %1180 : vector<16x1xf32>
    %1182 = math.sqrt %1181 : vector<16x1xf32>
    %cst_373 = arith.constant 9.99999997E-7 : f32
    %1183 = vector.broadcast %cst_373 : f32 to vector<16x1xf32>
    %1184 = arith.addf %1182, %1183 : vector<16x1xf32>
    %1185 = tpu.reciprocal %1184 {approx = true} : vector<16x1xf32> -> vector<16x1xf32>
    %1186 = vector.broadcast %1174 : vector<16x1xf32> to vector<16x32xf32>
    %1187 = arith.subf %1170, %1186 : vector<16x32xf32>
    %1188 = vector.broadcast %992 : vector<1x32xf32> to vector<16x32xf32>
    %1189 = arith.mulf %1188, %1187 : vector<16x32xf32>
    %1190 = vector.broadcast %1185 : vector<16x1xf32> to vector<16x32xf32>
    %1191 = arith.mulf %1189, %1190 : vector<16x32xf32>
    %1192 = vector.broadcast %994 : vector<1x32xf32> to vector<16x32xf32>
    %1193 = arith.addf %1191, %1192 : vector<16x32xf32>
    %c1_374 = arith.constant 1 : index
    %c0_375 = arith.constant 0 : index
    %c0_376 = arith.constant 0 : index
    %1194 = vector.load %arg17[%c1_374, %c0_375, %c0_376] : memref<2x32x96xbf16, #tpu.memory_space<vmem>>, vector<1x32x96xbf16>
    %1195 = vector.shape_cast %1194 : vector<1x32x96xbf16> to vector<32x96xbf16>
    %c1_377 = arith.constant 1 : index
    %c0_378 = arith.constant 0 : index
    %c0_379 = arith.constant 0 : index
    %1196 = vector.load %arg18[%c1_377, %c0_378, %c0_379] : memref<2x1x96xf32, #tpu.memory_space<vmem>>, vector<1x1x96xf32>
    %1197 = vector.shape_cast %1196 : vector<1x1x96xf32> to vector<1x96xf32>
    %c1_380 = arith.constant 1 : index
    %c0_381 = arith.constant 0 : index
    %c0_382 = arith.constant 0 : index
    %1198 = vector.load %arg19[%c1_380, %c0_381, %c0_382] : memref<2x32x32xbf16, #tpu.memory_space<vmem>>, vector<1x32x32xbf16>
    %1199 = vector.shape_cast %1198 : vector<1x32x32xbf16> to vector<32x32xbf16>
    %c1_383 = arith.constant 1 : index
    %c0_384 = arith.constant 0 : index
    %c0_385 = arith.constant 0 : index
    %1200 = vector.load %arg20[%c1_383, %c0_384, %c0_385] : memref<2x1x32xf32, #tpu.memory_space<vmem>>, vector<1x1x32xf32>
    %1201 = vector.shape_cast %1200 : vector<1x1x32xf32> to vector<1x32xf32>
    %c1_386 = arith.constant 1 : index
    %c0_387 = arith.constant 0 : index
    %c0_388 = arith.constant 0 : index
    %1202 = vector.load %arg21[%c1_386, %c0_387, %c0_388] : memref<2x1x32xf32, #tpu.memory_space<vmem>>, vector<1x1x32xf32>
    %1203 = vector.shape_cast %1202 : vector<1x1x32xf32> to vector<1x32xf32>
    %c1_389 = arith.constant 1 : index
    %c0_390 = arith.constant 0 : index
    %c0_391 = arith.constant 0 : index
    %1204 = vector.load %arg22[%c1_389, %c0_390, %c0_391] : memref<2x1x32xf32, #tpu.memory_space<vmem>>, vector<1x1x32xf32>
    %1205 = vector.shape_cast %1204 : vector<1x1x32xf32> to vector<1x32xf32>
    %1206 = vector.extract_strided_slice %1195 {offsets = [0, 0], sizes = [32, 32], strides = [1, 1]} : vector<32x96xbf16> to vector<32x32xbf16>
    %1207 = arith.truncf %1193 : vector<16x32xf32> to vector<16x32xbf16>
    %cst_392 = arith.constant dense<0.000000e+00> : vector<16x32xf32>
    %1208 = tpu.matmul %1207, %1206, %cst_392 {dimension_numbers = #tpu.dot_dimension_numbers<[1], [0], [0], [1], [0, 0, 1, 1], [], []>} : vector<16x32xbf16>, vector<32x32xbf16>, vector<16x32xf32> -> vector<16x32xf32>
    %1209 = vector.extract_strided_slice %1197 {offsets = [0, 0], sizes = [1, 32], strides = [1, 1]} : vector<1x96xf32> to vector<1x32xf32>
    %1210 = vector.broadcast %1209 : vector<1x32xf32> to vector<16x32xf32>
    %1211 = arith.addf %1208, %1210 : vector<16x32xf32>
    %1212 = vector.extract_strided_slice %1195 {offsets = [0, 32], sizes = [32, 64], strides = [1, 1]} : vector<32x96xbf16> to vector<32x64xbf16>
    %1213 = arith.truncf %488 : vector<16x32xf32> to vector<16x32xbf16>
    %cst_393 = arith.constant dense<0.000000e+00> : vector<16x64xf32>
    %1214 = tpu.matmul %1213, %1212, %cst_393 {dimension_numbers = #tpu.dot_dimension_numbers<[1], [0], [0], [1], [0, 0, 1, 1], [], []>} : vector<16x32xbf16>, vector<32x64xbf16>, vector<16x64xf32> -> vector<16x64xf32>
    %1215 = vector.extract_strided_slice %1197 {offsets = [0, 32], sizes = [1, 64], strides = [1, 1]} : vector<1x96xf32> to vector<1x64xf32>
    %1216 = vector.broadcast %1215 : vector<1x64xf32> to vector<16x64xf32>
    %1217 = arith.addf %1214, %1216 : vector<16x64xf32>
    %1218 = vector.extract_strided_slice %1217 {offsets = [0, 0], sizes = [16, 32], strides = [1, 1]} : vector<16x64xf32> to vector<16x32xf32>
    %1219 = vector.extract_strided_slice %1217 {offsets = [0, 32], sizes = [16, 32], strides = [1, 1]} : vector<16x64xf32> to vector<16x32xf32>
    %1220 = arith.truncf %1211 : vector<16x32xf32> to vector<16x32xbf16>
    %1221 = arith.truncf %1218 : vector<16x32xf32> to vector<16x32xbf16>
    %1222 = arith.truncf %1219 : vector<16x32xf32> to vector<16x32xbf16>
    %1223 = vector.extract_strided_slice %1220 {offsets = [0, 0], sizes = [8, 32], strides = [1, 1]} : vector<16x32xbf16> to vector<8x32xbf16>
    %1224 = vector.extract_strided_slice %1221 {offsets = [0, 0], sizes = [8, 32], strides = [1, 1]} : vector<16x32xbf16> to vector<8x32xbf16>
    %1225 = vector.extract_strided_slice %1222 {offsets = [0, 0], sizes = [8, 32], strides = [1, 1]} : vector<16x32xbf16> to vector<8x32xbf16>
    %1226 = vector.extract_strided_slice %1223 {offsets = [0, 0], sizes = [8, 8], strides = [1, 1]} : vector<8x32xbf16> to vector<8x8xbf16>
    %1227 = vector.extract_strided_slice %1224 {offsets = [0, 0], sizes = [8, 8], strides = [1, 1]} : vector<8x32xbf16> to vector<8x8xbf16>
    %cst_394 = arith.constant dense<0.000000e+00> : vector<8x8xf32>
    %1228 = tpu.matmul %1226, %1227, %cst_394 {dimension_numbers = #tpu.dot_dimension_numbers<[1], [1], [0], [0], [0, 0, 1, 0], [], []>} : vector<8x8xbf16>, vector<8x8xbf16>, vector<8x8xf32> -> vector<8x8xf32>
    %cst_395 = arith.constant 0.353553385 : f32
    %1229 = vector.broadcast %cst_395 : f32 to vector<8x8xf32>
    %1230 = arith.mulf %1228, %1229 : vector<8x8xf32>
    %1231 = vector.broadcast %16 : vector<1x8xf32> to vector<8x8xf32>
    %1232 = arith.addf %1230, %1231 : vector<8x8xf32>
    %cst_396 = arith.constant dense<0xFF800000> : vector<8xf32>
    %1233 = vector.multi_reduction <maximumf>, %1232, %cst_396 [1] : vector<8x8xf32> to vector<8xf32>
    %1234 = vector.shape_cast %1233 : vector<8xf32> to vector<8x1xf32>
    %1235 = vector.broadcast %1234 : vector<8x1xf32> to vector<8x8xf32>
    %1236 = arith.subf %1232, %1235 : vector<8x8xf32>
    %1237 = math.exp %1236 : vector<8x8xf32>
    %cst_397 = arith.constant dense<0.000000e+00> : vector<8xf32>
    %1238 = vector.multi_reduction <add>, %1237, %cst_397 [1] : vector<8x8xf32> to vector<8xf32>
    %1239 = vector.shape_cast %1238 : vector<8xf32> to vector<8x1xf32>
    %1240 = tpu.reciprocal %1239 {approx = true} : vector<8x1xf32> -> vector<8x1xf32>
    %1241 = vector.broadcast %1240 : vector<8x1xf32> to vector<8x8xf32>
    %1242 = arith.mulf %1237, %1241 : vector<8x8xf32>
    %1243 = vector.extract_strided_slice %1225 {offsets = [0, 0], sizes = [8, 8], strides = [1, 1]} : vector<8x32xbf16> to vector<8x8xbf16>
    %1244 = arith.truncf %1242 : vector<8x8xf32> to vector<8x8xbf16>
    %cst_398 = arith.constant dense<0.000000e+00> : vector<8x8xf32>
    %1245 = tpu.matmul %1244, %1243, %cst_398 {dimension_numbers = #tpu.dot_dimension_numbers<[1], [0], [0], [1], [0, 0, 1, 1], [], []>} : vector<8x8xbf16>, vector<8x8xbf16>, vector<8x8xf32> -> vector<8x8xf32>
    %1246 = vector.extract_strided_slice %1223 {offsets = [0, 8], sizes = [8, 8], strides = [1, 1]} : vector<8x32xbf16> to vector<8x8xbf16>
    %1247 = vector.extract_strided_slice %1224 {offsets = [0, 8], sizes = [8, 8], strides = [1, 1]} : vector<8x32xbf16> to vector<8x8xbf16>
    %cst_399 = arith.constant dense<0.000000e+00> : vector<8x8xf32>
    %1248 = tpu.matmul %1246, %1247, %cst_399 {dimension_numbers = #tpu.dot_dimension_numbers<[1], [1], [0], [0], [0, 0, 1, 0], [], []>} : vector<8x8xbf16>, vector<8x8xbf16>, vector<8x8xf32> -> vector<8x8xf32>
    %cst_400 = arith.constant 0.353553385 : f32
    %1249 = vector.broadcast %cst_400 : f32 to vector<8x8xf32>
    %1250 = arith.mulf %1248, %1249 : vector<8x8xf32>
    %1251 = vector.broadcast %16 : vector<1x8xf32> to vector<8x8xf32>
    %1252 = arith.addf %1250, %1251 : vector<8x8xf32>
    %cst_401 = arith.constant dense<0xFF800000> : vector<8xf32>
    %1253 = vector.multi_reduction <maximumf>, %1252, %cst_401 [1] : vector<8x8xf32> to vector<8xf32>
    %1254 = vector.shape_cast %1253 : vector<8xf32> to vector<8x1xf32>
    %1255 = vector.broadcast %1254 : vector<8x1xf32> to vector<8x8xf32>
    %1256 = arith.subf %1252, %1255 : vector<8x8xf32>
    %1257 = math.exp %1256 : vector<8x8xf32>
    %cst_402 = arith.constant dense<0.000000e+00> : vector<8xf32>
    %1258 = vector.multi_reduction <add>, %1257, %cst_402 [1] : vector<8x8xf32> to vector<8xf32>
    %1259 = vector.shape_cast %1258 : vector<8xf32> to vector<8x1xf32>
    %1260 = tpu.reciprocal %1259 {approx = true} : vector<8x1xf32> -> vector<8x1xf32>
    %1261 = vector.broadcast %1260 : vector<8x1xf32> to vector<8x8xf32>
    %1262 = arith.mulf %1257, %1261 : vector<8x8xf32>
    %1263 = vector.extract_strided_slice %1225 {offsets = [0, 8], sizes = [8, 8], strides = [1, 1]} : vector<8x32xbf16> to vector<8x8xbf16>
    %1264 = arith.truncf %1262 : vector<8x8xf32> to vector<8x8xbf16>
    %cst_403 = arith.constant dense<0.000000e+00> : vector<8x8xf32>
    %1265 = tpu.matmul %1264, %1263, %cst_403 {dimension_numbers = #tpu.dot_dimension_numbers<[1], [0], [0], [1], [0, 0, 1, 1], [], []>} : vector<8x8xbf16>, vector<8x8xbf16>, vector<8x8xf32> -> vector<8x8xf32>
    %1266 = vector.extract_strided_slice %1223 {offsets = [0, 16], sizes = [8, 8], strides = [1, 1]} : vector<8x32xbf16> to vector<8x8xbf16>
    %1267 = vector.extract_strided_slice %1224 {offsets = [0, 16], sizes = [8, 8], strides = [1, 1]} : vector<8x32xbf16> to vector<8x8xbf16>
    %cst_404 = arith.constant dense<0.000000e+00> : vector<8x8xf32>
    %1268 = tpu.matmul %1266, %1267, %cst_404 {dimension_numbers = #tpu.dot_dimension_numbers<[1], [1], [0], [0], [0, 0, 1, 0], [], []>} : vector<8x8xbf16>, vector<8x8xbf16>, vector<8x8xf32> -> vector<8x8xf32>
    %cst_405 = arith.constant 0.353553385 : f32
    %1269 = vector.broadcast %cst_405 : f32 to vector<8x8xf32>
    %1270 = arith.mulf %1268, %1269 : vector<8x8xf32>
    %1271 = vector.broadcast %16 : vector<1x8xf32> to vector<8x8xf32>
    %1272 = arith.addf %1270, %1271 : vector<8x8xf32>
    %cst_406 = arith.constant dense<0xFF800000> : vector<8xf32>
    %1273 = vector.multi_reduction <maximumf>, %1272, %cst_406 [1] : vector<8x8xf32> to vector<8xf32>
    %1274 = vector.shape_cast %1273 : vector<8xf32> to vector<8x1xf32>
    %1275 = vector.broadcast %1274 : vector<8x1xf32> to vector<8x8xf32>
    %1276 = arith.subf %1272, %1275 : vector<8x8xf32>
    %1277 = math.exp %1276 : vector<8x8xf32>
    %cst_407 = arith.constant dense<0.000000e+00> : vector<8xf32>
    %1278 = vector.multi_reduction <add>, %1277, %cst_407 [1] : vector<8x8xf32> to vector<8xf32>
    %1279 = vector.shape_cast %1278 : vector<8xf32> to vector<8x1xf32>
    %1280 = tpu.reciprocal %1279 {approx = true} : vector<8x1xf32> -> vector<8x1xf32>
    %1281 = vector.broadcast %1280 : vector<8x1xf32> to vector<8x8xf32>
    %1282 = arith.mulf %1277, %1281 : vector<8x8xf32>
    %1283 = vector.extract_strided_slice %1225 {offsets = [0, 16], sizes = [8, 8], strides = [1, 1]} : vector<8x32xbf16> to vector<8x8xbf16>
    %1284 = arith.truncf %1282 : vector<8x8xf32> to vector<8x8xbf16>
    %cst_408 = arith.constant dense<0.000000e+00> : vector<8x8xf32>
    %1285 = tpu.matmul %1284, %1283, %cst_408 {dimension_numbers = #tpu.dot_dimension_numbers<[1], [0], [0], [1], [0, 0, 1, 1], [], []>} : vector<8x8xbf16>, vector<8x8xbf16>, vector<8x8xf32> -> vector<8x8xf32>
    %1286 = vector.extract_strided_slice %1223 {offsets = [0, 24], sizes = [8, 8], strides = [1, 1]} : vector<8x32xbf16> to vector<8x8xbf16>
    %1287 = vector.extract_strided_slice %1224 {offsets = [0, 24], sizes = [8, 8], strides = [1, 1]} : vector<8x32xbf16> to vector<8x8xbf16>
    %cst_409 = arith.constant dense<0.000000e+00> : vector<8x8xf32>
    %1288 = tpu.matmul %1286, %1287, %cst_409 {dimension_numbers = #tpu.dot_dimension_numbers<[1], [1], [0], [0], [0, 0, 1, 0], [], []>} : vector<8x8xbf16>, vector<8x8xbf16>, vector<8x8xf32> -> vector<8x8xf32>
    %cst_410 = arith.constant 0.353553385 : f32
    %1289 = vector.broadcast %cst_410 : f32 to vector<8x8xf32>
    %1290 = arith.mulf %1288, %1289 : vector<8x8xf32>
    %1291 = vector.broadcast %16 : vector<1x8xf32> to vector<8x8xf32>
    %1292 = arith.addf %1290, %1291 : vector<8x8xf32>
    %cst_411 = arith.constant dense<0xFF800000> : vector<8xf32>
    %1293 = vector.multi_reduction <maximumf>, %1292, %cst_411 [1] : vector<8x8xf32> to vector<8xf32>
    %1294 = vector.shape_cast %1293 : vector<8xf32> to vector<8x1xf32>
    %1295 = vector.broadcast %1294 : vector<8x1xf32> to vector<8x8xf32>
    %1296 = arith.subf %1292, %1295 : vector<8x8xf32>
    %1297 = math.exp %1296 : vector<8x8xf32>
    %cst_412 = arith.constant dense<0.000000e+00> : vector<8xf32>
    %1298 = vector.multi_reduction <add>, %1297, %cst_412 [1] : vector<8x8xf32> to vector<8xf32>
    %1299 = vector.shape_cast %1298 : vector<8xf32> to vector<8x1xf32>
    %1300 = tpu.reciprocal %1299 {approx = true} : vector<8x1xf32> -> vector<8x1xf32>
    %1301 = vector.broadcast %1300 : vector<8x1xf32> to vector<8x8xf32>
    %1302 = arith.mulf %1297, %1301 : vector<8x8xf32>
    %1303 = vector.extract_strided_slice %1225 {offsets = [0, 24], sizes = [8, 8], strides = [1, 1]} : vector<8x32xbf16> to vector<8x8xbf16>
    %1304 = arith.truncf %1302 : vector<8x8xf32> to vector<8x8xbf16>
    %cst_413 = arith.constant dense<0.000000e+00> : vector<8x8xf32>
    %1305 = tpu.matmul %1304, %1303, %cst_413 {dimension_numbers = #tpu.dot_dimension_numbers<[1], [0], [0], [1], [0, 0, 1, 1], [], []>} : vector<8x8xbf16>, vector<8x8xbf16>, vector<8x8xf32> -> vector<8x8xf32>
    %1306 = tpu.concatenate %1245, %1265, %1285, %1305 in 1 : vector<8x8xf32>, vector<8x8xf32>, vector<8x8xf32>, vector<8x8xf32> -> vector<8x32xf32>
    %1307 = vector.extract_strided_slice %1220 {offsets = [8, 0], sizes = [8, 32], strides = [1, 1]} : vector<16x32xbf16> to vector<8x32xbf16>
    %1308 = vector.extract_strided_slice %1221 {offsets = [8, 0], sizes = [8, 32], strides = [1, 1]} : vector<16x32xbf16> to vector<8x32xbf16>
    %1309 = vector.extract_strided_slice %1222 {offsets = [8, 0], sizes = [8, 32], strides = [1, 1]} : vector<16x32xbf16> to vector<8x32xbf16>
    %1310 = vector.extract_strided_slice %1307 {offsets = [0, 0], sizes = [8, 8], strides = [1, 1]} : vector<8x32xbf16> to vector<8x8xbf16>
    %1311 = vector.extract_strided_slice %1308 {offsets = [0, 0], sizes = [8, 8], strides = [1, 1]} : vector<8x32xbf16> to vector<8x8xbf16>
    %cst_414 = arith.constant dense<0.000000e+00> : vector<8x8xf32>
    %1312 = tpu.matmul %1310, %1311, %cst_414 {dimension_numbers = #tpu.dot_dimension_numbers<[1], [1], [0], [0], [0, 0, 1, 0], [], []>} : vector<8x8xbf16>, vector<8x8xbf16>, vector<8x8xf32> -> vector<8x8xf32>
    %cst_415 = arith.constant 0.353553385 : f32
    %1313 = vector.broadcast %cst_415 : f32 to vector<8x8xf32>
    %1314 = arith.mulf %1312, %1313 : vector<8x8xf32>
    %1315 = vector.broadcast %38 : vector<1x8xf32> to vector<8x8xf32>
    %1316 = arith.addf %1314, %1315 : vector<8x8xf32>
    %cst_416 = arith.constant dense<0xFF800000> : vector<8xf32>
    %1317 = vector.multi_reduction <maximumf>, %1316, %cst_416 [1] : vector<8x8xf32> to vector<8xf32>
    %1318 = vector.shape_cast %1317 : vector<8xf32> to vector<8x1xf32>
    %1319 = vector.broadcast %1318 : vector<8x1xf32> to vector<8x8xf32>
    %1320 = arith.subf %1316, %1319 : vector<8x8xf32>
    %1321 = math.exp %1320 : vector<8x8xf32>
    %cst_417 = arith.constant dense<0.000000e+00> : vector<8xf32>
    %1322 = vector.multi_reduction <add>, %1321, %cst_417 [1] : vector<8x8xf32> to vector<8xf32>
    %1323 = vector.shape_cast %1322 : vector<8xf32> to vector<8x1xf32>
    %1324 = tpu.reciprocal %1323 {approx = true} : vector<8x1xf32> -> vector<8x1xf32>
    %1325 = vector.broadcast %1324 : vector<8x1xf32> to vector<8x8xf32>
    %1326 = arith.mulf %1321, %1325 : vector<8x8xf32>
    %1327 = vector.extract_strided_slice %1309 {offsets = [0, 0], sizes = [8, 8], strides = [1, 1]} : vector<8x32xbf16> to vector<8x8xbf16>
    %1328 = arith.truncf %1326 : vector<8x8xf32> to vector<8x8xbf16>
    %cst_418 = arith.constant dense<0.000000e+00> : vector<8x8xf32>
    %1329 = tpu.matmul %1328, %1327, %cst_418 {dimension_numbers = #tpu.dot_dimension_numbers<[1], [0], [0], [1], [0, 0, 1, 1], [], []>} : vector<8x8xbf16>, vector<8x8xbf16>, vector<8x8xf32> -> vector<8x8xf32>
    %1330 = vector.extract_strided_slice %1307 {offsets = [0, 8], sizes = [8, 8], strides = [1, 1]} : vector<8x32xbf16> to vector<8x8xbf16>
    %1331 = vector.extract_strided_slice %1308 {offsets = [0, 8], sizes = [8, 8], strides = [1, 1]} : vector<8x32xbf16> to vector<8x8xbf16>
    %cst_419 = arith.constant dense<0.000000e+00> : vector<8x8xf32>
    %1332 = tpu.matmul %1330, %1331, %cst_419 {dimension_numbers = #tpu.dot_dimension_numbers<[1], [1], [0], [0], [0, 0, 1, 0], [], []>} : vector<8x8xbf16>, vector<8x8xbf16>, vector<8x8xf32> -> vector<8x8xf32>
    %cst_420 = arith.constant 0.353553385 : f32
    %1333 = vector.broadcast %cst_420 : f32 to vector<8x8xf32>
    %1334 = arith.mulf %1332, %1333 : vector<8x8xf32>
    %1335 = vector.broadcast %38 : vector<1x8xf32> to vector<8x8xf32>
    %1336 = arith.addf %1334, %1335 : vector<8x8xf32>
    %cst_421 = arith.constant dense<0xFF800000> : vector<8xf32>
    %1337 = vector.multi_reduction <maximumf>, %1336, %cst_421 [1] : vector<8x8xf32> to vector<8xf32>
    %1338 = vector.shape_cast %1337 : vector<8xf32> to vector<8x1xf32>
    %1339 = vector.broadcast %1338 : vector<8x1xf32> to vector<8x8xf32>
    %1340 = arith.subf %1336, %1339 : vector<8x8xf32>
    %1341 = math.exp %1340 : vector<8x8xf32>
    %cst_422 = arith.constant dense<0.000000e+00> : vector<8xf32>
    %1342 = vector.multi_reduction <add>, %1341, %cst_422 [1] : vector<8x8xf32> to vector<8xf32>
    %1343 = vector.shape_cast %1342 : vector<8xf32> to vector<8x1xf32>
    %1344 = tpu.reciprocal %1343 {approx = true} : vector<8x1xf32> -> vector<8x1xf32>
    %1345 = vector.broadcast %1344 : vector<8x1xf32> to vector<8x8xf32>
    %1346 = arith.mulf %1341, %1345 : vector<8x8xf32>
    %1347 = vector.extract_strided_slice %1309 {offsets = [0, 8], sizes = [8, 8], strides = [1, 1]} : vector<8x32xbf16> to vector<8x8xbf16>
    %1348 = arith.truncf %1346 : vector<8x8xf32> to vector<8x8xbf16>
    %cst_423 = arith.constant dense<0.000000e+00> : vector<8x8xf32>
    %1349 = tpu.matmul %1348, %1347, %cst_423 {dimension_numbers = #tpu.dot_dimension_numbers<[1], [0], [0], [1], [0, 0, 1, 1], [], []>} : vector<8x8xbf16>, vector<8x8xbf16>, vector<8x8xf32> -> vector<8x8xf32>
    %1350 = vector.extract_strided_slice %1307 {offsets = [0, 16], sizes = [8, 8], strides = [1, 1]} : vector<8x32xbf16> to vector<8x8xbf16>
    %1351 = vector.extract_strided_slice %1308 {offsets = [0, 16], sizes = [8, 8], strides = [1, 1]} : vector<8x32xbf16> to vector<8x8xbf16>
    %cst_424 = arith.constant dense<0.000000e+00> : vector<8x8xf32>
    %1352 = tpu.matmul %1350, %1351, %cst_424 {dimension_numbers = #tpu.dot_dimension_numbers<[1], [1], [0], [0], [0, 0, 1, 0], [], []>} : vector<8x8xbf16>, vector<8x8xbf16>, vector<8x8xf32> -> vector<8x8xf32>
    %cst_425 = arith.constant 0.353553385 : f32
    %1353 = vector.broadcast %cst_425 : f32 to vector<8x8xf32>
    %1354 = arith.mulf %1352, %1353 : vector<8x8xf32>
    %1355 = vector.broadcast %38 : vector<1x8xf32> to vector<8x8xf32>
    %1356 = arith.addf %1354, %1355 : vector<8x8xf32>
    %cst_426 = arith.constant dense<0xFF800000> : vector<8xf32>
    %1357 = vector.multi_reduction <maximumf>, %1356, %cst_426 [1] : vector<8x8xf32> to vector<8xf32>
    %1358 = vector.shape_cast %1357 : vector<8xf32> to vector<8x1xf32>
    %1359 = vector.broadcast %1358 : vector<8x1xf32> to vector<8x8xf32>
    %1360 = arith.subf %1356, %1359 : vector<8x8xf32>
    %1361 = math.exp %1360 : vector<8x8xf32>
    %cst_427 = arith.constant dense<0.000000e+00> : vector<8xf32>
    %1362 = vector.multi_reduction <add>, %1361, %cst_427 [1] : vector<8x8xf32> to vector<8xf32>
    %1363 = vector.shape_cast %1362 : vector<8xf32> to vector<8x1xf32>
    %1364 = tpu.reciprocal %1363 {approx = true} : vector<8x1xf32> -> vector<8x1xf32>
    %1365 = vector.broadcast %1364 : vector<8x1xf32> to vector<8x8xf32>
    %1366 = arith.mulf %1361, %1365 : vector<8x8xf32>
    %1367 = vector.extract_strided_slice %1309 {offsets = [0, 16], sizes = [8, 8], strides = [1, 1]} : vector<8x32xbf16> to vector<8x8xbf16>
    %1368 = arith.truncf %1366 : vector<8x8xf32> to vector<8x8xbf16>
    %cst_428 = arith.constant dense<0.000000e+00> : vector<8x8xf32>
    %1369 = tpu.matmul %1368, %1367, %cst_428 {dimension_numbers = #tpu.dot_dimension_numbers<[1], [0], [0], [1], [0, 0, 1, 1], [], []>} : vector<8x8xbf16>, vector<8x8xbf16>, vector<8x8xf32> -> vector<8x8xf32>
    %1370 = vector.extract_strided_slice %1307 {offsets = [0, 24], sizes = [8, 8], strides = [1, 1]} : vector<8x32xbf16> to vector<8x8xbf16>
    %1371 = vector.extract_strided_slice %1308 {offsets = [0, 24], sizes = [8, 8], strides = [1, 1]} : vector<8x32xbf16> to vector<8x8xbf16>
    %cst_429 = arith.constant dense<0.000000e+00> : vector<8x8xf32>
    %1372 = tpu.matmul %1370, %1371, %cst_429 {dimension_numbers = #tpu.dot_dimension_numbers<[1], [1], [0], [0], [0, 0, 1, 0], [], []>} : vector<8x8xbf16>, vector<8x8xbf16>, vector<8x8xf32> -> vector<8x8xf32>
    %cst_430 = arith.constant 0.353553385 : f32
    %1373 = vector.broadcast %cst_430 : f32 to vector<8x8xf32>
    %1374 = arith.mulf %1372, %1373 : vector<8x8xf32>
    %1375 = vector.broadcast %38 : vector<1x8xf32> to vector<8x8xf32>
    %1376 = arith.addf %1374, %1375 : vector<8x8xf32>
    %cst_431 = arith.constant dense<0xFF800000> : vector<8xf32>
    %1377 = vector.multi_reduction <maximumf>, %1376, %cst_431 [1] : vector<8x8xf32> to vector<8xf32>
    %1378 = vector.shape_cast %1377 : vector<8xf32> to vector<8x1xf32>
    %1379 = vector.broadcast %1378 : vector<8x1xf32> to vector<8x8xf32>
    %1380 = arith.subf %1376, %1379 : vector<8x8xf32>
    %1381 = math.exp %1380 : vector<8x8xf32>
    %cst_432 = arith.constant dense<0.000000e+00> : vector<8xf32>
    %1382 = vector.multi_reduction <add>, %1381, %cst_432 [1] : vector<8x8xf32> to vector<8xf32>
    %1383 = vector.shape_cast %1382 : vector<8xf32> to vector<8x1xf32>
    %1384 = tpu.reciprocal %1383 {approx = true} : vector<8x1xf32> -> vector<8x1xf32>
    %1385 = vector.broadcast %1384 : vector<8x1xf32> to vector<8x8xf32>
    %1386 = arith.mulf %1381, %1385 : vector<8x8xf32>
    %1387 = vector.extract_strided_slice %1309 {offsets = [0, 24], sizes = [8, 8], strides = [1, 1]} : vector<8x32xbf16> to vector<8x8xbf16>
    %1388 = arith.truncf %1386 : vector<8x8xf32> to vector<8x8xbf16>
    %cst_433 = arith.constant dense<0.000000e+00> : vector<8x8xf32>
    %1389 = tpu.matmul %1388, %1387, %cst_433 {dimension_numbers = #tpu.dot_dimension_numbers<[1], [0], [0], [1], [0, 0, 1, 1], [], []>} : vector<8x8xbf16>, vector<8x8xbf16>, vector<8x8xf32> -> vector<8x8xf32>
    %1390 = tpu.concatenate %1329, %1349, %1369, %1389 in 1 : vector<8x8xf32>, vector<8x8xf32>, vector<8x8xf32>, vector<8x8xf32> -> vector<8x32xf32>
    %1391 = tpu.concatenate %1306, %1390 in 0 : vector<8x32xf32>, vector<8x32xf32> -> vector<16x32xf32>
    %1392 = arith.truncf %1391 : vector<16x32xf32> to vector<16x32xbf16>
    %cst_434 = arith.constant dense<0.000000e+00> : vector<16x32xf32>
    %1393 = tpu.matmul %1392, %1199, %cst_434 {dimension_numbers = #tpu.dot_dimension_numbers<[1], [0], [0], [1], [0, 0, 1, 1], [], []>} : vector<16x32xbf16>, vector<32x32xbf16>, vector<16x32xf32> -> vector<16x32xf32>
    %1394 = arith.addf %1193, %1393 : vector<16x32xf32>
    %1395 = vector.broadcast %1201 : vector<1x32xf32> to vector<16x32xf32>
    %1396 = arith.addf %1394, %1395 : vector<16x32xf32>
    %cst_435 = arith.constant dense<0.000000e+00> : vector<16xf32>
    %1397 = vector.multi_reduction <add>, %1396, %cst_435 [1] : vector<16x32xf32> to vector<16xf32>
    %1398 = vector.shape_cast %1397 : vector<16xf32> to vector<16x1xf32>
    %cst_436 = arith.constant 3.200000e+01 : f32
    %1399 = vector.broadcast %cst_436 : f32 to vector<16x1xf32>
    %1400 = arith.divf %1398, %1399 : vector<16x1xf32>
    %1401 = vector.broadcast %1400 : vector<16x1xf32> to vector<16x32xf32>
    %1402 = arith.subf %1396, %1401 : vector<16x32xf32>
    %1403 = arith.mulf %1402, %1402 : vector<16x32xf32>
    %cst_437 = arith.constant dense<0.000000e+00> : vector<16xf32>
    %1404 = vector.multi_reduction <add>, %1403, %cst_437 [1] : vector<16x32xf32> to vector<16xf32>
    %1405 = vector.shape_cast %1404 : vector<16xf32> to vector<16x1xf32>
    %cst_438 = arith.constant 3.100000e+01 : f32
    %1406 = vector.broadcast %cst_438 : f32 to vector<16x1xf32>
    %1407 = arith.divf %1405, %1406 : vector<16x1xf32>
    %1408 = math.sqrt %1407 : vector<16x1xf32>
    %cst_439 = arith.constant 9.99999997E-7 : f32
    %1409 = vector.broadcast %cst_439 : f32 to vector<16x1xf32>
    %1410 = arith.addf %1408, %1409 : vector<16x1xf32>
    %1411 = tpu.reciprocal %1410 {approx = true} : vector<16x1xf32> -> vector<16x1xf32>
    %1412 = vector.broadcast %1400 : vector<16x1xf32> to vector<16x32xf32>
    %1413 = arith.subf %1396, %1412 : vector<16x32xf32>
    %1414 = vector.broadcast %1203 : vector<1x32xf32> to vector<16x32xf32>
    %1415 = arith.mulf %1414, %1413 : vector<16x32xf32>
    %1416 = vector.broadcast %1411 : vector<16x1xf32> to vector<16x32xf32>
    %1417 = arith.mulf %1415, %1416 : vector<16x32xf32>
    %1418 = vector.broadcast %1205 : vector<1x32xf32> to vector<16x32xf32>
    %1419 = arith.addf %1417, %1418 : vector<16x32xf32>
    %c1_440 = arith.constant 1 : index
    %c0_441 = arith.constant 0 : index
    %c0_442 = arith.constant 0 : index
    %1420 = vector.load %arg23[%c1_440, %c0_441, %c0_442] : memref<2x32x128xbf16, #tpu.memory_space<vmem>>, vector<1x32x128xbf16>
    %1421 = vector.shape_cast %1420 : vector<1x32x128xbf16> to vector<32x128xbf16>
    %c1_443 = arith.constant 1 : index
    %c0_444 = arith.constant 0 : index
    %c0_445 = arith.constant 0 : index
    %1422 = vector.load %arg24[%c1_443, %c0_444, %c0_445] : memref<2x1x128xf32, #tpu.memory_space<vmem>>, vector<1x1x128xf32>
    %1423 = vector.shape_cast %1422 : vector<1x1x128xf32> to vector<1x128xf32>
    %c1_446 = arith.constant 1 : index
    %c0_447 = arith.constant 0 : index
    %c0_448 = arith.constant 0 : index
    %1424 = vector.load %arg25[%c1_446, %c0_447, %c0_448] : memref<2x128x32xbf16, #tpu.memory_space<vmem>>, vector<1x128x32xbf16>
    %1425 = vector.shape_cast %1424 : vector<1x128x32xbf16> to vector<128x32xbf16>
    %c1_449 = arith.constant 1 : index
    %c0_450 = arith.constant 0 : index
    %c0_451 = arith.constant 0 : index
    %1426 = vector.load %arg26[%c1_449, %c0_450, %c0_451] : memref<2x1x32xf32, #tpu.memory_space<vmem>>, vector<1x1x32xf32>
    %1427 = vector.shape_cast %1426 : vector<1x1x32xf32> to vector<1x32xf32>
    %c1_452 = arith.constant 1 : index
    %c0_453 = arith.constant 0 : index
    %c0_454 = arith.constant 0 : index
    %1428 = vector.load %arg27[%c1_452, %c0_453, %c0_454] : memref<2x1x32xf32, #tpu.memory_space<vmem>>, vector<1x1x32xf32>
    %1429 = vector.shape_cast %1428 : vector<1x1x32xf32> to vector<1x32xf32>
    %c1_455 = arith.constant 1 : index
    %c0_456 = arith.constant 0 : index
    %c0_457 = arith.constant 0 : index
    %1430 = vector.load %arg28[%c1_455, %c0_456, %c0_457] : memref<2x1x32xf32, #tpu.memory_space<vmem>>, vector<1x1x32xf32>
    %1431 = vector.shape_cast %1430 : vector<1x1x32xf32> to vector<1x32xf32>
    %1432 = arith.truncf %1419 : vector<16x32xf32> to vector<16x32xbf16>
    %cst_458 = arith.constant dense<0.000000e+00> : vector<16x128xf32>
    %1433 = tpu.matmul %1432, %1421, %cst_458 {dimension_numbers = #tpu.dot_dimension_numbers<[1], [0], [0], [1], [0, 0, 1, 1], [], []>} : vector<16x32xbf16>, vector<32x128xbf16>, vector<16x128xf32> -> vector<16x128xf32>
    %1434 = vector.broadcast %1423 : vector<1x128xf32> to vector<16x128xf32>
    %1435 = arith.addf %1433, %1434 : vector<16x128xf32>
    %cst_459 = arith.constant 5.000000e-01 : f32
    %1436 = vector.broadcast %cst_459 : f32 to vector<16x128xf32>
    %1437 = arith.mulf %1436, %1435 : vector<16x128xf32>
    %cst_460 = arith.constant 4.471500e-02 : f32
    %1438 = vector.broadcast %cst_460 : f32 to vector<16x128xf32>
    %1439 = arith.mulf %1438, %1435 : vector<16x128xf32>
    %1440 = arith.mulf %1439, %1435 : vector<16x128xf32>
    %1441 = arith.mulf %1440, %1435 : vector<16x128xf32>
    %1442 = arith.addf %1435, %1441 : vector<16x128xf32>
    %cst_461 = arith.constant 0.797884583 : f32
    %1443 = vector.broadcast %cst_461 : f32 to vector<16x128xf32>
    %1444 = arith.mulf %1443, %1442 : vector<16x128xf32>
    %1445 = math.tanh %1444 : vector<16x128xf32>
    %cst_462 = arith.constant 1.000000e+00 : f32
    %1446 = vector.broadcast %cst_462 : f32 to vector<16x128xf32>
    %1447 = arith.addf %1446, %1445 : vector<16x128xf32>
    %1448 = arith.mulf %1437, %1447 : vector<16x128xf32>
    %1449 = arith.truncf %1448 : vector<16x128xf32> to vector<16x128xbf16>
    %cst_463 = arith.constant dense<0.000000e+00> : vector<16x32xf32>
    %1450 = tpu.matmul %1449, %1425, %cst_463 {dimension_numbers = #tpu.dot_dimension_numbers<[1], [0], [0], [1], [0, 0, 1, 1], [], []>} : vector<16x128xbf16>, vector<128x32xbf16>, vector<16x32xf32> -> vector<16x32xf32>
    %1451 = vector.broadcast %1427 : vector<1x32xf32> to vector<16x32xf32>
    %1452 = arith.addf %1450, %1451 : vector<16x32xf32>
    %1453 = arith.addf %1419, %1452 : vector<16x32xf32>
    %cst_464 = arith.constant dense<0.000000e+00> : vector<16xf32>
    %1454 = vector.multi_reduction <add>, %1453, %cst_464 [1] : vector<16x32xf32> to vector<16xf32>
    %1455 = vector.shape_cast %1454 : vector<16xf32> to vector<16x1xf32>
    %cst_465 = arith.constant 3.200000e+01 : f32
    %1456 = vector.broadcast %cst_465 : f32 to vector<16x1xf32>
    %1457 = arith.divf %1455, %1456 : vector<16x1xf32>
    %1458 = vector.broadcast %1457 : vector<16x1xf32> to vector<16x32xf32>
    %1459 = arith.subf %1453, %1458 : vector<16x32xf32>
    %1460 = arith.mulf %1459, %1459 : vector<16x32xf32>
    %cst_466 = arith.constant dense<0.000000e+00> : vector<16xf32>
    %1461 = vector.multi_reduction <add>, %1460, %cst_466 [1] : vector<16x32xf32> to vector<16xf32>
    %1462 = vector.shape_cast %1461 : vector<16xf32> to vector<16x1xf32>
    %cst_467 = arith.constant 3.100000e+01 : f32
    %1463 = vector.broadcast %cst_467 : f32 to vector<16x1xf32>
    %1464 = arith.divf %1462, %1463 : vector<16x1xf32>
    %1465 = math.sqrt %1464 : vector<16x1xf32>
    %cst_468 = arith.constant 9.99999997E-7 : f32
    %1466 = vector.broadcast %cst_468 : f32 to vector<16x1xf32>
    %1467 = arith.addf %1465, %1466 : vector<16x1xf32>
    %1468 = tpu.reciprocal %1467 {approx = true} : vector<16x1xf32> -> vector<16x1xf32>
    %1469 = vector.broadcast %1457 : vector<16x1xf32> to vector<16x32xf32>
    %1470 = arith.subf %1453, %1469 : vector<16x32xf32>
    %1471 = vector.broadcast %1429 : vector<1x32xf32> to vector<16x32xf32>
    %1472 = arith.mulf %1471, %1470 : vector<16x32xf32>
    %1473 = vector.broadcast %1468 : vector<16x1xf32> to vector<16x32xf32>
    %1474 = arith.mulf %1472, %1473 : vector<16x32xf32>
    %1475 = vector.broadcast %1431 : vector<1x32xf32> to vector<16x32xf32>
    %1476 = arith.addf %1474, %1475 : vector<16x32xf32>
    %c0_469 = arith.constant 0 : index
    %c0_470 = arith.constant 0 : index
    %1477 = vector.load %arg29[%c0_469, %c0_470] : memref<32x128xbf16, #tpu.memory_space<vmem>>, vector<32x128xbf16>
    %1478 = arith.truncf %1476 : vector<16x32xf32> to vector<16x32xbf16>
    %cst_471 = arith.constant dense<0.000000e+00> : vector<16x128xf32>
    %1479 = tpu.matmul %1478, %1477, %cst_471 {dimension_numbers = #tpu.dot_dimension_numbers<[1], [0], [0], [1], [0, 0, 1, 1], [], []>} : vector<16x32xbf16>, vector<32x128xbf16>, vector<16x128xf32> -> vector<16x128xf32>
    %c0_472 = arith.constant 0 : index
    %c0_473 = arith.constant 0 : index
    %1480 = vector.load %arg30[%c0_472, %c0_473] : memref<1x128xf32, #tpu.memory_space<vmem>>, vector<1x128xf32>
    %1481 = vector.broadcast %1480 : vector<1x128xf32> to vector<16x128xf32>
    %1482 = arith.addf %1479, %1481 : vector<16x128xf32>
    %1483 = vector.extract_strided_slice %1482 {offsets = [0, 0], sizes = [8, 128], strides = [1, 1]} : vector<16x128xf32> to vector<8x128xf32>
    %c0_474 = arith.constant 0 : index
    %c0_475 = arith.constant 0 : index
    %c0_476 = arith.constant 0 : index
    %1484 = vector.load %arg31[%c0_474, %c0_475, %c0_476] : memref<2x8x128xf32, #tpu.memory_space<vmem>>, vector<1x8x128xf32>
    %1485 = vector.shape_cast %1484 : vector<1x8x128xf32> to vector<8x128xf32>
    %1486 = vector.shape_cast %1483 : vector<8x128xf32> to vector<1x8x128xf32>
    tpu.vector_store %arg31[%c0_474, %c0_475, %c0_476], %1486 {strides = array<i32>} : memref<2x8x128xf32, #tpu.memory_space<vmem>>, vector<1x8x128xf32>,
    %1487 = vector.extract_strided_slice %1482 {offsets = [8, 0], sizes = [8, 128], strides = [1, 1]} : vector<16x128xf32> to vector<8x128xf32>
    %c1_477 = arith.constant 1 : index
    %c0_478 = arith.constant 0 : index
    %c0_479 = arith.constant 0 : index
    %1488 = vector.load %arg31[%c1_477, %c0_478, %c0_479] : memref<2x8x128xf32, #tpu.memory_space<vmem>>, vector<1x8x128xf32>
    %1489 = vector.shape_cast %1488 : vector<1x8x128xf32> to vector<8x128xf32>
    %1490 = vector.shape_cast %1487 : vector<8x128xf32> to vector<1x8x128xf32>
    tpu.vector_store %arg31[%c1_477, %c0_478, %c0_479], %1490 {strides = array<i32>} : memref<2x8x128xf32, #tpu.memory_space<vmem>>, vector<1x8x128xf32>,
    return
  }
  func.func @transform_0(%arg0: i32, %arg1: memref<2xi32, #tpu.memory_space<smem>>, %arg2: memref<2xi32, #tpu.memory_space<smem>>) -> (i32, i32, i32) {
    %c0_i32 = arith.constant 0 : i32
    %c0_i32_0 = arith.constant 0 : i32
    %c0_i32_1 = arith.constant 0 : i32
    return %arg0, %c0_i32, %c0_i32_0 : i32, i32, i32
  }
  func.func @transform_1(%arg0: i32, %arg1: memref<2xi32, #tpu.memory_space<smem>>, %arg2: memref<2xi32, #tpu.memory_space<smem>>) -> (i32, i32, i32) {
    %c0_i32 = arith.constant 0 : i32
    %c0_i32_0 = arith.constant 0 : i32
    %c0_i32_1 = arith.constant 0 : i32
    return %arg0, %c0_i32, %c0_i32_0 : i32, i32, i32
  }
  func.func @transform_2(%arg0: i32, %arg1: memref<2xi32, #tpu.memory_space<smem>>, %arg2: memref<2xi32, #tpu.memory_space<smem>>) -> (i32, i32, i32) {
    %c0_i32 = arith.constant 0 : i32
    %c0_i32_0 = arith.constant 0 : i32
    %c0_i32_1 = arith.constant 0 : i32
    %c0_i32_2 = arith.constant 0 : i32
    return %c0_i32, %c0_i32_0, %c0_i32_1 : i32, i32, i32
  }
  func.func @transform_3(%arg0: i32, %arg1: memref<2xi32, #tpu.memory_space<smem>>, %arg2: memref<2xi32, #tpu.memory_space<smem>>) -> (i32, i32, i32) {
    %c0_i32 = arith.constant 0 : i32
    %c0_i32_0 = arith.constant 0 : i32
    %c0_i32_1 = arith.constant 0 : i32
    %c0_i32_2 = arith.constant 0 : i32
    return %c0_i32, %c0_i32_0, %c0_i32_1 : i32, i32, i32
  }
  func.func @transform_4(%arg0: i32, %arg1: memref<2xi32, #tpu.memory_space<smem>>, %arg2: memref<2xi32, #tpu.memory_space<smem>>) -> (i32, i32, i32) {
    %c0_i32 = arith.constant 0 : i32
    %c0_i32_0 = arith.constant 0 : i32
    %c0_i32_1 = arith.constant 0 : i32
    %c0_i32_2 = arith.constant 0 : i32
    return %c0_i32, %c0_i32_0, %c0_i32_1 : i32, i32, i32
  }
  func.func @transform_5(%arg0: i32, %arg1: memref<2xi32, #tpu.memory_space<smem>>, %arg2: memref<2xi32, #tpu.memory_space<smem>>) -> (i32, i32, i32) {
    %c0_i32 = arith.constant 0 : i32
    %c0_i32_0 = arith.constant 0 : i32
    %c0_i32_1 = arith.constant 0 : i32
    %c0_i32_2 = arith.constant 0 : i32
    return %c0_i32, %c0_i32_0, %c0_i32_1 : i32, i32, i32
  }
  func.func @transform_6(%arg0: i32, %arg1: memref<2xi32, #tpu.memory_space<smem>>, %arg2: memref<2xi32, #tpu.memory_space<smem>>) -> (i32, i32, i32) {
    %c0_i32 = arith.constant 0 : i32
    %c0_i32_0 = arith.constant 0 : i32
    %c0_i32_1 = arith.constant 0 : i32
    %c0_i32_2 = arith.constant 0 : i32
    return %c0_i32, %c0_i32_0, %c0_i32_1 : i32, i32, i32
  }
  func.func @transform_7(%arg0: i32, %arg1: memref<2xi32, #tpu.memory_space<smem>>, %arg2: memref<2xi32, #tpu.memory_space<smem>>) -> (i32, i32, i32) {
    %c0_i32 = arith.constant 0 : i32
    %c0_i32_0 = arith.constant 0 : i32
    %c0_i32_1 = arith.constant 0 : i32
    %c0_i32_2 = arith.constant 0 : i32
    return %c0_i32, %c0_i32_0, %c0_i32_1 : i32, i32, i32
  }
  func.func @transform_8(%arg0: i32, %arg1: memref<2xi32, #tpu.memory_space<smem>>, %arg2: memref<2xi32, #tpu.memory_space<smem>>) -> (i32, i32, i32) {
    %c0_i32 = arith.constant 0 : i32
    %c0_i32_0 = arith.constant 0 : i32
    %c0_i32_1 = arith.constant 0 : i32
    %c0_i32_2 = arith.constant 0 : i32
    return %c0_i32, %c0_i32_0, %c0_i32_1 : i32, i32, i32
  }
  func.func @transform_9(%arg0: i32, %arg1: memref<2xi32, #tpu.memory_space<smem>>, %arg2: memref<2xi32, #tpu.memory_space<smem>>) -> (i32, i32, i32) {
    %c0_i32 = arith.constant 0 : i32
    %c0_i32_0 = arith.constant 0 : i32
    %c0_i32_1 = arith.constant 0 : i32
    %c0_i32_2 = arith.constant 0 : i32
    return %c0_i32, %c0_i32_0, %c0_i32_1 : i32, i32, i32
  }
  func.func @transform_10(%arg0: i32, %arg1: memref<2xi32, #tpu.memory_space<smem>>, %arg2: memref<2xi32, #tpu.memory_space<smem>>) -> (i32, i32, i32) {
    %c0_i32 = arith.constant 0 : i32
    %c0_i32_0 = arith.constant 0 : i32
    %c0_i32_1 = arith.constant 0 : i32
    %c0_i32_2 = arith.constant 0 : i32
    return %c0_i32, %c0_i32_0, %c0_i32_1 : i32, i32, i32
  }
  func.func @transform_11(%arg0: i32, %arg1: memref<2xi32, #tpu.memory_space<smem>>, %arg2: memref<2xi32, #tpu.memory_space<smem>>) -> (i32, i32, i32) {
    %c0_i32 = arith.constant 0 : i32
    %c0_i32_0 = arith.constant 0 : i32
    %c0_i32_1 = arith.constant 0 : i32
    %c0_i32_2 = arith.constant 0 : i32
    return %c0_i32, %c0_i32_0, %c0_i32_1 : i32, i32, i32
  }
  func.func @transform_12(%arg0: i32, %arg1: memref<2xi32, #tpu.memory_space<smem>>, %arg2: memref<2xi32, #tpu.memory_space<smem>>) -> (i32, i32, i32) {
    %c0_i32 = arith.constant 0 : i32
    %c0_i32_0 = arith.constant 0 : i32
    %c0_i32_1 = arith.constant 0 : i32
    %c0_i32_2 = arith.constant 0 : i32
    return %c0_i32, %c0_i32_0, %c0_i32_1 : i32, i32, i32
  }
  func.func @transform_13(%arg0: i32, %arg1: memref<2xi32, #tpu.memory_space<smem>>, %arg2: memref<2xi32, #tpu.memory_space<smem>>) -> (i32, i32, i32) {
    %c0_i32 = arith.constant 0 : i32
    %c0_i32_0 = arith.constant 0 : i32
    %c0_i32_1 = arith.constant 0 : i32
    %c0_i32_2 = arith.constant 0 : i32
    return %c0_i32, %c0_i32_0, %c0_i32_1 : i32, i32, i32
  }
  func.func @transform_14(%arg0: i32, %arg1: memref<2xi32, #tpu.memory_space<smem>>, %arg2: memref<2xi32, #tpu.memory_space<smem>>) -> (i32, i32, i32) {
    %c0_i32 = arith.constant 0 : i32
    %c0_i32_0 = arith.constant 0 : i32
    %c0_i32_1 = arith.constant 0 : i32
    %c0_i32_2 = arith.constant 0 : i32
    return %c0_i32, %c0_i32_0, %c0_i32_1 : i32, i32, i32
  }
  func.func @transform_15(%arg0: i32, %arg1: memref<2xi32, #tpu.memory_space<smem>>, %arg2: memref<2xi32, #tpu.memory_space<smem>>) -> (i32, i32, i32) {
    %c0_i32 = arith.constant 0 : i32
    %c0_i32_0 = arith.constant 0 : i32
    %c0_i32_1 = arith.constant 0 : i32
    %c0_i32_2 = arith.constant 0 : i32
    return %c0_i32, %c0_i32_0, %c0_i32_1 : i32, i32, i32
  }
  func.func @transform_16(%arg0: i32, %arg1: memref<2xi32, #tpu.memory_space<smem>>, %arg2: memref<2xi32, #tpu.memory_space<smem>>) -> (i32, i32, i32) {
    %c0_i32 = arith.constant 0 : i32
    %c0_i32_0 = arith.constant 0 : i32
    %c0_i32_1 = arith.constant 0 : i32
    %c0_i32_2 = arith.constant 0 : i32
    return %c0_i32, %c0_i32_0, %c0_i32_1 : i32, i32, i32
  }
  func.func @transform_17(%arg0: i32, %arg1: memref<2xi32, #tpu.memory_space<smem>>, %arg2: memref<2xi32, #tpu.memory_space<smem>>) -> (i32, i32, i32) {
    %c0_i32 = arith.constant 0 : i32
    %c0_i32_0 = arith.constant 0 : i32
    %c0_i32_1 = arith.constant 0 : i32
    %c0_i32_2 = arith.constant 0 : i32
    return %c0_i32, %c0_i32_0, %c0_i32_1 : i32, i32, i32
  }
  func.func @transform_18(%arg0: i32, %arg1: memref<2xi32, #tpu.memory_space<smem>>, %arg2: memref<2xi32, #tpu.memory_space<smem>>) -> (i32, i32, i32) {
    %c0_i32 = arith.constant 0 : i32
    %c0_i32_0 = arith.constant 0 : i32
    %c0_i32_1 = arith.constant 0 : i32
    %c0_i32_2 = arith.constant 0 : i32
    return %c0_i32, %c0_i32_0, %c0_i32_1 : i32, i32, i32
  }
  func.func @transform_19(%arg0: i32, %arg1: memref<2xi32, #tpu.memory_space<smem>>, %arg2: memref<2xi32, #tpu.memory_space<smem>>) -> (i32, i32, i32) {
    %c0_i32 = arith.constant 0 : i32
    %c0_i32_0 = arith.constant 0 : i32
    %c0_i32_1 = arith.constant 0 : i32
    %c0_i32_2 = arith.constant 0 : i32
    return %c0_i32, %c0_i32_0, %c0_i32_1 : i32, i32, i32
  }
  func.func @transform_20(%arg0: i32, %arg1: memref<2xi32, #tpu.memory_space<smem>>, %arg2: memref<2xi32, #tpu.memory_space<smem>>) -> (i32, i32, i32) {
    %c0_i32 = arith.constant 0 : i32
    %c0_i32_0 = arith.constant 0 : i32
    %c0_i32_1 = arith.constant 0 : i32
    %c0_i32_2 = arith.constant 0 : i32
    return %c0_i32, %c0_i32_0, %c0_i32_1 : i32, i32, i32
  }
  func.func @transform_21(%arg0: i32, %arg1: memref<2xi32, #tpu.memory_space<smem>>, %arg2: memref<2xi32, #tpu.memory_space<smem>>) -> (i32, i32, i32) {
    %c0_i32 = arith.constant 0 : i32
    %c0_i32_0 = arith.constant 0 : i32
    %c0_i32_1 = arith.constant 0 : i32
    %c0_i32_2 = arith.constant 0 : i32
    return %c0_i32, %c0_i32_0, %c0_i32_1 : i32, i32, i32
  }
  func.func @transform_22(%arg0: i32, %arg1: memref<2xi32, #tpu.memory_space<smem>>, %arg2: memref<2xi32, #tpu.memory_space<smem>>) -> (i32, i32, i32) {
    %c0_i32 = arith.constant 0 : i32
    %c0_i32_0 = arith.constant 0 : i32
    %c0_i32_1 = arith.constant 0 : i32
    %c0_i32_2 = arith.constant 0 : i32
    return %c0_i32, %c0_i32_0, %c0_i32_1 : i32, i32, i32
  }
  func.func @transform_23(%arg0: i32, %arg1: memref<2xi32, #tpu.memory_space<smem>>, %arg2: memref<2xi32, #tpu.memory_space<smem>>) -> (i32, i32, i32) {
    %c0_i32 = arith.constant 0 : i32
    %c0_i32_0 = arith.constant 0 : i32
    %c0_i32_1 = arith.constant 0 : i32
    %c0_i32_2 = arith.constant 0 : i32
    return %c0_i32, %c0_i32_0, %c0_i32_1 : i32, i32, i32
  }
  func.func @transform_24(%arg0: i32, %arg1: memref<2xi32, #tpu.memory_space<smem>>, %arg2: memref<2xi32, #tpu.memory_space<smem>>) -> (i32, i32, i32) {
    %c0_i32 = arith.constant 0 : i32
    %c0_i32_0 = arith.constant 0 : i32
    %c0_i32_1 = arith.constant 0 : i32
    %c0_i32_2 = arith.constant 0 : i32
    return %c0_i32, %c0_i32_0, %c0_i32_1 : i32, i32, i32
  }
  func.func @transform_25(%arg0: i32, %arg1: memref<2xi32, #tpu.memory_space<smem>>, %arg2: memref<2xi32, #tpu.memory_space<smem>>) -> (i32, i32, i32) {
    %c0_i32 = arith.constant 0 : i32
    %c0_i32_0 = arith.constant 0 : i32
    %c0_i32_1 = arith.constant 0 : i32
    %c0_i32_2 = arith.constant 0 : i32
    return %c0_i32, %c0_i32_0, %c0_i32_1 : i32, i32, i32
  }
  func.func @transform_26(%arg0: i32, %arg1: memref<2xi32, #tpu.memory_space<smem>>, %arg2: memref<2xi32, #tpu.memory_space<smem>>) -> (i32, i32) {
    %c0_i32 = arith.constant 0 : i32
    %c0_i32_0 = arith.constant 0 : i32
    %c0_i32_1 = arith.constant 0 : i32
    return %c0_i32, %c0_i32_0 : i32, i32
  }
  func.func @transform_27(%arg0: i32, %arg1: memref<2xi32, #tpu.memory_space<smem>>, %arg2: memref<2xi32, #tpu.memory_space<smem>>) -> (i32, i32) {
    %c0_i32 = arith.constant 0 : i32
    %c0_i32_0 = arith.constant 0 : i32
    %c0_i32_1 = arith.constant 0 : i32
    return %c0_i32, %c0_i32_0 : i32, i32
  }
  func.func @transform_28(%arg0: i32, %arg1: memref<2xi32, #tpu.memory_space<smem>>, %arg2: memref<2xi32, #tpu.memory_space<smem>>) -> (i32, i32, i32) {
    %c0_i32 = arith.constant 0 : i32
    %c0_i32_0 = arith.constant 0 : i32
    %c0_i32_1 = arith.constant 0 : i32
    return %arg0, %c0_i32, %c0_i32_0 : i32, i32, i32
  }
}

</mosaic_0001>

<bundles_post_ra>
// kernel: transformer_forward.1
= control target key start
LH: loop header
LB: loop body
LE: loop exit
PB: predicated region body
PF: predicated region fallthrough
CT: control target
= control target key end

     0   :  { %s9441_s6 = smov 2   ;;  %s9442_s10 = smov 3   ;;  %s11210_s0 = inlined_call_operand.smem [shape: u32[31], index: -1, kind: input, shape index: {}] }
   0x1   :  { %s9500_s5 = sld [smem:[%s11210_s0]]   ;;  %s9443_s14 = smov 4  }
   0x2   :  { %s9505_s9 = sld [smem:[%s11210_s0 + %s9441_s6]]   ;;  %s9444_s18 = smov 5  }
   0x3   :  { %s9510_s13 = sld [smem:[%s11210_s0 + %s9442_s10]]   ;;  %s9445_s22 = smov 6  }
   0x4   :  { %s9515_s17 = sld [smem:[%s11210_s0 + %s9443_s14]]   ;;  %s9446_s26 = smov 7  }
   0x5   :  { %s9520_s21 = sld [smem:[%s11210_s0 + %s9444_s18]]   ;;  %s9447_s30 = smov 8  }
   0x6   :  { %s9525_s25 = sld [smem:[%s11210_s0 + %s9445_s22]]   ;;  %s9448_s4 = smov 9  }
   0x7   :  { %s9530_s29 = sld [smem:[%s11210_s0 + %s9446_s26]]   ;;  %s9449_s10 = smov 10  }
   0x8   :  { %s9535_s3 = sld [smem:[%s11210_s0 + %s9447_s30]]   ;;  %s9450_s15 = smov 11  }
   0x9   :  { %s9540_s8 = sld [smem:[%s11210_s0 + %s9448_s4]]   ;;  %s9451_s20 = smov 12  }
   0xa   :  { %s9545_s14 = sld [smem:[%s11210_s0 + %s9449_s10]]   ;;  %s9452_s26 = smov 13  }
   0xb   :  { %s9550_s19 = sld [smem:[%s11210_s0 + %s9450_s15]]   ;;  %s9453_s1 = smov 14  }
   0xc   :  { %s9555_s24 = sld [smem:[%s11210_s0 + %s9451_s20]]   ;;  %s9454_s7 = smov 15  }
   0xd   :  { %s9560_s30 = sld [smem:[%s11210_s0 + %s9452_s26]]   ;;  %s9455_s15 = smov 16  }
   0xe   :  { %s9565_s6 = sld [smem:[%s11210_s0 + %s9453_s1]]   ;;  %s9456_s22 = smov 17  }
   0xf   :  { %s9570_s12 = sld [smem:[%s11210_s0 + %s9454_s7]]   ;;  %s9457_s28 = smov 18  }
  0x10   :  { %s9575_s20 = sld [smem:[%s11210_s0 + %s9455_s15]]   ;;  %s9458_s7 = smov 19  }
  0x11   :  { %s9580_s27 = sld [smem:[%s11210_s0 + %s9456_s22]]   ;;  %s9459_s15 = smov 20  }
  0x12   :  { %s9585_s4 = sld [smem:[%s11210_s0 + %s9457_s28]]   ;;  %s9460_s22 = smov 21  }
  0x13   :  { %s9461_s28 = smov 22  }
  0x14   :  { %11231 = sst [smem:[#allocation9_spill]] %s9565_s6 }
  0x15   :  { %11232 = sst [smem:[#allocation10_spill]] %s9570_s12 }
  0x16   :  { %s9590_s12 = sld [smem:[%s11210_s0 + %s9458_s7]]   ;;  %s9462_s7 = smov 23  }
  0x17   :  { %11233 = sst [smem:[#allocation11_spill]] %s9580_s27 }
  0x18   :  { %11234 = sst [smem:[#allocation12_spill]] %s9585_s4 }
  0x19   :  { %s9595_s6 = sld [smem:[%s11210_s0 + %s9459_s15]]   ;;  %s9463_s15 = smov 24  }
  0x1a   :  { %s9600_s27 = sld [smem:[%s11210_s0 + %s9460_s22]]   ;;  %s9464_s22 = smov 25  }
  0x1b   :  { %s9605_s4 = sld [smem:[%s11210_s0 + %s9461_s28]]   ;;  %s9465_s28 = smov 26  }
  0x1c   :  { %11235 = sst [smem:[#allocation13_spill]] %s9590_s12 }
  0x1d   :  { %s9610_s16 = sld [smem:[%s11210_s0 + %s9462_s7]]   ;;  %s9466_s7 = smov 27  }
  0x1e   :  { %s9615_s23 = sld [smem:[%s11210_s0 + %s9463_s15]]  }
  0x1f   :  { %11236 = sst [smem:[#allocation14_spill]] %s9595_s6  ;;  %s9467_s6 = smov 28  }
  0x20   :  { %11237 = sst [smem:[#allocation15_spill]] %s9600_s27  ;;  %s9468_s27 = smov 29  }
  0x21   :  { %11238 = sst [smem:[#allocation16_spill]] %s9605_s4  ;;  %s9469_s4 = smov 30  }
  0x22   :  { %s9620_s1 = sld [smem:[%s11210_s0 + %s9464_s22]]  }
  0x23   :  { %11239 = sst [smem:[#allocation17_spill]] %s9610_s16  ;;  %s66_s16 = sshll.u32 %s9500_s5, 4  ;;  %s67_s16 = int_to_ptr.vmem [resolvable:$true] %s66_s16 }
  0x24   :  { %11240 = sst [smem:[#allocation18_spill]] %s9615_s23  ;;  %p9396_p1 = scmp.lt.s32.totalorder %s67_s16, %s67_s16 }
  0x25   :  { %s9625_s10 = sld [smem:[%s11210_s0 + %s9465_s28]]  }
  0x26   :  { %s9630_s12 = sld [smem:[%s11210_s0 + %s9466_s7]]   ;;  %s9391_s7 = scalar_lea.vmem %s67_s16, 16 }
  0x27   :  { %s9635_s23 = sld [smem:[%s11210_s0 + %s9467_s6]]   ;;  %p9392_p0 = scmp.ne.s32.totalorder %s67_s16, %s9391_s7 }
  0x28   :  { %11241 = sst [smem:[#allocation19_spill]] %s9620_s1  ;;  %p9397_p2 = scmp.lt.s32.totalorder %s9391_s7, %s9391_s7 }
  0x29   :  { %s9640_s1 = sld [smem:[%s11210_s0 + %s9468_s27]]  }
  0x2a   :  { %p9398_p3 = por %p9397_p2, %p9396_p1 }
  0x2b   :  { %11242 = sst [smem:[#allocation20_spill]] %s9625_s10 }
  0x2c   :  { %s9645_s10 = sld [smem:[%s11210_s0 + %s9469_s4]]   ;;  %p9399_p4 = pnand %p9398_p3, %p9392_p0 }
  0x2e   :  { %9402 = shalt.err (!%p9399_p4)  }
  0x2f   :  { %s9470_s11 = smov [#allocation3]   ;;  %s9471_s6 = smov 1  }
  0x30   :  { %69 = dma.vmem_to_smem %s67_s16, 16, %s9470_s11, [#allocation2] }
  0x31   :  { %s7643_s27 = sld [smem:[%s11210_s0 + %s9471_s6]]  }
  0x37   :  { %s70_s22 = sshll.u32 %s7643_s27, 4  ;;  %s71_s22 = int_to_ptr.vmem [resolvable:$true] %s70_s22 }
  0x38   :  { %s9403_s26 = scalar_lea.vmem %s71_s22, 16  ;;  %p9408_p6 = scmp.lt.s32.totalorder %s71_s22, %s71_s22 }
  0x39   :  { %p9404_p5 = scmp.ne.s32.totalorder %s71_s22, %s9403_s26  ;;  %p9409_p7 = scmp.lt.s32.totalorder %s9403_s26, %s9403_s26 }
  0x3b   :  { %p9410_p8 = por %p9409_p7, %p9408_p6 }
  0x3d   :  { %p9411_p9 = pnand %p9410_p8, %p9404_p5 }
  0x3f   :  { %9414 = shalt.err (!%p9411_p9)  }
  0x40   :  { %s9472_s5 = smov [#allocation4]  }
  0x41   :  { %73 = dma.vmem_to_smem %s71_s22, 16, %s9472_s5, [#allocation2] }
  0x42   :  { %9437 = dma.done.wait [#allocation2], 32 }
  0x43   :  { %9438 = vsyncadd [#allocation2], 4294967264 }
  0x44   :  { %75 = sfence }
  0x45   :  { %v9081_v0 = vld [vmem:[%s9515_s17] sm:$0xff]   ;;  %v9473_v1 = vmov 0.0   ;;  %v9082_v2 = vld [vmem:[%s9515_s17 + $0x8] sm:$0xff]   ;;  %vm9474_vm0 = vmmov 0   ;;  %vm198_vm1 = vcmask 261120  }
  0x46   :  { %8188 = vmatprep.subr.bf16.mxu1 %v9473_v1  ;;  %8202 = vmatprep.subr.bf16.mxu0 %v9473_v1  ;;  %v9658_v3 = vld [vmem:[%s9505_s9] sm:$0xff]  ;;  %v9661_v4 = vld [vmem:[%s9505_s9 + $0x8] sm:$0xff] }
  0x47   :  { %8189 = vmatpush3.bf16.msra.mxu1 %v9081_v0  ;;  %8192 = vmatprep.mubr.msk.bf16.mxu1 %vm9474_vm0, %v9473_v1  ;;  %v179_v5 = vpack.c.bf16 %v9661_v4, %v9658_v3 }
  0x48   :  { %8190 = vmatprep.subr.bf16.mxu1 %v9473_v1  ;;  %8204 = vmatprep.mubr.msk.bf16.mxu0 %vm9474_vm0, %v9473_v1 }
  0x4b   :  { %8191 = vmatpush3.bf16.msra.mxu1 %v9082_v2 }
  0x4c   :  { %8196 = vmatprep.subr.bf16.mxu1 %v9473_v1 }
  0x4e   :  { %8193 = vmatmul.mubr.msk.bf16.vlgmr.msra.gmra.mrb[0].mxu1 %vm198_vm1, %v179_v5 }
  0x4f   :  { %8198 = vmatprep.mubr.msk.bf16.mxu1 %vm9474_vm0, %v9473_v1 }
  0x50   :  { %76 = vsyncpa [#allocation6], 0  ;;  %v7675_v6 = vld [vmem:[%s9520_s21] ss:$0 sm:$0xff]  ;;  %s9475_s0 = smov 120   ;;  %s9476_s9 = smov 96   ;;  %v134_v37 = vlaneseq }
  0x51   :  { %s9477_s4 = smov 80   ;;  %s9478_s28 = smov 88   ;;  %vm247_vm2 = vcmask 64512   ;;  %vm313_vm5 = vcmask 1043456   ;;  %vm706_vm6 = vcmask 130048   ;;  %vm708_vm7 = vcmask 195584  }
  0x52   :  { %s9479_s2 = smov 72   ;;  %s9480_s16 = smov 112   ;;  %v9749_v38 = vand.u32 127, %v134_v37 }
  0x53   :  { %s9481_s7 = smov 104   ;;  %s139_s11 = sld [smem:[#allocation3]] }
  0x54   :  { %s7673_s15 = sld [smem:[#allocation3 + $0x1]]  ;;  %s9482_s27 = smov 56  }
  0x55   :  { %s9483_s22 = smov 64   ;;  %s9484_s26 = smov 48  }
  0x56   :  { %s11229_s5 = smov 40  }
  0x59   :  { %s141_s6 = ssub.s32 8, %s139_s11  ;;  %s11227_s11 = smov 8  }
  0x5a   :  { %v142_v39 = vstv %s141_s6  ;;  %s154_s18 = ssub.s32 8, %s7673_s15  ;;  %s11225_s6 = smov 16  }
  0x5b   :  { %vm143_vm3 = vcmp.ge.s32.totalorder %v9749_v38, %v142_v39  ;;  %v155_v5 = vstv %s154_s18  ;;  %s11223_s15 = smov 24   ;;  %s11246_s18 = sld [smem:[#allocation12_spill]] }
  0x5c   :  { %v9753_v41 = vsel %vm143_vm3, -1e+30, %v9473_v1  ;;  %vm156_vm4 = vcmp.ge.s32.totalorder %v9749_v38, %v155_v5 }
 0x121   :  { %v236_v7 = vpop.f32.mrb[0].mxu1 }
 0x122   :  { %v8194_v8 = vpop.f32.mrb[1].mxu1  ;;  %v237_v10 = vadd.f32 %v7675_v6, %v236_v7 }
 0x123   :  { %v239_v9 = vpop.f32.mrb[2].mxu1 }
 0x124   :  { %v240_v11 = vadd.f32 %v7675_v6, %v239_v9  ;;  %v8195_v12 = vpop.f32.mrb[3].mxu1 }
 0x126   :  { %v9673_v13 = vpack.c.bf16 %v240_v11, %v237_v10  ;;  %v9777_v10 = vsel %vm156_vm4, -1e+30, %v9473_v1 }
 0x128   :  { %357 = vrot.lane.b32.xlu1 %v9673_v13, %s9475_s0  ;;  %245 = vrot.lane.b32.xlu0 %v9673_v13, %s9476_s9  ;;  %v9688_v14 = vrot.slane %v9673_v13, 4 }
 0x12c   :  { %471 = vrot.lane.b32.xlu1 %v9673_v13, %s9477_s4  ;;  %359 = vrot.lane.b32.xlu0 %v9673_v13, %s9478_s28 }
 0x130   :  { %583 = vrot.lane.b32.xlu1 %v9673_v13, %s9479_s2  ;;  %469 = vrot.lane.b32.xlu0 %v9673_v13, %s9480_s16 }
 0x134   :  { %581 = vrot.lane.b32.xlu0 %v9673_v13, %s9481_s7  ;;  %711 = vrot.lane.b32.xlu1 %v9688_v14, %s9476_s9 }
 0x138   :  { %823 = vrot.lane.b32.xlu0 %v9688_v14, %s9478_s28  ;;  %821 = vrot.lane.b32.xlu1 %v9688_v14, %s9475_s0 }
 0x13c   :  { %935 = vrot.lane.b32.xlu0 %v9688_v14, %s9477_s4  ;;  %933 = vrot.lane.b32.xlu1 %v9688_v14, %s9480_s16 }
 0x140   :  { %1047 = vrot.lane.b32.xlu0 %v9688_v14, %s9479_s2  ;;  %1045 = vrot.lane.b32.xlu1 %v9688_v14, %s9481_s7 }
 0x19a   :  { %v246_v15 = vpop.permute.xlu0 %245  ;;  %v358_v18 = vpop.permute.xlu1 %357 }
 0x19b   :  { %v252_v16 = vsel %vm247_vm2, %v246_v15, 0 }
 0x19c   :  { %8197 = vmatpush3.bf16.xpose.msra.mxu1 %v252_v16 }
 0x19d   :  { %8208 = vmatprep.subr.bf16.mxu1 %v9473_v1 }
 0x19e   :  { %v360_v17 = vpop.permute.xlu0 %359  ;;  %v472_v20 = vpop.permute.xlu1 %471 }
 0x19f   :  { %v365_v19 = vsel %vm247_vm2, %v360_v17, 0  ;;  %v477_v21 = vsel %vm247_vm2, %v472_v20, 0 }
 0x1a2   :  { %v584_v22 = vpop.permute.xlu1 %583  ;;  %v470_v23 = vpop.permute.xlu0 %469 }
 0x1a3   :  { %8199 = vmatmul.mubr.msk.bf16.vlgmr.msra.gmra.mrb[4].mxu1 %vm247_vm2, %v9673_v13  ;;  %v589_v24 = vsel %vm247_vm2, %v584_v22, 0 }
 0x1a4   :  { %8209 = vmatpush3.bf16.xpose.msra.mxu1 %v365_v19  ;;  %8210 = vmatprep.mubr.msk.bf16.mxu1 %vm9474_vm0, %v9473_v1 }
 0x1a5   :  { %8220 = vmatprep.subr.bf16.mxu1 %v9473_v1 }
 0x1a6   :  { %v712_v25 = vpop.permute.xlu1 %711  ;;  %v582_v26 = vpop.permute.xlu0 %581 }
 0x1a7   :  { %v717_v27 = vsel %vm247_vm2, %v712_v25, 0 }
 0x1aa   :  { %v824_v28 = vpop.permute.xlu0 %823  ;;  %v822_v31 = vpop.permute.xlu1 %821 }
 0x1ab   :  { %8211 = vmatmul.mubr.msk.bf16.vlgmr.msra.gmra.mrb[8].mxu1 %vm247_vm2, %v358_v18  ;;  %v829_v29 = vsel %vm247_vm2, %v824_v28, 0 }
 0x1ac   :  { %8221 = vmatpush3.bf16.xpose.msra.mxu1 %v477_v21  ;;  %8222 = vmatprep.mubr.msk.bf16.mxu1 %vm9474_vm0, %v9473_v1 }
 0x1ad   :  { %8232 = vmatprep.subr.bf16.mxu1 %v9473_v1 }
 0x1ae   :  { %v936_v30 = vpop.permute.xlu0 %935  ;;  %v934_v34 = vpop.permute.xlu1 %933 }
 0x1af   :  { %v941_v32 = vsel %vm247_vm2, %v936_v30, 0 }
 0x1b2   :  { %v1048_v33 = vpop.permute.xlu0 %1047  ;;  %v1046_v36 = vpop.permute.xlu1 %1045 }
 0x1b3   :  { %8223 = vmatmul.mubr.msk.bf16.vlgmr.msra.gmra.mrb[12].mxu1 %vm247_vm2, %v470_v23  ;;  %v1053_v35 = vsel %vm247_vm2, %v1048_v33, 0 }
 0x1b4   :  { %8233 = vmatpush3.bf16.xpose.msra.mxu1 %v589_v24  ;;  %8234 = vmatprep.mubr.msk.bf16.mxu1 %vm9474_vm0, %v9473_v1 }
 0x1b5   :  { %8244 = vmatprep.subr.bf16.mxu1 %v9473_v1 }
 0x1bb   :  { %8235 = vmatmul.mubr.msk.bf16.vlgmr.msra.gmra.mrb[16].mxu1 %vm247_vm2, %v582_v26 }
 0x1bc   :  { %8245 = vmatpush3.bf16.xpose.msra.mxu1 %v717_v27  ;;  %8246 = vmatprep.mubr.msk.bf16.mxu1 %vm9474_vm0, %v9473_v1 }
 0x1bd   :  { %8256 = vmatprep.subr.bf16.mxu1 %v9473_v1 }
 0x1c3   :  { %8247 = vmatmul.mubr.msk.bf16.vlgmr.msra.gmra.mrb[20].mxu1 %vm247_vm2, %v9688_v14 }
 0x1c4   :  { %8257 = vmatpush3.bf16.xpose.msra.mxu1 %v829_v29  ;;  %8258 = vmatprep.mubr.msk.bf16.mxu1 %vm9474_vm0, %v9473_v1 }
 0x1c5   :  { %8268 = vmatprep.subr.bf16.mxu1 %v9473_v1 }
 0x1cb   :  { %8259 = vmatmul.mubr.msk.bf16.vlgmr.msra.gmra.mrb[24].mxu1 %vm247_vm2, %v822_v31 }
 0x1cc   :  { %8269 = vmatpush3.bf16.xpose.msra.mxu1 %v941_v32  ;;  %8270 = vmatprep.mubr.msk.bf16.mxu1 %vm9474_vm0, %v9473_v1 }
 0x1cd   :  { %8280 = vmatprep.subr.bf16.mxu1 %v9473_v1 }
 0x1d3   :  { %8271 = vmatmul.mubr.msk.bf16.vlgmr.msra.gmra.mrb[28].mxu1 %vm247_vm2, %v934_v34 }
 0x1d4   :  { %8281 = vmatpush3.bf16.xpose.msra.mxu1 %v1053_v35  ;;  %8282 = vmatprep.mubr.msk.bf16.mxu1 %vm9474_vm0, %v9473_v1 }
 0x1d5   :  { %8292 = vmatprep.subr.bf16.mxu1 %v9473_v1 }
 0x1db   :  { %8283 = vmatmul.mubr.msk.bf16.vlgmr.msra.gmra.mrb[32].mxu1 %vm247_vm2, %v1046_v36 }
 0x1dc   :  { %8296 = vmatprep.mubr.msk.bf16.mxu1 %vm9474_vm0, %v9473_v1 }
 0x276   :  { %v288_v40 = vpop.f32.mrb[4].mxu1 }
 0x277   :  { %v294_v42 = vmul.f32 0.35355338, %v288_v40  ;;  %v8200_v43 = vpop.f32.mrb[5].mxu1 }
 0x278   :  { %v291_v44 = vpop.f32.mrb[6].mxu1 }
 0x279   :  { %v8201_v45 = vpop.f32.mrb[7].mxu1  ;;  %v9756_v46 = vadd.f32 %v294_v42, %v9753_v41 }
 0x27b   :  { %v296_v47 = vsel %vm247_vm2, %v9756_v46, -inf }
 0x27c   :  { %297 = vmax.xlane.f32.xlu0 %v296_v47 }
 0x27e   :  { %v401_v48 = vpop.f32.mrb[8].mxu1 }
 0x27f   :  { %v407_v49 = vmul.f32 0.35355338, %v401_v48  ;;  %v8212_v50 = vpop.f32.mrb[9].mxu1 }
 0x280   :  { %v404_v51 = vpop.f32.mrb[10].mxu1 }
 0x281   :  { %v8213_v52 = vpop.f32.mrb[11].mxu1  ;;  %v9761_v53 = vadd.f32 %v407_v49, %v9753_v41 }
 0x283   :  { %v409_v54 = vsel %vm247_vm2, %v9761_v53, -inf }
 0x284   :  { %410 = vmax.xlane.f32.xlu1 %v409_v54 }
 0x286   :  { %v513_v55 = vpop.f32.mrb[12].mxu1 }
 0x287   :  { %v519_v56 = vmul.f32 0.35355338, %v513_v55  ;;  %v8224_v57 = vpop.f32.mrb[13].mxu1 }
 0x288   :  { %v516_v58 = vpop.f32.mrb[14].mxu1 }
 0x289   :  { %v8225_v59 = vpop.f32.mrb[15].mxu1  ;;  %v9766_v60 = vadd.f32 %v519_v56, %v9753_v41 }
 0x28b   :  { %v521_v61 = vsel %vm247_vm2, %v9766_v60, -inf }
 0x28c   :  { %522 = vmax.xlane.f32.xlu0 %v521_v61 }
 0x28e   :  { %v625_v62 = vpop.f32.mrb[16].mxu1 }
 0x28f   :  { %v631_v63 = vmul.f32 0.35355338, %v625_v62  ;;  %v8236_v0 = vpop.f32.mrb[17].mxu1 }
 0x290   :  { %v628_v2 = vpop.f32.mrb[18].mxu1 }
 0x291   :  { %v8237_v6 = vpop.f32.mrb[19].mxu1  ;;  %v9771_v7 = vadd.f32 %v631_v63, %v9753_v41 }
 0x293   :  { %v633_v8 = vsel %vm247_vm2, %v9771_v7, -inf }
 0x294   :  { %634 = vmax.xlane.f32.xlu0 %v633_v8 }
 0x296   :  { %v753_v9 = vpop.f32.mrb[20].mxu1 }
 0x297   :  { %v759_v11 = vmul.f32 0.35355338, %v753_v9  ;;  %v8248_v12 = vpop.f32.mrb[21].mxu1 }
 0x298   :  { %v756_v15 = vpop.f32.mrb[22].mxu1 }
 0x299   :  { %v8249_v16 = vpop.f32.mrb[23].mxu1  ;;  %v9780_v17 = vadd.f32 %v759_v11, %v9777_v10 }
 0x29b   :  { %v761_v18 = vsel %vm247_vm2, %v9780_v17, -inf }
 0x29c   :  { %762 = vmax.xlane.f32.xlu1 %v761_v18 }
 0x29e   :  { %v865_v19 = vpop.f32.mrb[24].mxu1 }
 0x29f   :  { %v871_v20 = vmul.f32 0.35355338, %v865_v19  ;;  %v8260_v21 = vpop.f32.mrb[25].mxu1 }
 0x2a0   :  { %v868_v22 = vpop.f32.mrb[26].mxu1 }
 0x2a1   :  { %v8261_v23 = vpop.f32.mrb[27].mxu1  ;;  %v9785_v24 = vadd.f32 %v871_v20, %v9777_v10 }
 0x2a3   :  { %v873_v25 = vsel %vm247_vm2, %v9785_v24, -inf }
 0x2a4   :  { %874 = vmax.xlane.f32.xlu0 %v873_v25 }
 0x2a6   :  { %v977_v26 = vpop.f32.mrb[28].mxu1 }
 0x2a7   :  { %v983_v27 = vmul.f32 0.35355338, %v977_v26  ;;  %v8272_v28 = vpop.f32.mrb[29].mxu1 }
 0x2a8   :  { %v980_v29 = vpop.f32.mrb[30].mxu1 }
 0x2a9   :  { %v8273_v30 = vpop.f32.mrb[31].mxu1  ;;  %v984_v31 = vadd.f32 %v983_v27, %v9777_v10 }
 0x2ab   :  { %v985_v32 = vsel %vm247_vm2, %v984_v31, -inf }
 0x2ac   :  { %986 = vmax.xlane.f32.xlu1 %v985_v32 }
 0x2ae   :  { %v1089_v33 = vpop.f32.mrb[32].mxu1 }
 0x2af   :  { %v8284_v34 = vpop.f32.mrb[33].mxu1  ;;  %v1095_v39 = vmul.f32 0.35355338, %v1089_v33 }
 0x2b0   :  { %v1092_v35 = vpop.f32.mrb[34].mxu1 }
 0x2b1   :  { %v8285_v36 = vpop.f32.mrb[35].mxu1  ;;  %v9796_v40 = vadd.f32 %v1095_v39, %v9777_v10 }
 0x2b3   :  { %v1097_v42 = vsel %vm247_vm2, %v9796_v40, -inf }
 0x2ba   :  { %421 = vrot.lane.b32.xlu0 %v9673_v13, %s9482_s27 }
 0x2bd   :  { %308 = vrot.lane.b32.xlu1 %v9673_v13, %s9483_s22 }
 0x2d9   :  { %1098 = vmax.xlane.f32.xlu0 %v1097_v42 }
 0x309   :  { %v298_v43 = vpop.xlane.xlu0 %297 }
 0x30a   :  { %v299_v44 = vsub.f32 %v9756_v46, %v298_v43 }
 0x30c   :  { %v300_v45 = vmul.f32 1.442695, %v299_v44 }
 0x30e   :  { %9127 = vpow2.f32 %v300_v45 }
 0x311   :  { %v411_v47 = vpop.xlane.xlu1 %410 }
 0x312   :  { %v412_v48 = vsub.f32 %v9761_v53, %v411_v47 }
 0x314   :  { %v413_v49 = vmul.f32 1.442695, %v412_v48 }
 0x316   :  { %9129 = vpow2.f32 %v413_v49 }
 0x318   :  { %v9802_v50 = vpop.eup %9127 }
 0x319   :  { %v523_v51 = vpop.xlane.xlu0 %522  ;;  %v302_v52 = vsel %vm247_vm2, %v9802_v50, 0.0 }
 0x31a   :  { %v524_v54 = vsub.f32 %v9766_v60, %v523_v51  ;;  %303 = vadd.xlane.f32.xlu1 %v302_v52 }
 0x31c   :  { %v525_v55 = vmul.f32 1.442695, %v524_v54 }
 0x31e   :  { %9131 = vpow2.f32 %v525_v55 }
 0x320   :  { %v9807_v56 = vpop.eup %9129 }
 0x321   :  { %v415_v46 = vsel %vm247_vm2, %v9807_v56, 0.0  ;;  %v635_v61 = vpop.xlane.xlu0 %634 }
 0x322   :  { %416 = vadd.xlane.f32.xlu0 %v415_v46  ;;  %v636_v63 = vsub.f32 %v9771_v7, %v635_v61 }
 0x324   :  { %v637_v0 = vmul.f32 1.442695, %v636_v63 }
 0x326   :  { %9133 = vpow2.f32 %v637_v0 }
 0x328   :  { %v9811_v53 = vpop.eup %9131 }
 0x329   :  { %v527_v57 = vsel %vm247_vm2, %v9811_v53, 0.0  ;;  %v763_v58 = vpop.xlane.xlu1 %762 }
 0x32a   :  { %528 = vadd.xlane.f32.xlu1 %v527_v57  ;;  %v764_v2 = vsub.f32 %v9780_v17, %v763_v58 }
 0x32c   :  { %v765_v8 = vmul.f32 1.442695, %v764_v2 }
 0x32e   :  { %9135 = vpow2.f32 %v765_v8 }
 0x330   :  { %v9134_v12 = vpop.eup %9133 }
 0x331   :  { %v875_v5 = vpop.xlane.xlu0 %874  ;;  %v639_v15 = vsel %vm247_vm2, %v9134_v12, 0.0 }
 0x332   :  { %v876_v6 = vsub.f32 %v9785_v24, %v875_v5 }
 0x335   :  { %v422_v21 = vpop.permute.xlu0 %421 }
 0x336   :  { %v427_v32 = vsel %vm313_vm5, %v422_v21, 0 }
 0x338   :  { %533 = vrot.lane.b32.xlu0 %v9673_v13, %s9484_s26  ;;  %v9825_v16 = vpop.eup %9135 }
 0x339   :  { %v987_v59 = vpop.xlane.xlu1 %986  ;;  %v767_v17 = vsel %vm247_vm2, %v9825_v16, 0.0 }
 0x33a   :  { %v988_v9 = vsub.f32 %v984_v31, %v987_v59 }
 0x33b   :  { %645 = vrot.lane.b32.xlu1 %v9673_v13, %s11229_s5  ;;  %v877_v13 = vmul.f32 1.442695, %v876_v6 }
 0x33c   :  { %v989_v11 = vmul.f32 1.442695, %v988_v9 }
 0x33d   :  { %v309_v60 = vpop.permute.xlu1 %308  ;;  %9137 = vpow2.f32 %v877_v13 }
 0x33e   :  { %v315_v62 = vsel %vm313_vm5, %v309_v60, 0  ;;  %9139 = vpow2.f32 %v989_v11 }
 0x33f   :  { %8203 = vmatpush3.bf16.msra.mxu0 %v315_v62 }
 0x340   :  { %8214 = vmatprep.subr.bf16.mxu0 %v9473_v1 }
 0x347   :  { %v9827_v7 = vpop.eup %9137 }
 0x348   :  { %v9831_v18 = vpop.eup %9139  ;;  %v879_v20 = vsel %vm247_vm2, %v9827_v7, 0.0 }
 0x349   :  { %v991_v19 = vsel %vm247_vm2, %v9831_v18, 0.0 }
 0x357   :  { %640 = vadd.xlane.f32.xlu0 %v639_v15 }
 0x35b   :  { %768 = vadd.xlane.f32.xlu0 %v767_v17 }
 0x35f   :  { %992 = vadd.xlane.f32.xlu0 %v991_v19  ;;  %880 = vadd.xlane.f32.xlu1 %v879_v20 }
 0x366   :  { %v1099_v22 = vpop.xlane.xlu0 %1098 }
 0x367   :  { %v1100_v23 = vsub.f32 %v9796_v40, %v1099_v22 }
 0x369   :  { %v1101_v24 = vmul.f32 1.442695, %v1100_v23 }
 0x36b   :  { %9141 = vpow2.f32 %v1101_v24 }
 0x370   :  { %885 = vrot.lane.b32.xlu1 %v9688_v14, %s9482_s27 }
 0x374   :  { %997 = vrot.lane.b32.xlu1 %v9688_v14, %s9484_s26 }
 0x375   :  { %v9842_v25 = vpop.eup %9141 }
 0x376   :  { %v1103_v26 = vsel %vm247_vm2, %v9842_v25, 0.0 }
 0x377   :  { %1104 = vadd.xlane.f32.xlu0 %v1103_v26 }
 0x378   :  { %1109 = vrot.lane.b32.xlu1 %v9688_v14, %s11229_s5 }
 0x38d   :  { %773 = vrot.lane.b32.xlu0 %v9688_v14, %s9483_s22 }
 0x3a7   :  { %v304_v27 = vpop.xlane.xlu1 %303 }
 0x3a8   :  { %9143 = vrcp.f32 %v304_v27 }
 0x3af   :  { %v417_v28 = vpop.xlane.xlu0 %416 }
 0x3b0   :  { %9145 = vrcp.f32 %v417_v28 }
 0x3b2   :  { %v9144_v29 = vpop.eup %9143 }
 0x3b3   :  { %v306_v30 = vmul.f32 %v9144_v29, %v9802_v50  ;;  %v534_v35 = vpop.permute.xlu0 %533 }
 0x3b4   :  { %v539_v39 = vsel %vm313_vm5, %v534_v35, 0  ;;  %v9083_v35 = vld [vmem:[%s9525_s25] sm:$0xff]  }
 0x3b5   :  { %v307_v31 = vpack.c.bf16 %v306_v30, %v306_v30  ;;  %8293 = vmatpush3.bf16.msra.mxu1 %v9083_v35 }
 0x3b6   :  { %8294 = vmatprep.subr.bf16.mxu1 %v9473_v1 }
 0x3b7   :  { %8205 = vmatmul.mubr.msk.bf16.vlgmr.msra.gmra.mrb[0].mxu0 %vm247_vm2, %v307_v31  ;;  %v529_v33 = vpop.xlane.xlu1 %528 }
 0x3b8   :  { %9147 = vrcp.f32 %v529_v33  ;;  %8215 = vmatpush3.bf16.msra.mxu0 %v427_v32  ;;  %8216 = vmatprep.mubr.msk.bf16.mxu0 %vm9474_vm0, %v9473_v1 }
 0x3b9   :  { %8226 = vmatprep.subr.bf16.mxu0 %v9473_v1 }
 0x3ba   :  { %v9146_v14 = vpop.eup %9145 }
 0x3bb   :  { %v419_v34 = vmul.f32 %v9146_v14, %v9807_v56  ;;  %v646_v43 = vpop.permute.xlu1 %645 }
 0x3bc   :  { %v651_v45 = vsel %vm313_vm5, %v646_v43, 0  ;;  %v9084_v43 = vld [vmem:[%s9525_s25 + $0x8] sm:$0xff]  }
 0x3bd   :  { %v420_v36 = vpack.c.bf16 %v419_v34, %v419_v34  ;;  %8295 = vmatpush3.bf16.msra.mxu1 %v9084_v43 }
 0x3be   :  { %8308 = vmatprep.subr.bf16.mxu1 %v9473_v1 }
 0x3bf   :  { %8217 = vmatmul.mubr.msk.bf16.vlgmr.msra.gmra.mrb[4].mxu0 %vm247_vm2, %v420_v36 }
 0x3c0   :  { %8227 = vmatpush3.bf16.msra.mxu0 %v539_v39  ;;  %8228 = vmatprep.mubr.msk.bf16.mxu0 %vm9474_vm0, %v9473_v1 }
 0x3c1   :  { %8238 = vmatprep.subr.bf16.mxu0 %v9473_v1 }
 0x3c2   :  { %v9148_v40 = vpop.eup %9147 }
 0x3c3   :  { %v531_v42 = vmul.f32 %v9148_v40, %v9811_v53 }
 0x3c5   :  { %v532_v44 = vpack.c.bf16 %v531_v42, %v531_v42 }
 0x3c7   :  { %8229 = vmatmul.mubr.msk.bf16.vlgmr.msra.gmra.mrb[8].mxu0 %vm247_vm2, %v532_v44 }
 0x3c8   :  { %8239 = vmatpush3.bf16.msra.mxu0 %v651_v45  ;;  %8240 = vmatprep.mubr.msk.bf16.mxu0 %vm9474_vm0, %v9473_v1 }
 0x3c9   :  { %8250 = vmatprep.subr.bf16.mxu0 %v9473_v1 }
 0x3e4   :  { %v641_v47 = vpop.xlane.xlu0 %640 }
 0x3e5   :  { %9149 = vrcp.f32 %v641_v47 }
 0x3e8   :  { %v769_v51 = vpop.xlane.xlu0 %768 }
 0x3e9   :  { %9151 = vrcp.f32 %v769_v51 }
 0x3ec   :  { %v881_v52 = vpop.xlane.xlu1 %880  ;;  %v993_v54 = vpop.xlane.xlu0 %992 }
 0x3ed   :  { %9153 = vrcp.f32 %v881_v52 }
 0x3ee   :  { %9155 = vrcp.f32 %v993_v54 }
 0x3ef   :  { %v9150_v48 = vpop.eup %9149 }
 0x3f0   :  { %v643_v49 = vmul.f32 %v9150_v48, %v9134_v12  ;;  %v886_v58 = vpop.permute.xlu1 %885 }
 0x3f1   :  { %v891_v61 = vsel %vm313_vm5, %v886_v58, 0 }
 0x3f2   :  { %v644_v50 = vpack.c.bf16 %v643_v49, %v643_v49 }
 0x3f3   :  { %v9152_v55 = vpop.eup %9151 }
 0x3f4   :  { %8241 = vmatmul.mubr.msk.bf16.vlgmr.msra.gmra.mrb[12].mxu0 %vm247_vm2, %v644_v50  ;;  %v771_v46 = vmul.f32 %v9152_v55, %v9825_v16  ;;  %v998_v63 = vpop.permute.xlu1 %997 }
 0x3f5   :  { %8252 = vmatprep.mubr.msk.bf16.mxu0 %vm9474_vm0, %v9473_v1  ;;  %v1003_v5 = vsel %vm313_vm5, %v998_v63, 0 }
 0x3f6   :  { %v772_v59 = vpack.c.bf16 %v771_v46, %v771_v46 }
 0x3f7   :  { %v9154_v60 = vpop.eup %9153 }
 0x3f8   :  { %v883_v62 = vmul.f32 %v9154_v60, %v9827_v7  ;;  %v9156_v2 = vpop.eup %9155  ;;  %v1110_v8 = vpop.permute.xlu1 %1109 }
 0x3f9   :  { %v995_v6 = vmul.f32 %v9156_v2, %v9831_v18  ;;  %v1115_v11 = vsel %vm313_vm5, %v1110_v8, 0 }
 0x3fa   :  { %v884_v0 = vpack.c.bf16 %v883_v62, %v883_v62 }
 0x3fb   :  { %v996_v9 = vpack.c.bf16 %v995_v6, %v995_v6 }
 0x404   :  { %v1105_v56 = vpop.xlane.xlu0 %1104 }
 0x405   :  { %9157 = vrcp.f32 %v1105_v56 }
 0x408   :  { %v774_v53 = vpop.permute.xlu0 %773 }
 0x409   :  { %v779_v57 = vsel %vm313_vm5, %v774_v53, 0 }
 0x40a   :  { %8251 = vmatpush3.bf16.msra.mxu0 %v779_v57 }
 0x40b   :  { %8262 = vmatprep.subr.bf16.mxu0 %v9473_v1 }
 0x40d   :  { %8253 = vmatmul.mubr.msk.bf16.vlgmr.msra.gmra.mrb[16].mxu0 %vm247_vm2, %v772_v59 }
 0x40e   :  { %8263 = vmatpush3.bf16.msra.mxu0 %v891_v61  ;;  %8264 = vmatprep.mubr.msk.bf16.mxu0 %vm9474_vm0, %v9473_v1 }
 0x40f   :  { %8274 = vmatprep.subr.bf16.mxu0 %v9473_v1  ;;  %v9158_v13 = vpop.eup %9157 }
 0x410   :  { %v1107_v12 = vmul.f32 %v9158_v13, %v9842_v25 }
 0x412   :  { %v1108_v15 = vpack.c.bf16 %v1107_v12, %v1107_v12 }
 0x415   :  { %8265 = vmatmul.mubr.msk.bf16.vlgmr.msra.gmra.mrb[20].mxu0 %vm247_vm2, %v884_v0 }
 0x416   :  { %8275 = vmatpush3.bf16.msra.mxu0 %v1003_v5  ;;  %8276 = vmatprep.mubr.msk.bf16.mxu0 %vm9474_vm0, %v9473_v1 }
 0x417   :  { %8286 = vmatprep.subr.bf16.mxu0 %v9473_v1 }
 0x41d   :  { %8277 = vmatmul.mubr.msk.bf16.vlgmr.msra.gmra.mrb[24].mxu0 %vm247_vm2, %v996_v9 }
 0x41e   :  { %8287 = vmatpush3.bf16.msra.mxu0 %v1115_v11  ;;  %8288 = vmatprep.mubr.msk.bf16.mxu0 %vm9474_vm0, %v9473_v1  ;;  %v7698_v11 = vld [vmem:[%s9530_s29] ss:$0 sm:$0xff] }
 0x41f   :  { %8300 = vmatprep.subr.bf16.mxu0 %v9473_v1 }
 0x425   :  { %8289 = vmatmul.mubr.msk.bf16.vlgmr.msra.gmra.mrb[28].mxu0 %vm247_vm2, %v1108_v15 }
 0x426   :  { %8304 = vmatprep.mubr.msk.bf16.mxu0 %vm9474_vm0, %v9473_v1 }
 0x48a   :  { %v351_v16 = vpop.f32.mrb[0].mxu0 }
 0x48b   :  { %v8206_v7 = vpop.f32.mrb[1].mxu0 }
 0x48c   :  { %v354_v17 = vpop.f32.mrb[2].mxu0 }
 0x48d   :  { %v8207_v18 = vpop.f32.mrb[3].mxu0 }
 0x492   :  { %v463_v19 = vpop.f32.mrb[4].mxu0 }
 0x493   :  { %v8218_v20 = vpop.f32.mrb[5].mxu0 }
 0x494   :  { %v466_v21 = vpop.f32.mrb[6].mxu0 }
 0x495   :  { %v8219_v22 = vpop.f32.mrb[7].mxu0 }
 0x49a   :  { %v575_v23 = vpop.f32.mrb[8].mxu0 }
 0x49b   :  { %v8230_v24 = vpop.f32.mrb[9].mxu0 }
 0x49c   :  { %v578_v25 = vpop.f32.mrb[10].mxu0 }
 0x49d   :  { %v8231_v26 = vpop.f32.mrb[11].mxu0 }
 0x4c7   :  { %v687_v27 = vpop.f32.mrb[12].mxu0 }
 0x4c8   :  { %v8242_v28 = vpop.f32.mrb[13].mxu0 }
 0x4c9   :  { %v690_v29 = vpop.f32.mrb[14].mxu0 }
 0x4ca   :  { %v8243_v30 = vpop.f32.mrb[15].mxu0 }
 0x4cb   :  { %v9085_v30 = vld [vmem:[%s9515_s17 + $0x10] sm:$0xff]  }
 0x4cc   :  { %8301 = vmatpush3.bf16.msra.mxu0 %v9085_v30 }
 0x4cd   :  { %8302 = vmatprep.subr.bf16.mxu0 %v9473_v1 }
 0x4e0   :  { %v815_v31 = vpop.f32.mrb[16].mxu0 }
 0x4e1   :  { %v8254_v32 = vpop.f32.mrb[17].mxu0 }
 0x4e2   :  { %v818_v33 = vpop.f32.mrb[18].mxu0 }
 0x4e3   :  { %v8255_v14 = vpop.f32.mrb[19].mxu0 }
 0x4e8   :  { %v927_v34 = vpop.f32.mrb[20].mxu0 }
 0x4e9   :  { %v8991_v36 = vpack.i.bf16 %v927_v34, %v463_v19  ;;  %v8266_v39 = vpop.f32.mrb[21].mxu0 }
 0x4ea   :  { %v930_v40 = vpop.f32.mrb[22].mxu0 }
 0x4eb   :  { %8992 = vrot.lane.b32.xlu1 %v8991_v36, %s11227_s11  ;;  %v8267_v42 = vpop.f32.mrb[23].mxu0 }
 0x4f0   :  { %v1039_v44 = vpop.f32.mrb[24].mxu0 }
 0x4f1   :  { %v8996_v45 = vpack.i.bf16 %v1039_v44, %v575_v23  ;;  %v8278_v47 = vpop.f32.mrb[25].mxu0 }
 0x4f2   :  { %v1042_v48 = vpop.f32.mrb[26].mxu0 }
 0x4f3   :  { %8997 = vrot.lane.b32.xlu1 %v8996_v45, %s11225_s6  ;;  %v8279_v49 = vpop.f32.mrb[27].mxu0 }
 0x4f8   :  { %v1151_v50 = vpop.f32.mrb[28].mxu0 }
 0x4f9   :  { %v9001_v51 = vpack.i.bf16 %v1151_v50, %v687_v27  ;;  %v8290_v52 = vpop.f32.mrb[29].mxu0 }
 0x4fa   :  { %v1154_v54 = vpop.f32.mrb[30].mxu0 }
 0x4fb   :  { %9002 = vrot.lane.b32.xlu0 %v9001_v51, %s11223_s15  ;;  %v8291_v55 = vpop.f32.mrb[31].mxu0  ;;  %v7699_v51 = vld [vmem:[%s9535_s3] ss:$0 sm:$0xff] }
 0x55d   :  { %v8993_v56 = vpop.permute.xlu1 %8992 }
 0x55e   :  { %v8995_v53 = vunpack.i.h.bf16 %v8993_v56  ;;  %v8994_v57 = vunpack.i.l.bf16 %v8993_v56 }
 0x560   :  { %v1169_v61 = vsel %vm247_vm2, %v815_v31, %v8995_v53  ;;  %v705_v62 = vsel %vm247_vm2, %v351_v16, %v8994_v57  ;;  %v9086_v31 = vld [vmem:[%s9515_s17 + $0x18] sm:$0xff]   ;;  %v7700_v53 = vld [vmem:[%s9540_s8] ss:$0 sm:$0xff] }
 0x561   :  { %8303 = vmatpush3.bf16.msra.mxu0 %v9086_v31 }
 0x562   :  { %8314 = vmatprep.subr.bf16.mxu0 %v9473_v1 }
 0x565   :  { %v8998_v46 = vpop.permute.xlu1 %8997 }
 0x566   :  { %v9000_v58 = vunpack.i.h.bf16 %v8998_v46  ;;  %v8999_v59 = vunpack.i.l.bf16 %v8998_v46 }
 0x568   :  { %v1170_v2 = vsel %vm706_vm6, %v1169_v61, %v9000_v58  ;;  %v707_v5 = vsel %vm706_vm6, %v705_v62, %v8999_v59  ;;  %v7713_v61 = vld [vmem:[%s9520_s21 + $0x1] ss:$0 sm:$0xff]  ;;  %s7674_s21 = sld [smem:[#allocation4 + $0x1]] }
 0x56d   :  { %v9003_v60 = vpop.permute.xlu0 %9002 }
 0x56e   :  { %v9005_v63 = vunpack.i.h.bf16 %v9003_v60  ;;  %v9004_v0 = vunpack.i.l.bf16 %v9003_v60 }
 0x570   :  { %v1171_v6 = vsel %vm708_vm7, %v1170_v2, %v9005_v63  ;;  %v709_v8 = vsel %vm708_vm7, %v707_v5, %v9004_v0 }
 0x571   :  { %v1172_v9 = vpack.c.bf16 %v1171_v6, %v709_v8 }
 0x573   :  { %8297 = vmatmul.mubr.msk.bf16.vlgmr.msra.gmra.mrb[36].mxu1 %vm198_vm1, %v1172_v9 }
 0x574   :  { %8310 = vmatprep.mubr.msk.bf16.mxu1 %vm9474_vm0, %v9473_v1 }
 0x646   :  { %v1222_v13 = vpop.f32.mrb[36].mxu1 }
 0x647   :  { %v1229_v12 = vadd.f32 %v1222_v13, %v9658_v3  ;;  %v8298_v15 = vpop.f32.mrb[37].mxu1 }
 0x648   :  { %v1225_v16 = vpop.f32.mrb[38].mxu1 }
 0x649   :  { %v1230_v7 = vadd.f32 %v1225_v16, %v9661_v4  ;;  %v8299_v17 = vpop.f32.mrb[39].mxu1  ;;  %v1237_v18 = vadd.f32 %v7698_v11, %v1229_v12 }
 0x64b   :  { %v1239_v19 = vsel %vm198_vm1, %v1237_v18, 0.0  ;;  %v1238_v20 = vadd.f32 %v7698_v11, %v1230_v7 }
 0x64c   :  { %1240 = vadd.xlane.f32.xlu1 %v1239_v19 }
 0x64d   :  { %v1242_v21 = vsel %vm198_vm1, %v1238_v20, 0.0 }
 0x64e   :  { %1243 = vadd.xlane.f32.xlu0 %v1242_v21 }
 0x6d9   :  { %v1241_v22 = vpop.xlane.xlu1 %1240 }
 0x6da   :  { %v1246_v23 = vmul.f32 0.03125, %v1241_v22 }
 0x6db   :  { %v1244_v24 = vpop.xlane.xlu0 %1243 }
 0x6dc   :  { %v1248_v25 = vsub.f32 %v1237_v18, %v1246_v23  ;;  %v1247_v3 = vmul.f32 0.03125, %v1244_v24 }
 0x6de   :  { %v1249_v26 = vsub.f32 %v1238_v20, %v1247_v3  ;;  %v1250_v27 = vmul.f32 %v1248_v25, %v1248_v25  ;;  %v1285_v54 = vmul.f32 %v7699_v51, %v1248_v25 }
 0x6e0   :  { %v1252_v4 = vsel %vm198_vm1, %v1250_v27, 0.0  ;;  %v1251_v28 = vmul.f32 %v1249_v26, %v1249_v26  ;;  %v1286_v55 = vmul.f32 %v7699_v51, %v1249_v26 }
 0x6e1   :  { %1253 = vadd.xlane.f32.xlu0 %v1252_v4 }
 0x6e2   :  { %v1255_v29 = vsel %vm198_vm1, %v1251_v28, 0.0 }
 0x6e3   :  { %1256 = vadd.xlane.f32.xlu1 %v1255_v29 }
 0x76e   :  { %v1254_v32 = vpop.xlane.xlu0 %1253 }
 0x76f   :  { %v1259_v33 = vmul.f32 0.032258064, %v1254_v32 }
 0x770   :  { %v1257_v14 = vpop.xlane.xlu1 %1256 }
 0x771   :  { %9159 = vrsqrt.f32 %v1259_v33  ;;  %v1260_v34 = vmul.f32 0.032258064, %v1257_v14  ;;  %vm1263_vm8 = vcmp.eq.f32.partialorder %v1259_v33, inf  ;;  %v1266_v39 = vand.u32 2147483648, %v1259_v33 }
 0x772   :  { %vm1265_vm9 = vcmp.eq.f32.partialorder %v1259_v33, 0.0 }
 0x773   :  { %9161 = vrsqrt.f32 %v1260_v34  ;;  %vm1270_vm10 = vcmp.eq.f32.partialorder %v1260_v34, inf  ;;  %v1273_v47 = vand.u32 2147483648, %v1260_v34  ;;  %vm1272_vm11 = vcmp.eq.f32.partialorder %v1260_v34, 0.0 }
 0x77b   :  { %v9160_v35 = vpop.eup %9159 }
 0x77c   :  { %v1262_v36 = vmul.f32 %v9160_v35, %v1259_v33 }
 0x77d   :  { %v9162_v40 = vpop.eup %9161 }
 0x77e   :  { %v1264_v42 = vsel %vm1263_vm8, %v1259_v33, %v1262_v36  ;;  %v1269_v44 = vmul.f32 %v9162_v40, %v1260_v34 }
 0x77f   :  { %v1267_v43 = vsel %vm1265_vm9, %v1266_v39, %v1264_v42 }
 0x780   :  { %v1275_v45 = vadd.f32 1e-06, %v1267_v43  ;;  %v1271_v48 = vsel %vm1270_vm10, %v1260_v34, %v1269_v44 }
 0x781   :  { %v1274_v49 = vsel %vm1272_vm11, %v1273_v47, %v1271_v48 }
 0x782   :  { %9163 = vrcp.f32 %v1275_v45  ;;  %v1276_v50 = vadd.f32 1e-06, %v1274_v49 }
 0x784   :  { %9165 = vrcp.f32 %v1276_v50 }
 0x78c   :  { %v9164_v52 = vpop.eup %9163 }
 0x78d   :  { %v1287_v56 = vmul.f32 %v9164_v52, %v1285_v54 }
 0x78e   :  { %v9166_v46 = vpop.eup %9165 }
 0x78f   :  { %v1288_v57 = vmul.f32 %v9166_v46, %v1286_v55  ;;  %v9924_v58 = vadd.f32 %v7700_v53, %v1287_v56 }
 0x791   :  { %v9926_v59 = vadd.f32 %v7700_v53, %v1288_v57 }
 0x793   :  { %v1315_v60 = vpack.c.bf16 %v9926_v59, %v9924_v58 }
 0x795   :  { %8305 = vmatmul.mubr.msk.bf16.vlgmr.msra.gmra.mrb[32].mxu0 %vm198_vm1, %v1315_v60 }
 0x796   :  { %8316 = vmatprep.mubr.msk.bf16.mxu0 %vm9474_vm0, %v9473_v1 }
 0x868   :  { %v1371_v62 = vpop.f32.mrb[32].mxu0 }
 0x869   :  { %v8306_v63 = vpop.f32.mrb[33].mxu0  ;;  %v1372_v2 = vadd.f32 %v7713_v61, %v1371_v62 }
 0x86a   :  { %v1374_v0 = vpop.f32.mrb[34].mxu0 }
 0x86b   :  { %v1375_v5 = vadd.f32 %v7713_v61, %v1374_v0  ;;  %v8307_v6 = vpop.f32.mrb[35].mxu0 }
 0x86d   :  { %v9934_v8 = vpack.c.bf16 %v1375_v5, %v1372_v2 }
 0x86f   :  { %1492 = vrot.lane.b32.xlu1 %v9934_v8, %s9478_s28  ;;  %1380 = vrot.lane.b32.xlu0 %v9934_v8, %s9476_s9  ;;  %v9949_v9 = vrot.slane %v9934_v8, 4 }
 0x873   :  { %1490 = vrot.lane.b32.xlu1 %v9934_v8, %s9475_s0  ;;  %1604 = vrot.lane.b32.xlu0 %v9934_v8, %s9477_s4 }
 0x877   :  { %1602 = vrot.lane.b32.xlu1 %v9934_v8, %s9480_s16  ;;  %1716 = vrot.lane.b32.xlu0 %v9934_v8, %s9479_s2 }
 0x87b   :  { %1714 = vrot.lane.b32.xlu1 %v9934_v8, %s9481_s7  ;;  %1842 = vrot.lane.b32.xlu0 %v9949_v9, %s9476_s9 }
 0x87f   :  { %1954 = vrot.lane.b32.xlu1 %v9949_v9, %s9478_s28  ;;  %1952 = vrot.lane.b32.xlu0 %v9949_v9, %s9475_s0 }
 0x883   :  { %2066 = vrot.lane.b32.xlu1 %v9949_v9, %s9477_s4  ;;  %2064 = vrot.lane.b32.xlu0 %v9949_v9, %s9480_s16 }
 0x887   :  { %2178 = vrot.lane.b32.xlu1 %v9949_v9, %s9479_s2  ;;  %2176 = vrot.lane.b32.xlu0 %v9949_v9, %s9481_s7 }
 0x8e1   :  { %v1381_v13 = vpop.permute.xlu0 %1380  ;;  %v1493_v12 = vpop.permute.xlu1 %1492 }
 0x8e2   :  { %v1386_v11 = vsel %vm247_vm2, %v1381_v13, 0  ;;  %v1498_v15 = vsel %vm247_vm2, %v1493_v12, 0 }
 0x8e3   :  { %8309 = vmatpush3.bf16.xpose.msra.mxu1 %v1386_v11 }
 0x8e4   :  { %8320 = vmatprep.subr.bf16.mxu1 %v9473_v1 }
 0x8e5   :  { %v1605_v16 = vpop.permute.xlu0 %1604  ;;  %v1491_v7 = vpop.permute.xlu1 %1490 }
 0x8e6   :  { %v1610_v17 = vsel %vm247_vm2, %v1605_v16, 0 }
 0x8e9   :  { %v1717_v18 = vpop.permute.xlu0 %1716  ;;  %v1603_v19 = vpop.permute.xlu1 %1602 }
 0x8ea   :  { %8311 = vmatmul.mubr.msk.bf16.vlgmr.msra.gmra.mrb[40].mxu1 %vm247_vm2, %v9934_v8  ;;  %v1722_v20 = vsel %vm247_vm2, %v1717_v18, 0 }
 0x8eb   :  { %8321 = vmatpush3.bf16.xpose.msra.mxu1 %v1498_v15  ;;  %8322 = vmatprep.mubr.msk.bf16.mxu1 %vm9474_vm0, %v9473_v1 }
 0x8ec   :  { %8332 = vmatprep.subr.bf16.mxu1 %v9473_v1 }
 0x8ed   :  { %v1843_v21 = vpop.permute.xlu0 %1842  ;;  %v1715_v22 = vpop.permute.xlu1 %1714 }
 0x8ee   :  { %v1848_v23 = vsel %vm247_vm2, %v1843_v21, 0 }
 0x8f1   :  { %v1955_v24 = vpop.permute.xlu1 %1954  ;;  %v1953_v26 = vpop.permute.xlu0 %1952 }
 0x8f2   :  { %8323 = vmatmul.mubr.msk.bf16.vlgmr.msra.gmra.mrb[44].mxu1 %vm247_vm2, %v1491_v7  ;;  %v1960_v25 = vsel %vm247_vm2, %v1955_v24, 0 }
 0x8f3   :  { %8333 = vmatpush3.bf16.xpose.msra.mxu1 %v1610_v17  ;;  %8334 = vmatprep.mubr.msk.bf16.mxu1 %vm9474_vm0, %v9473_v1 }
 0x8f4   :  { %8344 = vmatprep.subr.bf16.mxu1 %v9473_v1 }
 0x8f5   :  { %v2067_v3 = vpop.permute.xlu1 %2066  ;;  %v2065_v28 = vpop.permute.xlu0 %2064 }
 0x8f6   :  { %v2072_v27 = vsel %vm247_vm2, %v2067_v3, 0 }
 0x8f9   :  { %v2179_v4 = vpop.permute.xlu1 %2178  ;;  %v2177_v30 = vpop.permute.xlu0 %2176 }
 0x8fa   :  { %8335 = vmatmul.mubr.msk.bf16.vlgmr.msra.gmra.mrb[48].mxu1 %vm247_vm2, %v1603_v19  ;;  %v2184_v29 = vsel %vm247_vm2, %v2179_v4, 0 }
 0x8fb   :  { %8345 = vmatpush3.bf16.xpose.msra.mxu1 %v1722_v20  ;;  %8346 = vmatprep.mubr.msk.bf16.mxu1 %vm9474_vm0, %v9473_v1 }
 0x8fc   :  { %8356 = vmatprep.subr.bf16.mxu1 %v9473_v1 }
 0x902   :  { %8347 = vmatmul.mubr.msk.bf16.vlgmr.msra.gmra.mrb[52].mxu1 %vm247_vm2, %v1715_v22 }
 0x903   :  { %8357 = vmatpush3.bf16.xpose.msra.mxu1 %v1848_v23  ;;  %8358 = vmatprep.mubr.msk.bf16.mxu1 %vm9474_vm0, %v9473_v1 }
 0x904   :  { %8368 = vmatprep.subr.bf16.mxu1 %v9473_v1 }
 0x90a   :  { %8359 = vmatmul.mubr.msk.bf16.vlgmr.msra.gmra.mrb[56].mxu1 %vm247_vm2, %v9949_v9 }
 0x90b   :  { %8369 = vmatpush3.bf16.xpose.msra.mxu1 %v1960_v25  ;;  %8370 = vmatprep.mubr.msk.bf16.mxu1 %vm9474_vm0, %v9473_v1 }
 0x90c   :  { %8380 = vmatprep.subr.bf16.mxu1 %v9473_v1 }
 0x912   :  { %8371 = vmatmul.mubr.msk.bf16.vlgmr.msra.gmra.mrb[60].mxu1 %vm247_vm2, %v1953_v26 }
 0x913   :  { %8381 = vmatpush3.bf16.xpose.msra.mxu1 %v2072_v27  ;;  %8382 = vmatprep.mubr.msk.bf16.mxu1 %vm9474_vm0, %v9473_v1 }
 0x914   :  { %8392 = vmatprep.subr.bf16.mxu1 %v9473_v1 }
 0x91a   :  { %8383 = vmatmul.mubr.msk.bf16.vlgmr.msra.gmra.mrb[64].mxu1 %vm247_vm2, %v2065_v28 }
 0x91b   :  { %8393 = vmatpush3.bf16.xpose.msra.mxu1 %v2184_v29  ;;  %8394 = vmatprep.mubr.msk.bf16.mxu1 %vm9474_vm0, %v9473_v1 }
 0x91c   :  { %8404 = vmatprep.subr.bf16.mxu1 %v9473_v1 }
 0x922   :  { %8395 = vmatmul.mubr.msk.bf16.vlgmr.msra.gmra.mrb[68].mxu1 %vm247_vm2, %v2177_v30 }
 0x923   :  { %8408 = vmatprep.mubr.msk.bf16.mxu1 %vm9474_vm0, %v9473_v1 }
 0x9bd   :  { %v1422_v31 = vpop.f32.mrb[40].mxu1 }
 0x9be   :  { %v1428_v32 = vmul.f32 0.35355338, %v1422_v31  ;;  %v8312_v33 = vpop.f32.mrb[41].mxu1 }
 0x9bf   :  { %v1425_v14 = vpop.f32.mrb[42].mxu1 }
 0x9c0   :  { %v8313_v34 = vpop.f32.mrb[43].mxu1  ;;  %v10010_v35 = vadd.f32 %v1428_v32, %v9753_v41 }
 0x9c2   :  { %v1430_v36 = vsel %vm247_vm2, %v10010_v35, -inf }
 0x9c3   :  { %1431 = vmax.xlane.f32.xlu1 %v1430_v36 }
 0x9c5   :  { %v1534_v39 = vpop.f32.mrb[44].mxu1 }
 0x9c6   :  { %v1540_v40 = vmul.f32 0.35355338, %v1534_v39  ;;  %v8324_v42 = vpop.f32.mrb[45].mxu1 }
 0x9c7   :  { %v1537_v43 = vpop.f32.mrb[46].mxu1 }
 0x9c8   :  { %v8325_v44 = vpop.f32.mrb[47].mxu1  ;;  %v1541_v45 = vadd.f32 %v1540_v40, %v9753_v41 }
 0x9ca   :  { %v1542_v47 = vsel %vm247_vm2, %v1541_v45, -inf }
 0x9cb   :  { %1543 = vmax.xlane.f32.xlu0 %v1542_v47 }
 0x9cd   :  { %v1646_v48 = vpop.f32.mrb[48].mxu1 }
 0x9ce   :  { %v1652_v49 = vmul.f32 0.35355338, %v1646_v48  ;;  %v8336_v50 = vpop.f32.mrb[49].mxu1 }
 0x9cf   :  { %v1649_v51 = vpop.f32.mrb[50].mxu1 }
 0x9d0   :  { %v8337_v52 = vpop.f32.mrb[51].mxu1  ;;  %v1653_v54 = vadd.f32 %v1652_v49, %v9753_v41 }
 0x9d2   :  { %v1654_v55 = vsel %vm247_vm2, %v1653_v54, -inf }
 0x9d3   :  { %1655 = vmax.xlane.f32.xlu0 %v1654_v55 }
 0x9d5   :  { %v1758_v56 = vpop.f32.mrb[52].mxu1 }
 0x9d6   :  { %v1764_v46 = vmul.f32 0.35355338, %v1758_v56  ;;  %v8348_v53 = vpop.f32.mrb[53].mxu1 }
 0x9d7   :  { %v1761_v57 = vpop.f32.mrb[54].mxu1 }
 0x9d8   :  { %v8349_v60 = vpop.f32.mrb[55].mxu1  ;;  %v1765_v61 = vadd.f32 %v1764_v46, %v9753_v41 }
 0x9da   :  { %v1766_v62 = vsel %vm247_vm2, %v1765_v61, -inf }
 0x9db   :  { %1767 = vmax.xlane.f32.xlu1 %v1766_v62 }
 0x9dd   :  { %v1884_v63 = vpop.f32.mrb[56].mxu1 }
 0x9de   :  { %v1890_v0 = vmul.f32 0.35355338, %v1884_v63  ;;  %v8360_v2 = vpop.f32.mrb[57].mxu1 }
 0x9df   :  { %v1887_v5 = vpop.f32.mrb[58].mxu1 }
 0x9e0   :  { %v8361_v6 = vpop.f32.mrb[59].mxu1  ;;  %v1891_v13 = vadd.f32 %v1890_v0, %v9777_v10 }
 0x9e2   :  { %v1892_v11 = vsel %vm247_vm2, %v1891_v13, -inf }
 0x9e3   :  { %1893 = vmax.xlane.f32.xlu0 %v1892_v11 }
 0x9e5   :  { %v1996_v12 = vpop.f32.mrb[60].mxu1 }
 0x9e6   :  { %v2002_v15 = vmul.f32 0.35355338, %v1996_v12  ;;  %v8372_v16 = vpop.f32.mrb[61].mxu1 }
 0x9e7   :  { %v1999_v7 = vpop.f32.mrb[62].mxu1 }
 0x9e8   :  { %v8373_v17 = vpop.f32.mrb[63].mxu1  ;;  %v10023_v18 = vadd.f32 %v2002_v15, %v9777_v10 }
 0x9ea   :  { %v2004_v19 = vsel %vm247_vm2, %v10023_v18, -inf }
 0x9eb   :  { %2005 = vmax.xlane.f32.xlu1 %v2004_v19 }
 0x9ed   :  { %v2108_v20 = vpop.f32.mrb[64].mxu1 }
 0x9ee   :  { %v2114_v21 = vmul.f32 0.35355338, %v2108_v20  ;;  %v8384_v22 = vpop.f32.mrb[65].mxu1 }
 0x9ef   :  { %v2111_v23 = vpop.f32.mrb[66].mxu1 }
 0x9f0   :  { %v8385_v24 = vpop.f32.mrb[67].mxu1  ;;  %v2115_v25 = vadd.f32 %v2114_v21, %v9777_v10 }
 0x9f2   :  { %v2116_v3 = vsel %vm247_vm2, %v2115_v25, -inf }
 0x9f3   :  { %2117 = vmax.xlane.f32.xlu0 %v2116_v3 }
 0x9f5   :  { %v2220_v26 = vpop.f32.mrb[68].mxu1 }
 0x9f6   :  { %v8396_v27 = vpop.f32.mrb[69].mxu1  ;;  %v2226_v29 = vmul.f32 0.35355338, %v2220_v26 }
 0x9f7   :  { %v2223_v4 = vpop.f32.mrb[70].mxu1 }
 0x9f8   :  { %v8397_v28 = vpop.f32.mrb[71].mxu1  ;;  %v2227_v30 = vadd.f32 %v2226_v29, %v9777_v10 }
 0x9fa   :  { %v2228_v31 = vsel %vm247_vm2, %v2227_v30, -inf }
 0x9fc   :  { %1554 = vrot.lane.b32.xlu1 %v9934_v8, %s9482_s27 }
 0xa09   :  { %1442 = vrot.lane.b32.xlu0 %v9934_v8, %s9483_s22 }
 0xa20   :  { %2229 = vmax.xlane.f32.xlu1 %v2228_v31 }
 0xa31   :  { %1666 = vrot.lane.b32.xlu1 %v9934_v8, %s9484_s26 }
 0xa50   :  { %v1432_v32 = vpop.xlane.xlu1 %1431 }
 0xa51   :  { %v1433_v33 = vsub.f32 %v10010_v35, %v1432_v32 }
 0xa53   :  { %v1434_v14 = vmul.f32 1.442695, %v1433_v33 }
 0xa55   :  { %9167 = vpow2.f32 %v1434_v14 }
 0xa58   :  { %v1544_v34 = vpop.xlane.xlu0 %1543 }
 0xa59   :  { %v1545_v36 = vsub.f32 %v1541_v45, %v1544_v34 }
 0xa5b   :  { %v1546_v39 = vmul.f32 1.442695, %v1545_v36 }
 0xa5d   :  { %9169 = vpow2.f32 %v1546_v39 }
 0xa5f   :  { %v10038_v40 = vpop.eup %9167 }
 0xa60   :  { %v1656_v42 = vpop.xlane.xlu0 %1655  ;;  %v1436_v43 = vsel %vm247_vm2, %v10038_v40, 0.0 }
 0xa61   :  { %v1657_v44 = vsub.f32 %v1653_v54, %v1656_v42  ;;  %1437 = vadd.xlane.f32.xlu0 %v1436_v43 }
 0xa63   :  { %v1658_v47 = vmul.f32 1.442695, %v1657_v44 }
 0xa65   :  { %9171 = vpow2.f32 %v1658_v47 }
 0xa67   :  { %v10042_v48 = vpop.eup %9169 }
 0xa68   :  { %v1768_v49 = vpop.xlane.xlu1 %1767  ;;  %v1548_v35 = vsel %vm247_vm2, %v10042_v48, 0.0 }
 0xa69   :  { %v1769_v50 = vsub.f32 %v1765_v61, %v1768_v49  ;;  %1549 = vadd.xlane.f32.xlu1 %v1548_v35 }
 0xa6b   :  { %v1770_v45 = vmul.f32 1.442695, %v1769_v50 }
 0xa6d   :  { %9173 = vpow2.f32 %v1770_v45 }
 0xa6f   :  { %v10046_v51 = vpop.eup %9171 }
 0xa70   :  { %v1894_v52 = vpop.xlane.xlu0 %1893  ;;  %v1660_v55 = vsel %vm247_vm2, %v10046_v51, 0.0 }
 0xa71   :  { %v1895_v54 = vsub.f32 %v1891_v13, %v1894_v52  ;;  %1661 = vadd.xlane.f32.xlu0 %v1660_v55 }
 0xa73   :  { %v1896_v56 = vmul.f32 1.442695, %v1895_v54 }
 0xa75   :  { %9175 = vpow2.f32 %v1896_v56 }
 0xa77   :  { %v10050_v46 = vpop.eup %9173 }
 0xa78   :  { %v1772_v53 = vsel %vm247_vm2, %v10050_v46, 0.0  ;;  %v2006_v5 = vpop.xlane.xlu1 %2005 }
 0xa79   :  { %1773 = vadd.xlane.f32.xlu1 %v1772_v53  ;;  %v2007_v13 = vsub.f32 %v10023_v18, %v2006_v5  ;;  %v9087_v5 = vld [vmem:[%s9545_s14] sm:$0xff]  }
 0xa7b   :  { %v2008_v12 = vmul.f32 1.442695, %v2007_v13 }
 0xa7f   :  { %v10054_v57 = vpop.eup %9175 }
 0xa80   :  { %v2118_v60 = vpop.xlane.xlu0 %2117  ;;  %v1898_v61 = vsel %vm247_vm2, %v10054_v57, 0.0 }
 0xa81   :  { %v2119_v62 = vsub.f32 %v2115_v25, %v2118_v60  ;;  %1899 = vadd.xlane.f32.xlu1 %v1898_v61 }
 0xa83   :  { %v2120_v63 = vmul.f32 1.442695, %v2119_v62 }
 0xa84   :  { %v1443_v0 = vpop.permute.xlu0 %1442 }
 0xa85   :  { %9177 = vpow2.f32 %v2120_v63  ;;  %v1448_v2 = vsel %vm313_vm5, %v1443_v0, 0 }
 0xa86   :  { %8315 = vmatpush3.bf16.msra.mxu0 %v1448_v2  ;;  %9179 = vpow2.f32 %v2008_v12  ;;  %v10135_v12 = vld [vmem:[%s9510_s13 + $0x8] sm:$0xff] }
 0xa87   :  { %1778 = vrot.lane.b32.xlu0 %v9934_v8, %s11229_s5  ;;  %8326 = vmatprep.subr.bf16.mxu0 %v9473_v1  ;;  %v1555_v8 = vpop.permute.xlu1 %1554 }
 0xa88   :  { %v1560_v26 = vsel %vm313_vm5, %v1555_v8, 0 }
 0xa8f   :  { %v10062_v6 = vpop.eup %9177 }
 0xa90   :  { %v2122_v11 = vsel %vm247_vm2, %v10062_v6, 0.0  ;;  %v10067_v15 = vpop.eup %9179 }
 0xa91   :  { %2123 = vadd.xlane.f32.xlu1 %v2122_v11  ;;  %v2010_v16 = vsel %vm247_vm2, %v10067_v15, 0.0  ;;  %v10132_v11 = vld [vmem:[%s9510_s13] sm:$0xff]  ;;  %s140_s13 = sld [smem:[#allocation4]] }
 0xa97   :  { %s146_s17 = ssub.s32 8, %s140_s13  ;;  %s11247_s13 = sld [smem:[#allocation13_spill]] }
 0xaa6   :  { %2011 = vadd.xlane.f32.xlu0 %v2010_v16 }
 0xaad   :  { %v2230_v7 = vpop.xlane.xlu1 %2229 }
 0xaae   :  { %v2231_v17 = vsub.f32 %v2227_v30, %v2230_v7 }
 0xab0   :  { %v2232_v19 = vmul.f32 1.442695, %v2231_v17 }
 0xab1   :  { %v1667_v22 = vpop.permute.xlu1 %1666 }
 0xab2   :  { %9181 = vpow2.f32 %v2232_v19  ;;  %v1672_v29 = vsel %vm313_vm5, %v1667_v22, 0 }
 0xabc   :  { %v10071_v20 = vpop.eup %9181  ;;  %2016 = vrot.lane.b32.xlu0 %v9949_v9, %s9482_s27 }
 0xabd   :  { %v2234_v18 = vsel %vm247_vm2, %v10071_v20, 0.0 }
 0xabe   :  { %2235 = vadd.xlane.f32.xlu1 %v2234_v18 }
 0xac0   :  { %2128 = vrot.lane.b32.xlu0 %v9949_v9, %s9484_s26 }
 0xac4   :  { %2240 = vrot.lane.b32.xlu0 %v9949_v9, %s11229_s5 }
 0xacf   :  { %1904 = vrot.lane.b32.xlu1 %v9949_v9, %s9483_s22 }
 0xaee   :  { %v1438_v21 = vpop.xlane.xlu0 %1437 }
 0xaef   :  { %9183 = vrcp.f32 %v1438_v21 }
 0xaf6   :  { %v1550_v23 = vpop.xlane.xlu1 %1549 }
 0xaf7   :  { %9185 = vrcp.f32 %v1550_v23 }
 0xaf9   :  { %v9184_v24 = vpop.eup %9183 }
 0xafa   :  { %v1440_v25 = vmul.f32 %v9184_v24, %v10038_v40 }
 0xafc   :  { %v1441_v3 = vpack.c.bf16 %v1440_v25, %v1440_v25 }
 0xafe   :  { %8317 = vmatmul.mubr.msk.bf16.vlgmr.msra.gmra.mrb[36].mxu0 %vm247_vm2, %v1441_v3  ;;  %v1662_v27 = vpop.xlane.xlu0 %1661 }
 0xaff   :  { %8327 = vmatpush3.bf16.msra.mxu0 %v1560_v26  ;;  %9187 = vrcp.f32 %v1662_v27  ;;  %8328 = vmatprep.mubr.msk.bf16.mxu0 %vm9474_vm0, %v9473_v1 }
 0xb00   :  { %8338 = vmatprep.subr.bf16.mxu0 %v9473_v1 }
 0xb01   :  { %v9186_v9 = vpop.eup %9185 }
 0xb02   :  { %v1552_v4 = vmul.f32 %v9186_v9, %v10042_v48  ;;  %v1779_v33 = vpop.permute.xlu0 %1778 }
 0xb03   :  { %v1784_v34 = vsel %vm313_vm5, %v1779_v33, 0 }
 0xb04   :  { %v1553_v28 = vpack.c.bf16 %v1552_v4, %v1552_v4 }
 0xb06   :  { %v1774_v30 = vpop.xlane.xlu1 %1773  ;;  %8329 = vmatmul.mubr.msk.bf16.vlgmr.msra.gmra.mrb[40].mxu0 %vm247_vm2, %v1553_v28 }
 0xb07   :  { %9189 = vrcp.f32 %v1774_v30  ;;  %8339 = vmatpush3.bf16.msra.mxu0 %v1672_v29  ;;  %8340 = vmatprep.mubr.msk.bf16.mxu0 %vm9474_vm0, %v9473_v1 }
 0xb08   :  { %8350 = vmatprep.subr.bf16.mxu0 %v9473_v1 }
 0xb09   :  { %v9188_v31 = vpop.eup %9187 }
 0xb0a   :  { %v1664_v32 = vmul.f32 %v9188_v31, %v10046_v51 }
 0xb0c   :  { %v1665_v14 = vpack.c.bf16 %v1664_v32, %v1664_v32  ;;  %v9089_v32 = vld [vmem:[%s9525_s25 + $0x10] sm:$0xff]  }
 0xb0d   :  { %8405 = vmatpush3.bf16.msra.mxu1 %v9089_v32 }
 0xb0e   :  { %8341 = vmatmul.mubr.msk.bf16.vlgmr.msra.gmra.mrb[44].mxu0 %vm247_vm2, %v1665_v14  ;;  %v1900_v42 = vpop.xlane.xlu1 %1899  ;;  %8406 = vmatprep.subr.bf16.mxu1 %v9473_v1 }
 0xb0f   :  { %8351 = vmatpush3.bf16.msra.mxu0 %v1784_v34  ;;  %8352 = vmatprep.mubr.msk.bf16.mxu0 %vm9474_vm0, %v9473_v1  ;;  %9191 = vrcp.f32 %v1900_v42 }
 0xb10   :  { %8362 = vmatprep.subr.bf16.mxu0 %v9473_v1 }
 0xb11   :  { %v9190_v36 = vpop.eup %9189 }
 0xb12   :  { %v1776_v39 = vmul.f32 %v9190_v36, %v10050_v46 }
 0xb14   :  { %v1777_v40 = vpack.c.bf16 %v1776_v39, %v1776_v39  ;;  %v9090_v39 = vld [vmem:[%s9525_s25 + $0x18] sm:$0xff]   ;;  %s158_s25 = ssub.s32 8, %s7674_s21  ;;  %s11249_s21 = sld [smem:[#allocation14_spill]] }
 0xb15   :  { %8407 = vmatpush3.bf16.msra.mxu1 %v9090_v39 }
 0xb16   :  { %8353 = vmatmul.mubr.msk.bf16.vlgmr.msra.gmra.mrb[48].mxu0 %vm247_vm2, %v1777_v40  ;;  %8420 = vmatprep.subr.bf16.mxu1 %v9473_v1 }
 0xb17   :  { %8364 = vmatprep.mubr.msk.bf16.mxu0 %vm9474_vm0, %v9473_v1 }
 0xb19   :  { %v9192_v47 = vpop.eup %9191 }
 0xb1a   :  { %v1902_v49 = vmul.f32 %v9192_v47, %v10054_v57 }
 0xb1c   :  { %v1903_v51 = vpack.c.bf16 %v1902_v49, %v1902_v49 }
 0xb1e   :  { %v2124_v44 = vpop.xlane.xlu1 %2123 }
 0xb33   :  { %v2012_v43 = vpop.xlane.xlu0 %2011 }
 0xb34   :  { %9193 = vrcp.f32 %v2012_v43 }
 0xb35   :  { %9195 = vrcp.f32 %v2124_v44 }
 0xb37   :  { %v2017_v45 = vpop.permute.xlu0 %2016 }
 0xb38   :  { %v2022_v55 = vsel %vm313_vm5, %v2017_v45, 0 }
 0xb3b   :  { %v2129_v56 = vpop.permute.xlu0 %2128 }
 0xb3c   :  { %v2134_v57 = vsel %vm313_vm5, %v2129_v56, 0 }
 0xb3e   :  { %v9194_v52 = vpop.eup %9193 }
 0xb3f   :  { %v2014_v54 = vmul.f32 %v9194_v52, %v10067_v15  ;;  %v9196_v53 = vpop.eup %9195  ;;  %v2241_v61 = vpop.permute.xlu0 %2240  ;;  %v2438_v15 = vpack.c.bf16 %v10135_v12, %v10132_v11 }
 0xb40   :  { %v2126_v60 = vmul.f32 %v9196_v53, %v10062_v6  ;;  %v2246_v0 = vsel %vm313_vm5, %v2241_v61, 0  ;;  %v9088_v6 = vld [vmem:[%s9545_s14 + $0x8] sm:$0xff]  }
 0xb41   :  { %v2015_v46 = vpack.c.bf16 %v2014_v54, %v2014_v54 }
 0xb42   :  { %v2127_v62 = vpack.c.bf16 %v2126_v60, %v2126_v60 }
 0xb4b   :  { %v2236_v48 = vpop.xlane.xlu1 %2235 }
 0xb4c   :  { %9197 = vrcp.f32 %v2236_v48 }
 0xb4f   :  { %v1905_v35 = vpop.permute.xlu1 %1904 }
 0xb50   :  { %v1910_v50 = vsel %vm313_vm5, %v1905_v35, 0 }
 0xb51   :  { %8363 = vmatpush3.bf16.msra.mxu0 %v1910_v50 }
 0xb52   :  { %8374 = vmatprep.subr.bf16.mxu0 %v9473_v1 }
 0xb54   :  { %8365 = vmatmul.mubr.msk.bf16.vlgmr.msra.gmra.mrb[52].mxu0 %vm247_vm2, %v1903_v51  ;;  %v7739_v51 = vld [vmem:[%s9550_s19] ss:$0 sm:$0xff] }
 0xb55   :  { %8375 = vmatpush3.bf16.msra.mxu0 %v2022_v55  ;;  %8376 = vmatprep.mubr.msk.bf16.mxu0 %vm9474_vm0, %v9473_v1 }
 0xb56   :  { %8386 = vmatprep.subr.bf16.mxu0 %v9473_v1  ;;  %v9198_v63 = vpop.eup %9197 }
 0xb57   :  { %v2238_v2 = vmul.f32 %v9198_v63, %v10071_v20 }
 0xb59   :  { %v2239_v13 = vpack.c.bf16 %v2238_v2, %v2238_v2 }
 0xb5c   :  { %8377 = vmatmul.mubr.msk.bf16.vlgmr.msra.gmra.mrb[56].mxu0 %vm247_vm2, %v2015_v46 }
 0xb5d   :  { %8387 = vmatpush3.bf16.msra.mxu0 %v2134_v57  ;;  %8388 = vmatprep.mubr.msk.bf16.mxu0 %vm9474_vm0, %v9473_v1 }
 0xb5e   :  { %8398 = vmatprep.subr.bf16.mxu0 %v9473_v1 }
 0xb64   :  { %8389 = vmatmul.mubr.msk.bf16.vlgmr.msra.gmra.mrb[60].mxu0 %vm247_vm2, %v2127_v62 }
 0xb65   :  { %8399 = vmatpush3.bf16.msra.mxu0 %v2246_v0  ;;  %8400 = vmatprep.mubr.msk.bf16.mxu0 %vm9474_vm0, %v9473_v1 }
 0xb66   :  { %8412 = vmatprep.subr.bf16.mxu0 %v9473_v1 }
 0xb6c   :  { %8401 = vmatmul.mubr.msk.bf16.vlgmr.msra.gmra.mrb[64].mxu0 %vm247_vm2, %v2239_v13 }
 0xb6d   :  { %8413 = vmatpush3.bf16.msra.mxu0 %v9087_v5  ;;  %8416 = vmatprep.mubr.msk.bf16.mxu0 %vm9474_vm0, %v9473_v1 }
 0xb6e   :  { %8414 = vmatprep.subr.bf16.mxu0 %v9473_v1 }
 0xb71   :  { %8415 = vmatpush3.bf16.msra.mxu0 %v9088_v6 }
 0xb72   :  { %8426 = vmatprep.subr.bf16.mxu0 %v9473_v1 }
 0xb74   :  { %8417 = vmatmul.mubr.msk.bf16.vlgmr.msra.gmra.mrb[68].mxu0 %vm198_vm1, %v2438_v15 }
 0xb75   :  { %8428 = vmatprep.mubr.msk.bf16.mxu0 %vm9474_vm0, %v9473_v1 }
 0xbd1   :  { %v10144_v16 = vpop.f32.mrb[36].mxu0 }
 0xbd2   :  { %v8318_v8 = vpop.f32.mrb[37].mxu0 }
 0xbd3   :  { %v1487_v7 = vpop.f32.mrb[38].mxu0 }
 0xbd4   :  { %v8319_v17 = vpop.f32.mrb[39].mxu0 }
 0xbd9   :  { %v1596_v19 = vpop.f32.mrb[40].mxu0 }
 0xbda   :  { %v8330_v20 = vpop.f32.mrb[41].mxu0 }
 0xbdb   :  { %v1599_v18 = vpop.f32.mrb[42].mxu0 }
 0xbdc   :  { %v8331_v21 = vpop.f32.mrb[43].mxu0 }
 0xbe1   :  { %v1708_v22 = vpop.f32.mrb[44].mxu0 }
 0xbe2   :  { %v8342_v23 = vpop.f32.mrb[45].mxu0 }
 0xbe3   :  { %v1711_v24 = vpop.f32.mrb[46].mxu0 }
 0xbe4   :  { %v8343_v25 = vpop.f32.mrb[47].mxu0 }
 0xbe9   :  { %v1820_v3 = vpop.f32.mrb[48].mxu0 }
 0xbea   :  { %v8354_v26 = vpop.f32.mrb[49].mxu0 }
 0xbeb   :  { %v1823_v27 = vpop.f32.mrb[50].mxu0 }
 0xbec   :  { %v8355_v9 = vpop.f32.mrb[51].mxu0 }
 0xc27   :  { %v1946_v4 = vpop.f32.mrb[52].mxu0 }
 0xc28   :  { %v8366_v28 = vpop.f32.mrb[53].mxu0 }
 0xc29   :  { %v1949_v29 = vpop.f32.mrb[54].mxu0 }
 0xc2a   :  { %v8367_v30 = vpop.f32.mrb[55].mxu0 }
 0xc2f   :  { %v2058_v31 = vpop.f32.mrb[56].mxu0 }
 0xc30   :  { %v9006_v33 = vpack.i.bf16 %v2058_v31, %v1596_v19  ;;  %v8378_v14 = vpop.f32.mrb[57].mxu0 }
 0xc31   :  { %v2061_v34 = vpop.f32.mrb[58].mxu0 }
 0xc32   :  { %9007 = vrot.lane.b32.xlu1 %v9006_v33, %s11227_s11  ;;  %v8379_v36 = vpop.f32.mrb[59].mxu0 }
 0xc37   :  { %v2170_v40 = vpop.f32.mrb[60].mxu0 }
 0xc38   :  { %v9011_v42 = vpack.i.bf16 %v2170_v40, %v1708_v22  ;;  %v8390_v43 = vpop.f32.mrb[61].mxu0 }
 0xc39   :  { %v2173_v44 = vpop.f32.mrb[62].mxu0 }
 0xc3a   :  { %9012 = vrot.lane.b32.xlu0 %v9011_v42, %s11225_s6  ;;  %v8391_v47 = vpop.f32.mrb[63].mxu0 }
 0xc3f   :  { %v2282_v48 = vpop.f32.mrb[64].mxu0 }
 0xc40   :  { %v9016_v49 = vpack.i.bf16 %v2282_v48, %v1820_v3  ;;  %v8402_v35 = vpop.f32.mrb[65].mxu0 }
 0xc41   :  { %v2285_v50 = vpop.f32.mrb[66].mxu0  ;;  %v147_v35 = vstv %s146_s17  ;;  %s11248_s17 = sld [smem:[#allocation16_spill]] }
 0xc42   :  { %9017 = vrot.lane.b32.xlu1 %v9016_v49, %s11223_s15  ;;  %v8403_v45 = vpop.f32.mrb[67].mxu0  ;;  %v137_v49 = vshrl.u32 %v134_v37, 7  ;;  %vm148_vm13 = vcmp.lt.s32.totalorder %v9749_v38, %v147_v35  ;;  %v9489_v50 = vmov -1e+30  }
 0xc44   :  { %vm145_vm12 = vcmp.le.s32.totalorder %v9749_v38, %v137_v49 }
 0xc45   :  { %vm149_vm14 = vmand %vm145_vm12, %vm148_vm13 }
 0xc46   :  { %v10248_v45 = vsel %vm149_vm14, 0.0, %v9489_v50 }
 0xc47   :  { %v2494_v52 = vpop.f32.mrb[68].mxu0 }
 0xc48   :  { %v8418_v55 = vpop.f32.mrb[69].mxu0  ;;  %v2495_v56 = vadd.f32 %v7739_v51, %v2494_v52 }
 0xc49   :  { %v2497_v54 = vpop.f32.mrb[70].mxu0 }
 0xc4a   :  { %v2498_v46 = vadd.f32 %v7739_v51, %v2497_v54  ;;  %v8419_v53 = vpop.f32.mrb[71].mxu0 }
 0xc4c   :  { %v10154_v57 = vpack.c.bf16 %v2498_v46, %v2495_v56 }
 0xc4e   :  { %2615 = vrot.lane.b32.xlu1 %v10154_v57, %s9478_s28  ;;  %2503 = vrot.lane.b32.xlu0 %v10154_v57, %s9476_s9  ;;  %v10169_v60 = vrot.slane %v10154_v57, 4 }
 0xc52   :  { %2727 = vrot.lane.b32.xlu1 %v10154_v57, %s9477_s4  ;;  %2613 = vrot.lane.b32.xlu0 %v10154_v57, %s9475_s0 }
 0xc56   :  { %2839 = vrot.lane.b32.xlu1 %v10154_v57, %s9479_s2  ;;  %2725 = vrot.lane.b32.xlu0 %v10154_v57, %s9480_s16 }
 0xc5a   :  { %2837 = vrot.lane.b32.xlu0 %v10154_v57, %s9481_s7  ;;  %2965 = vrot.lane.b32.xlu1 %v10169_v60, %s9476_s9 }
 0xc5e   :  { %3077 = vrot.lane.b32.xlu0 %v10169_v60, %s9478_s28  ;;  %3075 = vrot.lane.b32.xlu1 %v10169_v60, %s9475_s0 }
 0xc62   :  { %3189 = vrot.lane.b32.xlu0 %v10169_v60, %s9477_s4  ;;  %3187 = vrot.lane.b32.xlu1 %v10169_v60, %s9480_s16 }
 0xc66   :  { %3301 = vrot.lane.b32.xlu0 %v10169_v60, %s9479_s2  ;;  %3299 = vrot.lane.b32.xlu1 %v10169_v60, %s9481_s7 }
 0xca4   :  { %v9008_v61 = vpop.permute.xlu1 %9007 }
 0xca5   :  { %v9010_v63 = vunpack.i.h.bf16 %v9008_v61  ;;  %v9009_v0 = vunpack.i.l.bf16 %v9008_v61 }
 0xca7   :  { %v2300_v6 = vsel %vm247_vm2, %v1946_v4, %v9010_v63  ;;  %v1838_v15 = vsel %vm247_vm2, %v10144_v16, %v9009_v0 }
 0xcac   :  { %v9013_v62 = vpop.permute.xlu0 %9012 }
 0xcad   :  { %v9015_v2 = vunpack.i.h.bf16 %v9013_v62  ;;  %v9014_v5 = vunpack.i.l.bf16 %v9013_v62 }
 0xcaf   :  { %v2301_v17 = vsel %vm706_vm6, %v2300_v6, %v9015_v2  ;;  %v1839_v19 = vsel %vm706_vm6, %v1838_v15, %v9014_v5 }
 0xcb4   :  { %v9018_v13 = vpop.permute.xlu1 %9017 }
 0xcb5   :  { %v9020_v8 = vunpack.i.h.bf16 %v9018_v13  ;;  %v9019_v7 = vunpack.i.l.bf16 %v9018_v13 }
 0xcb7   :  { %v2302_v20 = vsel %vm708_vm7, %v2301_v17, %v9020_v8  ;;  %v1840_v18 = vsel %vm708_vm7, %v1839_v19, %v9019_v7 }
 0xcb8   :  { %v2303_v21 = vpack.c.bf16 %v2302_v20, %v1840_v18  ;;  %v159_v20 = vstv %s158_s25  ;;  %s11250_s25 = sld [smem:[#allocation15_spill]] }
 0xcb9   :  { %vm160_vm15 = vcmp.lt.s32.totalorder %v9749_v38, %v159_v20 }
 0xcba   :  { %8409 = vmatmul.mubr.msk.bf16.vlgmr.msra.gmra.mrb[72].mxu1 %vm198_vm1, %v2303_v21  ;;  %vm161_vm3 = vmand %vm145_vm12, %vm160_vm15 }
 0xcbb   :  { %8422 = vmatprep.mubr.msk.bf16.mxu1 %vm9474_vm0, %v9473_v1 }
 0xcc0   :  { %v2504_v22 = vpop.permute.xlu0 %2503  ;;  %v2616_v16 = vpop.permute.xlu1 %2615 }
 0xcc1   :  { %v2509_v23 = vsel %vm247_vm2, %v2504_v22, 0  ;;  %v2621_v24 = vsel %vm247_vm2, %v2616_v16, 0 }
 0xcc2   :  { %8421 = vmatpush3.bf16.xpose.msra.mxu1 %v2509_v23 }
 0xcc3   :  { %8432 = vmatprep.subr.bf16.mxu1 %v9473_v1 }
 0xcc4   :  { %v2728_v25 = vpop.permute.xlu1 %2727  ;;  %v2614_v3 = vpop.permute.xlu0 %2613 }
 0xcc5   :  { %v2733_v26 = vsel %vm247_vm2, %v2728_v25, 0 }
 0xcc8   :  { %v2840_v27 = vpop.permute.xlu1 %2839  ;;  %v2726_v9 = vpop.permute.xlu0 %2725 }
 0xcc9   :  { %8423 = vmatmul.mubr.msk.bf16.vlgmr.msra.gmra.mrb[76].mxu1 %vm247_vm2, %v10154_v57  ;;  %v2845_v4 = vsel %vm247_vm2, %v2840_v27, 0 }
 0xcca   :  { %8433 = vmatpush3.bf16.xpose.msra.mxu1 %v2621_v24  ;;  %8434 = vmatprep.mubr.msk.bf16.mxu1 %vm9474_vm0, %v9473_v1 }
 0xccb   :  { %8444 = vmatprep.subr.bf16.mxu1 %v9473_v1 }
 0xccc   :  { %v2966_v28 = vpop.permute.xlu1 %2965  ;;  %v2838_v29 = vpop.permute.xlu0 %2837 }
 0xccd   :  { %v2971_v30 = vsel %vm247_vm2, %v2966_v28, 0 }
 0xcd0   :  { %v3078_v31 = vpop.permute.xlu0 %3077  ;;  %v3076_v14 = vpop.permute.xlu1 %3075 }
 0xcd1   :  { %8435 = vmatmul.mubr.msk.bf16.vlgmr.msra.gmra.mrb[80].mxu1 %vm247_vm2, %v2614_v3  ;;  %v3083_v32 = vsel %vm247_vm2, %v3078_v31, 0  ;;  %v10273_v3 = vsel %vm161_vm3, 0.0, %v9489_v50 }
 0xcd2   :  { %8445 = vmatpush3.bf16.xpose.msra.mxu1 %v2733_v26  ;;  %8446 = vmatprep.mubr.msk.bf16.mxu1 %vm9474_vm0, %v9473_v1 }
 0xcd3   :  { %8456 = vmatprep.subr.bf16.mxu1 %v9473_v1 }
 0xcd4   :  { %v3190_v33 = vpop.permute.xlu0 %3189  ;;  %v3188_v39 = vpop.permute.xlu1 %3187 }
 0xcd5   :  { %v3195_v34 = vsel %vm247_vm2, %v3190_v33, 0 }
 0xcd8   :  { %v3302_v36 = vpop.permute.xlu0 %3301  ;;  %v3300_v42 = vpop.permute.xlu1 %3299 }
 0xcd9   :  { %8447 = vmatmul.mubr.msk.bf16.vlgmr.msra.gmra.mrb[84].mxu1 %vm247_vm2, %v2726_v9  ;;  %v3307_v40 = vsel %vm247_vm2, %v3302_v36, 0 }
 0xcda   :  { %8457 = vmatpush3.bf16.xpose.msra.mxu1 %v2845_v4  ;;  %8458 = vmatprep.mubr.msk.bf16.mxu1 %vm9474_vm0, %v9473_v1 }
 0xcdb   :  { %8468 = vmatprep.subr.bf16.mxu1 %v9473_v1 }
 0xce1   :  { %8459 = vmatmul.mubr.msk.bf16.vlgmr.msra.gmra.mrb[88].mxu1 %vm247_vm2, %v2838_v29 }
 0xce2   :  { %8469 = vmatpush3.bf16.xpose.msra.mxu1 %v2971_v30  ;;  %8470 = vmatprep.mubr.msk.bf16.mxu1 %vm9474_vm0, %v9473_v1 }
 0xce3   :  { %8480 = vmatprep.subr.bf16.mxu1 %v9473_v1 }
 0xce9   :  { %8471 = vmatmul.mubr.msk.bf16.vlgmr.msra.gmra.mrb[92].mxu1 %vm247_vm2, %v10169_v60 }
 0xcea   :  { %8481 = vmatpush3.bf16.xpose.msra.mxu1 %v3083_v32  ;;  %8482 = vmatprep.mubr.msk.bf16.mxu1 %vm9474_vm0, %v9473_v1 }
 0xceb   :  { %8492 = vmatprep.subr.bf16.mxu1 %v9473_v1 }
 0xcf1   :  { %8483 = vmatmul.mubr.msk.bf16.vlgmr.msra.gmra.mrb[96].mxu1 %vm247_vm2, %v3076_v14 }
 0xcf2   :  { %8493 = vmatpush3.bf16.xpose.msra.mxu1 %v3195_v34  ;;  %8494 = vmatprep.mubr.msk.bf16.mxu1 %vm9474_vm0, %v9473_v1 }
 0xcf3   :  { %8504 = vmatprep.subr.bf16.mxu1 %v9473_v1 }
 0xcf9   :  { %8495 = vmatmul.mubr.msk.bf16.vlgmr.msra.gmra.mrb[100].mxu1 %vm247_vm2, %v3188_v39 }
 0xcfa   :  { %8505 = vmatpush3.bf16.xpose.msra.mxu1 %v3307_v40  ;;  %8506 = vmatprep.mubr.msk.bf16.mxu1 %vm9474_vm0, %v9473_v1 }
 0xcfb   :  { %8516 = vmatprep.subr.bf16.mxu1 %v9473_v1 }
 0xd01   :  { %8507 = vmatmul.mubr.msk.bf16.vlgmr.msra.gmra.mrb[104].mxu1 %vm247_vm2, %v3300_v42 }
 0xd02   :  { %8520 = vmatprep.mubr.msk.bf16.mxu1 %vm9474_vm0, %v9473_v1 }
 0xd8d   :  { %v10239_v43 = vpop.f32.mrb[72].mxu1 }
 0xd8e   :  { %v8410_v44 = vpop.f32.mrb[73].mxu1 }
 0xd8f   :  { %v10241_v47 = vpop.f32.mrb[74].mxu1 }
 0xd90   :  { %v8411_v48 = vpop.f32.mrb[75].mxu1 }
 0xd9c   :  { %v2545_v51 = vpop.f32.mrb[76].mxu1 }
 0xd9d   :  { %v2551_v52 = vmul.f32 0.35355338, %v2545_v51  ;;  %v8424_v55 = vpop.f32.mrb[77].mxu1 }
 0xd9e   :  { %v2548_v54 = vpop.f32.mrb[78].mxu1 }
 0xd9f   :  { %v10251_v56 = vadd.f32 %v2551_v52, %v10248_v45  ;;  %v8425_v46 = vpop.f32.mrb[79].mxu1 }
 0xda1   :  { %v2553_v37 = vsel %vm247_vm2, %v10251_v56, -inf }
 0xda2   :  { %2554 = vmax.xlane.f32.xlu0 %v2553_v37 }
 0xda4   :  { %v2657_v53 = vpop.f32.mrb[80].mxu1 }
 0xda5   :  { %v2663_v61 = vmul.f32 0.35355338, %v2657_v53  ;;  %v8436_v62 = vpop.f32.mrb[81].mxu1 }
 0xda6   :  { %v2660_v63 = vpop.f32.mrb[82].mxu1 }
 0xda7   :  { %v10256_v0 = vadd.f32 %v2663_v61, %v10248_v45  ;;  %v8437_v2 = vpop.f32.mrb[83].mxu1 }
 0xda9   :  { %v2665_v5 = vsel %vm247_vm2, %v10256_v0, -inf }
 0xdaa   :  { %2666 = vmax.xlane.f32.xlu1 %v2665_v5 }
 0xdac   :  { %v2769_v13 = vpop.f32.mrb[84].mxu1 }
 0xdad   :  { %v2775_v6 = vmul.f32 0.35355338, %v2769_v13  ;;  %v8448_v15 = vpop.f32.mrb[85].mxu1 }
 0xdae   :  { %v2772_v8 = vpop.f32.mrb[86].mxu1 }
 0xdaf   :  { %v10261_v7 = vadd.f32 %v2775_v6, %v10248_v45  ;;  %v8449_v17 = vpop.f32.mrb[87].mxu1 }
 0xdb1   :  { %v2777_v19 = vsel %vm247_vm2, %v10261_v7, -inf }
 0xdb2   :  { %2778 = vmax.xlane.f32.xlu0 %v2777_v19 }
 0xdb4   :  { %v2881_v18 = vpop.f32.mrb[88].mxu1 }
 0xdb5   :  { %v2887_v21 = vmul.f32 0.35355338, %v2881_v18  ;;  %v8460_v22 = vpop.f32.mrb[89].mxu1 }
 0xdb6   :  { %v2884_v23 = vpop.f32.mrb[90].mxu1 }
 0xdb7   :  { %v10267_v16 = vadd.f32 %v2887_v21, %v10248_v45  ;;  %v8461_v24 = vpop.f32.mrb[91].mxu1 }
 0xdb9   :  { %v2889_v25 = vsel %vm247_vm2, %v10267_v16, -inf }
 0xdba   :  { %2890 = vmax.xlane.f32.xlu0 %v2889_v25 }
 0xdbc   :  { %v3007_v26 = vpop.f32.mrb[92].mxu1 }
 0xdbd   :  { %v3013_v27 = vmul.f32 0.35355338, %v3007_v26  ;;  %v8472_v9 = vpop.f32.mrb[93].mxu1 }
 0xdbe   :  { %v3010_v4 = vpop.f32.mrb[94].mxu1 }
 0xdbf   :  { %v10276_v28 = vadd.f32 %v3013_v27, %v10273_v3  ;;  %v8473_v29 = vpop.f32.mrb[95].mxu1 }
 0xdc1   :  { %v3015_v30 = vsel %vm247_vm2, %v10276_v28, -inf }
 0xdc2   :  { %3016 = vmax.xlane.f32.xlu1 %v3015_v30 }
 0xdc4   :  { %v3119_v31 = vpop.f32.mrb[96].mxu1 }
 0xdc5   :  { %v3125_v32 = vmul.f32 0.35355338, %v3119_v31  ;;  %v8484_v33 = vpop.f32.mrb[97].mxu1 }
 0xdc6   :  { %v3122_v38 = vpop.f32.mrb[98].mxu1 }
 0xdc7   :  { %v3126_v14 = vadd.f32 %v3125_v32, %v10273_v3  ;;  %v8485_v34 = vpop.f32.mrb[99].mxu1 }
 0xdc9   :  { %v3127_v36 = vsel %vm247_vm2, %v3126_v14, -inf }
 0xdca   :  { %3128 = vmax.xlane.f32.xlu0 %v3127_v36 }
 0xdcc   :  { %v3231_v39 = vpop.f32.mrb[100].mxu1 }
 0xdcd   :  { %v3237_v40 = vmul.f32 0.35355338, %v3231_v39  ;;  %v8496_v42 = vpop.f32.mrb[101].mxu1 }
 0xdce   :  { %v3234_v44 = vpop.f32.mrb[102].mxu1 }
 0xdcf   :  { %v3238_v48 = vadd.f32 %v3237_v40, %v10273_v3  ;;  %v8497_v49 = vpop.f32.mrb[103].mxu1 }
 0xdd1   :  { %v3239_v35 = vsel %vm247_vm2, %v3238_v48, -inf }
 0xdd2   :  { %3240 = vmax.xlane.f32.xlu1 %v3239_v35 }
 0xdd4   :  { %v3343_v50 = vpop.f32.mrb[104].mxu1 }
 0xdd5   :  { %v8508_v51 = vpop.f32.mrb[105].mxu1  ;;  %v3349_v54 = vmul.f32 0.35355338, %v3343_v50 }
 0xdd6   :  { %v3346_v52 = vpop.f32.mrb[106].mxu1 }
 0xdd7   :  { %v8509_v55 = vpop.f32.mrb[107].mxu1  ;;  %v3350_v46 = vadd.f32 %v3349_v54, %v10273_v3 }
 0xdd9   :  { %v3351_v37 = vsel %vm247_vm2, %v3350_v46, -inf }
 0xde0   :  { %2677 = vrot.lane.b32.xlu0 %v10154_v57, %s9482_s27 }
 0xde3   :  { %2565 = vrot.lane.b32.xlu1 %v10154_v57, %s9483_s22 }
 0xdff   :  { %3352 = vmax.xlane.f32.xlu0 %v3351_v37 }
 0xe2f   :  { %v2555_v53 = vpop.xlane.xlu0 %2554 }
 0xe30   :  { %v2556_v61 = vsub.f32 %v10251_v56, %v2555_v53 }
 0xe32   :  { %v2557_v62 = vmul.f32 1.442695, %v2556_v61 }
 0xe34   :  { %9199 = vpow2.f32 %v2557_v62 }
 0xe37   :  { %v2667_v63 = vpop.xlane.xlu1 %2666 }
 0xe38   :  { %v2668_v2 = vsub.f32 %v10256_v0, %v2667_v63 }
 0xe3a   :  { %v2669_v5 = vmul.f32 1.442695, %v2668_v2 }
 0xe3c   :  { %9201 = vpow2.f32 %v2669_v5 }
 0xe3e   :  { %v10292_v13 = vpop.eup %9199 }
 0xe3f   :  { %v2779_v6 = vpop.xlane.xlu0 %2778  ;;  %v2559_v15 = vsel %vm247_vm2, %v10292_v13, 0.0 }
 0xe40   :  { %v2780_v8 = vsub.f32 %v10261_v7, %v2779_v6  ;;  %2560 = vadd.xlane.f32.xlu1 %v2559_v15 }
 0xe42   :  { %v2781_v17 = vmul.f32 1.442695, %v2780_v8 }
 0xe44   :  { %9203 = vpow2.f32 %v2781_v17 }
 0xe46   :  { %v10297_v19 = vpop.eup %9201 }
 0xe47   :  { %v2671_v56 = vsel %vm247_vm2, %v10297_v19, 0.0  ;;  %v2891_v22 = vpop.xlane.xlu0 %2890 }
 0xe48   :  { %2672 = vadd.xlane.f32.xlu0 %v2671_v56  ;;  %v2892_v24 = vsub.f32 %v10267_v16, %v2891_v22 }
 0xe4a   :  { %v2893_v25 = vmul.f32 1.442695, %v2892_v24 }
 0xe4c   :  { %9205 = vpow2.f32 %v2893_v25 }
 0xe4e   :  { %v10301_v0 = vpop.eup %9203 }
 0xe4f   :  { %v2783_v20 = vsel %vm247_vm2, %v10301_v0, 0.0  ;;  %v3017_v18 = vpop.xlane.xlu1 %3016 }
 0xe50   :  { %2784 = vadd.xlane.f32.xlu1 %v2783_v20  ;;  %v3018_v26 = vsub.f32 %v10276_v28, %v3017_v18 }
 0xe52   :  { %v3019_v4 = vmul.f32 1.442695, %v3018_v26 }
 0xe54   :  { %9207 = vpow2.f32 %v3019_v4 }
 0xe56   :  { %v9206_v31 = vpop.eup %9205 }
 0xe57   :  { %v3129_v27 = vpop.xlane.xlu0 %3128  ;;  %v2895_v32 = vsel %vm247_vm2, %v9206_v31, 0.0 }
 0xe58   :  { %v3130_v9 = vsub.f32 %v3126_v14, %v3129_v27 }
 0xe5a   :  { %v3131_v30 = vmul.f32 1.442695, %v3130_v9 }
 0xe5b   :  { %v2678_v36 = vpop.permute.xlu0 %2677 }
 0xe5c   :  { %9209 = vpow2.f32 %v3131_v30  ;;  %v2683_v55 = vsel %vm313_vm5, %v2678_v36, 0 }
 0xe5e   :  { %2789 = vrot.lane.b32.xlu0 %v10154_v57, %s9484_s26  ;;  %v10314_v33 = vpop.eup %9207 }
 0xe5f   :  { %v3241_v7 = vpop.xlane.xlu1 %3240  ;;  %v3021_v28 = vsel %vm247_vm2, %v10314_v33, 0.0 }
 0xe60   :  { %v3242_v29 = vsub.f32 %v3238_v48, %v3241_v7 }
 0xe61   :  { %2901 = vrot.lane.b32.xlu1 %v10154_v57, %s11229_s5 }
 0xe62   :  { %v3243_v57 = vmul.f32 1.442695, %v3242_v29 }
 0xe63   :  { %v2566_v21 = vpop.permute.xlu1 %2565 }
 0xe64   :  { %v2571_v23 = vsel %vm313_vm5, %v2566_v21, 0  ;;  %9211 = vpow2.f32 %v3243_v57 }
 0xe65   :  { %8427 = vmatpush3.bf16.msra.mxu0 %v2571_v23 }
 0xe66   :  { %8438 = vmatprep.subr.bf16.mxu0 %v9473_v1  ;;  %v10316_v16 = vpop.eup %9209 }
 0xe67   :  { %v3133_v14 = vsel %vm247_vm2, %v10316_v16, 0.0 }
 0xe6e   :  { %v10320_v38 = vpop.eup %9211 }
 0xe6f   :  { %v3245_v34 = vsel %vm247_vm2, %v10320_v38, 0.0 }
 0xe7d   :  { %2896 = vadd.xlane.f32.xlu0 %v2895_v32 }
 0xe81   :  { %3022 = vadd.xlane.f32.xlu0 %v3021_v28 }
 0xe85   :  { %3134 = vadd.xlane.f32.xlu1 %v3133_v14  ;;  %3246 = vadd.xlane.f32.xlu0 %v3245_v34 }
 0xe8c   :  { %v3353_v39 = vpop.xlane.xlu0 %3352 }
 0xe8d   :  { %v3354_v40 = vsub.f32 %v3350_v46, %v3353_v39 }
 0xe8f   :  { %v3355_v42 = vmul.f32 1.442695, %v3354_v40 }
 0xe91   :  { %9213 = vpow2.f32 %v3355_v42 }
 0xe96   :  { %3139 = vrot.lane.b32.xlu1 %v10169_v60, %s9482_s27 }
 0xe9a   :  { %3251 = vrot.lane.b32.xlu1 %v10169_v60, %s9484_s26 }
 0xe9b   :  { %v10330_v44 = vpop.eup %9213 }
 0xe9c   :  { %v3357_v48 = vsel %vm247_vm2, %v10330_v44, 0.0 }
 0xe9d   :  { %3358 = vadd.xlane.f32.xlu0 %v3357_v48 }
 0xe9e   :  { %3363 = vrot.lane.b32.xlu1 %v10169_v60, %s11229_s5  ;;  %s11254_s5 = sld [smem:[#allocation20_spill]] }
 0xeb3   :  { %3027 = vrot.lane.b32.xlu0 %v10169_v60, %s9483_s22 }
 0xecd   :  { %v2561_v49 = vpop.xlane.xlu1 %2560 }
 0xece   :  { %9215 = vrcp.f32 %v2561_v49 }
 0xed5   :  { %v2673_v35 = vpop.xlane.xlu0 %2672 }
 0xed6   :  { %9217 = vrcp.f32 %v2673_v35 }
 0xed8   :  { %v9216_v50 = vpop.eup %9215 }
 0xed9   :  { %v2563_v51 = vmul.f32 %v9216_v50, %v10292_v13  ;;  %v2790_v37 = vpop.permute.xlu0 %2789 }
 0xeda   :  { %v2795_v61 = vsel %vm313_vm5, %v2790_v37, 0 }
 0xedb   :  { %v2564_v52 = vpack.c.bf16 %v2563_v51, %v2563_v51 }
 0xedd   :  { %8429 = vmatmul.mubr.msk.bf16.vlgmr.msra.gmra.mrb[72].mxu0 %vm247_vm2, %v2564_v52  ;;  %v2785_v54 = vpop.xlane.xlu1 %2784 }
 0xede   :  { %8439 = vmatpush3.bf16.msra.mxu0 %v2683_v55  ;;  %9219 = vrcp.f32 %v2785_v54  ;;  %8440 = vmatprep.mubr.msk.bf16.mxu0 %vm9474_vm0, %v9473_v1 }
 0xedf   :  { %8450 = vmatprep.subr.bf16.mxu0 %v9473_v1 }
 0xee0   :  { %v9218_v60 = vpop.eup %9217 }
 0xee1   :  { %v2675_v46 = vmul.f32 %v9218_v60, %v10297_v19  ;;  %v2902_v2 = vpop.permute.xlu1 %2901 }
 0xee2   :  { %v2907_v13 = vsel %vm313_vm5, %v2902_v2, 0 }
 0xee3   :  { %v2676_v53 = vpack.c.bf16 %v2675_v46, %v2675_v46 }
 0xee5   :  { %8441 = vmatmul.mubr.msk.bf16.vlgmr.msra.gmra.mrb[76].mxu0 %vm247_vm2, %v2676_v53 }
 0xee6   :  { %8451 = vmatpush3.bf16.msra.mxu0 %v2795_v61  ;;  %8452 = vmatprep.mubr.msk.bf16.mxu0 %vm9474_vm0, %v9473_v1 }
 0xee7   :  { %8462 = vmatprep.subr.bf16.mxu0 %v9473_v1 }
 0xee8   :  { %v9220_v62 = vpop.eup %9219 }
 0xee9   :  { %v2787_v63 = vmul.f32 %v9220_v62, %v10301_v0 }
 0xeeb   :  { %v2788_v5 = vpack.c.bf16 %v2787_v63, %v2787_v63  ;;  %v9091_v63 = vld [vmem:[%s9555_s24] sm:$0xff]  }
 0xeec   :  { %8517 = vmatpush3.bf16.msra.mxu1 %v9091_v63 }
 0xeed   :  { %8453 = vmatmul.mubr.msk.bf16.vlgmr.msra.gmra.mrb[80].mxu0 %vm247_vm2, %v2788_v5  ;;  %8518 = vmatprep.subr.bf16.mxu1 %v9473_v1 }
 0xeee   :  { %8463 = vmatpush3.bf16.msra.mxu0 %v2907_v13  ;;  %8464 = vmatprep.mubr.msk.bf16.mxu0 %vm9474_vm0, %v9473_v1 }
 0xeef   :  { %8474 = vmatprep.subr.bf16.mxu0 %v9473_v1 }
 0xf0a   :  { %v2897_v6 = vpop.xlane.xlu0 %2896 }
 0xf0b   :  { %9221 = vrcp.f32 %v2897_v6 }
 0xf0e   :  { %v3023_v19 = vpop.xlane.xlu0 %3022 }
 0xf0f   :  { %9223 = vrcp.f32 %v3023_v19 }
 0xf12   :  { %v3135_v56 = vpop.xlane.xlu1 %3134  ;;  %v3247_v0 = vpop.xlane.xlu0 %3246 }
 0xf13   :  { %9225 = vrcp.f32 %v3135_v56 }
 0xf14   :  { %9227 = vrcp.f32 %v3247_v0 }
 0xf15   :  { %v9222_v15 = vpop.eup %9221 }
 0xf16   :  { %v2899_v8 = vmul.f32 %v9222_v15, %v9206_v31  ;;  %v3140_v23 = vpop.permute.xlu1 %3139  ;;  %v9092_v15 = vld [vmem:[%s9555_s24 + $0x8] sm:$0xff]  }
 0xf17   :  { %v3145_v26 = vsel %vm313_vm5, %v3140_v23, 0  ;;  %8519 = vmatpush3.bf16.msra.mxu1 %v9092_v15  ;;  %v2360_v23 = vadd.f32 %v10239_v43, %v9924_v58 }
 0xf18   :  { %v2900_v17 = vpack.c.bf16 %v2899_v8, %v2899_v8  ;;  %8532 = vmatprep.subr.bf16.mxu1 %v9473_v1 }
 0xf19   :  { %v9224_v20 = vpop.eup %9223 }
 0xf1a   :  { %8465 = vmatmul.mubr.msk.bf16.vlgmr.msra.gmra.mrb[84].mxu0 %vm247_vm2, %v2900_v17  ;;  %v3025_v7 = vmul.f32 %v9224_v20, %v10314_v33  ;;  %v3252_v9 = vpop.permute.xlu1 %3251 }
 0xf1b   :  { %8476 = vmatprep.mubr.msk.bf16.mxu0 %vm9474_vm0, %v9473_v1  ;;  %v3257_v30 = vsel %vm313_vm5, %v3252_v9, 0 }
 0xf1c   :  { %v3026_v24 = vpack.c.bf16 %v3025_v7, %v3025_v7 }
 0xf1d   :  { %v9226_v25 = vpop.eup %9225 }
 0xf1e   :  { %v3137_v27 = vmul.f32 %v9226_v25, %v10316_v16  ;;  %v9228_v29 = vpop.eup %9227  ;;  %v3364_v31 = vpop.permute.xlu1 %3363  ;;  %v2361_v25 = vadd.f32 %v10241_v47, %v9926_v59 }
 0xf1f   :  { %v3249_v57 = vmul.f32 %v9228_v29, %v10320_v38  ;;  %v3369_v16 = vsel %vm313_vm5, %v3364_v31, 0 }
 0xf20   :  { %v3138_v4 = vpack.c.bf16 %v3137_v27, %v3137_v27 }
 0xf21   :  { %v3250_v32 = vpack.c.bf16 %v3249_v57, %v3249_v57 }
 0xf2a   :  { %v3359_v18 = vpop.xlane.xlu0 %3358 }
 0xf2b   :  { %9229 = vrcp.f32 %v3359_v18 }
 0xf2e   :  { %v3028_v21 = vpop.permute.xlu0 %3027 }
 0xf2f   :  { %v3033_v22 = vsel %vm313_vm5, %v3028_v21, 0 }
 0xf30   :  { %8475 = vmatpush3.bf16.msra.mxu0 %v3033_v22 }
 0xf31   :  { %8486 = vmatprep.subr.bf16.mxu0 %v9473_v1 }
 0xf33   :  { %8477 = vmatmul.mubr.msk.bf16.vlgmr.msra.gmra.mrb[88].mxu0 %vm247_vm2, %v3026_v24  ;;  %v7736_v24 = vld [vmem:[%s9530_s29 + $0x1] ss:$0 sm:$0xff]  ;;  %s11243_s29 = sld [smem:[#allocation11_spill]] }
 0xf34   :  { %8487 = vmatpush3.bf16.msra.mxu0 %v3145_v26  ;;  %8488 = vmatprep.mubr.msk.bf16.mxu0 %vm9474_vm0, %v9473_v1  ;;  %v2368_v26 = vadd.f32 %v7736_v24, %v2360_v23  ;;  %v2369_v27 = vadd.f32 %v7736_v24, %v2361_v25 }
 0xf35   :  { %8498 = vmatprep.subr.bf16.mxu0 %v9473_v1  ;;  %v9230_v33 = vpop.eup %9229 }
 0xf36   :  { %v3361_v28 = vmul.f32 %v9230_v33, %v10330_v44  ;;  %v2370_v9 = vsel %vm198_vm1, %v2368_v26, 0.0 }
 0xf38   :  { %v3362_v14 = vpack.c.bf16 %v3361_v28, %v3361_v28 }
 0xf3b   :  { %8489 = vmatmul.mubr.msk.bf16.vlgmr.msra.gmra.mrb[92].mxu0 %vm247_vm2, %v3138_v4  ;;  %v2373_v4 = vsel %vm198_vm1, %v2369_v27, 0.0 }
 0xf3c   :  { %8499 = vmatpush3.bf16.msra.mxu0 %v3257_v30  ;;  %8500 = vmatprep.mubr.msk.bf16.mxu0 %vm9474_vm0, %v9473_v1 }
 0xf3d   :  { %8510 = vmatprep.subr.bf16.mxu0 %v9473_v1 }
 0xf43   :  { %8501 = vmatmul.mubr.msk.bf16.vlgmr.msra.gmra.mrb[96].mxu0 %vm247_vm2, %v3250_v32 }
 0xf44   :  { %8511 = vmatpush3.bf16.msra.mxu0 %v3369_v16  ;;  %8512 = vmatprep.mubr.msk.bf16.mxu0 %vm9474_vm0, %v9473_v1 }
 0xf45   :  { %8524 = vmatprep.subr.bf16.mxu0 %v9473_v1 }
 0xf4b   :  { %8513 = vmatmul.mubr.msk.bf16.vlgmr.msra.gmra.mrb[100].mxu0 %vm247_vm2, %v3362_v14 }
 0xf4c   :  { %8528 = vmatprep.mubr.msk.bf16.mxu0 %vm9474_vm0, %v9473_v1 }
 0xfb0   :  { %v2607_v38 = vpop.f32.mrb[72].mxu0 }
 0xfb1   :  { %v8430_v34 = vpop.f32.mrb[73].mxu0 }
 0xfb2   :  { %v2610_v36 = vpop.f32.mrb[74].mxu0 }
 0xfb3   :  { %v8431_v39 = vpop.f32.mrb[75].mxu0 }
 0xfb8   :  { %v2719_v40 = vpop.f32.mrb[76].mxu0 }
 0xfb9   :  { %v8442_v42 = vpop.f32.mrb[77].mxu0 }
 0xfba   :  { %v2722_v48 = vpop.f32.mrb[78].mxu0 }
 0xfbb   :  { %v8443_v49 = vpop.f32.mrb[79].mxu0 }
 0xfbc   :  { %v7762_v49 = vld [vmem:[%s9560_s30] ss:$0 sm:$0xff] }
 0xfc0   :  { %v2831_v35 = vpop.f32.mrb[80].mxu0 }
 0xfc1   :  { %v8454_v50 = vpop.f32.mrb[81].mxu0 }
 0xfc2   :  { %v2834_v44 = vpop.f32.mrb[82].mxu0 }
 0xfc3   :  { %v8455_v51 = vpop.f32.mrb[83].mxu0 }
 0xfed   :  { %v2943_v52 = vpop.f32.mrb[84].mxu0 }
 0xfee   :  { %v8466_v55 = vpop.f32.mrb[85].mxu0 }
 0xfef   :  { %v2946_v54 = vpop.f32.mrb[86].mxu0 }
 0xff0   :  { %v8467_v60 = vpop.f32.mrb[87].mxu0 }
0x1006   :  { %v3069_v46 = vpop.f32.mrb[88].mxu0 }
0x1007   :  { %v8478_v37 = vpop.f32.mrb[89].mxu0 }
0x1008   :  { %v3072_v53 = vpop.f32.mrb[90].mxu0 }
0x1009   :  { %v8479_v61 = vpop.f32.mrb[91].mxu0 }
0x100e   :  { %v3181_v62 = vpop.f32.mrb[92].mxu0 }
0x100f   :  { %v9021_v2 = vpack.i.bf16 %v3181_v62, %v2719_v40  ;;  %v8490_v5 = vpop.f32.mrb[93].mxu0 }
0x1010   :  { %v3184_v13 = vpop.f32.mrb[94].mxu0  ;;  %v9094_v5 = vld [vmem:[%s9575_s20 + $0x8] sm:$0xff]  }
0x1011   :  { %9022 = vrot.lane.b32.xlu1 %v9021_v2, %s11227_s11  ;;  %v8491_v6 = vpop.f32.mrb[95].mxu0 }
0x1016   :  { %v3293_v8 = vpop.f32.mrb[96].mxu0 }
0x1017   :  { %v9026_v17 = vpack.i.bf16 %v3293_v8, %v2831_v35  ;;  %v8502_v19 = vpop.f32.mrb[97].mxu0 }
0x1018   :  { %v3296_v56 = vpop.f32.mrb[98].mxu0 }
0x1019   :  { %9027 = vrot.lane.b32.xlu1 %v9026_v17, %s11225_s6  ;;  %v8503_v0 = vpop.f32.mrb[99].mxu0 }
0x101e   :  { %v3405_v20 = vpop.f32.mrb[100].mxu0 }
0x101f   :  { %v9031_v18 = vpack.i.bf16 %v3405_v20, %v2943_v52  ;;  %v8514_v7 = vpop.f32.mrb[101].mxu0 }
0x1020   :  { %v3408_v21 = vpop.f32.mrb[102].mxu0 }
0x1021   :  { %9032 = vrot.lane.b32.xlu0 %v9031_v18, %s11223_s15  ;;  %v8515_v22 = vpop.f32.mrb[103].mxu0 }
0x103d   :  { %2371 = vadd.xlane.f32.xlu1 %v2370_v9 }
0x1040   :  { %2374 = vadd.xlane.f32.xlu0 %v2373_v4 }
0x1083   :  { %v9023_v29 = vpop.permute.xlu1 %9022 }
0x1084   :  { %v9025_v57 = vunpack.i.h.bf16 %v9023_v29  ;;  %v9024_v31 = vunpack.i.l.bf16 %v9023_v29 }
0x1086   :  { %v3423_v58 = vsel %vm247_vm2, %v3069_v46, %v9025_v57  ;;  %v2961_v59 = vsel %vm247_vm2, %v2607_v38, %v9024_v31 }
0x108b   :  { %v9028_v30 = vpop.permute.xlu1 %9027 }
0x108c   :  { %v9030_v32 = vunpack.i.h.bf16 %v9028_v30  ;;  %v9029_v33 = vunpack.i.l.bf16 %v9028_v30 }
0x108e   :  { %v3424_v28 = vsel %vm706_vm6, %v3423_v58, %v9030_v32  ;;  %v2962_v14 = vsel %vm706_vm6, %v2961_v59, %v9029_v33 }
0x1093   :  { %v9033_v16 = vpop.permute.xlu0 %9032 }
0x1094   :  { %v9035_v43 = vunpack.i.h.bf16 %v9033_v16  ;;  %v9034_v47 = vunpack.i.l.bf16 %v9033_v16  ;;  %v7737_v16 = vld [vmem:[%s9535_s3 + $0x1] ss:$0 sm:$0xff]  ;;  %s11244_s3 = sld [smem:[#allocation9_spill]] }
0x1096   :  { %v3425_v34 = vsel %vm708_vm7, %v3424_v28, %v9035_v43  ;;  %v2963_v36 = vsel %vm708_vm7, %v2962_v14, %v9034_v47  ;;  %v7738_v14 = vld [vmem:[%s9540_s8 + $0x1] ss:$0 sm:$0xff]  ;;  %s11245_s8 = sld [smem:[#allocation10_spill]] }
0x1097   :  { %v3426_v39 = vpack.c.bf16 %v3425_v34, %v2963_v36 }
0x1099   :  { %8521 = vmatmul.mubr.msk.bf16.vlgmr.msra.gmra.mrb[108].mxu1 %vm198_vm1, %v3426_v39 }
0x109a   :  { %8536 = vmatprep.mubr.msk.bf16.mxu1 %vm9474_vm0, %v9473_v1 }
0x10ca   :  { %v2372_v40 = vpop.xlane.xlu1 %2371 }
0x10cb   :  { %v2376_v48 = vmul.f32 0.03125, %v2372_v40 }
0x10cd   :  { %v2375_v42 = vpop.xlane.xlu0 %2374  ;;  %v10407_v50 = vsub.f32 %v2368_v26, %v2376_v48 }
0x10ce   :  { %v2377_v38 = vmul.f32 0.03125, %v2375_v42  ;;  %v10439_v42 = vld [vmem:[%s11243_s29] ss:$0 sm:$0xff] }
0x10cf   :  { %v2380_v61 = vmul.f32 %v10407_v50, %v10407_v50  ;;  %v2414_v59 = vmul.f32 %v7737_v16, %v10407_v50 }
0x10d0   :  { %v2379_v55 = vsub.f32 %v2369_v27, %v2377_v38 }
0x10d2   :  { %v2381_v63 = vmul.f32 %v2379_v55, %v2379_v55  ;;  %v2415_v43 = vmul.f32 %v7737_v16, %v2379_v55 }
0x10d4   :  { %v2385_v2 = vsel %vm198_vm1, %v2381_v63, 0.0 }
0x116c   :  { %v3476_v35 = vpop.f32.mrb[108].mxu1 }
0x116d   :  { %v3483_v44 = vadd.f32 %v3476_v35, %v10132_v11  ;;  %v8522_v51 = vpop.f32.mrb[109].mxu1  ;;  %v2382_v11 = vsel %vm198_vm1, %v2380_v61, 0.0 }
0x116e   :  { %v3479_v52 = vpop.f32.mrb[110].mxu1 }
0x116f   :  { %v3491_v54 = vadd.f32 %v7762_v49, %v3483_v44  ;;  %v3484_v60 = vadd.f32 %v3479_v52, %v10135_v12  ;;  %v8523_v46 = vpop.f32.mrb[111].mxu1  ;;  %v9093_v12 = vld [vmem:[%s9575_s20] sm:$0xff]  }
0x1170   :  { %8525 = vmatpush3.bf16.msra.mxu0 %v9093_v12 }
0x1171   :  { %v3492_v37 = vadd.f32 %v7762_v49, %v3484_v60  ;;  %v3493_v53 = vsel %vm198_vm1, %v3491_v54, 0.0  ;;  %8526 = vmatprep.subr.bf16.mxu0 %v9473_v1 }
0x1172   :  { %3494 = vadd.xlane.f32.xlu0 %v3493_v53 }
0x1173   :  { %v3496_v62 = vsel %vm198_vm1, %v3492_v37, 0.0 }
0x1174   :  { %3497 = vadd.xlane.f32.xlu1 %v3496_v62  ;;  %8527 = vmatpush3.bf16.msra.mxu0 %v9094_v5 }
0x1175   :  { %8540 = vmatprep.subr.bf16.mxu0 %v9473_v1 }
0x1176   :  { %2383 = vadd.xlane.f32.xlu0 %v2382_v11 }
0x1178   :  { %2386 = vadd.xlane.f32.xlu1 %v2385_v2  ;;  %v7763_v2 = vld [vmem:[%s11244_s3] ss:$0 sm:$0xff] }
0x11ff   :  { %v3495_v13 = vpop.xlane.xlu0 %3494 }
0x1200   :  { %v3499_v6 = vmul.f32 0.03125, %v3495_v13 }
0x1201   :  { %v3498_v15 = vpop.xlane.xlu1 %3497 }
0x1202   :  { %v10421_v8 = vsub.f32 %v3491_v54, %v3499_v6  ;;  %v3500_v17 = vmul.f32 0.03125, %v3498_v15 }
0x1203   :  { %v2384_v19 = vpop.xlane.xlu0 %2383 }
0x1204   :  { %v10423_v56 = vsub.f32 %v3492_v37, %v3500_v17  ;;  %v2388_v0 = vmul.f32 0.032258064, %v2384_v19  ;;  %v3503_v20 = vmul.f32 %v10421_v8, %v10421_v8  ;;  %v7764_v17 = vld [vmem:[%s11245_s8] ss:$0 sm:$0xff] }
0x1205   :  { %v2387_v18 = vpop.xlane.xlu1 %2386 }
0x1206   :  { %9231 = vrsqrt.f32 %v2388_v0  ;;  %v2389_v7 = vmul.f32 0.032258064, %v2387_v18  ;;  %v3505_v21 = vsel %vm198_vm1, %v3503_v20, 0.0  ;;  %v3504_v22 = vmul.f32 %v10423_v56, %v10423_v56 }
0x1207   :  { %3506 = vadd.xlane.f32.xlu0 %v3505_v21  ;;  %vm2392_vm4 = vcmp.eq.f32.partialorder %v2388_v0, inf  ;;  %v2395_v26 = vand.u32 2147483648, %v2388_v0  ;;  %vm2394_vm8 = vcmp.eq.f32.partialorder %v2388_v0, 0.0  ;;  %v3538_v13 = vmul.f32 %v7763_v2, %v10423_v56 }
0x1208   :  { %9233 = vrsqrt.f32 %v2389_v7  ;;  %v3508_v23 = vsel %vm198_vm1, %v3504_v22, 0.0  ;;  %vm2399_vm9 = vcmp.eq.f32.partialorder %v2389_v7, inf  ;;  %v2402_v57 = vand.u32 2147483648, %v2389_v7 }
0x1209   :  { %3509 = vadd.xlane.f32.xlu1 %v3508_v23  ;;  %vm2401_vm10 = vcmp.eq.f32.partialorder %v2389_v7, 0.0 }
0x1210   :  { %v9232_v24 = vpop.eup %9231 }
0x1211   :  { %v2391_v25 = vmul.f32 %v9232_v24, %v2388_v0 }
0x1212   :  { %v9234_v27 = vpop.eup %9233 }
0x1213   :  { %v2393_v9 = vsel %vm2392_vm4, %v2388_v0, %v2391_v25  ;;  %v2398_v29 = vmul.f32 %v9234_v27, %v2389_v7 }
0x1214   :  { %v2396_v4 = vsel %vm2394_vm8, %v2395_v26, %v2393_v9 }
0x1215   :  { %v2404_v30 = vadd.f32 1e-06, %v2396_v4  ;;  %v2400_v31 = vsel %vm2399_vm9, %v2389_v7, %v2398_v29 }
0x1216   :  { %v2403_v32 = vsel %vm2401_vm10, %v2402_v57, %v2400_v31 }
0x1217   :  { %9235 = vrcp.f32 %v2404_v30  ;;  %v2405_v33 = vadd.f32 1e-06, %v2403_v32 }
0x1219   :  { %9237 = vrcp.f32 %v2405_v33 }
0x121a   :  { %3627 = vrot.lane.b32.xlu1 %v9094_v5, %s9476_s9  ;;  %v3537_v5 = vmul.f32 %v7763_v2, %v10421_v8 }
0x121d   :  { %3625 = vrot.lane.b32.xlu0 %v9093_v12, %s9476_s9 }
0x121e   :  { %3631 = vrot.lane.b32.xlu1 %v10439_v42, %s9476_s9 }
0x1221   :  { %v9236_v58 = vpop.eup %9235 }
0x1222   :  { %v2416_v47 = vmul.f32 %v9236_v58, %v2414_v59 }
0x1223   :  { %v9238_v28 = vpop.eup %9237 }
0x1224   :  { %v2417_v34 = vmul.f32 %v9238_v28, %v2415_v43  ;;  %v2424_v36 = vadd.f32 %v7738_v14, %v2416_v47 }
0x1226   :  { %v2425_v39 = vadd.f32 %v7738_v14, %v2417_v34 }
0x1228   :  { %v10436_v40 = vpack.c.bf16 %v2425_v39, %v2424_v36 }
0x1294   :  { %v3507_v48 = vpop.xlane.xlu0 %3506 }
0x1295   :  { %v3511_v38 = vmul.f32 0.032258064, %v3507_v48 }
0x1296   :  { %v3510_v49 = vpop.xlane.xlu1 %3509 }
0x1297   :  { %9239 = vrsqrt.f32 %v3511_v38  ;;  %v3512_v35 = vmul.f32 0.032258064, %v3510_v49  ;;  %vm3515_vm11 = vcmp.eq.f32.partialorder %v3511_v38, inf  ;;  %v3518_v55 = vand.u32 2147483648, %v3511_v38 }
0x1298   :  { %v3626_v50 = vpop.permute.xlu0 %3625  ;;  %vm3517_vm12 = vcmp.eq.f32.partialorder %v3511_v38, 0.0 }
0x1299   :  { %8533 = vmatpush3.bf16.msra.mxu1 %v3626_v50  ;;  %9241 = vrsqrt.f32 %v3512_v35  ;;  %vm3522_vm13 = vcmp.eq.f32.partialorder %v3512_v35, inf  ;;  %v3525_v61 = vand.u32 2147483648, %v3512_v35  ;;  %vm3524_vm14 = vcmp.eq.f32.partialorder %v3512_v35, 0.0 }
0x129a   :  { %8534 = vmatprep.subr.bf16.mxu1 %v9473_v1  ;;  %v3628_v44 = vpop.permute.xlu1 %3627 }
0x129d   :  { %8535 = vmatpush3.bf16.msra.mxu1 %v3628_v44 }
0x129e   :  { %8546 = vmatprep.subr.bf16.mxu1 %v9473_v1  ;;  %v3632_v7 = vpop.permute.xlu1 %3631 }
0x12a0   :  { %8537 = vmatmul.mubr.msk.bf16.vlgmr.msra.gmra.mrb[112].mxu1 %vm198_vm1, %v10436_v40 }
0x12a1   :  { %v9240_v51 = vpop.eup %9239  ;;  %8548 = vmatprep.mubr.msk.bf16.mxu1 %vm9474_vm0, %v9473_v1 }
0x12a2   :  { %v3514_v52 = vmul.f32 %v9240_v51, %v3511_v38 }
0x12a3   :  { %v9242_v54 = vpop.eup %9241 }
0x12a4   :  { %v3516_v60 = vsel %vm3515_vm11, %v3511_v38, %v3514_v52  ;;  %v3521_v37 = vmul.f32 %v9242_v54, %v3512_v35 }
0x12a5   :  { %v3519_v46 = vsel %vm3517_vm12, %v3518_v55, %v3516_v60 }
0x12a6   :  { %v3527_v53 = vadd.f32 1e-06, %v3519_v46  ;;  %v3523_v62 = vsel %vm3522_vm13, %v3512_v35, %v3521_v37 }
0x12a7   :  { %v3526_v63 = vsel %vm3524_vm14, %v3525_v61, %v3523_v62 }
0x12a8   :  { %9243 = vrcp.f32 %v3527_v53  ;;  %v3528_v11 = vadd.f32 1e-06, %v3526_v63 }
0x12aa   :  { %9245 = vrcp.f32 %v3528_v11 }
0x12b2   :  { %v9244_v12 = vpop.eup %9243 }
0x12b3   :  { %v3539_v6 = vmul.f32 %v9244_v12, %v3537_v5 }
0x12b4   :  { %v9246_v15 = vpop.eup %9245 }
0x12b5   :  { %v3540_v19 = vmul.f32 %v9246_v15, %v3538_v13  ;;  %v10453_v0 = vadd.f32 %v7764_v17, %v3539_v6 }
0x12b7   :  { %v10455_v20 = vadd.f32 %v7764_v17, %v3540_v19 }
0x12b9   :  { %v3561_v18 = vpack.c.bf16 %v10455_v20, %v10453_v0 }
0x12bb   :  { %8529 = vmatmul.mubr.msk.bf16.vlgmr.msra.gmra.mrb[104].mxu0 %vm198_vm1, %v3561_v18 }
0x12bc   :  { %8542 = vmatprep.mubr.msk.bf16.mxu0 %vm9474_vm0, %v9473_v1 }
0x1373   :  { %v3671_v8 = vpop.f32.mrb[112].mxu1 }
0x1374   :  { %v8538_v21 = vpop.f32.mrb[113].mxu1  ;;  %v3672_v22 = vadd.f32 %v3671_v8, %v3632_v7 }
0x1375   :  { %v3674_v56 = vpop.f32.mrb[114].mxu1 }
0x1376   :  { %v3675_v23 = vadd.f32 %v3674_v56, %v3632_v7  ;;  %v8539_v24 = vpop.f32.mrb[115].mxu1 }
0x1378   :  { %v10462_v25 = vpack.c.bf16 %v3675_v23, %v3672_v22 }
0x137a   :  { %3792 = vrot.lane.b32.xlu0 %v10462_v25, %s9475_s0  ;;  %v3684_v26 = vsel %vm247_vm2, %v10462_v25, 0  ;;  %v10474_v27 = vrot.slane %v10462_v25, 4 }
0x137b   :  { %8541 = vmatpush3.bf16.xpose.msra.mxu0 %v3684_v26 }
0x137c   :  { %8552 = vmatprep.subr.bf16.mxu0 %v9473_v1  ;;  %v4147_v39 = vsel %vm247_vm2, %v10474_v27, 0 }
0x137e   :  { %3904 = vrot.lane.b32.xlu0 %v10462_v25, %s9480_s16 }
0x1382   :  { %4016 = vrot.lane.b32.xlu0 %v10462_v25, %s9481_s7 }
0x1386   :  { %4253 = vrot.lane.b32.xlu0 %v10474_v27, %s9475_s0 }
0x138a   :  { %4365 = vrot.lane.b32.xlu0 %v10474_v27, %s9480_s16 }
0x138e   :  { %4477 = vrot.lane.b32.xlu0 %v10474_v27, %s9481_s7  ;;  %v3617_v9 = vpop.f32.mrb[104].mxu0 }
0x138f   :  { %v8530_v4 = vpop.f32.mrb[105].mxu0  ;;  %v3618_v30 = vadd.f32 %v10439_v42, %v3617_v9 }
0x1390   :  { %v3620_v29 = vpop.f32.mrb[106].mxu0 }
0x1391   :  { %v3621_v57 = vadd.f32 %v10439_v42, %v3620_v29  ;;  %v8531_v31 = vpop.f32.mrb[107].mxu0 }
0x1393   :  { %v3678_v32 = vpack.c.bf16 %v3621_v57, %v3618_v30 }
0x1395   :  { %3790 = vrot.lane.b32.xlu1 %v3678_v32, %s9475_s0  ;;  %8543 = vmatmul.mubr.msk.bf16.vlgmr.msra.gmra.mrb[108].mxu0 %vm247_vm2, %v3678_v32  ;;  %v4141_v33 = vrot.slane %v3678_v32, 4 }
0x1396   :  { %8554 = vmatprep.mubr.msk.bf16.mxu0 %vm9474_vm0, %v9473_v1 }
0x1399   :  { %3902 = vrot.lane.b32.xlu1 %v3678_v32, %s9480_s16 }
0x139d   :  { %4014 = vrot.lane.b32.xlu1 %v3678_v32, %s9481_s7 }
0x13a1   :  { %4251 = vrot.lane.b32.xlu1 %v4141_v33, %s9475_s0 }
0x13a5   :  { %4363 = vrot.lane.b32.xlu1 %v4141_v33, %s9480_s16 }
0x13a9   :  { %4475 = vrot.lane.b32.xlu1 %v4141_v33, %s9481_s7 }
0x13ec   :  { %v3793_v16 = vpop.permute.xlu0 %3792 }
0x13ed   :  { %v3798_v58 = vsel %vm247_vm2, %v3793_v16, 0 }
0x13ee   :  { %8553 = vmatpush3.bf16.xpose.msra.mxu0 %v3798_v58 }
0x13ef   :  { %8564 = vmatprep.subr.bf16.mxu0 %v9473_v1 }
0x13f0   :  { %v3905_v59 = vpop.permute.xlu0 %3904 }
0x13f1   :  { %v3910_v47 = vsel %vm247_vm2, %v3905_v59, 0 }
0x13f4   :  { %v4017_v28 = vpop.permute.xlu0 %4016 }
0x13f5   :  { %v4022_v34 = vsel %vm247_vm2, %v4017_v28, 0 }
0x13f8   :  { %v4254_v42 = vpop.permute.xlu0 %4253 }
0x13f9   :  { %v4259_v48 = vsel %vm247_vm2, %v4254_v42, 0 }
0x13fc   :  { %v4366_v38 = vpop.permute.xlu0 %4365 }
0x13fd   :  { %v4371_v35 = vsel %vm247_vm2, %v4366_v38, 0 }
0x1400   :  { %v4478_v50 = vpop.permute.xlu0 %4477 }
0x1401   :  { %v4483_v51 = vsel %vm247_vm2, %v4478_v50, 0 }
0x1407   :  { %v3791_v43 = vpop.permute.xlu1 %3790 }
0x1408   :  { %8555 = vmatmul.mubr.msk.bf16.vlgmr.msra.gmra.mrb[112].mxu0 %vm247_vm2, %v3791_v43 }
0x1409   :  { %8565 = vmatpush3.bf16.xpose.msra.mxu0 %v3910_v47  ;;  %8566 = vmatprep.mubr.msk.bf16.mxu0 %vm9474_vm0, %v9473_v1 }
0x140a   :  { %8576 = vmatprep.subr.bf16.mxu0 %v9473_v1 }
0x140b   :  { %v3903_v14 = vpop.permute.xlu1 %3902 }
0x140f   :  { %v4015_v36 = vpop.permute.xlu1 %4014 }
0x1410   :  { %8567 = vmatmul.mubr.msk.bf16.vlgmr.msra.gmra.mrb[116].mxu0 %vm247_vm2, %v3903_v14 }
0x1411   :  { %8577 = vmatpush3.bf16.xpose.msra.mxu0 %v4022_v34  ;;  %8578 = vmatprep.mubr.msk.bf16.mxu0 %vm9474_vm0, %v9473_v1 }
0x1412   :  { %8588 = vmatprep.subr.bf16.mxu0 %v9473_v1 }
0x1413   :  { %v4252_v49 = vpop.permute.xlu1 %4251 }
0x1417   :  { %v4364_v44 = vpop.permute.xlu1 %4363 }
0x1418   :  { %8579 = vmatmul.mubr.msk.bf16.vlgmr.msra.gmra.mrb[120].mxu0 %vm247_vm2, %v4015_v36 }
0x1419   :  { %8589 = vmatpush3.bf16.xpose.msra.mxu0 %v4147_v39  ;;  %8590 = vmatprep.mubr.msk.bf16.mxu0 %vm9474_vm0, %v9473_v1 }
0x141a   :  { %8600 = vmatprep.subr.bf16.mxu0 %v9473_v1 }
0x141b   :  { %v4476_v52 = vpop.permute.xlu1 %4475 }
0x1420   :  { %8591 = vmatmul.mubr.msk.bf16.vlgmr.msra.gmra.mrb[124].mxu0 %vm247_vm2, %v4141_v33 }
0x1421   :  { %8601 = vmatpush3.bf16.xpose.msra.mxu0 %v4259_v48  ;;  %8602 = vmatprep.mubr.msk.bf16.mxu0 %vm9474_vm0, %v9473_v1 }
0x1422   :  { %8612 = vmatprep.subr.bf16.mxu0 %v9473_v1 }
0x1428   :  { %8603 = vmatmul.mubr.msk.bf16.vlgmr.msra.gmra.mrb[128].mxu0 %vm247_vm2, %v4252_v49 }
0x1429   :  { %8613 = vmatpush3.bf16.xpose.msra.mxu0 %v4371_v35  ;;  %8614 = vmatprep.mubr.msk.bf16.mxu0 %vm9474_vm0, %v9473_v1 }
0x142a   :  { %8624 = vmatprep.subr.bf16.mxu0 %v9473_v1 }
0x1430   :  { %8615 = vmatmul.mubr.msk.bf16.vlgmr.msra.gmra.mrb[132].mxu0 %vm247_vm2, %v4364_v44 }
0x1431   :  { %8625 = vmatpush3.bf16.xpose.msra.mxu0 %v4483_v51  ;;  %8626 = vmatprep.mubr.msk.bf16.mxu0 %vm9474_vm0, %v9473_v1 }
0x1432   :  { %8636 = vmatprep.subr.bf16.mxu0 %v9473_v1 }
0x1438   :  { %8627 = vmatmul.mubr.msk.bf16.vlgmr.msra.gmra.mrb[136].mxu0 %vm247_vm2, %v4476_v52 }
0x1439   :  { %8640 = vmatprep.mubr.msk.bf16.mxu0 %vm9474_vm0, %v9473_v1 }
0x1468   :  { %v3720_v55 = vpop.f32.mrb[108].mxu0 }
0x1469   :  { %v3726_v54 = vmul.f32 0.35355338, %v3720_v55  ;;  %v8544_v60 = vpop.f32.mrb[109].mxu0 }
0x146a   :  { %v3723_v46 = vpop.f32.mrb[110].mxu0 }
0x146b   :  { %v3727_v37 = vadd.f32 %v3726_v54, %v9753_v41  ;;  %v8545_v53 = vpop.f32.mrb[111].mxu0 }
0x146d   :  { %v3728_v61 = vsel %vm247_vm2, %v3727_v37, -inf }
0x146e   :  { %3729 = vmax.xlane.f32.xlu0 %v3728_v61 }
0x14db   :  { %v3834_v62 = vpop.f32.mrb[112].mxu0 }
0x14dc   :  { %v3840_v63 = vmul.f32 0.35355338, %v3834_v62  ;;  %v8556_v11 = vpop.f32.mrb[113].mxu0 }
0x14dd   :  { %v3837_v2 = vpop.f32.mrb[114].mxu0 }
0x14de   :  { %v10532_v12 = vadd.f32 %v3840_v63, %v9753_v41  ;;  %v8557_v5 = vpop.f32.mrb[115].mxu0 }
0x14e0   :  { %v3842_v13 = vsel %vm247_vm2, %v10532_v12, -inf }
0x14e1   :  { %3843 = vmax.xlane.f32.xlu1 %v3842_v13 }
0x14e3   :  { %v3946_v6 = vpop.f32.mrb[116].mxu0 }
0x14e4   :  { %v3952_v15 = vmul.f32 0.35355338, %v3946_v6  ;;  %v8568_v17 = vpop.f32.mrb[117].mxu0 }
0x14e5   :  { %v3949_v19 = vpop.f32.mrb[118].mxu0 }
0x14e6   :  { %v3953_v18 = vadd.f32 %v3952_v15, %v9753_v41  ;;  %v8569_v7 = vpop.f32.mrb[119].mxu0 }
0x14e8   :  { %v3954_v8 = vsel %vm247_vm2, %v3953_v18, -inf }
0x14e9   :  { %3955 = vmax.xlane.f32.xlu0 %v3954_v8 }
0x14eb   :  { %v4058_v21 = vpop.f32.mrb[120].mxu0 }
0x14ec   :  { %v4064_v56 = vmul.f32 0.35355338, %v4058_v21  ;;  %v8580_v22 = vpop.f32.mrb[121].mxu0 }
0x14ed   :  { %v4061_v23 = vpop.f32.mrb[122].mxu0 }
0x14ee   :  { %v10539_v24 = vadd.f32 %v4064_v56, %v9753_v41  ;;  %v8581_v26 = vpop.f32.mrb[123].mxu0 }
0x14f0   :  { %v4066_v9 = vsel %vm247_vm2, %v10539_v24, -inf }
0x14f1   :  { %4067 = vmax.xlane.f32.xlu0 %v4066_v9 }
0x14f3   :  { %v4183_v4 = vpop.f32.mrb[124].mxu0 }
0x14f4   :  { %v4189_v29 = vmul.f32 0.35355338, %v4183_v4  ;;  %v8592_v30 = vpop.f32.mrb[125].mxu0 }
0x14f5   :  { %v4186_v57 = vpop.f32.mrb[126].mxu0 }
0x14f6   :  { %v10544_v31 = vadd.f32 %v4189_v29, %v9777_v10  ;;  %v8593_v32 = vpop.f32.mrb[127].mxu0 }
0x14f8   :  { %v4191_v33 = vsel %vm247_vm2, %v10544_v31, -inf }
0x14f9   :  { %4192 = vmax.xlane.f32.xlu1 %v4191_v33 }
0x14fb   :  { %v4295_v16 = vpop.f32.mrb[128].mxu0  ;;  %v3730_v52 = vpop.xlane.xlu0 %3729 }
0x14fc   :  { %v4301_v58 = vmul.f32 0.35355338, %v4295_v16  ;;  %v8604_v59 = vpop.f32.mrb[129].mxu0  ;;  %v3731_v55 = vsub.f32 %v3727_v37, %v3730_v52 }
0x14fd   :  { %v4298_v43 = vpop.f32.mrb[130].mxu0 }
0x14fe   :  { %v4302_v47 = vadd.f32 %v4301_v58, %v9777_v10  ;;  %v8605_v28 = vpop.f32.mrb[131].mxu0  ;;  %v3732_v54 = vmul.f32 1.442695, %v3731_v55 }
0x1500   :  { %v4303_v14 = vsel %vm247_vm2, %v4302_v47, -inf  ;;  %9247 = vpow2.f32 %v3732_v54 }
0x1501   :  { %4304 = vmax.xlane.f32.xlu0 %v4303_v14 }
0x1503   :  { %v4407_v34 = vpop.f32.mrb[132].mxu0 }
0x1504   :  { %v4413_v36 = vmul.f32 0.35355338, %v4407_v34  ;;  %v8616_v39 = vpop.f32.mrb[133].mxu0 }
0x1505   :  { %v4410_v42 = vpop.f32.mrb[134].mxu0 }
0x1506   :  { %v4414_v48 = vadd.f32 %v4413_v36, %v9777_v10  ;;  %v8617_v38 = vpop.f32.mrb[135].mxu0 }
0x1508   :  { %v4415_v49 = vsel %vm247_vm2, %v4414_v48, -inf }
0x1509   :  { %4416 = vmax.xlane.f32.xlu1 %v4415_v49 }
0x150a   :  { %v10558_v61 = vpop.eup %9247 }
0x150b   :  { %v4519_v35 = vpop.f32.mrb[136].mxu0  ;;  %v3734_v62 = vsel %vm247_vm2, %v10558_v61, 0.0 }
0x150c   :  { %v8628_v50 = vpop.f32.mrb[137].mxu0  ;;  %v4525_v60 = vmul.f32 0.35355338, %v4519_v35 }
0x150d   :  { %v4522_v44 = vpop.f32.mrb[138].mxu0 }
0x150e   :  { %v8629_v51 = vpop.f32.mrb[139].mxu0  ;;  %v4526_v46 = vadd.f32 %v4525_v60, %v9777_v10 }
0x1510   :  { %v4527_v53 = vsel %vm247_vm2, %v4526_v46, -inf }
0x1517   :  { %3854 = vrot.lane.b32.xlu0 %v10462_v25, %s9478_s28 }
0x151a   :  { %3741 = vrot.lane.b32.xlu1 %v10462_v25, %s9476_s9 }
0x1536   :  { %4528 = vmax.xlane.f32.xlu0 %v4527_v53 }
0x153e   :  { %3735 = vadd.xlane.f32.xlu1 %v3734_v62 }
0x156e   :  { %v3844_v63 = vpop.xlane.xlu1 %3843 }
0x156f   :  { %v3845_v11 = vsub.f32 %v10532_v12, %v3844_v63 }
0x1571   :  { %v3846_v2 = vmul.f32 1.442695, %v3845_v11 }
0x1573   :  { %9249 = vpow2.f32 %v3846_v2 }
0x1576   :  { %v3956_v37 = vpop.xlane.xlu0 %3955 }
0x1577   :  { %v3957_v5 = vsub.f32 %v3953_v18, %v3956_v37 }
0x1579   :  { %v3958_v13 = vmul.f32 1.442695, %v3957_v5 }
0x157b   :  { %9251 = vpow2.f32 %v3958_v13 }
0x157d   :  { %v10563_v6 = vpop.eup %9249 }
0x157e   :  { %v3848_v15 = vsel %vm247_vm2, %v10563_v6, 0.0  ;;  %v4068_v8 = vpop.xlane.xlu0 %4067 }
0x157f   :  { %3849 = vadd.xlane.f32.xlu0 %v3848_v15  ;;  %v4069_v56 = vsub.f32 %v10539_v24, %v4068_v8 }
0x1581   :  { %v4070_v22 = vmul.f32 1.442695, %v4069_v56 }
0x1583   :  { %9253 = vpow2.f32 %v4070_v22 }
0x1585   :  { %v10567_v17 = vpop.eup %9251 }
0x1586   :  { %v3960_v19 = vsel %vm247_vm2, %v10567_v17, 0.0  ;;  %v4193_v7 = vpop.xlane.xlu1 %4192 }
0x1587   :  { %3961 = vadd.xlane.f32.xlu1 %v3960_v19  ;;  %v4194_v23 = vsub.f32 %v10544_v31, %v4193_v7 }
0x1589   :  { %v4195_v4 = vmul.f32 1.442695, %v4194_v23 }
0x158b   :  { %9255 = vpow2.f32 %v4195_v4 }
0x158d   :  { %v9254_v57 = vpop.eup %9253 }
0x158e   :  { %v4305_v26 = vpop.xlane.xlu0 %4304  ;;  %v4072_v32 = vsel %vm247_vm2, %v9254_v57, 0.0 }
0x158f   :  { %v4306_v9 = vsub.f32 %v4302_v47, %v4305_v26 }
0x1591   :  { %v4307_v30 = vmul.f32 1.442695, %v4306_v9 }
0x1592   :  { %v3855_v43 = vpop.permute.xlu0 %3854 }
0x1593   :  { %9257 = vpow2.f32 %v4307_v30  ;;  %v3860_v49 = vsel %vm313_vm5, %v3855_v43, 0 }
0x1595   :  { %3966 = vrot.lane.b32.xlu0 %v10462_v25, %s9477_s4  ;;  %v10580_v33 = vpop.eup %9255 }
0x1596   :  { %v4417_v12 = vpop.xlane.xlu1 %4416  ;;  %v4197_v31 = vsel %vm247_vm2, %v10580_v33, 0.0 }
0x1597   :  { %v4418_v29 = vsub.f32 %v4414_v48, %v4417_v12 }
0x1598   :  { %4078 = vrot.lane.b32.xlu1 %v10462_v25, %s9479_s2 }
0x1599   :  { %v4419_v25 = vmul.f32 1.442695, %v4418_v29 }
0x159a   :  { %v3742_v18 = vpop.permute.xlu1 %3741 }
0x159b   :  { %v3747_v21 = vsel %vm313_vm5, %v3742_v18, 0  ;;  %9259 = vpow2.f32 %v4419_v25 }
0x159c   :  { %8547 = vmatpush3.bf16.msra.mxu1 %v3747_v21 }
0x159d   :  { %8558 = vmatprep.subr.bf16.mxu1 %v9473_v1  ;;  %v10582_v24 = vpop.eup %9257 }
0x159e   :  { %v4309_v58 = vsel %vm247_vm2, %v10582_v24, 0.0 }
0x15a5   :  { %v10586_v16 = vpop.eup %9259 }
0x15a6   :  { %v4421_v59 = vsel %vm247_vm2, %v10586_v16, 0.0 }
0x15b4   :  { %4073 = vadd.xlane.f32.xlu0 %v4072_v32 }
0x15b8   :  { %4198 = vadd.xlane.f32.xlu0 %v4197_v31 }
0x15bc   :  { %4310 = vadd.xlane.f32.xlu1 %v4309_v58  ;;  %4422 = vadd.xlane.f32.xlu0 %v4421_v59 }
0x15c3   :  { %v4529_v47 = vpop.xlane.xlu0 %4528 }
0x15c4   :  { %v4530_v28 = vsub.f32 %v4526_v46, %v4529_v47 }
0x15c6   :  { %v4531_v14 = vmul.f32 1.442695, %v4530_v28 }
0x15c8   :  { %9261 = vpow2.f32 %v4531_v14 }
0x15cb   :  { %v3736_v34 = vpop.xlane.xlu1 %3735 }
0x15cc   :  { %9263 = vrcp.f32 %v3736_v34 }
0x15cd   :  { %4315 = vrot.lane.b32.xlu1 %v10474_v27, %s9478_s28 }
0x15d1   :  { %4427 = vrot.lane.b32.xlu1 %v10474_v27, %s9477_s4 }
0x15d2   :  { %v10596_v36 = vpop.eup %9261 }
0x15d3   :  { %v4533_v39 = vsel %vm247_vm2, %v10596_v36, 0.0 }
0x15d4   :  { %4534 = vadd.xlane.f32.xlu0 %v4533_v39 }
0x15d5   :  { %4539 = vrot.lane.b32.xlu1 %v10474_v27, %s9479_s2 }
0x15d6   :  { %v9264_v42 = vpop.eup %9263 }
0x15d7   :  { %v3738_v48 = vmul.f32 %v9264_v42, %v10558_v61 }
0x15d9   :  { %v3739_v38 = vpack.c.bf16 %v3738_v48, %v3738_v48 }
0x15db   :  { %8549 = vmatmul.mubr.msk.bf16.vlgmr.msra.gmra.mrb[116].mxu1 %vm247_vm2, %v3739_v38 }
0x15dc   :  { %8559 = vmatpush3.bf16.msra.mxu1 %v3860_v49  ;;  %8560 = vmatprep.mubr.msk.bf16.mxu1 %vm9474_vm0, %v9473_v1 }
0x15dd   :  { %8570 = vmatprep.subr.bf16.mxu1 %v9473_v1 }
0x15ea   :  { %4203 = vrot.lane.b32.xlu0 %v10474_v27, %s9476_s9 }
0x160c   :  { %v3850_v35 = vpop.xlane.xlu0 %3849 }
0x160d   :  { %9265 = vrcp.f32 %v3850_v35 }
0x1610   :  { %v3967_v52 = vpop.permute.xlu0 %3966 }
0x1611   :  { %v3972_v54 = vsel %vm313_vm5, %v3967_v52, 0 }
0x1614   :  { %v3962_v50 = vpop.xlane.xlu1 %3961 }
0x1615   :  { %9267 = vrcp.f32 %v3962_v50 }
0x1617   :  { %v9266_v44 = vpop.eup %9265 }
0x1618   :  { %v3852_v51 = vmul.f32 %v9266_v44, %v10563_v6  ;;  %v4079_v46 = vpop.permute.xlu1 %4078 }
0x1619   :  { %v4084_v61 = vsel %vm313_vm5, %v4079_v46, 0 }
0x161a   :  { %v3853_v55 = vpack.c.bf16 %v3852_v51, %v3852_v51 }
0x161c   :  { %8561 = vmatmul.mubr.msk.bf16.vlgmr.msra.gmra.mrb[120].mxu1 %vm247_vm2, %v3853_v55  ;;  %v9095_v55 = vld [vmem:[%s11246_s18] sm:$0xff]  }
0x161d   :  { %8571 = vmatpush3.bf16.msra.mxu1 %v3972_v54  ;;  %8572 = vmatprep.mubr.msk.bf16.mxu1 %vm9474_vm0, %v9473_v1 }
0x161e   :  { %8582 = vmatprep.subr.bf16.mxu1 %v9473_v1  ;;  %8637 = vmatpush3.bf16.msra.mxu0 %v9095_v55 }
0x161f   :  { %v9268_v27 = vpop.eup %9267  ;;  %8638 = vmatprep.subr.bf16.mxu0 %v9473_v1 }
0x1620   :  { %v3964_v60 = vmul.f32 %v9268_v27, %v10567_v17 }
0x1622   :  { %v3965_v53 = vpack.c.bf16 %v3964_v60, %v3964_v60 }
0x1624   :  { %8573 = vmatmul.mubr.msk.bf16.vlgmr.msra.gmra.mrb[124].mxu1 %vm247_vm2, %v3965_v53  ;;  %v9096_v53 = vld [vmem:[%s11246_s18 + $0x8] sm:$0xff]  }
0x1625   :  { %8583 = vmatpush3.bf16.msra.mxu1 %v4084_v61  ;;  %8584 = vmatprep.mubr.msk.bf16.mxu1 %vm9474_vm0, %v9473_v1 }
0x1626   :  { %8594 = vmatprep.subr.bf16.mxu1 %v9473_v1  ;;  %8639 = vmatpush3.bf16.msra.mxu0 %v9096_v53 }
0x1627   :  { %8652 = vmatprep.subr.bf16.mxu0 %v9473_v1 }
0x1641   :  { %v4074_v62 = vpop.xlane.xlu0 %4073 }
0x1642   :  { %9269 = vrcp.f32 %v4074_v62 }
0x1645   :  { %v4199_v37 = vpop.xlane.xlu0 %4198 }
0x1646   :  { %9271 = vrcp.f32 %v4199_v37 }
0x1649   :  { %v4311_v5 = vpop.xlane.xlu1 %4310  ;;  %v4423_v13 = vpop.xlane.xlu0 %4422 }
0x164a   :  { %9273 = vrcp.f32 %v4311_v5 }
0x164b   :  { %9275 = vrcp.f32 %v4423_v13 }
0x164c   :  { %v9270_v63 = vpop.eup %9269 }
0x164d   :  { %v4076_v11 = vmul.f32 %v9270_v63, %v9254_v57  ;;  %v4316_v12 = vpop.permute.xlu1 %4315 }
0x164e   :  { %v4321_v21 = vsel %vm313_vm5, %v4316_v12, 0 }
0x164f   :  { %v4077_v2 = vpack.c.bf16 %v4076_v11, %v4076_v11 }
0x1650   :  { %v9272_v6 = vpop.eup %9271 }
0x1651   :  { %8585 = vmatmul.mubr.msk.bf16.vlgmr.msra.gmra.mrb[128].mxu1 %vm247_vm2, %v4077_v2  ;;  %v4201_v17 = vmul.f32 %v9272_v6, %v10580_v33  ;;  %v4428_v22 = vpop.permute.xlu1 %4427 }
0x1652   :  { %8596 = vmatprep.mubr.msk.bf16.mxu1 %vm9474_vm0, %v9473_v1  ;;  %v4433_v9 = vsel %vm313_vm5, %v4428_v22, 0 }
0x1653   :  { %v4202_v18 = vpack.c.bf16 %v4201_v17, %v4201_v17 }
0x1654   :  { %v9274_v8 = vpop.eup %9273 }
0x1655   :  { %v4313_v56 = vmul.f32 %v9274_v8, %v10582_v24  ;;  %v9276_v26 = vpop.eup %9275  ;;  %v4540_v29 = vpop.permute.xlu1 %4539 }
0x1656   :  { %v4425_v4 = vmul.f32 %v9276_v26, %v10586_v16  ;;  %v4545_v57 = vsel %vm313_vm5, %v4540_v29, 0 }
0x1657   :  { %v4314_v23 = vpack.c.bf16 %v4313_v56, %v4313_v56 }
0x1658   :  { %v4426_v30 = vpack.c.bf16 %v4425_v4, %v4425_v4 }
0x1661   :  { %v4535_v15 = vpop.xlane.xlu0 %4534 }
0x1662   :  { %9277 = vrcp.f32 %v4535_v15 }
0x1665   :  { %v4204_v19 = vpop.permute.xlu0 %4203 }
0x1666   :  { %v4209_v7 = vsel %vm313_vm5, %v4204_v19, 0 }
0x1667   :  { %8595 = vmatpush3.bf16.msra.mxu1 %v4209_v7 }
0x1668   :  { %8606 = vmatprep.subr.bf16.mxu1 %v9473_v1 }
0x166a   :  { %8597 = vmatmul.mubr.msk.bf16.vlgmr.msra.gmra.mrb[132].mxu1 %vm247_vm2, %v4202_v18 }
0x166b   :  { %8607 = vmatpush3.bf16.msra.mxu1 %v4321_v21  ;;  %8608 = vmatprep.mubr.msk.bf16.mxu1 %vm9474_vm0, %v9473_v1 }
0x166c   :  { %8618 = vmatprep.subr.bf16.mxu1 %v9473_v1  ;;  %v9278_v25 = vpop.eup %9277 }
0x166d   :  { %v4537_v32 = vmul.f32 %v9278_v25, %v10596_v36 }
0x166f   :  { %v4538_v33 = vpack.c.bf16 %v4537_v32, %v4537_v32 }
0x1672   :  { %8609 = vmatmul.mubr.msk.bf16.vlgmr.msra.gmra.mrb[136].mxu1 %vm247_vm2, %v4314_v23 }
0x1673   :  { %8619 = vmatpush3.bf16.msra.mxu1 %v4433_v9  ;;  %8620 = vmatprep.mubr.msk.bf16.mxu1 %vm9474_vm0, %v9473_v1 }
0x1674   :  { %8630 = vmatprep.subr.bf16.mxu1 %v9473_v1 }
0x167a   :  { %8621 = vmatmul.mubr.msk.bf16.vlgmr.msra.gmra.mrb[140].mxu1 %vm247_vm2, %v4426_v30 }
0x167b   :  { %8631 = vmatpush3.bf16.msra.mxu1 %v4545_v57  ;;  %8632 = vmatprep.mubr.msk.bf16.mxu1 %vm9474_vm0, %v9473_v1  ;;  %v7789_v57 = vld [vmem:[%s11247_s13] ss:$0 sm:$0xff] }
0x167c   :  { %8644 = vmatprep.subr.bf16.mxu1 %v9473_v1 }
0x1682   :  { %8633 = vmatmul.mubr.msk.bf16.vlgmr.msra.gmra.mrb[144].mxu1 %vm247_vm2, %v4538_v33 }
0x1683   :  { %8648 = vmatprep.mubr.msk.bf16.mxu1 %vm9474_vm0, %v9473_v1 }
0x16ae   :  { %v3783_v24 = vpop.f32.mrb[116].mxu1 }
0x16af   :  { %v8550_v31 = vpop.f32.mrb[117].mxu1 }
0x16b0   :  { %v3786_v16 = vpop.f32.mrb[118].mxu1 }
0x16b1   :  { %v8551_v58 = vpop.f32.mrb[119].mxu1 }
0x16ef   :  { %v3896_v59 = vpop.f32.mrb[120].mxu1 }
0x16f0   :  { %v8562_v43 = vpop.f32.mrb[121].mxu1 }
0x16f1   :  { %v3899_v47 = vpop.f32.mrb[122].mxu1 }
0x16f2   :  { %v8563_v28 = vpop.f32.mrb[123].mxu1 }
0x16f7   :  { %v4008_v14 = vpop.f32.mrb[124].mxu1 }
0x16f8   :  { %v8574_v34 = vpop.f32.mrb[125].mxu1 }
0x16f9   :  { %v4011_v36 = vpop.f32.mrb[126].mxu1 }
0x16fa   :  { %v8575_v39 = vpop.f32.mrb[127].mxu1 }
0x1724   :  { %v4120_v42 = vpop.f32.mrb[128].mxu1 }
0x1725   :  { %v8586_v48 = vpop.f32.mrb[129].mxu1 }
0x1726   :  { %v4123_v38 = vpop.f32.mrb[130].mxu1 }
0x1727   :  { %v8587_v49 = vpop.f32.mrb[131].mxu1 }
0x173d   :  { %v4245_v35 = vpop.f32.mrb[132].mxu1 }
0x173e   :  { %v8598_v50 = vpop.f32.mrb[133].mxu1 }
0x173f   :  { %v4248_v44 = vpop.f32.mrb[134].mxu1  ;;  %v9098_v50 = vld [vmem:[%s11248_s17 + $0x8] sm:$0xff]  }
0x1740   :  { %v8599_v51 = vpop.f32.mrb[135].mxu1 }
0x1745   :  { %v4357_v52 = vpop.f32.mrb[136].mxu1 }
0x1746   :  { %v9036_v54 = vpack.i.bf16 %v4357_v52, %v3896_v59  ;;  %v8610_v27 = vpop.f32.mrb[137].mxu1 }
0x1747   :  { %v4360_v60 = vpop.f32.mrb[138].mxu1 }
0x1748   :  { %9037 = vrot.lane.b32.xlu1 %v9036_v54, %s11227_s11  ;;  %v8611_v46 = vpop.f32.mrb[139].mxu1  ;;  %s11253_s11 = sld [smem:[#allocation19_spill]] }
0x174d   :  { %v4469_v61 = vpop.f32.mrb[140].mxu1 }
0x174e   :  { %v9041_v62 = vpack.i.bf16 %v4469_v61, %v4008_v14  ;;  %v8622_v63 = vpop.f32.mrb[141].mxu1 }
0x174f   :  { %v4472_v11 = vpop.f32.mrb[142].mxu1 }
0x1750   :  { %9042 = vrot.lane.b32.xlu1 %v9041_v62, %s11225_s6  ;;  %v8623_v2 = vpop.f32.mrb[143].mxu1  ;;  %s11252_s6 = sld [smem:[#allocation17_spill]] }
0x1755   :  { %v4581_v37 = vpop.f32.mrb[144].mxu1 }
0x1756   :  { %v9046_v5 = vpack.i.bf16 %v4581_v37, %v4120_v42  ;;  %v8634_v13 = vpop.f32.mrb[145].mxu1 }
0x1757   :  { %v4584_v6 = vpop.f32.mrb[146].mxu1  ;;  %v7790_v13 = vld [vmem:[%s11249_s21] ss:$0 sm:$0xff] }
0x1758   :  { %9047 = vrot.lane.b32.xlu0 %v9046_v5, %s11223_s15  ;;  %v8635_v15 = vpop.f32.mrb[147].mxu1  ;;  %s11251_s15 = sld [smem:[#allocation18_spill]] }
0x17ba   :  { %v9038_v17 = vpop.permute.xlu1 %9037 }
0x17bb   :  { %v9040_v7 = vunpack.i.h.bf16 %v9038_v17  ;;  %v9039_v12 = vunpack.i.l.bf16 %v9038_v17 }
0x17bd   :  { %v4599_v56 = vsel %vm247_vm2, %v4245_v35, %v9040_v7  ;;  %v4138_v22 = vsel %vm247_vm2, %v3783_v24, %v9039_v12  ;;  %v9097_v35 = vld [vmem:[%s11248_s17] sm:$0xff]  }
0x17be   :  { %8645 = vmatpush3.bf16.msra.mxu1 %v9097_v35  ;;  %v7791_v12 = vld [vmem:[%s11250_s25] ss:$0 sm:$0xff] }
0x17bf   :  { %8646 = vmatprep.subr.bf16.mxu1 %v9473_v1 }
0x17c2   :  { %v9043_v19 = vpop.permute.xlu1 %9042  ;;  %8647 = vmatpush3.bf16.msra.mxu1 %v9098_v50 }
0x17c3   :  { %v9045_v18 = vunpack.i.h.bf16 %v9043_v19  ;;  %v9044_v8 = vunpack.i.l.bf16 %v9043_v19  ;;  %8672 = vmatprep.subr.bf16.mxu1 %v9473_v1 }
0x17c5   :  { %v4600_v9 = vsel %vm706_vm6, %v4599_v56, %v9045_v18  ;;  %v4139_v4 = vsel %vm706_vm6, %v4138_v22, %v9044_v8  ;;  %v9099_v22 = vld [vmem:[%s11251_s15] sm:$0xff]  }
0x17ca   :  { %v9048_v21 = vpop.permute.xlu0 %9047 }
0x17cb   :  { %v9050_v23 = vunpack.i.h.bf16 %v9048_v21  ;;  %v9049_v26 = vunpack.i.l.bf16 %v9048_v21 }
0x17cd   :  { %v4601_v29 = vsel %vm708_vm7, %v4600_v9, %v9050_v23  ;;  %v4140_v30 = vsel %vm708_vm7, %v4139_v4, %v9049_v26  ;;  %v9100_v23 = vld [vmem:[%s11251_s15 + $0x8] sm:$0xff]   ;;  %v9101_v26 = vld [vmem:[%s11251_s15 + $0x10] sm:$0xff]   ;;  %v9102_v9 = vld [vmem:[%s11251_s15 + $0x18] sm:$0xff]  }
0x17ce   :  { %v4602_v25 = vpack.c.bf16 %v4601_v29, %v4140_v30  ;;  %v9103_v4 = vld [vmem:[%s11251_s15 + $0x20] sm:$0xff]   ;;  %v9104_v29 = vld [vmem:[%s11251_s15 + $0x28] sm:$0xff]   ;;  %v9105_v30 = vld [vmem:[%s11251_s15 + $0x30] sm:$0xff]  }
0x17d0   :  { %8641 = vmatmul.mubr.msk.bf16.vlgmr.msra.gmra.mrb[140].mxu0 %vm198_vm1, %v4602_v25  ;;  %v9106_v25 = vld [vmem:[%s11251_s15 + $0x38] sm:$0xff]  }
0x17d1   :  { %8668 = vmatprep.mubr.msk.bf16.mxu0 %vm9474_vm0, %v9473_v1  ;;  %8653 = vmatpush3.bf16.msra.mxu0 %v9099_v22 }
0x17d2   :  { %8654 = vmatprep.subr.bf16.mxu0 %v9473_v1 }
0x17d5   :  { %8655 = vmatpush3.bf16.msra.mxu0 %v9100_v23 }
0x17d6   :  { %8656 = vmatprep.subr.bf16.mxu0 %v9473_v1 }
0x17d9   :  { %8657 = vmatpush3.bf16.msra.mxu0 %v9101_v26 }
0x17da   :  { %8658 = vmatprep.subr.bf16.mxu0 %v9473_v1 }
0x17dd   :  { %8659 = vmatpush3.bf16.msra.mxu0 %v9102_v9 }
0x17de   :  { %8660 = vmatprep.subr.bf16.mxu0 %v9473_v1 }
0x17e1   :  { %8661 = vmatpush3.bf16.msra.mxu0 %v9103_v4 }
0x17e2   :  { %8662 = vmatprep.subr.bf16.mxu0 %v9473_v1 }
0x17e5   :  { %8663 = vmatpush3.bf16.msra.mxu0 %v9104_v29 }
0x17e6   :  { %8664 = vmatprep.subr.bf16.mxu0 %v9473_v1 }
0x17e9   :  { %8665 = vmatpush3.bf16.msra.mxu0 %v9105_v30 }
0x17ea   :  { %8666 = vmatprep.subr.bf16.mxu0 %v9473_v1 }
0x17ed   :  { %8667 = vmatpush3.bf16.msra.mxu0 %v9106_v25 }
0x17ee   :  { %8698 = vmatprep.subr.bf16.mxu0 %v9473_v1 }
0x18a3   :  { %v4652_v32 = vpop.f32.mrb[140].mxu0 }
0x18a4   :  { %v4659_v33 = vadd.f32 %v4652_v32, %v10453_v0  ;;  %v8642_v24 = vpop.f32.mrb[141].mxu0 }
0x18a5   :  { %v4655_v31 = vpop.f32.mrb[142].mxu0 }
0x18a6   :  { %v4667_v16 = vadd.f32 %v7789_v57, %v4659_v33  ;;  %v4660_v58 = vadd.f32 %v4655_v31, %v10455_v20  ;;  %v8643_v59 = vpop.f32.mrb[143].mxu0 }
0x18a8   :  { %v4668_v43 = vadd.f32 %v7789_v57, %v4660_v58  ;;  %v4669_v47 = vsel %vm198_vm1, %v4667_v16, 0.0  ;;  %v7792_v57 = vld [vmem:[%s11252_s6] ss:$0 sm:$0xff] }
0x18a9   :  { %4670 = vadd.xlane.f32.xlu1 %v4669_v47 }
0x18aa   :  { %v4672_v28 = vsel %vm198_vm1, %v4668_v43, 0.0 }
0x18ab   :  { %4673 = vadd.xlane.f32.xlu0 %v4672_v28 }
0x1936   :  { %v4671_v14 = vpop.xlane.xlu1 %4670 }
0x1937   :  { %v4675_v34 = vmul.f32 0.03125, %v4671_v14 }
0x1938   :  { %v4674_v36 = vpop.xlane.xlu0 %4673 }
0x1939   :  { %v4677_v39 = vsub.f32 %v4667_v16, %v4675_v34  ;;  %v4676_v0 = vmul.f32 0.03125, %v4674_v36 }
0x193b   :  { %v4678_v42 = vsub.f32 %v4668_v43, %v4676_v0  ;;  %v4679_v48 = vmul.f32 %v4677_v39, %v4677_v39  ;;  %v4713_v15 = vmul.f32 %v7790_v13, %v4677_v39 }
0x193d   :  { %v4681_v38 = vsel %vm198_vm1, %v4679_v48, 0.0  ;;  %v4680_v20 = vmul.f32 %v4678_v42, %v4678_v42  ;;  %v4714_v17 = vmul.f32 %v7790_v13, %v4678_v42 }
0x193e   :  { %4682 = vadd.xlane.f32.xlu0 %v4681_v38 }
0x193f   :  { %v4684_v49 = vsel %vm198_vm1, %v4680_v20, 0.0 }
0x1940   :  { %4685 = vadd.xlane.f32.xlu1 %v4684_v49 }
0x19cb   :  { %v4683_v44 = vpop.xlane.xlu0 %4682 }
0x19cc   :  { %v4687_v51 = vmul.f32 0.032258064, %v4683_v44 }
0x19cd   :  { %v4686_v52 = vpop.xlane.xlu1 %4685 }
0x19ce   :  { %9279 = vrsqrt.f32 %v4687_v51  ;;  %v4688_v55 = vmul.f32 0.032258064, %v4686_v52  ;;  %vm4691_vm15 = vcmp.eq.f32.partialorder %v4687_v51, inf  ;;  %v4694_v60 = vand.u32 2147483648, %v4687_v51 }
0x19cf   :  { %vm4693_vm3 = vcmp.eq.f32.partialorder %v4687_v51, 0.0 }
0x19d0   :  { %9281 = vrsqrt.f32 %v4688_v55  ;;  %vm4698_vm4 = vcmp.eq.f32.partialorder %v4688_v55, inf  ;;  %v4701_v11 = vand.u32 2147483648, %v4688_v55  ;;  %vm4700_vm8 = vcmp.eq.f32.partialorder %v4688_v55, 0.0 }
0x19d8   :  { %v9280_v54 = vpop.eup %9279 }
0x19d9   :  { %v4690_v27 = vmul.f32 %v9280_v54, %v4687_v51 }
0x19da   :  { %v9282_v46 = vpop.eup %9281 }
0x19db   :  { %v4692_v53 = vsel %vm4691_vm15, %v4687_v51, %v4690_v27  ;;  %v4697_v62 = vmul.f32 %v9282_v46, %v4688_v55 }
0x19dc   :  { %v4695_v61 = vsel %vm4693_vm3, %v4694_v60, %v4692_v53 }
0x19dd   :  { %v4703_v63 = vadd.f32 1e-06, %v4695_v61  ;;  %v4699_v2 = vsel %vm4698_vm4, %v4688_v55, %v4697_v62  ;;  %v7796_v55 = vld [vmem:[%s11253_s11] ss:$0 sm:$0xff] }
0x19de   :  { %v4702_v37 = vsel %vm4700_vm8, %v4701_v11, %v4699_v2 }
0x19df   :  { %9283 = vrcp.f32 %v4703_v63  ;;  %v4704_v5 = vadd.f32 1e-06, %v4702_v37 }
0x19e1   :  { %9285 = vrcp.f32 %v4704_v5 }
0x19e9   :  { %v9284_v6 = vpop.eup %9283 }
0x19ea   :  { %v4715_v19 = vmul.f32 %v9284_v6, %v4713_v15 }
0x19eb   :  { %v9286_v7 = vpop.eup %9285 }
0x19ec   :  { %v4716_v18 = vmul.f32 %v9286_v7, %v4714_v17  ;;  %v10678_v8 = vadd.f32 %v7791_v12, %v4715_v19 }
0x19ee   :  { %v10680_v21 = vadd.f32 %v7791_v12, %v4716_v18 }
0x19f0   :  { %v4749_v56 = vpack.c.bf16 %v10680_v21, %v10678_v8 }
0x19f2   :  { %8649 = vmatmul.mubr.msk.bf16.vlgmr.msra.gmra.mrb[148].mxu1 %vm198_vm1, %v4749_v56 }
0x19f3   :  { %8676 = vmatprep.mubr.msk.bf16.mxu1 %vm9474_vm0, %v9473_v1 }
0x1ac5   :  { %v4805_v32 = vpop.f32.mrb[148].mxu1 }
0x1ac6   :  { %v4806_v33 = vadd.f32 %v7792_v57, %v4805_v32  ;;  %v8650_v24 = vpop.f32.mrb[149].mxu1 }
0x1ac7   :  { %v4808_v31 = vpop.f32.mrb[150].mxu1 }
0x1ac8   :  { %v4814_v16 = vmul.f32 0.044715, %v4806_v33  ;;  %v4809_v58 = vadd.f32 %v7792_v57, %v4808_v31  ;;  %v8651_v59 = vpop.f32.mrb[151].mxu1  ;;  %v4812_v49 = vmul.f32 0.5, %v4806_v33 }
0x1ac9   :  { %v7805_v59 = vld [vmem:[%s11254_s5] ss:$0 sm:$0xff] }
0x1aca   :  { %v4816_v43 = vmul.f32 %v4814_v16, %v4806_v33  ;;  %v4815_v47 = vmul.f32 0.044715, %v4809_v58  ;;  %v4813_v35 = vmul.f32 0.5, %v4809_v58 }
0x1acc   :  { %v4818_v28 = vmul.f32 %v4816_v43, %v4806_v33  ;;  %v4817_v14 = vmul.f32 %v4815_v47, %v4809_v58 }
0x1ace   :  { %v4820_v34 = vadd.f32 %v4818_v28, %v4806_v33  ;;  %v4819_v36 = vmul.f32 %v4817_v14, %v4809_v58 }
0x1ad0   :  { %v4822_v39 = vmul.f32 0.7978846, %v4820_v34  ;;  %v4821_v0 = vadd.f32 %v4819_v36, %v4809_v58  ;;  %v7806_v36 = vld [vmem:[%s9630_s12] ss:$0 sm:$0xff] }
0x1ad2   :  { %9287 = vtanh.f32 %v4822_v39  ;;  %v4823_v42 = vmul.f32 0.7978846, %v4821_v0 }
0x1ad4   :  { %9289 = vtanh.f32 %v4823_v42 }
0x1adc   :  { %v9288_v48 = vpop.eup %9287 }
0x1add   :  { %v4826_v38 = vadd.f32 1.0, %v9288_v48 }
0x1ade   :  { %v9290_v20 = vpop.eup %9289 }
0x1adf   :  { %v4827_v50 = vadd.f32 1.0, %v9290_v20  ;;  %v4828_v44 = vmul.f32 %v4826_v38, %v4812_v49  ;;  %v7819_v38 = vld [vmem:[%s9550_s19 + $0x1] ss:$0 sm:$0xff]  ;;  %s11256_s19 = smov 8  }
0x1ae1   :  { %v4829_v51 = vmul.f32 %v4827_v50, %v4813_v35 }
0x1ae3   :  { %v4830_v52 = vpack.c.bf16 %v4829_v51, %v4828_v44 }
0x1ae5   :  { %8669 = vmatmul.mubr.bf16.vlgmr.msra.gmra.mrb[144].mxu0 %v4830_v52 }
0x1ae6   :  { %8700 = vmatprep.mubr.msk.bf16.mxu0 %vm9474_vm0, %v9473_v1 }
0x1bb8   :  { %v4919_v54 = vpop.f32.mrb[144].mxu0 }
0x1bb9   :  { %v4920_v27 = vadd.f32 %v7796_v55, %v4919_v54  ;;  %v8670_v60 = vpop.f32.mrb[145].mxu0 }
0x1bba   :  { %v4922_v46 = vpop.f32.mrb[146].mxu0 }
0x1bbb   :  { %v4926_v53 = vadd.f32 %v4920_v27, %v10678_v8  ;;  %v4923_v61 = vadd.f32 %v7796_v55, %v4922_v46  ;;  %v8671_v62 = vpop.f32.mrb[147].mxu0  ;;  %v9107_v8 = vld [vmem:[%s9545_s14 + $0x10] sm:$0xff]  }
0x1bbc   :  { %8673 = vmatpush3.bf16.msra.mxu1 %v9107_v8 }
0x1bbd   :  { %v4927_v63 = vadd.f32 %v4923_v61, %v10680_v21  ;;  %v4928_v11 = vsel %vm198_vm1, %v4926_v53, 0.0  ;;  %v9108_v21 = vld [vmem:[%s9545_s14 + $0x18] sm:$0xff]   ;;  %8674 = vmatprep.subr.bf16.mxu1 %v9473_v1  ;;  %s11255_s14 = smov 40  }
0x1bbe   :  { %4929 = vadd.xlane.f32.xlu0 %v4928_v11 }
0x1bbf   :  { %v4931_v2 = vsel %vm198_vm1, %v4927_v63, 0.0 }
0x1bc0   :  { %4932 = vadd.xlane.f32.xlu1 %v4931_v2  ;;  %8675 = vmatpush3.bf16.msra.mxu1 %v9108_v21 }
0x1bc1   :  { %8680 = vmatprep.subr.bf16.mxu1 %v9473_v1 }
0x1c4b   :  { %v4930_v37 = vpop.xlane.xlu0 %4929 }
0x1c4c   :  { %v4934_v5 = vmul.f32 0.03125, %v4930_v37 }
0x1c4d   :  { %v4933_v13 = vpop.xlane.xlu1 %4932 }
0x1c4e   :  { %v4936_v6 = vsub.f32 %v4926_v53, %v4934_v5  ;;  %v4935_v15 = vmul.f32 0.03125, %v4933_v13 }
0x1c50   :  { %v4937_v17 = vsub.f32 %v4927_v63, %v4935_v15  ;;  %v4938_v19 = vmul.f32 %v4936_v6, %v4936_v6  ;;  %v4972_v47 = vmul.f32 %v7805_v59, %v4936_v6 }
0x1c52   :  { %v4940_v7 = vsel %vm198_vm1, %v4938_v19, 0.0  ;;  %v4939_v12 = vmul.f32 %v4937_v17, %v4937_v17  ;;  %v4973_v28 = vmul.f32 %v7805_v59, %v4937_v17 }
0x1c53   :  { %4941 = vadd.xlane.f32.xlu0 %v4940_v7 }
0x1c54   :  { %v4943_v18 = vsel %vm198_vm1, %v4939_v12, 0.0 }
0x1c55   :  { %4944 = vadd.xlane.f32.xlu1 %v4943_v18 }
0x1ce0   :  { %v4942_v56 = vpop.xlane.xlu0 %4941 }
0x1ce1   :  { %v4946_v22 = vmul.f32 0.032258064, %v4942_v56 }
0x1ce2   :  { %v4945_v23 = vpop.xlane.xlu1 %4944 }
0x1ce3   :  { %9291 = vrsqrt.f32 %v4946_v22  ;;  %v4947_v26 = vmul.f32 0.032258064, %v4945_v23  ;;  %vm4950_vm9 = vcmp.eq.f32.partialorder %v4946_v22, inf  ;;  %v4953_v29 = vand.u32 2147483648, %v4946_v22 }
0x1ce4   :  { %vm4952_vm10 = vcmp.eq.f32.partialorder %v4946_v22, 0.0 }
0x1ce5   :  { %9293 = vrsqrt.f32 %v4947_v26  ;;  %vm4957_vm11 = vcmp.eq.f32.partialorder %v4947_v26, inf  ;;  %v4960_v24 = vand.u32 2147483648, %v4947_v26  ;;  %vm4959_vm12 = vcmp.eq.f32.partialorder %v4947_v26, 0.0 }
0x1ced   :  { %v9292_v9 = vpop.eup %9291 }
0x1cee   :  { %v4949_v4 = vmul.f32 %v9292_v9, %v4946_v22 }
0x1cef   :  { %v9294_v30 = vpop.eup %9293 }
0x1cf0   :  { %v4951_v25 = vsel %vm4950_vm9, %v4946_v22, %v4949_v4  ;;  %v4956_v32 = vmul.f32 %v9294_v30, %v4947_v26 }
0x1cf1   :  { %v4954_v57 = vsel %vm4952_vm10, %v4953_v29, %v4951_v25 }
0x1cf2   :  { %v4962_v33 = vadd.f32 1e-06, %v4954_v57  ;;  %v4958_v31 = vsel %vm4957_vm11, %v4947_v26, %v4956_v32 }
0x1cf3   :  { %v4961_v16 = vsel %vm4959_vm12, %v4960_v24, %v4958_v31 }
0x1cf4   :  { %9295 = vrcp.f32 %v4962_v33  ;;  %v4963_v58 = vadd.f32 1e-06, %v4961_v16 }
0x1cf6   :  { %9297 = vrcp.f32 %v4963_v58 }
0x1cfe   :  { %v9296_v43 = vpop.eup %9295 }
0x1cff   :  { %v4974_v14 = vmul.f32 %v9296_v43, %v4972_v47 }
0x1d00   :  { %v9298_v34 = vpop.eup %9297 }
0x1d01   :  { %v4975_v39 = vmul.f32 %v9298_v34, %v4973_v28  ;;  %v10719_v0 = vadd.f32 %v7806_v36, %v4974_v14 }
0x1d03   :  { %v10721_v42 = vadd.f32 %v7806_v36, %v4975_v39 }
0x1d05   :  { %v5002_v48 = vpack.c.bf16 %v10721_v42, %v10719_v0 }
0x1d07   :  { %8677 = vmatmul.mubr.msk.bf16.vlgmr.msra.gmra.mrb[152].mxu1 %vm198_vm1, %v5002_v48 }
0x1d08   :  { %8682 = vmatprep.mubr.msk.bf16.mxu1 %vm9474_vm0, %v9473_v1 }
0x1dda   :  { %v5058_v20 = vpop.f32.mrb[152].mxu1 }
0x1ddb   :  { %v8678_v49 = vpop.f32.mrb[153].mxu1  ;;  %v5059_v50 = vadd.f32 %v7819_v38, %v5058_v20 }
0x1ddc   :  { %v5061_v35 = vpop.f32.mrb[154].mxu1 }
0x1ddd   :  { %v5062_v44 = vadd.f32 %v7819_v38, %v5061_v35  ;;  %v8679_v51 = vpop.f32.mrb[155].mxu1 }
0x1ddf   :  { %v10729_v52 = vpack.c.bf16 %v5062_v44, %v5059_v50 }
0x1de1   :  { %5067 = vrot.lane.b32.xlu0 %v10729_v52, %s9476_s9  ;;  %v10742_v55 = vrot.slane %v10729_v52, 4 }
0x1de5   :  { %5179 = vrot.lane.b32.xlu0 %v10729_v52, %s9478_s28 }
0x1de9   :  { %5177 = vrot.lane.b32.xlu0 %v10729_v52, %s9475_s0 }
0x1ded   :  { %5289 = vrot.lane.b32.xlu0 %v10729_v52, %s9480_s16 }
0x1df1   :  { %5401 = vrot.lane.b32.xlu0 %v10729_v52, %s9481_s7 }
0x1df5   :  { %5641 = vrot.lane.b32.xlu0 %v10742_v55, %s9478_s28 }
0x1df9   :  { %5753 = vrot.lane.b32.xlu0 %v10742_v55, %s9477_s4 }
0x1dfd   :  { %5865 = vrot.lane.b32.xlu0 %v10742_v55, %s9479_s2 }
0x1e53   :  { %v5068_v54 = vpop.permute.xlu0 %5067 }
0x1e54   :  { %v5073_v27 = vsel %vm247_vm2, %v5068_v54, 0 }
0x1e55   :  { %8681 = vmatpush3.bf16.xpose.msra.mxu1 %v5073_v27 }
0x1e56   :  { %8686 = vmatprep.subr.bf16.mxu1 %v9473_v1 }
0x1e57   :  { %v5180_v18 = vpop.permute.xlu0 %5179 }
0x1e58   :  { %v5185_v21 = vsel %vm247_vm2, %v5180_v18, 0 }
0x1e5b   :  { %v5178_v22 = vpop.permute.xlu0 %5177 }
0x1e5c   :  { %8683 = vmatmul.mubr.msk.bf16.vlgmr.msra.gmra.mrb[156].mxu1 %vm247_vm2, %v10729_v52 }
0x1e5d   :  { %8688 = vmatprep.mubr.msk.bf16.mxu1 %vm9474_vm0, %v9473_v1 }
0x1e5f   :  { %v5290_v9 = vpop.permute.xlu0 %5289 }
0x1e63   :  { %v5402_v30 = vpop.permute.xlu0 %5401 }
0x1e67   :  { %v5642_v57 = vpop.permute.xlu0 %5641 }
0x1e68   :  { %v5647_v32 = vsel %vm247_vm2, %v5642_v57, 0 }
0x1e6b   :  { %v5754_v33 = vpop.permute.xlu0 %5753 }
0x1e6c   :  { %v5759_v31 = vsel %vm247_vm2, %v5754_v33, 0 }
0x1e6f   :  { %v5866_v16 = vpop.permute.xlu0 %5865 }
0x1e70   :  { %v5871_v59 = vsel %vm247_vm2, %v5866_v16, 0 }
0x1f2f   :  { %v5109_v60 = vpop.f32.mrb[156].mxu1 }
0x1f30   :  { %v5115_v46 = vmul.f32 0.35355338, %v5109_v60  ;;  %v8684_v53 = vpop.f32.mrb[157].mxu1 }
0x1f31   :  { %v5112_v61 = vpop.f32.mrb[158].mxu1 }
0x1f32   :  { %v5116_v62 = vadd.f32 %v5115_v46, %v10248_v45  ;;  %v8685_v63 = vpop.f32.mrb[159].mxu1 }
0x1f34   :  { %v5117_v11 = vsel %vm247_vm2, %v5116_v62, -inf }
0x1f35   :  { %5118 = vmax.xlane.f32.xlu1 %v5117_v11 }
0x1fc2   :  { %v5119_v2 = vpop.xlane.xlu1 %5118 }
0x1fc3   :  { %v5120_v37 = vsub.f32 %v5116_v62, %v5119_v2 }
0x1fc5   :  { %v5121_v5 = vmul.f32 1.442695, %v5120_v37 }
0x1fc7   :  { %9299 = vpow2.f32 %v5121_v5 }
0x1fd1   :  { %v9300_v13 = vpop.eup %9299 }
0x1fd2   :  { %v5123_v6 = vsel %vm247_vm2, %v9300_v13, 0.0 }
0x1fd3   :  { %5124 = vadd.xlane.f32.xlu1 %v5123_v6 }
0x1fe4   :  { %5129 = vrot.lane.b32.xlu1 %v10729_v52, %s9483_s22 }
0x1fe8   :  { %5291 = vrot.lane.b32.xlu1 %v10729_v52, %s9477_s4 }
0x1fec   :  { %5403 = vrot.lane.b32.xlu1 %v10729_v52, %s9479_s2 }
0x1ff0   :  { %5529 = vrot.lane.b32.xlu1 %v10742_v55, %s9476_s9 }
0x1ff4   :  { %5639 = vrot.lane.b32.xlu1 %v10742_v55, %s9475_s0 }
0x1ff8   :  { %5751 = vrot.lane.b32.xlu1 %v10742_v55, %s9480_s16 }
0x1ffc   :  { %5863 = vrot.lane.b32.xlu1 %v10742_v55, %s9481_s7 }
0x2060   :  { %v5125_v15 = vpop.xlane.xlu1 %5124 }
0x2061   :  { %9301 = vrcp.f32 %v5125_v15 }
0x2064   :  { %v5130_v17 = vpop.permute.xlu1 %5129 }
0x2065   :  { %v5135_v19 = vsel %vm313_vm5, %v5130_v17, 0 }
0x2066   :  { %8687 = vmatpush3.bf16.msra.mxu1 %v5135_v19 }
0x2067   :  { %8692 = vmatprep.subr.bf16.mxu1 %v9473_v1 }
0x2068   :  { %v5292_v56 = vpop.permute.xlu1 %5291 }
0x2069   :  { %v5297_v23 = vsel %vm247_vm2, %v5292_v56, 0 }
0x206b   :  { %v9302_v7 = vpop.eup %9301 }
0x206c   :  { %v5127_v12 = vmul.f32 %v9302_v7, %v9300_v13  ;;  %v5404_v26 = vpop.permute.xlu1 %5403 }
0x206d   :  { %v5409_v4 = vsel %vm247_vm2, %v5404_v26, 0 }
0x206e   :  { %v5128_v8 = vpack.c.bf16 %v5127_v12, %v5127_v12 }
0x2070   :  { %8689 = vmatmul.mubr.msk.bf16.vlgmr.msra.gmra.mrb[160].mxu1 %vm247_vm2, %v5128_v8  ;;  %v5530_v29 = vpop.permute.xlu1 %5529 }
0x2071   :  { %8693 = vmatpush3.bf16.xpose.msra.mxu1 %v5185_v21  ;;  %8694 = vmatprep.mubr.msk.bf16.mxu1 %vm9474_vm0, %v9473_v1  ;;  %v5535_v25 = vsel %vm247_vm2, %v5530_v29, 0 }
0x2072   :  { %8704 = vmatprep.subr.bf16.mxu1 %v9473_v1 }
0x2074   :  { %v5640_v24 = vpop.permute.xlu1 %5639 }
0x2078   :  { %8695 = vmatmul.mubr.msk.bf16.vlgmr.msra.gmra.mrb[164].mxu1 %vm247_vm2, %v5178_v22  ;;  %v5752_v58 = vpop.permute.xlu1 %5751 }
0x2079   :  { %8705 = vmatpush3.bf16.xpose.msra.mxu1 %v5297_v23  ;;  %8706 = vmatprep.mubr.msk.bf16.mxu1 %vm9474_vm0, %v9473_v1 }
0x207a   :  { %8716 = vmatprep.subr.bf16.mxu1 %v9473_v1 }
0x207c   :  { %v5864_v43 = vpop.permute.xlu1 %5863 }
0x2080   :  { %8707 = vmatmul.mubr.msk.bf16.vlgmr.msra.gmra.mrb[168].mxu1 %vm247_vm2, %v5290_v9 }
0x2081   :  { %8717 = vmatpush3.bf16.xpose.msra.mxu1 %v5409_v4  ;;  %8718 = vmatprep.mubr.msk.bf16.mxu1 %vm9474_vm0, %v9473_v1 }
0x2082   :  { %8728 = vmatprep.subr.bf16.mxu1 %v9473_v1 }
0x2088   :  { %8719 = vmatmul.mubr.msk.bf16.vlgmr.msra.gmra.mrb[172].mxu1 %vm247_vm2, %v5402_v30 }
0x2089   :  { %8729 = vmatpush3.bf16.xpose.msra.mxu1 %v5535_v25  ;;  %8730 = vmatprep.mubr.msk.bf16.mxu1 %vm9474_vm0, %v9473_v1 }
0x208a   :  { %8740 = vmatprep.subr.bf16.mxu1 %v9473_v1 }
0x2090   :  { %8731 = vmatmul.mubr.msk.bf16.vlgmr.msra.gmra.mrb[176].mxu1 %vm247_vm2, %v10742_v55 }
0x2091   :  { %8741 = vmatpush3.bf16.xpose.msra.mxu1 %v5647_v32  ;;  %8742 = vmatprep.mubr.msk.bf16.mxu1 %vm9474_vm0, %v9473_v1 }
0x2092   :  { %8752 = vmatprep.subr.bf16.mxu1 %v9473_v1 }
0x2098   :  { %8743 = vmatmul.mubr.msk.bf16.vlgmr.msra.gmra.mrb[180].mxu1 %vm247_vm2, %v5640_v24 }
0x2099   :  { %8753 = vmatpush3.bf16.xpose.msra.mxu1 %v5759_v31  ;;  %8754 = vmatprep.mubr.msk.bf16.mxu1 %vm9474_vm0, %v9473_v1 }
0x209a   :  { %8764 = vmatprep.subr.bf16.mxu1 %v9473_v1 }
0x20a0   :  { %8755 = vmatmul.mubr.msk.bf16.vlgmr.msra.gmra.mrb[184].mxu1 %vm247_vm2, %v5752_v58 }
0x20a1   :  { %8765 = vmatpush3.bf16.xpose.msra.mxu1 %v5871_v59  ;;  %8766 = vmatprep.mubr.msk.bf16.mxu1 %vm9474_vm0, %v9473_v1 }
0x20a2   :  { %8776 = vmatprep.subr.bf16.mxu1 %v9473_v1 }
0x20a8   :  { %8767 = vmatmul.mubr.msk.bf16.vlgmr.msra.gmra.mrb[188].mxu1 %vm247_vm2, %v5864_v43 }
0x20a9   :  { %8780 = vmatprep.mubr.msk.bf16.mxu1 %vm9474_vm0, %v9473_v1 }
0x2143   :  { %v10814_v47 = vpop.f32.mrb[160].mxu1 }
0x2144   :  { %v8690_v28 = vpop.f32.mrb[161].mxu1 }
0x2145   :  { %v5174_v14 = vpop.f32.mrb[162].mxu1 }
0x2146   :  { %v8691_v34 = vpop.f32.mrb[163].mxu1 }
0x214b   :  { %v5221_v36 = vpop.f32.mrb[164].mxu1 }
0x214c   :  { %v5227_v39 = vmul.f32 0.35355338, %v5221_v36  ;;  %v8696_v48 = vpop.f32.mrb[165].mxu1 }
0x214d   :  { %v5224_v38 = vpop.f32.mrb[166].mxu1 }
0x214e   :  { %v5228_v20 = vadd.f32 %v5227_v39, %v10248_v45  ;;  %v8697_v49 = vpop.f32.mrb[167].mxu1 }
0x2150   :  { %v5229_v35 = vsel %vm247_vm2, %v5228_v20, -inf }
0x2151   :  { %5230 = vmax.xlane.f32.xlu0 %v5229_v35 }
0x2153   :  { %v5333_v50 = vpop.f32.mrb[168].mxu1 }
0x2154   :  { %v5339_v44 = vmul.f32 0.35355338, %v5333_v50  ;;  %v8708_v51 = vpop.f32.mrb[169].mxu1 }
0x2155   :  { %v5336_v54 = vpop.f32.mrb[170].mxu1 }
0x2156   :  { %v5340_v27 = vadd.f32 %v5339_v44, %v10248_v45  ;;  %v8709_v60 = vpop.f32.mrb[171].mxu1 }
0x2158   :  { %v5341_v46 = vsel %vm247_vm2, %v5340_v27, -inf }
0x2159   :  { %5342 = vmax.xlane.f32.xlu1 %v5341_v46 }
0x215b   :  { %v5445_v53 = vpop.f32.mrb[172].mxu1 }
0x215c   :  { %v5451_v61 = vmul.f32 0.35355338, %v5445_v53  ;;  %v8720_v62 = vpop.f32.mrb[173].mxu1 }
0x215d   :  { %v5448_v63 = vpop.f32.mrb[174].mxu1 }
0x215e   :  { %v5452_v11 = vadd.f32 %v5451_v61, %v10248_v45  ;;  %v8721_v2 = vpop.f32.mrb[175].mxu1 }
0x2160   :  { %v5453_v37 = vsel %vm247_vm2, %v5452_v11, -inf }
0x2161   :  { %5454 = vmax.xlane.f32.xlu0 %v5453_v37 }
0x2163   :  { %v5571_v5 = vpop.f32.mrb[176].mxu1 }
0x2164   :  { %v5577_v13 = vmul.f32 0.35355338, %v5571_v5  ;;  %v8732_v6 = vpop.f32.mrb[177].mxu1 }
0x2165   :  { %v5574_v15 = vpop.f32.mrb[178].mxu1 }
0x2166   :  { %v5578_v17 = vadd.f32 %v5577_v13, %v10273_v3  ;;  %v8733_v19 = vpop.f32.mrb[179].mxu1 }
0x2168   :  { %v5579_v7 = vsel %vm247_vm2, %v5578_v17, -inf }
0x2169   :  { %5580 = vmax.xlane.f32.xlu0 %v5579_v7 }
0x216b   :  { %v5683_v12 = vpop.f32.mrb[180].mxu1 }
0x216c   :  { %v5689_v18 = vmul.f32 0.35355338, %v5683_v12  ;;  %v8744_v8 = vpop.f32.mrb[181].mxu1 }
0x216d   :  { %v5686_v21 = vpop.f32.mrb[182].mxu1 }
0x216e   :  { %v5690_v45 = vadd.f32 %v5689_v18, %v10273_v3  ;;  %v8745_v56 = vpop.f32.mrb[183].mxu1 }
0x2170   :  { %v5691_v22 = vsel %vm247_vm2, %v5690_v45, -inf }
0x2171   :  { %5692 = vmax.xlane.f32.xlu1 %v5691_v22 }
0x2173   :  { %v5795_v23 = vpop.f32.mrb[184].mxu1 }
0x2174   :  { %v5801_v26 = vmul.f32 0.35355338, %v5795_v23  ;;  %v8756_v9 = vpop.f32.mrb[185].mxu1 }
0x2175   :  { %v5798_v4 = vpop.f32.mrb[186].mxu1 }
0x2176   :  { %v5802_v29 = vadd.f32 %v5801_v26, %v10273_v3  ;;  %v8757_v30 = vpop.f32.mrb[187].mxu1 }
0x2178   :  { %v5803_v25 = vsel %vm247_vm2, %v5802_v29, -inf }
0x2179   :  { %5804 = vmax.xlane.f32.xlu0 %v5803_v25 }
0x217b   :  { %v5907_v57 = vpop.f32.mrb[188].mxu1 }
0x217c   :  { %v8768_v32 = vpop.f32.mrb[189].mxu1  ;;  %v5913_v31 = vmul.f32 0.35355338, %v5907_v57 }
0x217d   :  { %v5910_v33 = vpop.f32.mrb[190].mxu1 }
0x217e   :  { %v8769_v24 = vpop.f32.mrb[191].mxu1  ;;  %v5914_v16 = vadd.f32 %v5913_v31, %v10273_v3 }
0x2180   :  { %v5915_v58 = vsel %vm247_vm2, %v5914_v16, -inf }
0x2182   :  { %5353 = vrot.lane.b32.xlu1 %v10729_v52, %s9484_s26 }
0x218f   :  { %5241 = vrot.lane.b32.xlu0 %v10729_v52, %s9482_s27 }
0x21a6   :  { %5916 = vmax.xlane.f32.xlu1 %v5915_v58 }
0x21de   :  { %v5231_v59 = vpop.xlane.xlu0 %5230 }
0x21df   :  { %v5232_v43 = vsub.f32 %v5228_v20, %v5231_v59 }
0x21e1   :  { %v5233_v28 = vmul.f32 1.442695, %v5232_v43 }
0x21e3   :  { %9303 = vpow2.f32 %v5233_v28 }
0x21e6   :  { %v5343_v14 = vpop.xlane.xlu1 %5342 }
0x21e7   :  { %v5344_v34 = vsub.f32 %v5340_v27, %v5343_v14 }
0x21e9   :  { %v5345_v36 = vmul.f32 1.442695, %v5344_v34 }
0x21eb   :  { %9305 = vpow2.f32 %v5345_v36 }
0x21ed   :  { %v9304_v39 = vpop.eup %9303 }
0x21ee   :  { %v5455_v48 = vpop.xlane.xlu0 %5454  ;;  %v5235_v38 = vsel %vm247_vm2, %v9304_v39, 0.0 }
0x21ef   :  { %v5456_v49 = vsub.f32 %v5452_v11, %v5455_v48  ;;  %5236 = vadd.xlane.f32.xlu0 %v5235_v38 }
0x21f1   :  { %v5457_v35 = vmul.f32 1.442695, %v5456_v49 }
0x21f3   :  { %9307 = vpow2.f32 %v5457_v35 }
0x21f5   :  { %v9306_v3 = vpop.eup %9305 }
0x21f6   :  { %v5347_v50 = vsel %vm247_vm2, %v9306_v3, 0.0  ;;  %v5581_v51 = vpop.xlane.xlu0 %5580 }
0x21f7   :  { %5348 = vadd.xlane.f32.xlu1 %v5347_v50  ;;  %v5582_v46 = vsub.f32 %v5578_v17, %v5581_v51 }
0x21f9   :  { %v5583_v61 = vmul.f32 1.442695, %v5582_v46 }
0x21fb   :  { %9309 = vpow2.f32 %v5583_v61 }
0x21fd   :  { %v10836_v44 = vpop.eup %9307 }
0x21fe   :  { %v5459_v20 = vsel %vm247_vm2, %v10836_v44, 0.0  ;;  %v5693_v53 = vpop.xlane.xlu1 %5692 }
0x21ff   :  { %5460 = vadd.xlane.f32.xlu0 %v5459_v20  ;;  %v5694_v62 = vsub.f32 %v5690_v45, %v5693_v53 }
0x2201   :  { %v5695_v63 = vmul.f32 1.442695, %v5694_v62 }
0x2202   :  { %v5354_v13 = vpop.permute.xlu1 %5353 }
0x2203   :  { %9311 = vpow2.f32 %v5695_v63  ;;  %v5359_v26 = vsel %vm313_vm5, %v5354_v13, 0 }
0x2206   :  { %v5805_v54 = vpop.xlane.xlu0 %5804 }
0x2207   :  { %v5806_v11 = vsub.f32 %v5802_v29, %v5805_v54 }
0x2208   :  { %5465 = vrot.lane.b32.xlu1 %v10729_v52, %s11255_s14  ;;  %v9310_v52 = vpop.eup %9309 }
0x2209   :  { %v5807_v2 = vmul.f32 1.442695, %v5806_v11  ;;  %v5585_v37 = vsel %vm247_vm2, %v9310_v52, 0.0 }
0x220a   :  { %v5242_v27 = vpop.permute.xlu0 %5241 }
0x220b   :  { %v5247_v60 = vsel %vm313_vm5, %v5242_v27, 0  ;;  %9313 = vpow2.f32 %v5807_v2 }
0x220c   :  { %8699 = vmatpush3.bf16.msra.mxu0 %v5247_v60 }
0x220d   :  { %8710 = vmatprep.subr.bf16.mxu0 %v9473_v1  ;;  %v10847_v5 = vpop.eup %9311 }
0x220e   :  { %v5697_v6 = vsel %vm247_vm2, %v10847_v5, 0.0 }
0x2215   :  { %5591 = vrot.lane.b32.xlu0 %v10742_v55, %s9483_s22  ;;  %v10851_v15 = vpop.eup %9313  ;;  %s11258_s22 = smov 24  }
0x2216   :  { %v5809_v19 = vsel %vm247_vm2, %v10851_v15, 0.0 }
0x222c   :  { %5586 = vadd.xlane.f32.xlu1 %v5585_v37 }
0x2230   :  { %5698 = vadd.xlane.f32.xlu1 %v5697_v6 }
0x2233   :  { %v5917_v17 = vpop.xlane.xlu1 %5916 }
0x2234   :  { %v5918_v7 = vsub.f32 %v5914_v16, %v5917_v17  ;;  %5810 = vadd.xlane.f32.xlu0 %v5809_v19 }
0x2236   :  { %v5919_v12 = vmul.f32 1.442695, %v5918_v7 }
0x2238   :  { %9315 = vpow2.f32 %v5919_v12 }
0x2242   :  { %v10855_v18 = vpop.eup %9315 }
0x2243   :  { %v5921_v8 = vsel %vm247_vm2, %v10855_v18, 0.0 }
0x2244   :  { %5922 = vadd.xlane.f32.xlu1 %v5921_v8  ;;  %v9109_v8 = vld [vmem:[%s9555_s24 + $0x10] sm:$0xff]  }
0x2245   :  { %8777 = vmatpush3.bf16.msra.mxu1 %v9109_v8 }
0x2246   :  { %8778 = vmatprep.subr.bf16.mxu1 %v9473_v1 }
0x224a   :  { %5815 = vrot.lane.b32.xlu0 %v10742_v55, %s9484_s26 }
0x224e   :  { %5927 = vrot.lane.b32.xlu0 %v10742_v55, %s11255_s14 }
0x2255   :  { %5703 = vrot.lane.b32.xlu1 %v10742_v55, %s9482_s27  ;;  %s11257_s27 = smov 16  }
0x227c   :  { %v5237_v21 = vpop.xlane.xlu0 %5236 }
0x227d   :  { %9317 = vrcp.f32 %v5237_v21 }
0x2284   :  { %v5349_v45 = vpop.xlane.xlu1 %5348 }
0x2285   :  { %9319 = vrcp.f32 %v5349_v45 }
0x2287   :  { %v9318_v56 = vpop.eup %9317 }
0x2288   :  { %v5239_v22 = vmul.f32 %v9318_v56, %v9304_v39  ;;  %v5466_v29 = vpop.permute.xlu1 %5465 }
0x2289   :  { %v5471_v25 = vsel %vm313_vm5, %v5466_v29, 0 }
0x228a   :  { %v5240_v23 = vpack.c.bf16 %v5239_v22, %v5239_v22 }
0x228c   :  { %8701 = vmatmul.mubr.msk.bf16.vlgmr.msra.gmra.mrb[148].mxu0 %vm247_vm2, %v5240_v23  ;;  %v5461_v9 = vpop.xlane.xlu0 %5460  ;;  %v9110_v23 = vld [vmem:[%s9555_s24 + $0x18] sm:$0xff]   ;;  %s9490_s24 = smov [#allocation5]  }
0x228d   :  { %8711 = vmatpush3.bf16.msra.mxu0 %v5359_v26  ;;  %9321 = vrcp.f32 %v5461_v9  ;;  %8712 = vmatprep.mubr.msk.bf16.mxu0 %vm9474_vm0, %v9473_v1 }
0x228e   :  { %8722 = vmatprep.subr.bf16.mxu0 %v9473_v1  ;;  %8779 = vmatpush3.bf16.msra.mxu1 %v9110_v23 }
0x228f   :  { %v9320_v55 = vpop.eup %9319  ;;  %8792 = vmatprep.subr.bf16.mxu1 %v9473_v1 }
0x2290   :  { %v5351_v4 = vmul.f32 %v9320_v55, %v9306_v3  ;;  %v5592_v33 = vpop.permute.xlu0 %5591 }
0x2291   :  { %v5597_v31 = vsel %vm313_vm5, %v5592_v33, 0 }
0x2292   :  { %v5352_v30 = vpack.c.bf16 %v5351_v4, %v5351_v4 }
0x2294   :  { %8713 = vmatmul.mubr.msk.bf16.vlgmr.msra.gmra.mrb[152].mxu0 %vm247_vm2, %v5352_v30 }
0x2295   :  { %8723 = vmatpush3.bf16.msra.mxu0 %v5471_v25  ;;  %8724 = vmatprep.mubr.msk.bf16.mxu0 %vm9474_vm0, %v9473_v1 }
0x2296   :  { %8734 = vmatprep.subr.bf16.mxu0 %v9473_v1 }
0x2297   :  { %v9322_v57 = vpop.eup %9321 }
0x2298   :  { %v5463_v32 = vmul.f32 %v9322_v57, %v10836_v44 }
0x229a   :  { %v5464_v24 = vpack.c.bf16 %v5463_v32, %v5463_v32 }
0x229c   :  { %8725 = vmatmul.mubr.msk.bf16.vlgmr.msra.gmra.mrb[156].mxu0 %vm247_vm2, %v5464_v24 }
0x229d   :  { %8735 = vmatpush3.bf16.msra.mxu0 %v5597_v31  ;;  %8736 = vmatprep.mubr.msk.bf16.mxu0 %vm9474_vm0, %v9473_v1 }
0x229e   :  { %8746 = vmatprep.subr.bf16.mxu0 %v9473_v1 }
0x22b9   :  { %v5587_v16 = vpop.xlane.xlu1 %5586 }
0x22ba   :  { %9323 = vrcp.f32 %v5587_v16 }
0x22bd   :  { %v5699_v59 = vpop.xlane.xlu1 %5698 }
0x22be   :  { %9325 = vrcp.f32 %v5699_v59 }
0x22c1   :  { %v5811_v14 = vpop.xlane.xlu0 %5810 }
0x22c2   :  { %9327 = vrcp.f32 %v5811_v14 }
0x22c4   :  { %v9324_v58 = vpop.eup %9323 }
0x22c5   :  { %v5589_v43 = vmul.f32 %v9324_v58, %v9310_v52  ;;  %v5816_v49 = vpop.permute.xlu0 %5815 }
0x22c6   :  { %v5821_v50 = vsel %vm313_vm5, %v5816_v49, 0 }
0x22c7   :  { %v5590_v28 = vpack.c.bf16 %v5589_v43, %v5589_v43 }
0x22c8   :  { %v9326_v34 = vpop.eup %9325 }
0x22c9   :  { %8737 = vmatmul.mubr.msk.bf16.vlgmr.msra.gmra.mrb[160].mxu0 %vm247_vm2, %v5590_v28  ;;  %v5701_v39 = vmul.f32 %v9326_v34, %v10847_v5  ;;  %v5928_v20 = vpop.permute.xlu0 %5927 }
0x22ca   :  { %8748 = vmatprep.mubr.msk.bf16.mxu0 %vm9474_vm0, %v9473_v1  ;;  %v5933_v27 = vsel %vm313_vm5, %v5928_v20, 0 }
0x22cb   :  { %v5702_v35 = vpack.c.bf16 %v5701_v39, %v5701_v39 }
0x22cc   :  { %v9328_v3 = vpop.eup %9327 }
0x22cd   :  { %v5813_v44 = vmul.f32 %v9328_v3, %v10851_v15 }
0x22cf   :  { %v5814_v51 = vpack.c.bf16 %v5813_v44, %v5813_v44 }
0x22d1   :  { %v5923_v36 = vpop.xlane.xlu1 %5922 }
0x22d2   :  { %9329 = vrcp.f32 %v5923_v36 }
0x22d5   :  { %v5704_v48 = vpop.permute.xlu1 %5703 }
0x22d6   :  { %v5709_v38 = vsel %vm313_vm5, %v5704_v48, 0 }
0x22d7   :  { %8747 = vmatpush3.bf16.msra.mxu0 %v5709_v38 }
0x22d8   :  { %8758 = vmatprep.subr.bf16.mxu0 %v9473_v1 }
0x22da   :  { %8749 = vmatmul.mubr.msk.bf16.vlgmr.msra.gmra.mrb[164].mxu0 %vm247_vm2, %v5702_v35 }
0x22db   :  { %8759 = vmatpush3.bf16.msra.mxu0 %v5821_v50  ;;  %8760 = vmatprep.mubr.msk.bf16.mxu0 %vm9474_vm0, %v9473_v1  ;;  %v7842_v50 = vld [vmem:[%s9560_s30 + $0x1] ss:$0 sm:$0xff]  ;;  %s7632_s30 = sshll.u32 %s9490_s24, 4  ;;  %s7633_s30 = int_to_ptr.vmem [resolvable:$true] %s7632_s30 }
0x22dc   :  { %8770 = vmatprep.subr.bf16.mxu0 %v9473_v1  ;;  %v9330_v54 = vpop.eup %9329  ;;  %p9420_p11 = scmp.lt.s32.totalorder %s7633_s30, %s7633_s30 }
0x22dd   :  { %v5925_v60 = vmul.f32 %v9330_v54, %v10855_v18 }
0x22df   :  { %v5926_v46 = vpack.c.bf16 %v5925_v60, %v5925_v60 }
0x22e2   :  { %8761 = vmatmul.mubr.msk.bf16.vlgmr.msra.gmra.mrb[168].mxu0 %vm247_vm2, %v5814_v51 }
0x22e3   :  { %8771 = vmatpush3.bf16.msra.mxu0 %v5933_v27  ;;  %8772 = vmatprep.mubr.msk.bf16.mxu0 %vm9474_vm0, %v9473_v1 }
0x22e4   :  { %8784 = vmatprep.subr.bf16.mxu0 %v9473_v1 }
0x22ea   :  { %8773 = vmatmul.mubr.msk.bf16.vlgmr.msra.gmra.mrb[172].mxu0 %vm247_vm2, %v5926_v46 }
0x22eb   :  { %8788 = vmatprep.mubr.msk.bf16.mxu0 %vm9474_vm0, %v9473_v1 }
0x235f   :  { %v5283_v53 = vpop.f32.mrb[148].mxu0 }
0x2360   :  { %v8702_v61 = vpop.f32.mrb[149].mxu0 }
0x2361   :  { %v5286_v62 = vpop.f32.mrb[150].mxu0 }
0x2362   :  { %v8703_v63 = vpop.f32.mrb[151].mxu0  ;;  %v9111_v62 = vld [vmem:[%s9575_s20 + $0x10] sm:$0xff]  }
0x2363   :  { %8785 = vmatpush3.bf16.msra.mxu0 %v9111_v62 }
0x2364   :  { %8786 = vmatprep.subr.bf16.mxu0 %v9473_v1 }
0x2367   :  { %v5395_v11 = vpop.f32.mrb[152].mxu0 }
0x2368   :  { %v8714_v2 = vpop.f32.mrb[153].mxu0 }
0x2369   :  { %v5398_v52 = vpop.f32.mrb[154].mxu0 }
0x236a   :  { %v8715_v37 = vpop.f32.mrb[155].mxu0 }
0x236f   :  { %v5507_v5 = vpop.f32.mrb[156].mxu0 }
0x2370   :  { %v8726_v13 = vpop.f32.mrb[157].mxu0 }
0x2371   :  { %v5510_v6 = vpop.f32.mrb[158].mxu0 }
0x2372   :  { %v8727_v15 = vpop.f32.mrb[159].mxu0 }
0x239c   :  { %v5633_v17 = vpop.f32.mrb[160].mxu0 }
0x239d   :  { %v8738_v19 = vpop.f32.mrb[161].mxu0 }
0x239e   :  { %v5636_v7 = vpop.f32.mrb[162].mxu0  ;;  %v10934_v19 = vld [vmem:[%s11243_s29 + $0x1] ss:$0 sm:$0xff] }
0x239f   :  { %v8739_v12 = vpop.f32.mrb[163].mxu0 }
0x23ad   :  { %v5745_v18 = vpop.f32.mrb[164].mxu0 }
0x23ae   :  { %v9051_v21 = vpack.i.bf16 %v5745_v18, %v5283_v53  ;;  %v8750_v45 = vpop.f32.mrb[165].mxu0 }
0x23af   :  { %v5748_v56 = vpop.f32.mrb[166].mxu0 }
0x23b0   :  { %9052 = vrot.lane.b32.xlu1 %v9051_v21, %s11256_s19  ;;  %v8751_v22 = vpop.f32.mrb[167].mxu0 }
0x23b5   :  { %v5857_v26 = vpop.f32.mrb[168].mxu0 }
0x23b6   :  { %v9056_v9 = vpack.i.bf16 %v5857_v26, %v5395_v11  ;;  %v8762_v55 = vpop.f32.mrb[169].mxu0 }
0x23b7   :  { %v5860_v4 = vpop.f32.mrb[170].mxu0 }
0x23b8   :  { %9057 = vrot.lane.b32.xlu0 %v9056_v9, %s11257_s27  ;;  %v8763_v29 = vpop.f32.mrb[171].mxu0 }
0x23bd   :  { %v5969_v30 = vpop.f32.mrb[172].mxu0 }
0x23be   :  { %v9061_v25 = vpack.i.bf16 %v5969_v30, %v5507_v5  ;;  %v8774_v57 = vpop.f32.mrb[173].mxu0 }
0x23bf   :  { %v5972_v32 = vpop.f32.mrb[174].mxu0  ;;  %v7843_v57 = vld [vmem:[%s11244_s3 + $0x1] ss:$0 sm:$0xff] }
0x23c0   :  { %9062 = vrot.lane.b32.xlu1 %v9061_v25, %s11258_s22  ;;  %v8775_v33 = vpop.f32.mrb[175].mxu0 }
0x2422   :  { %v9053_v24 = vpop.permute.xlu1 %9052 }
0x2423   :  { %v9055_v16 = vunpack.i.h.bf16 %v9053_v24  ;;  %v9054_v58 = vunpack.i.l.bf16 %v9053_v24 }
0x2425   :  { %v5987_v14 = vsel %vm247_vm2, %v5633_v17, %v9055_v16  ;;  %v5525_v34 = vsel %vm247_vm2, %v10814_v47, %v9054_v58  ;;  %v7844_v58 = vld [vmem:[%s11245_s8 + $0x1] ss:$0 sm:$0xff] }
0x242a   :  { %v9058_v31 = vpop.permute.xlu0 %9057 }
0x242b   :  { %v9060_v59 = vunpack.i.h.bf16 %v9058_v31  ;;  %v9059_v43 = vunpack.i.l.bf16 %v9058_v31 }
0x242d   :  { %v5988_v48 = vsel %vm706_vm6, %v5987_v14, %v9060_v59  ;;  %v5526_v38 = vsel %vm706_vm6, %v5525_v34, %v9059_v43 }
0x2432   :  { %v9063_v28 = vpop.permute.xlu1 %9062 }
0x2433   :  { %v9065_v36 = vunpack.i.h.bf16 %v9063_v28  ;;  %v9064_v39 = vunpack.i.l.bf16 %v9063_v28 }
0x2435   :  { %v5989_v49 = vsel %vm708_vm7, %v5988_v48, %v9065_v36  ;;  %v5527_v35 = vsel %vm708_vm7, %v5526_v38, %v9064_v39 }
0x2436   :  { %v5990_v3 = vpack.c.bf16 %v5989_v49, %v5527_v35 }
0x2438   :  { %8781 = vmatmul.mubr.msk.bf16.vlgmr.msra.gmra.mrb[192].mxu1 %vm198_vm1, %v5990_v3 }
0x2439   :  { %8796 = vmatprep.mubr.msk.bf16.mxu1 %vm9474_vm0, %v9473_v1 }
0x250b   :  { %v6040_v44 = vpop.f32.mrb[192].mxu1 }
0x250c   :  { %v6047_v47 = vadd.f32 %v6040_v44, %v10719_v0  ;;  %v8782_v20 = vpop.f32.mrb[193].mxu1  ;;  %v9112_v0 = vld [vmem:[%s9575_s20 + $0x18] sm:$0xff]   ;;  %s9415_s20 = scalar_lea.vmem %s7633_s30, 256 }
0x250d   :  { %v6043_v51 = vpop.f32.mrb[194].mxu1  ;;  %8787 = vmatpush3.bf16.msra.mxu0 %v9112_v0  ;;  %p9416_p10 = scmp.ne.s32.totalorder %s7633_s30, %s9415_s20  ;;  %p9421_p12 = scmp.lt.s32.totalorder %s9415_s20, %s9415_s20 }
0x250e   :  { %v6055_v54 = vadd.f32 %v7842_v50, %v6047_v47  ;;  %v6048_v27 = vadd.f32 %v6043_v51, %v10721_v42  ;;  %v8783_v60 = vpop.f32.mrb[195].mxu1  ;;  %8800 = vmatprep.subr.bf16.mxu0 %v9473_v1 }
0x250f   :  { %p9422_p13 = por %p9421_p12, %p9420_p11 }
0x2510   :  { %v6056_v46 = vadd.f32 %v7842_v50, %v6048_v27  ;;  %v6057_v53 = vsel %vm198_vm1, %v6055_v54, 0.0 }
0x2511   :  { %6058 = vadd.xlane.f32.xlu0 %v6057_v53  ;;  %p9423_p0 = pnand %p9422_p13, %p9416_p10 }
0x2512   :  { %v6060_v61 = vsel %vm198_vm1, %v6056_v46, 0.0 }
0x2513   :  { %6061 = vadd.xlane.f32.xlu1 %v6060_v61 }
0x2524   :  { %6194 = vrot.lane.b32.xlu1 %v9111_v62, %s9476_s9 }
0x2528   :  { %6200 = vrot.lane.b32.xlu1 %v10934_v19, %s9476_s9 }
0x259e   :  { %v6059_v63 = vpop.xlane.xlu0 %6058 }
0x259f   :  { %v6063_v42 = vmul.f32 0.03125, %v6059_v63 }
0x25a0   :  { %v6062_v11 = vpop.xlane.xlu1 %6061 }
0x25a1   :  { %v6065_v2 = vsub.f32 %v6055_v54, %v6063_v42  ;;  %v6064_v52 = vmul.f32 0.03125, %v6062_v11 }
0x25a3   :  { %v6066_v37 = vsub.f32 %v6056_v46, %v6064_v52  ;;  %v6067_v5 = vmul.f32 %v6065_v2, %v6065_v2  ;;  %v6101_v33 = vmul.f32 %v7843_v57, %v6065_v2 }
0x25a4   :  { %v6195_v17 = vpop.permute.xlu1 %6194 }
0x25a5   :  { %v6069_v13 = vsel %vm198_vm1, %v6067_v5, 0.0  ;;  %v6068_v6 = vmul.f32 %v6066_v37, %v6066_v37  ;;  %8793 = vmatpush3.bf16.msra.mxu1 %v6195_v17  ;;  %v6102_v24 = vmul.f32 %v7843_v57, %v6066_v37 }
0x25a6   :  { %6070 = vadd.xlane.f32.xlu0 %v6069_v13  ;;  %8794 = vmatprep.subr.bf16.mxu1 %v9473_v1 }
0x25a7   :  { %v6072_v15 = vsel %vm198_vm1, %v6068_v6, 0.0 }
0x25a8   :  { %v6201_v34 = vpop.permute.xlu1 %6200 }
0x25aa   :  { %6073 = vadd.xlane.f32.xlu0 %v6072_v15 }
0x25c0   :  { %6196 = vrot.lane.b32.xlu0 %v9112_v0, %s9476_s9 }
0x2633   :  { %v6071_v7 = vpop.xlane.xlu0 %6070 }
0x2634   :  { %v6075_v12 = vmul.f32 0.032258064, %v6071_v7 }
0x2636   :  { %9331 = vrsqrt.f32 %v6075_v12  ;;  %vm6079_vm13 = vcmp.eq.f32.partialorder %v6075_v12, inf  ;;  %v6082_v22 = vand.u32 2147483648, %v6075_v12  ;;  %vm6081_vm14 = vcmp.eq.f32.partialorder %v6075_v12, 0.0 }
0x2637   :  { %v6074_v18 = vpop.xlane.xlu0 %6073 }
0x2638   :  { %v6076_v8 = vmul.f32 0.032258064, %v6074_v18 }
0x263a   :  { %9333 = vrsqrt.f32 %v6076_v8  ;;  %vm6086_vm15 = vcmp.eq.f32.partialorder %v6076_v8, inf  ;;  %v6089_v29 = vand.u32 2147483648, %v6076_v8  ;;  %vm6088_vm3 = vcmp.eq.f32.partialorder %v6076_v8, 0.0 }
0x263b   :  { %v6197_v21 = vpop.permute.xlu0 %6196 }
0x263c   :  { %8795 = vmatpush3.bf16.msra.mxu1 %v6197_v21 }
0x263d   :  { %8806 = vmatprep.subr.bf16.mxu1 %v9473_v1 }
0x263f   :  { %8797 = vmatmul.mubr.msk.bf16.vlgmr.msra.gmra.mrb[196].mxu1 %vm198_vm1, %v10436_v40 }
0x2640   :  { %v9332_v45 = vpop.eup %9331  ;;  %8808 = vmatprep.mubr.msk.bf16.mxu1 %vm9474_vm0, %v9473_v1 }
0x2641   :  { %v6078_v56 = vmul.f32 %v9332_v45, %v6075_v12 }
0x2643   :  { %v6080_v23 = vsel %vm6079_vm13, %v6075_v12, %v6078_v56 }
0x2644   :  { %v9334_v26 = vpop.eup %9333  ;;  %v6083_v9 = vsel %vm6081_vm14, %v6082_v22, %v6080_v23 }
0x2645   :  { %v6091_v55 = vadd.f32 1e-06, %v6083_v9  ;;  %v6085_v4 = vmul.f32 %v9334_v26, %v6076_v8 }
0x2647   :  { %9335 = vrcp.f32 %v6091_v55  ;;  %v6087_v30 = vsel %vm6086_vm15, %v6076_v8, %v6085_v4 }
0x2648   :  { %v6090_v40 = vsel %vm6088_vm3, %v6089_v29, %v6087_v30 }
0x2649   :  { %v6092_v25 = vadd.f32 1e-06, %v6090_v40 }
0x264b   :  { %9337 = vrcp.f32 %v6092_v25 }
0x2651   :  { %v9336_v32 = vpop.eup %9335 }
0x2652   :  { %v6103_v31 = vmul.f32 %v9336_v32, %v6101_v33 }
0x2654   :  { %v10945_v43 = vadd.f32 %v7844_v58, %v6103_v31 }
0x2655   :  { %v9338_v16 = vpop.eup %9337 }
0x2656   :  { %v6104_v59 = vmul.f32 %v9338_v16, %v6102_v24 }
0x2658   :  { %v10947_v28 = vadd.f32 %v7844_v58, %v6104_v59 }
0x265a   :  { %v6131_v14 = vpack.c.bf16 %v10947_v28, %v10945_v43 }
0x265c   :  { %8789 = vmatmul.mubr.msk.bf16.vlgmr.msra.gmra.mrb[176].mxu0 %vm198_vm1, %v6131_v14 }
0x265d   :  { %8802 = vmatprep.mubr.msk.bf16.mxu0 %vm9474_vm0, %v9473_v1 }
0x2712   :  { %v6237_v36 = vpop.f32.mrb[196].mxu1 }
0x2713   :  { %v8798_v39 = vpop.f32.mrb[197].mxu1  ;;  %v6238_v38 = vadd.f32 %v6237_v36, %v6201_v34 }
0x2714   :  { %v6240_v48 = vpop.f32.mrb[198].mxu1 }
0x2715   :  { %v6241_v49 = vadd.f32 %v6240_v48, %v6201_v34  ;;  %v8799_v35 = vpop.f32.mrb[199].mxu1 }
0x2717   :  { %v10954_v3 = vpack.c.bf16 %v6241_v49, %v6238_v38 }
0x2719   :  { %6358 = vrot.lane.b32.xlu1 %v10954_v3, %s9475_s0  ;;  %v6250_v50 = vsel %vm247_vm2, %v10954_v3, 0  ;;  %v10966_v44 = vrot.slane %v10954_v3, 4 }
0x271a   :  { %8801 = vmatpush3.bf16.xpose.msra.mxu0 %v6250_v50 }
0x271b   :  { %8812 = vmatprep.subr.bf16.mxu0 %v9473_v1  ;;  %v6713_v5 = vsel %vm247_vm2, %v10966_v44, 0 }
0x271d   :  { %6470 = vrot.lane.b32.xlu1 %v10954_v3, %s9480_s16 }
0x2721   :  { %6582 = vrot.lane.b32.xlu1 %v10954_v3, %s9481_s7 }
0x2725   :  { %6819 = vrot.lane.b32.xlu1 %v10966_v44, %s9475_s0 }
0x2729   :  { %6931 = vrot.lane.b32.xlu1 %v10966_v44, %s9480_s16 }
0x272d   :  { %7043 = vrot.lane.b32.xlu1 %v10966_v44, %s9481_s7 }
0x272f   :  { %v6187_v47 = vpop.f32.mrb[176].mxu0 }
0x2730   :  { %v8790_v20 = vpop.f32.mrb[177].mxu0  ;;  %v6188_v54 = vadd.f32 %v10934_v19, %v6187_v47 }
0x2731   :  { %v6190_v51 = vpop.f32.mrb[178].mxu0 }
0x2732   :  { %v6191_v27 = vadd.f32 %v10934_v19, %v6190_v51  ;;  %v8791_v60 = vpop.f32.mrb[179].mxu0 }
0x2734   :  { %v6244_v46 = vpack.c.bf16 %v6191_v27, %v6188_v54 }
0x2736   :  { %6356 = vrot.lane.b32.xlu0 %v6244_v46, %s9475_s0  ;;  %8803 = vmatmul.mubr.msk.bf16.vlgmr.msra.gmra.mrb[180].mxu0 %vm247_vm2, %v6244_v46  ;;  %v6707_v53 = vrot.slane %v6244_v46, 4 }
0x2737   :  { %8814 = vmatprep.mubr.msk.bf16.mxu0 %vm9474_vm0, %v9473_v1 }
0x273a   :  { %6468 = vrot.lane.b32.xlu0 %v6244_v46, %s9480_s16 }
0x273e   :  { %6580 = vrot.lane.b32.xlu0 %v6244_v46, %s9481_s7 }
0x2742   :  { %6817 = vrot.lane.b32.xlu0 %v6707_v53, %s9475_s0 }
0x2746   :  { %6929 = vrot.lane.b32.xlu0 %v6707_v53, %s9480_s16 }
0x274a   :  { %7041 = vrot.lane.b32.xlu0 %v6707_v53, %s9481_s7 }
0x278b   :  { %v6359_v61 = vpop.permute.xlu1 %6358 }
0x278c   :  { %v6364_v62 = vsel %vm247_vm2, %v6359_v61, 0 }
0x278d   :  { %8813 = vmatpush3.bf16.xpose.msra.mxu0 %v6364_v62 }
0x278e   :  { %8824 = vmatprep.subr.bf16.mxu0 %v9473_v1 }
0x278f   :  { %v6471_v0 = vpop.permute.xlu1 %6470 }
0x2790   :  { %v6476_v42 = vsel %vm247_vm2, %v6471_v0, 0 }
0x2793   :  { %v6583_v11 = vpop.permute.xlu1 %6582 }
0x2794   :  { %v6588_v52 = vsel %vm247_vm2, %v6583_v11, 0 }
0x2797   :  { %v6820_v13 = vpop.permute.xlu1 %6819 }
0x2798   :  { %v6825_v6 = vsel %vm247_vm2, %v6820_v13, 0 }
0x279b   :  { %v6932_v15 = vpop.permute.xlu1 %6931 }
0x279c   :  { %v6937_v19 = vsel %vm247_vm2, %v6932_v15, 0 }
0x279f   :  { %v7044_v7 = vpop.permute.xlu1 %7043 }
0x27a0   :  { %v7049_v18 = vsel %vm247_vm2, %v7044_v7, 0 }
0x27a8   :  { %v6357_v63 = vpop.permute.xlu0 %6356 }
0x27a9   :  { %8815 = vmatmul.mubr.msk.bf16.vlgmr.msra.gmra.mrb[184].mxu0 %vm247_vm2, %v6357_v63 }
0x27aa   :  { %8825 = vmatpush3.bf16.xpose.msra.mxu0 %v6476_v42  ;;  %8826 = vmatprep.mubr.msk.bf16.mxu0 %vm9474_vm0, %v9473_v1 }
0x27ab   :  { %8836 = vmatprep.subr.bf16.mxu0 %v9473_v1 }
0x27ac   :  { %v6469_v2 = vpop.permute.xlu0 %6468 }
0x27b0   :  { %v6581_v37 = vpop.permute.xlu0 %6580 }
0x27b1   :  { %8827 = vmatmul.mubr.msk.bf16.vlgmr.msra.gmra.mrb[188].mxu0 %vm247_vm2, %v6469_v2 }
0x27b2   :  { %8837 = vmatpush3.bf16.xpose.msra.mxu0 %v6588_v52  ;;  %8838 = vmatprep.mubr.msk.bf16.mxu0 %vm9474_vm0, %v9473_v1 }
0x27b3   :  { %8848 = vmatprep.subr.bf16.mxu0 %v9473_v1 }
0x27b4   :  { %v6818_v17 = vpop.permute.xlu0 %6817 }
0x27b8   :  { %v6930_v12 = vpop.permute.xlu0 %6929 }
0x27b9   :  { %8839 = vmatmul.mubr.msk.bf16.vlgmr.msra.gmra.mrb[192].mxu0 %vm247_vm2, %v6581_v37 }
0x27ba   :  { %8849 = vmatpush3.bf16.xpose.msra.mxu0 %v6713_v5  ;;  %8850 = vmatprep.mubr.msk.bf16.mxu0 %vm9474_vm0, %v9473_v1 }
0x27bb   :  { %8860 = vmatprep.subr.bf16.mxu0 %v9473_v1 }
0x27bc   :  { %v7042_v8 = vpop.permute.xlu0 %7041 }
0x27c1   :  { %8851 = vmatmul.mubr.msk.bf16.vlgmr.msra.gmra.mrb[196].mxu0 %vm247_vm2, %v6707_v53 }
0x27c2   :  { %8861 = vmatpush3.bf16.xpose.msra.mxu0 %v6825_v6  ;;  %8862 = vmatprep.mubr.msk.bf16.mxu0 %vm9474_vm0, %v9473_v1 }
0x27c3   :  { %8872 = vmatprep.subr.bf16.mxu0 %v9473_v1 }
0x27c9   :  { %8863 = vmatmul.mubr.msk.bf16.vlgmr.msra.gmra.mrb[200].mxu0 %vm247_vm2, %v6818_v17 }
0x27ca   :  { %8873 = vmatpush3.bf16.xpose.msra.mxu0 %v6937_v19  ;;  %8874 = vmatprep.mubr.msk.bf16.mxu0 %vm9474_vm0, %v9473_v1 }
0x27cb   :  { %8884 = vmatprep.subr.bf16.mxu0 %v9473_v1 }
0x27d1   :  { %8875 = vmatmul.mubr.msk.bf16.vlgmr.msra.gmra.mrb[204].mxu0 %vm247_vm2, %v6930_v12 }
0x27d2   :  { %8885 = vmatpush3.bf16.xpose.msra.mxu0 %v7049_v18  ;;  %8886 = vmatprep.mubr.msk.bf16.mxu0 %vm9474_vm0, %v9473_v1 }
0x27d3   :  { %8896 = vmatprep.subr.bf16.mxu0 %v9473_v1 }
0x27d9   :  { %8887 = vmatmul.mubr.msk.bf16.vlgmr.msra.gmra.mrb[208].mxu0 %vm247_vm2, %v7042_v8 }
0x27da   :  { %8900 = vmatprep.mubr.msk.bf16.mxu0 %vm9474_vm0, %v9473_v1 }
0x2809   :  { %v6286_v21 = vpop.f32.mrb[180].mxu0 }
0x280a   :  { %v6292_v45 = vmul.f32 0.35355338, %v6286_v21  ;;  %v8804_v56 = vpop.f32.mrb[181].mxu0 }
0x280b   :  { %v6289_v22 = vpop.f32.mrb[182].mxu0 }
0x280c   :  { %v6293_v23 = vadd.f32 %v6292_v45, %v9753_v41  ;;  %v8805_v26 = vpop.f32.mrb[183].mxu0 }
0x280e   :  { %v6294_v9 = vsel %vm247_vm2, %v6293_v23, -inf }
0x280f   :  { %6295 = vmax.xlane.f32.xlu1 %v6294_v9 }
0x287c   :  { %v6400_v55 = vpop.f32.mrb[184].mxu0 }
0x287d   :  { %v6406_v4 = vmul.f32 0.35355338, %v6400_v55  ;;  %v8816_v29 = vpop.f32.mrb[185].mxu0 }
0x287e   :  { %v6403_v30 = vpop.f32.mrb[186].mxu0 }
0x287f   :  { %v11024_v40 = vadd.f32 %v6406_v4, %v9753_v41  ;;  %v8817_v25 = vpop.f32.mrb[187].mxu0 }
0x2881   :  { %v6408_v57 = vsel %vm247_vm2, %v11024_v40, -inf }
0x2882   :  { %6409 = vmax.xlane.f32.xlu0 %v6408_v57 }
0x2884   :  { %v6512_v32 = vpop.f32.mrb[188].mxu0 }
0x2885   :  { %v6518_v33 = vmul.f32 0.35355338, %v6512_v32  ;;  %v8828_v24 = vpop.f32.mrb[189].mxu0 }
0x2886   :  { %v6515_v31 = vpop.f32.mrb[190].mxu0 }
0x2887   :  { %v6519_v16 = vadd.f32 %v6518_v33, %v9753_v41  ;;  %v8829_v58 = vpop.f32.mrb[191].mxu0 }
0x2889   :  { %v6520_v59 = vsel %vm247_vm2, %v6519_v16, -inf }
0x288a   :  { %6521 = vmax.xlane.f32.xlu0 %v6520_v59 }
0x288c   :  { %v6624_v14 = vpop.f32.mrb[192].mxu0 }
0x288d   :  { %v6630_v34 = vmul.f32 0.35355338, %v6624_v14  ;;  %v8840_v36 = vpop.f32.mrb[193].mxu0 }
0x288e   :  { %v6627_v39 = vpop.f32.mrb[194].mxu0 }
0x288f   :  { %v6631_v48 = vadd.f32 %v6630_v34, %v9753_v41  ;;  %v8841_v38 = vpop.f32.mrb[195].mxu0 }
0x2891   :  { %v6632_v49 = vsel %vm247_vm2, %v6631_v48, -inf }
0x2892   :  { %6633 = vmax.xlane.f32.xlu1 %v6632_v49 }
0x2894   :  { %v6749_v35 = vpop.f32.mrb[196].mxu0 }
0x2895   :  { %v6755_v50 = vmul.f32 0.35355338, %v6749_v35  ;;  %v8852_v47 = vpop.f32.mrb[197].mxu0 }
0x2896   :  { %v6752_v20 = vpop.f32.mrb[198].mxu0 }
0x2897   :  { %v6756_v51 = vadd.f32 %v6755_v50, %v9777_v10  ;;  %v8853_v54 = vpop.f32.mrb[199].mxu0 }
0x2899   :  { %v6757_v27 = vsel %vm247_vm2, %v6756_v51, -inf }
0x289a   :  { %6758 = vmax.xlane.f32.xlu0 %v6757_v27 }
0x289c   :  { %v6861_v60 = vpop.f32.mrb[200].mxu0  ;;  %v6296_v19 = vpop.xlane.xlu1 %6295 }
0x289d   :  { %v6867_v46 = vmul.f32 0.35355338, %v6861_v60  ;;  %v8864_v53 = vpop.f32.mrb[201].mxu0  ;;  %v6297_v7 = vsub.f32 %v6293_v23, %v6296_v19 }
0x289e   :  { %v6864_v61 = vpop.f32.mrb[202].mxu0 }
0x289f   :  { %v11035_v41 = vadd.f32 %v6867_v46, %v9777_v10  ;;  %v8865_v62 = vpop.f32.mrb[203].mxu0  ;;  %v6298_v12 = vmul.f32 1.442695, %v6297_v7 }
0x28a1   :  { %v6869_v0 = vsel %vm247_vm2, %v11035_v41, -inf  ;;  %9339 = vpow2.f32 %v6298_v12 }
0x28a2   :  { %6870 = vmax.xlane.f32.xlu1 %v6869_v0 }
0x28a4   :  { %v6973_v63 = vpop.f32.mrb[204].mxu0 }
0x28a5   :  { %v6979_v42 = vmul.f32 0.35355338, %v6973_v63  ;;  %v8876_v11 = vpop.f32.mrb[205].mxu0 }
0x28a6   :  { %v6976_v2 = vpop.f32.mrb[206].mxu0 }
0x28a7   :  { %v6980_v52 = vadd.f32 %v6979_v42, %v9777_v10  ;;  %v8877_v37 = vpop.f32.mrb[207].mxu0 }
0x28a9   :  { %v6981_v5 = vsel %vm247_vm2, %v6980_v52, -inf }
0x28aa   :  { %6982 = vmax.xlane.f32.xlu0 %v6981_v5 }
0x28ab   :  { %v11047_v45 = vpop.eup %9339 }
0x28ac   :  { %v7085_v13 = vpop.f32.mrb[208].mxu0  ;;  %v6300_v56 = vsel %vm247_vm2, %v11047_v45, 0.0 }
0x28ad   :  { %v8888_v6 = vpop.f32.mrb[209].mxu0  ;;  %v7091_v18 = vmul.f32 0.35355338, %v7085_v13 }
0x28ae   :  { %v7088_v15 = vpop.f32.mrb[210].mxu0 }
0x28af   :  { %v8889_v17 = vpop.f32.mrb[211].mxu0  ;;  %v7092_v8 = vadd.f32 %v7091_v18, %v9777_v10 }
0x28b1   :  { %v7093_v21 = vsel %vm247_vm2, %v7092_v8, -inf }
0x28b3   :  { %6420 = vrot.lane.b32.xlu1 %v10954_v3, %s9478_s28 }
0x28c0   :  { %6307 = vrot.lane.b32.xlu0 %v10954_v3, %s9476_s9 }
0x28d7   :  { %7094 = vmax.xlane.f32.xlu1 %v7093_v21 }
0x28df   :  { %6301 = vadd.xlane.f32.xlu0 %v6300_v56 }
0x28e8   :  { %6532 = vrot.lane.b32.xlu1 %v10954_v3, %s9477_s4 }
0x290f   :  { %v6410_v22 = vpop.xlane.xlu0 %6409 }
0x2910   :  { %v6411_v23 = vsub.f32 %v11024_v40, %v6410_v22 }
0x2912   :  { %v6412_v26 = vmul.f32 1.442695, %v6411_v23 }
0x2914   :  { %9341 = vpow2.f32 %v6412_v26 }
0x2917   :  { %v6522_v9 = vpop.xlane.xlu0 %6521 }
0x2918   :  { %v6523_v55 = vsub.f32 %v6519_v16, %v6522_v9 }
0x291a   :  { %v6524_v10 = vmul.f32 1.442695, %v6523_v55 }
0x291c   :  { %9343 = vpow2.f32 %v6524_v10 }
0x291e   :  { %v11054_v4 = vpop.eup %9341 }
0x291f   :  { %v6634_v29 = vpop.xlane.xlu1 %6633  ;;  %v6414_v30 = vsel %vm247_vm2, %v11054_v4, 0.0 }
0x2920   :  { %v6635_v25 = vsub.f32 %v6631_v48, %v6634_v29  ;;  %6415 = vadd.xlane.f32.xlu1 %v6414_v30 }
0x2922   :  { %v6636_v57 = vmul.f32 1.442695, %v6635_v25 }
0x2924   :  { %9345 = vpow2.f32 %v6636_v57 }
0x2926   :  { %v11058_v32 = vpop.eup %9343 }
0x2927   :  { %v6759_v33 = vpop.xlane.xlu0 %6758  ;;  %v6526_v40 = vsel %vm247_vm2, %v11058_v32, 0.0 }
0x2928   :  { %v6760_v24 = vsub.f32 %v6756_v51, %v6759_v33  ;;  %6527 = vadd.xlane.f32.xlu0 %v6526_v40 }
0x292a   :  { %v6761_v31 = vmul.f32 1.442695, %v6760_v24 }
0x292c   :  { %9347 = vpow2.f32 %v6761_v31 }
0x292e   :  { %v11062_v16 = vpop.eup %9345 }
0x292f   :  { %v6638_v58 = vsel %vm247_vm2, %v11062_v16, 0.0  ;;  %v6871_v49 = vpop.xlane.xlu1 %6870 }
0x2930   :  { %6639 = vadd.xlane.f32.xlu1 %v6638_v58  ;;  %v6872_v50 = vsub.f32 %v11035_v41, %v6871_v49 }
0x2932   :  { %v6873_v20 = vmul.f32 1.442695, %v6872_v50 }
0x2936   :  { %v11066_v59 = vpop.eup %9347 }
0x2937   :  { %v6983_v14 = vpop.xlane.xlu0 %6982  ;;  %v6763_v34 = vsel %vm247_vm2, %v11066_v59, 0.0 }
0x2938   :  { %v6984_v36 = vsub.f32 %v6980_v52, %v6983_v14  ;;  %6764 = vadd.xlane.f32.xlu1 %v6763_v34 }
0x293a   :  { %v6985_v39 = vmul.f32 1.442695, %v6984_v36 }
0x293b   :  { %v6308_v48 = vpop.permute.xlu0 %6307 }
0x293c   :  { %9349 = vpow2.f32 %v6985_v39  ;;  %v6313_v38 = vsel %vm313_vm5, %v6308_v48, 0 }
0x293d   :  { %8807 = vmatpush3.bf16.msra.mxu1 %v6313_v38  ;;  %9351 = vpow2.f32 %v6873_v20 }
0x293e   :  { %6644 = vrot.lane.b32.xlu0 %v10954_v3, %s9479_s2  ;;  %8818 = vmatprep.subr.bf16.mxu1 %v9473_v1  ;;  %v6421_v3 = vpop.permute.xlu1 %6420 }
0x293f   :  { %v6426_v42 = vsel %vm313_vm5, %v6421_v3, 0 }
0x2946   :  { %v11074_v35 = vpop.eup %9349 }
0x2947   :  { %v6987_v47 = vsel %vm247_vm2, %v11074_v35, 0.0  ;;  %v11079_v51 = vpop.eup %9351 }
0x2948   :  { %6988 = vadd.xlane.f32.xlu1 %v6987_v47  ;;  %v6875_v54 = vsel %vm247_vm2, %v11079_v51, 0.0 }
0x295d   :  { %6876 = vadd.xlane.f32.xlu0 %v6875_v54 }
0x2964   :  { %v7095_v27 = vpop.xlane.xlu1 %7094 }
0x2965   :  { %v7096_v60 = vsub.f32 %v7092_v8, %v7095_v27 }
0x2967   :  { %v7097_v46 = vmul.f32 1.442695, %v7096_v60 }
0x2968   :  { %v6533_v11 = vpop.permute.xlu1 %6532 }
0x2969   :  { %9353 = vpow2.f32 %v7097_v46  ;;  %v6538_v6 = vsel %vm313_vm5, %v6533_v11, 0  ;;  %v9113_v11 = vld [vmem:[%s11246_s18 + $0x10] sm:$0xff]  }
0x296a   :  { %8897 = vmatpush3.bf16.msra.mxu0 %v9113_v11 }
0x296b   :  { %8898 = vmatprep.subr.bf16.mxu0 %v9473_v1 }
0x296c   :  { %v6302_v53 = vpop.xlane.xlu0 %6301 }
0x296d   :  { %9355 = vrcp.f32 %v6302_v53 }
0x2973   :  { %v11083_v61 = vpop.eup %9353  ;;  %6881 = vrot.lane.b32.xlu0 %v10966_v44, %s9478_s28 }
0x2974   :  { %v7099_v41 = vsel %vm247_vm2, %v11083_v61, 0.0 }
0x2975   :  { %7100 = vadd.xlane.f32.xlu1 %v7099_v41 }
0x2977   :  { %v9356_v62 = vpop.eup %9355  ;;  %6993 = vrot.lane.b32.xlu0 %v10966_v44, %s9477_s4 }
0x2978   :  { %v6304_v0 = vmul.f32 %v9356_v62, %v11047_v45 }
0x297a   :  { %v6305_v63 = vpack.c.bf16 %v6304_v0, %v6304_v0 }
0x297b   :  { %7105 = vrot.lane.b32.xlu0 %v10966_v44, %s9479_s2 }
0x297c   :  { %8809 = vmatmul.mubr.msk.bf16.vlgmr.msra.gmra.mrb[200].mxu1 %vm247_vm2, %v6305_v63 }
0x297d   :  { %8819 = vmatpush3.bf16.msra.mxu1 %v6426_v42  ;;  %8820 = vmatprep.mubr.msk.bf16.mxu1 %vm9474_vm0, %v9473_v1 }
0x297e   :  { %8830 = vmatprep.subr.bf16.mxu1 %v9473_v1 }
0x2986   :  { %6769 = vrot.lane.b32.xlu1 %v10966_v44, %s9476_s9 }
0x29ad   :  { %v6416_v2 = vpop.xlane.xlu1 %6415 }
0x29ae   :  { %9357 = vrcp.f32 %v6416_v2 }
0x29b5   :  { %v6528_v52 = vpop.xlane.xlu0 %6527 }
0x29b6   :  { %9359 = vrcp.f32 %v6528_v52 }
0x29b8   :  { %v9358_v37 = vpop.eup %9357 }
0x29b9   :  { %v6418_v5 = vmul.f32 %v9358_v37, %v11054_v4  ;;  %v6645_v19 = vpop.permute.xlu0 %6644 }
0x29ba   :  { %v6650_v12 = vsel %vm313_vm5, %v6645_v19, 0 }
0x29bb   :  { %v6419_v13 = vpack.c.bf16 %v6418_v5, %v6418_v5 }
0x29bd   :  { %8821 = vmatmul.mubr.msk.bf16.vlgmr.msra.gmra.mrb[204].mxu1 %vm247_vm2, %v6419_v13  ;;  %v6640_v15 = vpop.xlane.xlu1 %6639  ;;  %v9114_v13 = vld [vmem:[%s11246_s18 + $0x18] sm:$0xff]  }
0x29be   :  { %8831 = vmatpush3.bf16.msra.mxu1 %v6538_v6  ;;  %9361 = vrcp.f32 %v6640_v15  ;;  %8832 = vmatprep.mubr.msk.bf16.mxu1 %vm9474_vm0, %v9473_v1 }
0x29bf   :  { %8842 = vmatprep.subr.bf16.mxu1 %v9473_v1  ;;  %8899 = vmatpush3.bf16.msra.mxu0 %v9114_v13 }
0x29c0   :  { %v9360_v44 = vpop.eup %9359  ;;  %8912 = vmatprep.subr.bf16.mxu0 %v9473_v1 }
0x29c1   :  { %v6530_v17 = vmul.f32 %v9360_v44, %v11058_v32 }
0x29c3   :  { %v6531_v7 = vpack.c.bf16 %v6530_v17, %v6530_v17 }
0x29c5   :  { %8833 = vmatmul.mubr.msk.bf16.vlgmr.msra.gmra.mrb[208].mxu1 %vm247_vm2, %v6531_v7  ;;  %v6765_v45 = vpop.xlane.xlu1 %6764 }
0x29c6   :  { %8843 = vmatpush3.bf16.msra.mxu1 %v6650_v12  ;;  %8844 = vmatprep.mubr.msk.bf16.mxu1 %vm9474_vm0, %v9473_v1  ;;  %9363 = vrcp.f32 %v6765_v45 }
0x29c7   :  { %8854 = vmatprep.subr.bf16.mxu1 %v9473_v1 }
0x29c8   :  { %v9362_v18 = vpop.eup %9361 }
0x29c9   :  { %v6642_v8 = vmul.f32 %v9362_v18, %v11062_v16 }
0x29cb   :  { %v6643_v21 = vpack.c.bf16 %v6642_v8, %v6642_v8 }
0x29cd   :  { %8845 = vmatmul.mubr.msk.bf16.vlgmr.msra.gmra.mrb[212].mxu1 %vm247_vm2, %v6643_v21 }
0x29ce   :  { %8856 = vmatprep.mubr.msk.bf16.mxu1 %vm9474_vm0, %v9473_v1 }
0x29d0   :  { %v9364_v23 = vpop.eup %9363 }
0x29d1   :  { %v6767_v9 = vmul.f32 %v9364_v23, %v11066_v59 }
0x29d3   :  { %v6768_v29 = vpack.c.bf16 %v6767_v9, %v6767_v9 }
0x29d5   :  { %v6989_v22 = vpop.xlane.xlu1 %6988 }
0x29ea   :  { %v6877_v56 = vpop.xlane.xlu0 %6876 }
0x29eb   :  { %9365 = vrcp.f32 %v6877_v56 }
0x29ec   :  { %9367 = vrcp.f32 %v6989_v22 }
0x29ee   :  { %v6882_v4 = vpop.permute.xlu0 %6881 }
0x29ef   :  { %v6887_v25 = vsel %vm313_vm5, %v6882_v4, 0 }
0x29f2   :  { %v6994_v32 = vpop.permute.xlu0 %6993 }
0x29f3   :  { %v6999_v24 = vsel %vm313_vm5, %v6994_v32, 0 }
0x29f5   :  { %v9366_v30 = vpop.eup %9365 }
0x29f6   :  { %v6879_v57 = vmul.f32 %v9366_v30, %v11079_v51  ;;  %v9368_v40 = vpop.eup %9367  ;;  %v7106_v16 = vpop.permute.xlu0 %7105 }
0x29f7   :  { %v6991_v31 = vmul.f32 %v9368_v40, %v11074_v35  ;;  %v7111_v14 = vsel %vm313_vm5, %v7106_v16, 0 }
0x29f8   :  { %v6880_v33 = vpack.c.bf16 %v6879_v57, %v6879_v57 }
0x29f9   :  { %v6992_v58 = vpack.c.bf16 %v6991_v31, %v6991_v31 }
0x2a02   :  { %v7101_v26 = vpop.xlane.xlu1 %7100 }
0x2a03   :  { %9369 = vrcp.f32 %v7101_v26 }
0x2a06   :  { %v6770_v55 = vpop.permute.xlu1 %6769 }
0x2a07   :  { %v6775_v10 = vsel %vm313_vm5, %v6770_v55, 0 }
0x2a08   :  { %8855 = vmatpush3.bf16.msra.mxu1 %v6775_v10 }
0x2a09   :  { %8866 = vmatprep.subr.bf16.mxu1 %v9473_v1 }
0x2a0b   :  { %8857 = vmatmul.mubr.msk.bf16.vlgmr.msra.gmra.mrb[216].mxu1 %vm247_vm2, %v6768_v29 }
0x2a0c   :  { %8867 = vmatpush3.bf16.msra.mxu1 %v6887_v25  ;;  %8868 = vmatprep.mubr.msk.bf16.mxu1 %vm9474_vm0, %v9473_v1 }
0x2a0d   :  { %8878 = vmatprep.subr.bf16.mxu1 %v9473_v1  ;;  %v9370_v59 = vpop.eup %9369 }
0x2a0e   :  { %v7103_v34 = vmul.f32 %v9370_v59, %v11083_v61 }
0x2a10   :  { %v7104_v36 = vpack.c.bf16 %v7103_v34, %v7103_v34 }
0x2a13   :  { %8869 = vmatmul.mubr.msk.bf16.vlgmr.msra.gmra.mrb[220].mxu1 %vm247_vm2, %v6880_v33 }
0x2a14   :  { %8879 = vmatpush3.bf16.msra.mxu1 %v6999_v24  ;;  %8880 = vmatprep.mubr.msk.bf16.mxu1 %vm9474_vm0, %v9473_v1  ;;  %v7881_v24 = vld [vmem:[%s11247_s13 + $0x1] ss:$0 sm:$0xff] }
0x2a15   :  { %8890 = vmatprep.subr.bf16.mxu1 %v9473_v1 }
0x2a1b   :  { %8881 = vmatmul.mubr.msk.bf16.vlgmr.msra.gmra.mrb[224].mxu1 %vm247_vm2, %v6992_v58 }
0x2a1c   :  { %8891 = vmatpush3.bf16.msra.mxu1 %v7111_v14  ;;  %8892 = vmatprep.mubr.msk.bf16.mxu1 %vm9474_vm0, %v9473_v1 }
0x2a1d   :  { %8904 = vmatprep.subr.bf16.mxu1 %v9473_v1 }
0x2a23   :  { %8893 = vmatmul.mubr.msk.bf16.vlgmr.msra.gmra.mrb[228].mxu1 %vm247_vm2, %v7104_v36 }
0x2a24   :  { %8908 = vmatprep.mubr.msk.bf16.mxu1 %vm9474_vm0, %v9473_v1 }
0x2a4f   :  { %v6349_v39 = vpop.f32.mrb[200].mxu1 }
0x2a50   :  { %v8810_v48 = vpop.f32.mrb[201].mxu1 }
0x2a51   :  { %v6352_v38 = vpop.f32.mrb[202].mxu1 }
0x2a52   :  { %v8811_v49 = vpop.f32.mrb[203].mxu1 }
0x2a90   :  { %v6462_v35 = vpop.f32.mrb[204].mxu1 }
0x2a91   :  { %v8822_v50 = vpop.f32.mrb[205].mxu1 }
0x2a92   :  { %v6465_v47 = vpop.f32.mrb[206].mxu1 }
0x2a93   :  { %v8823_v20 = vpop.f32.mrb[207].mxu1 }
0x2a98   :  { %v6574_v51 = vpop.f32.mrb[208].mxu1 }
0x2a99   :  { %v8834_v54 = vpop.f32.mrb[209].mxu1 }
0x2a9a   :  { %v6577_v3 = vpop.f32.mrb[210].mxu1 }
0x2a9b   :  { %v8835_v27 = vpop.f32.mrb[211].mxu1 }
0x2a9c   :  { %v9115_v27 = vld [vmem:[%s11248_s17 + $0x10] sm:$0xff]  }
0x2a9d   :  { %8905 = vmatpush3.bf16.msra.mxu1 %v9115_v27  ;;  %v7912_v27 = vld [vmem:[%s11253_s11 + $0x1] ss:$0 sm:$0xff] }
0x2a9e   :  { %8906 = vmatprep.subr.bf16.mxu1 %v9473_v1 }
0x2aa0   :  { %v6686_v60 = vpop.f32.mrb[212].mxu1 }
0x2aa1   :  { %v8846_v46 = vpop.f32.mrb[213].mxu1 }
0x2aa2   :  { %v6689_v53 = vpop.f32.mrb[214].mxu1 }
0x2aa3   :  { %v8847_v61 = vpop.f32.mrb[215].mxu1 }
0x2ade   :  { %v6811_v41 = vpop.f32.mrb[216].mxu1 }
0x2adf   :  { %v8858_v62 = vpop.f32.mrb[217].mxu1 }
0x2ae0   :  { %v6814_v0 = vpop.f32.mrb[218].mxu1 }
0x2ae1   :  { %v8859_v63 = vpop.f32.mrb[219].mxu1 }
0x2ae6   :  { %v6923_v42 = vpop.f32.mrb[220].mxu1 }
0x2ae7   :  { %v9066_v2 = vpack.i.bf16 %v6923_v42, %v6462_v35  ;;  %v8870_v52 = vpop.f32.mrb[221].mxu1 }
0x2ae8   :  { %v6926_v37 = vpop.f32.mrb[222].mxu1 }
0x2ae9   :  { %9067 = vrot.lane.b32.xlu1 %v9066_v2, %s11256_s19  ;;  %v8871_v5 = vpop.f32.mrb[223].mxu1 }
0x2aee   :  { %v7035_v6 = vpop.f32.mrb[224].mxu1 }
0x2aef   :  { %v9071_v15 = vpack.i.bf16 %v7035_v6, %v6574_v51  ;;  %v8882_v44 = vpop.f32.mrb[225].mxu1 }
0x2af0   :  { %v7038_v17 = vpop.f32.mrb[226].mxu1  ;;  %v7882_v44 = vld [vmem:[%s11249_s21 + $0x1] ss:$0 sm:$0xff] }
0x2af1   :  { %9072 = vrot.lane.b32.xlu0 %v9071_v15, %s11257_s27  ;;  %v8883_v19 = vpop.f32.mrb[227].mxu1 }
0x2af6   :  { %v7147_v7 = vpop.f32.mrb[228].mxu1 }
0x2af7   :  { %v9076_v12 = vpack.i.bf16 %v7147_v7, %v6686_v60  ;;  %v8894_v18 = vpop.f32.mrb[229].mxu1  ;;  %v9116_v60 = vld [vmem:[%s11248_s17 + $0x18] sm:$0xff]  }
0x2af8   :  { %v7150_v8 = vpop.f32.mrb[230].mxu1  ;;  %8907 = vmatpush3.bf16.msra.mxu1 %v9116_v60 }
0x2af9   :  { %9077 = vrot.lane.b32.xlu1 %v9076_v12, %s11258_s22  ;;  %v8895_v21 = vpop.f32.mrb[231].mxu1  ;;  %8932 = vmatprep.subr.bf16.mxu1 %v9473_v1  ;;  %v7883_v8 = vld [vmem:[%s11250_s25 + $0x1] ss:$0 sm:$0xff] }
0x2b5b   :  { %v9068_v45 = vpop.permute.xlu1 %9067 }
0x2b5c   :  { %v9070_v22 = vunpack.i.h.bf16 %v9068_v45  ;;  %v9069_v23 = vunpack.i.l.bf16 %v9068_v45 }
0x2b5e   :  { %v7165_v10 = vsel %vm247_vm2, %v6811_v41, %v9070_v22  ;;  %v6704_v4 = vsel %vm247_vm2, %v6349_v39, %v9069_v23  ;;  %v9117_v23 = vld [vmem:[%s11251_s15 + $0x40] sm:$0xff]  }
0x2b63   :  { %v9073_v56 = vpop.permute.xlu0 %9072 }
0x2b64   :  { %v9075_v26 = vunpack.i.h.bf16 %v9073_v56  ;;  %v9074_v9 = vunpack.i.l.bf16 %v9073_v56 }
0x2b66   :  { %v7166_v25 = vsel %vm706_vm6, %v7165_v10, %v9075_v26  ;;  %v6705_v57 = vsel %vm706_vm6, %v6704_v4, %v9074_v9  ;;  %v9118_v26 = vld [vmem:[%s11251_s15 + $0x48] sm:$0xff]   ;;  %v9119_v9 = vld [vmem:[%s11251_s15 + $0x50] sm:$0xff]   ;;  %v9121_v10 = vld [vmem:[%s11251_s15 + $0x60] sm:$0xff]  }
0x2b67   :  { %v9122_v4 = vld [vmem:[%s11251_s15 + $0x68] sm:$0xff]  }
0x2b6b   :  { %v9078_v55 = vpop.permute.xlu1 %9077 }
0x2b6c   :  { %v9080_v29 = vunpack.i.h.bf16 %v9078_v55  ;;  %v9079_v30 = vunpack.i.l.bf16 %v9078_v55  ;;  %v9120_v55 = vld [vmem:[%s11251_s15 + $0x58] sm:$0xff]  }
0x2b6e   :  { %v7167_v32 = vsel %vm708_vm7, %v7166_v25, %v9080_v29  ;;  %v6706_v33 = vsel %vm708_vm7, %v6705_v57, %v9079_v30  ;;  %v9123_v29 = vld [vmem:[%s11251_s15 + $0x70] sm:$0xff]   ;;  %v9124_v30 = vld [vmem:[%s11251_s15 + $0x78] sm:$0xff]   ;;  %v7908_v25 = vld [vmem:[%s11252_s6 + $0x1] ss:$0 sm:$0xff] }
0x2b6f   :  { %v7168_v40 = vpack.c.bf16 %v7167_v32, %v6706_v33 }
0x2b71   :  { %8901 = vmatmul.mubr.msk.bf16.vlgmr.msra.gmra.mrb[212].mxu0 %vm198_vm1, %v7168_v40 }
0x2b72   :  { %8928 = vmatprep.mubr.msk.bf16.mxu0 %vm9474_vm0, %v9473_v1  ;;  %8913 = vmatpush3.bf16.msra.mxu0 %v9117_v23 }
0x2b73   :  { %8914 = vmatprep.subr.bf16.mxu0 %v9473_v1 }
0x2b76   :  { %8915 = vmatpush3.bf16.msra.mxu0 %v9118_v26 }
0x2b77   :  { %8916 = vmatprep.subr.bf16.mxu0 %v9473_v1 }
0x2b7a   :  { %8917 = vmatpush3.bf16.msra.mxu0 %v9119_v9 }
0x2b7b   :  { %8918 = vmatprep.subr.bf16.mxu0 %v9473_v1 }
0x2b7e   :  { %8919 = vmatpush3.bf16.msra.mxu0 %v9120_v55 }
0x2b7f   :  { %8920 = vmatprep.subr.bf16.mxu0 %v9473_v1 }
0x2b82   :  { %8921 = vmatpush3.bf16.msra.mxu0 %v9121_v10 }
0x2b83   :  { %8922 = vmatprep.subr.bf16.mxu0 %v9473_v1 }
0x2b86   :  { %8923 = vmatpush3.bf16.msra.mxu0 %v9122_v4 }
0x2b87   :  { %8924 = vmatprep.subr.bf16.mxu0 %v9473_v1 }
0x2b8a   :  { %8925 = vmatpush3.bf16.msra.mxu0 %v9123_v29 }
0x2b8b   :  { %8926 = vmatprep.subr.bf16.mxu0 %v9473_v1 }
0x2b8e   :  { %8927 = vmatpush3.bf16.msra.mxu0 %v9124_v30 }
0x2c44   :  { %v7218_v31 = vpop.f32.mrb[212].mxu0 }
0x2c45   :  { %v7225_v16 = vadd.f32 %v7218_v31, %v10945_v43  ;;  %v8902_v58 = vpop.f32.mrb[213].mxu0 }
0x2c46   :  { %v7221_v59 = vpop.f32.mrb[214].mxu0 }
0x2c47   :  { %v7233_v14 = vadd.f32 %v7881_v24, %v7225_v16  ;;  %v7226_v34 = vadd.f32 %v7221_v59, %v10947_v28  ;;  %v8903_v36 = vpop.f32.mrb[215].mxu0 }
0x2c49   :  { %v7234_v39 = vadd.f32 %v7881_v24, %v7226_v34  ;;  %v7235_v48 = vsel %vm198_vm1, %v7233_v14, 0.0 }
0x2c4a   :  { %7236 = vadd.xlane.f32.xlu0 %v7235_v48 }
0x2c4b   :  { %v7238_v38 = vsel %vm198_vm1, %v7234_v39, 0.0 }
0x2c4c   :  { %7239 = vadd.xlane.f32.xlu1 %v7238_v38 }
0x2cd7   :  { %v7237_v49 = vpop.xlane.xlu0 %7236 }
0x2cd8   :  { %v7241_v35 = vmul.f32 0.03125, %v7237_v49 }
0x2cd9   :  { %v7240_v50 = vpop.xlane.xlu1 %7239 }
0x2cda   :  { %v7243_v47 = vsub.f32 %v7233_v14, %v7241_v35  ;;  %v7242_v43 = vmul.f32 0.03125, %v7240_v50 }
0x2cdc   :  { %v7244_v20 = vsub.f32 %v7234_v39, %v7242_v43  ;;  %v7245_v51 = vmul.f32 %v7243_v47, %v7243_v47  ;;  %v7279_v19 = vmul.f32 %v7882_v44, %v7243_v47 }
0x2cde   :  { %v7247_v54 = vsel %vm198_vm1, %v7245_v51, 0.0  ;;  %v7246_v28 = vmul.f32 %v7244_v20, %v7244_v20  ;;  %v7280_v7 = vmul.f32 %v7882_v44, %v7244_v20 }
0x2cdf   :  { %7248 = vadd.xlane.f32.xlu0 %v7247_v54 }
0x2ce0   :  { %v7250_v3 = vsel %vm198_vm1, %v7246_v28, 0.0 }
0x2ce3   :  { %7251 = vadd.xlane.f32.xlu0 %v7250_v3 }
0x2d6c   :  { %v7249_v46 = vpop.xlane.xlu0 %7248 }
0x2d6d   :  { %v7253_v53 = vmul.f32 0.032258064, %v7249_v46 }
0x2d6f   :  { %9371 = vrsqrt.f32 %v7253_v53  ;;  %vm7257_vm2 = vcmp.eq.f32.partialorder %v7253_v53, inf  ;;  %v7260_v63 = vand.u32 2147483648, %v7253_v53  ;;  %vm7259_vm5 = vcmp.eq.f32.partialorder %v7253_v53, 0.0 }
0x2d70   :  { %v7252_v61 = vpop.xlane.xlu0 %7251 }
0x2d71   :  { %v7254_v41 = vmul.f32 0.032258064, %v7252_v61 }
0x2d73   :  { %9373 = vrsqrt.f32 %v7254_v41  ;;  %vm7264_vm6 = vcmp.eq.f32.partialorder %v7254_v41, inf  ;;  %v7267_v5 = vand.u32 2147483648, %v7254_v41  ;;  %vm7266_vm7 = vcmp.eq.f32.partialorder %v7254_v41, 0.0 }
0x2d79   :  { %v9372_v62 = vpop.eup %9371 }
0x2d7a   :  { %v7256_v0 = vmul.f32 %v9372_v62, %v7253_v53 }
0x2d7c   :  { %v7258_v42 = vsel %vm7257_vm2, %v7253_v53, %v7256_v0 }
0x2d7d   :  { %v9374_v11 = vpop.eup %9373  ;;  %v7261_v2 = vsel %vm7259_vm5, %v7260_v63, %v7258_v42 }
0x2d7e   :  { %v7269_v52 = vadd.f32 1e-06, %v7261_v2  ;;  %v7263_v37 = vmul.f32 %v9374_v11, %v7254_v41 }
0x2d80   :  { %9375 = vrcp.f32 %v7269_v52  ;;  %v7265_v13 = vsel %vm7264_vm6, %v7254_v41, %v7263_v37 }
0x2d81   :  { %v7268_v6 = vsel %vm7266_vm7, %v7267_v5, %v7265_v13 }
0x2d82   :  { %v7270_v15 = vadd.f32 1e-06, %v7268_v6 }
0x2d84   :  { %9377 = vrcp.f32 %v7270_v15 }
0x2d8a   :  { %v9376_v17 = vpop.eup %9375 }
0x2d8b   :  { %v7281_v12 = vmul.f32 %v9376_v17, %v7279_v19 }
0x2d8d   :  { %v7289_v45 = vadd.f32 %v7883_v8, %v7281_v12  ;;  %v9126_v12 = vld [vmem:[%s9635_s23 + $0x8] sm:$0xff]  }
0x2d8e   :  { %v9378_v18 = vpop.eup %9377 }
0x2d8f   :  { %v7282_v21 = vmul.f32 %v9378_v18, %v7280_v7  ;;  %v9125_v7 = vld [vmem:[%s9635_s23] sm:$0xff]  }
0x2d91   :  { %v11170_v56 = vadd.f32 %v7883_v8, %v7282_v21 }
0x2d93   :  { %v7321_v22 = vpack.c.bf16 %v11170_v56, %v7289_v45 }
0x2d95   :  { %8909 = vmatmul.mubr.msk.bf16.vlgmr.msra.gmra.mrb[232].mxu1 %vm198_vm1, %v7321_v22 }
0x2d96   :  { %8936 = vmatprep.mubr.msk.bf16.mxu1 %vm9474_vm0, %v9473_v1  ;;  %8933 = vmatpush3.bf16.msra.mxu1 %v9125_v7 }
0x2d97   :  { %8934 = vmatprep.subr.bf16.mxu1 %v9473_v1 }
0x2d9a   :  { %8935 = vmatpush3.bf16.msra.mxu1 %v9126_v12 }
0x2e68   :  { %v7377_v57 = vpop.f32.mrb[232].mxu1 }
0x2e69   :  { %v7378_v32 = vadd.f32 %v7908_v25, %v7377_v57  ;;  %v8910_v33 = vpop.f32.mrb[233].mxu1  ;;  %v7921_v57 = vld [vmem:[%s11254_s5 + $0x1] ss:$0 sm:$0xff] }
0x2e6a   :  { %v7380_v40 = vpop.f32.mrb[234].mxu1 }
0x2e6b   :  { %v7386_v24 = vmul.f32 0.044715, %v7378_v32  ;;  %v7381_v31 = vadd.f32 %v7908_v25, %v7380_v40  ;;  %v8911_v16 = vpop.f32.mrb[235].mxu1  ;;  %v7384_v43 = vmul.f32 0.5, %v7378_v32 }
0x2e6c   :  { %v7922_v16 = vld [vmem:[%s9630_s12 + $0x1] ss:$0 sm:$0xff] }
0x2e6d   :  { %v7388_v58 = vmul.f32 %v7386_v24, %v7378_v32  ;;  %v7387_v59 = vmul.f32 0.044715, %v7381_v31  ;;  %v7385_v20 = vmul.f32 0.5, %v7381_v31 }
0x2e6f   :  { %v7390_v14 = vmul.f32 %v7388_v58, %v7378_v32  ;;  %v7389_v34 = vmul.f32 %v7387_v59, %v7381_v31 }
0x2e71   :  { %v7392_v36 = vadd.f32 %v7390_v14, %v7378_v32  ;;  %v7391_v39 = vmul.f32 %v7389_v34, %v7381_v31 }
0x2e73   :  { %v7394_v48 = vmul.f32 0.7978846, %v7392_v36  ;;  %v7393_v38 = vadd.f32 %v7391_v39, %v7381_v31  ;;  %v7923_v36 = vld [vmem:[%s9640_s1] ss:$0 sm:$0xff] }
0x2e75   :  { %9379 = vtanh.f32 %v7394_v48  ;;  %v7395_v49 = vmul.f32 0.7978846, %v7393_v38 }
0x2e77   :  { %9381 = vtanh.f32 %v7395_v49 }
0x2e7f   :  { %v9380_v35 = vpop.eup %9379 }
0x2e80   :  { %v7398_v50 = vadd.f32 1.0, %v9380_v35 }
0x2e81   :  { %v9382_v47 = vpop.eup %9381 }
0x2e82   :  { %v7399_v51 = vadd.f32 1.0, %v9382_v47  ;;  %v7400_v54 = vmul.f32 %v7398_v50, %v7384_v43 }
0x2e84   :  { %v7401_v28 = vmul.f32 %v7399_v51, %v7385_v20 }
0x2e86   :  { %v7402_v3 = vpack.c.bf16 %v7401_v28, %v7400_v54 }
0x2e88   :  { %8929 = vmatmul.mubr.bf16.vlgmr.msra.gmra.mrb[216].mxu0 %v7402_v3 }
0x2f5b   :  { %v7491_v60 = vpop.f32.mrb[216].mxu0 }
0x2f5c   :  { %v7492_v46 = vadd.f32 %v7912_v27, %v7491_v60  ;;  %v8930_v53 = vpop.f32.mrb[217].mxu0 }
0x2f5d   :  { %v7494_v61 = vpop.f32.mrb[218].mxu0 }
0x2f5e   :  { %v7498_v41 = vadd.f32 %v7492_v46, %v7289_v45  ;;  %v7495_v62 = vadd.f32 %v7912_v27, %v7494_v61  ;;  %v8931_v0 = vpop.f32.mrb[219].mxu0 }
0x2f60   :  { %v7499_v63 = vadd.f32 %v7495_v62, %v11170_v56  ;;  %v7500_v42 = vsel %vm198_vm1, %v7498_v41, 0.0 }
0x2f61   :  { %7501 = vadd.xlane.f32.xlu1 %v7500_v42 }
0x2f62   :  { %v7503_v11 = vsel %vm198_vm1, %v7499_v63, 0.0 }
0x2f63   :  { %7504 = vadd.xlane.f32.xlu0 %v7503_v11 }
0x2fee   :  { %v7502_v2 = vpop.xlane.xlu1 %7501 }
0x2fef   :  { %v7506_v52 = vmul.f32 0.03125, %v7502_v2 }
0x2ff0   :  { %v7505_v37 = vpop.xlane.xlu0 %7504 }
0x2ff1   :  { %v7508_v5 = vsub.f32 %v7498_v41, %v7506_v52  ;;  %v7507_v13 = vmul.f32 0.03125, %v7505_v37 }
0x2ff3   :  { %v7509_v6 = vsub.f32 %v7499_v63, %v7507_v13  ;;  %v7510_v15 = vmul.f32 %v7508_v5, %v7508_v5  ;;  %v7544_v33 = vmul.f32 %v7921_v57, %v7508_v5 }
0x2ff5   :  { %v7512_v44 = vsel %vm198_vm1, %v7510_v15, 0.0  ;;  %v7511_v17 = vmul.f32 %v7509_v6, %v7509_v6  ;;  %v7545_v40 = vmul.f32 %v7921_v57, %v7509_v6 }
0x2ff6   :  { %7513 = vadd.xlane.f32.xlu1 %v7512_v44 }
0x2ff7   :  { %v7515_v19 = vsel %vm198_vm1, %v7511_v17, 0.0 }
0x2ff8   :  { %7516 = vadd.xlane.f32.xlu0 %v7515_v19 }
0x3083   :  { %v7514_v18 = vpop.xlane.xlu1 %7513 }
0x3084   :  { %v7518_v8 = vmul.f32 0.032258064, %v7514_v18 }
0x3085   :  { %v7517_v21 = vpop.xlane.xlu0 %7516 }
0x3086   :  { %9383 = vrsqrt.f32 %v7518_v8  ;;  %v7519_v45 = vmul.f32 0.032258064, %v7517_v21  ;;  %vm7522_vm0 = vcmp.eq.f32.partialorder %v7518_v8, inf  ;;  %v7525_v23 = vand.u32 2147483648, %v7518_v8 }
0x3087   :  { %vm7524_vm4 = vcmp.eq.f32.partialorder %v7518_v8, 0.0 }
0x3088   :  { %9385 = vrsqrt.f32 %v7519_v45  ;;  %vm7529_vm8 = vcmp.eq.f32.partialorder %v7519_v45, inf  ;;  %v7532_v1 = vand.u32 2147483648, %v7519_v45  ;;  %vm7531_vm9 = vcmp.eq.f32.partialorder %v7519_v45, 0.0 }
0x3090   :  { %v9384_v56 = vpop.eup %9383 }
0x3091   :  { %v7521_v22 = vmul.f32 %v9384_v56, %v7518_v8 }
0x3092   :  { %v9386_v26 = vpop.eup %9385 }
0x3093   :  { %v7523_v9 = vsel %vm7522_vm0, %v7518_v8, %v7521_v22  ;;  %v7528_v10 = vmul.f32 %v9386_v26, %v7519_v45 }
0x3094   :  { %v7526_v55 = vsel %vm7524_vm4, %v7525_v23, %v7523_v9 }
0x3095   :  { %v7534_v4 = vadd.f32 1e-06, %v7526_v55  ;;  %v7530_v29 = vsel %vm7529_vm8, %v7519_v45, %v7528_v10 }
0x3096   :  { %v7533_v30 = vsel %vm7531_vm9, %v7532_v1, %v7530_v29 }
0x3097   :  { %9387 = vrcp.f32 %v7534_v4  ;;  %v7535_v25 = vadd.f32 1e-06, %v7533_v30 }
0x3099   :  { %9389 = vrcp.f32 %v7535_v25 }
0x30a1   :  { %v9388_v32 = vpop.eup %9387 }
0x30a2   :  { %v7546_v24 = vmul.f32 %v9388_v32, %v7544_v33 }
0x30a3   :  { %v9390_v31 = vpop.eup %9389 }
0x30a4   :  { %v7547_v58 = vmul.f32 %v9390_v31, %v7545_v40  ;;  %v7554_v59 = vadd.f32 %v7922_v16, %v7546_v24 }
0x30a6   :  { %v7555_v14 = vadd.f32 %v7922_v16, %v7547_v58 }
0x30a8   :  { %v7560_v34 = vpack.c.bf16 %v7555_v14, %v7554_v59 }
0x30aa   :  { %8937 = vmatmul.mubr.msk.bf16.vlgmr.msra.gmra.mrb[236].mxu1 %vm198_vm1, %v7560_v34 }
0x317d   :  { %v7617_v39 = vpop.f32.mrb[236].mxu1 }
0x317e   :  { %v7618_v48 = vadd.f32 %v7923_v36, %v7617_v39  ;;  %v8938_v38 = vpop.f32.mrb[237].mxu1 }
0x317f   :  { %v7620_v49 = vpop.f32.mrb[238].mxu1 }
0x3180   :  { %7624 = vst [vmem:[#allocation5] sm:$0xff] %v7618_v48  ;;  %v7621_v35 = vadd.f32 %v7923_v36, %v7620_v49  ;;  %v8939_v50 = vpop.f32.mrb[239].mxu1 }
0x3182   :  { %7626 = vst [vmem:[#allocation5 + $0x8] sm:$0xff] %v7621_v35 }
0x3183   :  { %9426 = shalt.err (!%p9423_p0)
}
0x3184   :  { %s9427_s12 = scalar_lea.hbm %s9645_s10, 256 }
0x3185   :  { %p9428_p1 = scmp.ne.s32.totalorder %s9645_s10, %s9427_s12  ;;  %p9431_p2 = scmp.lt.u32.totalorder %s9427_s12, %s9645_s10 }
0x3187   :  { %p9433_p3 = pnand %p9431_p2, %p9428_p1 }
0x3189   :  { %9436 = shalt.err (!%p9433_p3)
}
0x318a   :  { %s9491_s23 = smov 128  }
0x318b   :  { %7638 = dma.vmem_to_hbm [thread:$0]  %s7633_s30, 256, %s9645_s10, [#allocation6], %s9491_s23, %s9491_s23, %s11256_s19  }
0x318c   :  { %9439 = dma.done.wait [#allocation6], 256  }
0x318d   :  { %9440 = vsyncadd [#allocation6], 4294967040 }
0x318e   :  { %7642 = vsyncpa [#allocation6], 1 }

</bundles_post_ra>
